<compile_context>
chip_gen: v6e
topology: v6e:2x2x1
jax: 0.10.0
libtpu: 0.0.40
codegen_flags: <defaults>
</compile_context>

<pallas_src>
import jax
import jax.numpy as jnp
from jax.experimental import pallas as pl
from jax.experimental.pallas import tpu as pltpu


# ----------------------------- Pallas kernel ---------------------------------
def vcnef_kernel(x_ref, c_ref,
                 wmod_ref, bmod_ref, w1_ref, b1_ref, w2_ref, b2_ref,
                 gamma_ref, beta_ref,
                 o_ref):
    """One grid step = one (batch b, spatial-tile s, time-block t) slab.

    x_ref  : (1, ts, C)          f32   -- shared across T (index_map ignores t, so the
                                          tile stays resident for the inner time loop)
    c_ref  : (1, t_blk, ts, Dc)  f32
    w1/w2  : (L, C, H)/(L, H, C) bf16  -- MXU operands, pre-cast in the wrapper
    o_ref  : (1, t_blk, ts, C)
    """
    t_blk, ts, Dc = c_ref.shape[1], c_ref.shape[2], c_ref.shape[3]
    C = x_ref.shape[-1]
    R = t_blk * ts                                       # matmul M dimension (large)

    # Broadcast the initial state over the folded time block: (ts, C) -> (R, C).
    # (Implements x.unsqueeze(1).repeat over the t_blk time steps of this tile.)
    x = jnp.tile(x_ref[0], (t_blk, 1)).astype(jnp.float32)          # (R, C)
    co = c_ref[0].reshape(R, Dc).astype(jnp.float32)                # (R, Dc)

    num_layers = w1_ref.shape[0]
    for l in range(num_layers):                  # static Python loop (small L)
        wm = wmod_ref[l]                         # (Dc, C) f32
        bm = bmod_ref[l]                         # (C,)    f32

        # Coordinate modulation on the VPU: unrolled broadcast FMAs (Dc is tiny).
        m = bm + co[:, 0:1] * wm[0:1, :]                            # (R, C)
        for d in range(1, Dc):
            m = m + co[:, d:d + 1] * wm[d:d + 1, :]

        # MXU matmuls: bf16 operands, f32 accumulation.
        xm = (x * m).astype(jnp.bfloat16)                           # (R, C)
        h = jnp.dot(xm, w1_ref[l], preferred_element_type=jnp.float32) + b1_ref[l]
        h = jax.nn.gelu(h)                                          # f32 VPU/EUP
        h = h.astype(jnp.bfloat16)                                  # (R, H)
        x = x + jnp.dot(h, w2_ref[l], preferred_element_type=jnp.float32) + b2_ref[l]

    # Final LayerNorm over the channel axis (population variance, eps=1e-5), in f32.
    mu = jnp.mean(x, axis=-1, keepdims=True)
    var = jnp.mean((x - mu) ** 2, axis=-1, keepdims=True)
    y = (x - mu) * jax.lax.rsqrt(var + 1e-5)
    y = y * gamma_ref[0] + beta_ref[0]

    # Lane-dense store (C is the minor dim; C % 128 == 0 in the demo config).
    o_ref[0] = y.reshape(t_blk, ts, C).astype(o_ref.dtype)


# ------------------------------- wrapper --------------------------------------
def vcnef_forward(x, coordinates, params, *, ts=None, t_blk=None,
                  matmul_dtype=jnp.bfloat16, out_dtype=jnp.float32,
                  vmem_limit_bytes=48 * 1024 * 1024):
    """x: (B, S, C), coordinates: (B, T, S, Dc) -> (B, T, S, C)."""
    B, S, C = x.shape
    _, T, _, Dc = coordinates.shape

    if ts is None:
        ts = S                       # full spatial extent per tile (contiguous HBM slab)
    if t_blk is None:
        # Fold time steps until the tile has >= 512 matmul rows (fills the MXU M dim
        # and amortizes per-grid-step overhead), without exceeding T.
        t_blk = 1
        while t_blk < T and t_blk * ts < 512:
            t_blk *= 2
        while T % t_blk != 0:
            t_blk -= 1
    assert S % ts == 0 and T % t_blk == 0
    assert ts == S or ts % 8 == 0

    # Pre-cast the MXU weight operands to bf16 (halves their DMA + VMEM footprint).
    w1 = params["w1"].astype(matmul_dtype)
    w2 = params["w2"].astype(matmul_dtype)

    def full_spec(arr):
        # Grid-invariant: constant index_map -> DMA'd once for the whole grid.
        nd = arr.ndim
        return pl.BlockSpec(arr.shape, lambda b, s, t, _nd=nd: (0,) * _nd)

    # Time axis innermost so the x tile (index_map ignores t) stays resident in VMEM.
    grid = (B, S // ts, T // t_blk)

    in_specs = [
        # x: ignore the t grid index -> implements x.unsqueeze(1).repeat((1,T,1,1))
        #    with zero extra HBM traffic (no re-DMA across the inner time loop).
        pl.BlockSpec((1, ts, C), lambda b, s, t: (b, s, 0)),
        # coordinates: a block of t_blk time steps per grid step.
        pl.BlockSpec((1, t_blk, ts, Dc), lambda b, s, t: (b, t, s, 0)),
        # stacked per-layer weights + final LayerNorm affine params (fully resident)
        full_spec(params["wmod"]), full_spec(params["bmod"]),
        full_spec(w1),             full_spec(params["b1"]),
        full_spec(w2),             full_spec(params["b2"]),
        full_spec(params["gamma"]), full_spec(params["beta"]),
    ]
    out_spec = pl.BlockSpec((1, t_blk, ts, C), lambda b, s, t: (b, t, s, 0))

    return pl.pallas_call(
        vcnef_kernel,
        out_shape=jax.ShapeDtypeStruct((B, T, S, C), out_dtype),
        grid_spec=pltpu.PrefetchScalarGridSpec(
            num_scalar_prefetch=0,
            grid=grid,
            in_specs=in_specs,
            out_specs=out_spec,
        ),
        compiler_params=pltpu.CompilerParams(
            # Outer (B, S//ts) axes parallel for megacore sharding; inner time axis
            # arbitrary/sequential so x-residency is reused across the time loop.
            dimension_semantics=("parallel", "parallel", "arbitrary"),
            vmem_limit_bytes=vmem_limit_bytes),
    )(x, coordinates,
      params["wmod"], params["bmod"],
      w1, params["b1"],
      w2, params["b2"],
      params["gamma"], params["beta"])


# ---------------------------- pure-JAX reference -------------------------------
def vcnef_reference(x, coordinates, params, *, matmul_dtype=jnp.bfloat16):
    """Mirrors the kernel's math and precision (bf16 matmul operands, f32 accum)."""
    B, S, C = x.shape
    T = coordinates.shape[1]
    Dc = coordinates.shape[-1]
    xr = jnp.broadcast_to(x[:, None], (B, T, S, C)).astype(jnp.float32)
    L = params["w1"].shape[0]
    for l in range(L):
        m = params["bmod"][l] + coordinates[..., 0:1] * params["wmod"][l, 0]
        for d in range(1, Dc):
            m = m + coordinates[..., d:d + 1] * params["wmod"][l, d]
        xm = (xr * m).astype(matmul_dtype)
        h = jnp.einsum("btsc,ch->btsh", xm, params["w1"][l].astype(matmul_dtype),
                       preferred_element_type=jnp.float32) + params["b1"][l]
        h = jax.nn.gelu(h).astype(matmul_dtype)
        xr = xr + jnp.einsum("btsh,hc->btsc", h, params["w2"][l].astype(matmul_dtype),
                             preferred_element_type=jnp.float32) + params["b2"][l]
    mu = jnp.mean(xr, axis=-1, keepdims=True)
    var = jnp.mean((xr - mu) ** 2, axis=-1, keepdims=True)
    y = (xr - mu) * jax.lax.rsqrt(var + 1e-5)
    return y * params["gamma"][0] + params["beta"][0]


# --------------------------------- main ----------------------------------------
if __name__ == "__main__":
    # C chosen as a multiple of 128 so output stores are lane-dense (full 128 lanes).
    B, T, S, C, H, Dc, L = 2, 16, 64, 128, 256, 2, 2

    key = jax.random.PRNGKey(0)
    ks = jax.random.split(key, 8)

    params = {
        "wmod":  0.2 * jax.random.normal(ks[0], (L, Dc, C), jnp.float32),
        "bmod":  0.1 * jax.random.normal(ks[1], (L, C), jnp.float32) + 1.0,  # near-identity modulation
        "w1":    0.08 * jax.random.normal(ks[2], (L, C, H), jnp.float32),
        "b1":    0.1 * jax.random.normal(ks[3], (L, H), jnp.float32),
        "w2":    0.06 * jax.random.normal(ks[4], (L, H, C), jnp.float32),
        "b2":    0.1 * jax.random.normal(ks[5], (L, C), jnp.float32),
        "gamma": jnp.ones((1, C), jnp.float32),
        "beta":  jnp.zeros((1, C), jnp.float32),
    }

    x = jax.random.normal(ks[6], (B, S, C), jnp.float32)
    coordinates = jax.random.uniform(ks[7], (B, T, S, Dc), jnp.float32)

    out = vcnef_forward(x, coordinates, params)
    out = jax.block_until_ready(out)

    ref = vcnef_reference(x, coordinates, params)
    assert out.shape == (B, T, S, C)
    err = jnp.max(jnp.abs(out - ref))
    # bf16 matmul operands -> tolerance looser than a pure-f32 comparison would allow.
    assert jnp.allclose(out, ref, atol=1e-2, rtol=1e-2), f"max err {err}"

    print("KERNEL_OK")
</pallas_src>

<mosaic_0001>
module attributes {stable_mosaic.version = 11 : i64} {
  func.func @vcnef_kernel(%arg0: i32, %arg1: i32, %arg2: i32, %arg3: memref<1x64x128xf32, #tpu.memory_space<vmem>>, %arg4: memref<1x8x64x2xf32, #tpu.memory_space<vmem>>, %arg5: memref<2x2x128xf32, #tpu.memory_space<vmem>>, %arg6: memref<2x128xf32, #tpu.memory_space<vmem>>, %arg7: memref<2x128x256xbf16, #tpu.memory_space<vmem>>, %arg8: memref<2x256xf32, #tpu.memory_space<vmem>>, %arg9: memref<2x256x128xbf16, #tpu.memory_space<vmem>>, %arg10: memref<2x128xf32, #tpu.memory_space<vmem>>, %arg11: memref<1x128xf32, #tpu.memory_space<vmem>>, %arg12: memref<1x128xf32, #tpu.memory_space<vmem>>, %arg13: memref<1x8x64x128xf32, #tpu.memory_space<vmem>>) attributes {dimension_semantics = [#tpu.dimension_semantics<parallel>, #tpu.dimension_semantics<parallel>, #tpu.dimension_semantics<arbitrary>], iteration_bounds = array<i64: 2, 1, 2>, scalar_prefetch = 0 : i64, scratch_operands = 0 : i64, tpu.core_type = #tpu.core_type<tc>, window_params = [{transform_indices = @transform_0, window_bounds = array<i64: 1, 64, 128>}, {transform_indices = @transform_1, window_bounds = array<i64: 1, 8, 64, 2>}, {pipeline_mode = #tpu.pipeline_mode<synchronous>, transform_indices = @transform_2, window_bounds = array<i64: 2, 2, 128>}, {pipeline_mode = #tpu.pipeline_mode<synchronous>, transform_indices = @transform_3, window_bounds = array<i64: 2, 128>}, {pipeline_mode = #tpu.pipeline_mode<synchronous>, transform_indices = @transform_4, window_bounds = array<i64: 2, 128, 256>}, {pipeline_mode = #tpu.pipeline_mode<synchronous>, transform_indices = @transform_5, window_bounds = array<i64: 2, 256>}, {pipeline_mode = #tpu.pipeline_mode<synchronous>, transform_indices = @transform_6, window_bounds = array<i64: 2, 256, 128>}, {pipeline_mode = #tpu.pipeline_mode<synchronous>, transform_indices = @transform_7, window_bounds = array<i64: 2, 128>}, {pipeline_mode = #tpu.pipeline_mode<synchronous>, transform_indices = @transform_8, window_bounds = array<i64: 1, 128>}, {pipeline_mode = #tpu.pipeline_mode<synchronous>, transform_indices = @transform_9, window_bounds = array<i64: 1, 128>}, {transform_indices = @transform_10, window_bounds = array<i64: 1, 8, 64, 128>}]} {
    %c0 = arith.constant 0 : index
    %c0_0 = arith.constant 0 : index
    %c0_1 = arith.constant 0 : index
    %0 = vector.load %arg3[%c0, %c0_0, %c0_1] : memref<1x64x128xf32, #tpu.memory_space<vmem>>, vector<1x64x128xf32>
    %1 = vector.shape_cast %0 : vector<1x64x128xf32> to vector<64x128xf32>
    %2 = tpu.concatenate %1, %1, %1, %1, %1, %1, %1, %1 in 0 : vector<64x128xf32>, vector<64x128xf32>, vector<64x128xf32>, vector<64x128xf32>, vector<64x128xf32>, vector<64x128xf32>, vector<64x128xf32>, vector<64x128xf32> -> vector<512x128xf32>
    %c0_2 = arith.constant 0 : index
    %c0_3 = arith.constant 0 : index
    %c0_4 = arith.constant 0 : index
    %c0_5 = arith.constant 0 : index
    %3 = vector.load %arg4[%c0_2, %c0_3, %c0_4, %c0_5] : memref<1x8x64x2xf32, #tpu.memory_space<vmem>>, vector<1x8x64x2xf32>
    %4 = vector.shape_cast %3 : vector<1x8x64x2xf32> to vector<8x64x2xf32>
    %5 = vector.shape_cast %4 : vector<8x64x2xf32> to vector<512x2xf32>
    %c0_6 = arith.constant 0 : index
    %c0_7 = arith.constant 0 : index
    %c0_8 = arith.constant 0 : index
    %6 = vector.load %arg5[%c0_6, %c0_7, %c0_8] : memref<2x2x128xf32, #tpu.memory_space<vmem>>, vector<1x2x128xf32>
    %7 = vector.shape_cast %6 : vector<1x2x128xf32> to vector<2x128xf32>
    %c0_9 = arith.constant 0 : index
    %c0_10 = arith.constant 0 : index
    %8 = vector.load %arg6[%c0_9, %c0_10] : memref<2x128xf32, #tpu.memory_space<vmem>>, vector<1x128xf32>
    %9 = vector.shape_cast %8 : vector<1x128xf32> to vector<128xf32>
    %10 = vector.extract_strided_slice %5 {offsets = [0, 0], sizes = [512, 1], strides = [1, 1]} : vector<512x2xf32> to vector<512x1xf32>
    %11 = vector.extract_strided_slice %7 {offsets = [0, 0], sizes = [1, 128], strides = [1, 1]} : vector<2x128xf32> to vector<1x128xf32>
    %12 = vector.broadcast %10 : vector<512x1xf32> to vector<512x128xf32>
    %13 = vector.broadcast %11 : vector<1x128xf32> to vector<512x128xf32>
    %14 = arith.mulf %12, %13 : vector<512x128xf32>
    %15 = vector.shape_cast %9 : vector<128xf32> to vector<1x128xf32>
    %16 = vector.broadcast %15 : vector<1x128xf32> to vector<512x128xf32>
    %17 = arith.addf %16, %14 : vector<512x128xf32>
    %18 = vector.extract_strided_slice %5 {offsets = [0, 1], sizes = [512, 1], strides = [1, 1]} : vector<512x2xf32> to vector<512x1xf32>
    %19 = vector.extract_strided_slice %7 {offsets = [1, 0], sizes = [1, 128], strides = [1, 1]} : vector<2x128xf32> to vector<1x128xf32>
    %20 = vector.broadcast %18 : vector<512x1xf32> to vector<512x128xf32>
    %21 = vector.broadcast %19 : vector<1x128xf32> to vector<512x128xf32>
    %22 = arith.mulf %20, %21 : vector<512x128xf32>
    %23 = arith.addf %17, %22 : vector<512x128xf32>
    %24 = arith.mulf %2, %23 : vector<512x128xf32>
    %25 = arith.truncf %24 : vector<512x128xf32> to vector<512x128xbf16>
    %c0_11 = arith.constant 0 : index
    %c0_12 = arith.constant 0 : index
    %c0_13 = arith.constant 0 : index
    %26 = vector.load %arg7[%c0_11, %c0_12, %c0_13] : memref<2x128x256xbf16, #tpu.memory_space<vmem>>, vector<1x128x256xbf16>
    %27 = vector.shape_cast %26 : vector<1x128x256xbf16> to vector<128x256xbf16>
    %cst = arith.constant dense<0.000000e+00> : vector<512x256xf32>
    %28 = tpu.matmul %25, %27, %cst {dimension_numbers = #tpu.dot_dimension_numbers<[1], [0], [0], [1], [0, 0, 1, 1], [], []>} : vector<512x128xbf16>, vector<128x256xbf16>, vector<512x256xf32> -> vector<512x256xf32>
    %c0_14 = arith.constant 0 : index
    %c0_15 = arith.constant 0 : index
    %29 = vector.load %arg8[%c0_14, %c0_15] : memref<2x256xf32, #tpu.memory_space<vmem>>, vector<1x256xf32>
    %30 = vector.shape_cast %29 : vector<1x256xf32> to vector<256xf32>
    %31 = vector.shape_cast %30 : vector<256xf32> to vector<1x256xf32>
    %32 = vector.broadcast %31 : vector<1x256xf32> to vector<512x256xf32>
    %33 = arith.addf %28, %32 : vector<512x256xf32>
    %34 = arith.mulf %33, %33 : vector<512x256xf32>
    %35 = arith.mulf %33, %34 : vector<512x256xf32>
    %cst_16 = arith.constant 4.471500e-02 : f32
    %36 = vector.broadcast %cst_16 : f32 to vector<512x256xf32>
    %37 = arith.mulf %36, %35 : vector<512x256xf32>
    %38 = arith.addf %33, %37 : vector<512x256xf32>
    %cst_17 = arith.constant 0.797884583 : f32
    %39 = vector.broadcast %cst_17 : f32 to vector<512x256xf32>
    %40 = arith.mulf %39, %38 : vector<512x256xf32>
    %41 = math.tanh %40 : vector<512x256xf32>
    %cst_18 = arith.constant 1.000000e+00 : f32
    %42 = vector.broadcast %cst_18 : f32 to vector<512x256xf32>
    %43 = arith.addf %42, %41 : vector<512x256xf32>
    %cst_19 = arith.constant 5.000000e-01 : f32
    %44 = vector.broadcast %cst_19 : f32 to vector<512x256xf32>
    %45 = arith.mulf %44, %43 : vector<512x256xf32>
    %46 = arith.mulf %33, %45 : vector<512x256xf32>
    %47 = arith.truncf %46 : vector<512x256xf32> to vector<512x256xbf16>
    %c0_20 = arith.constant 0 : index
    %c0_21 = arith.constant 0 : index
    %c0_22 = arith.constant 0 : index
    %48 = vector.load %arg9[%c0_20, %c0_21, %c0_22] : memref<2x256x128xbf16, #tpu.memory_space<vmem>>, vector<1x256x128xbf16>
    %49 = vector.shape_cast %48 : vector<1x256x128xbf16> to vector<256x128xbf16>
    %cst_23 = arith.constant dense<0.000000e+00> : vector<512x128xf32>
    %50 = tpu.matmul %47, %49, %cst_23 {dimension_numbers = #tpu.dot_dimension_numbers<[1], [0], [0], [1], [0, 0, 1, 1], [], []>} : vector<512x256xbf16>, vector<256x128xbf16>, vector<512x128xf32> -> vector<512x128xf32>
    %51 = arith.addf %2, %50 : vector<512x128xf32>
    %c0_24 = arith.constant 0 : index
    %c0_25 = arith.constant 0 : index
    %52 = vector.load %arg10[%c0_24, %c0_25] : memref<2x128xf32, #tpu.memory_space<vmem>>, vector<1x128xf32>
    %53 = vector.shape_cast %52 : vector<1x128xf32> to vector<128xf32>
    %54 = vector.shape_cast %53 : vector<128xf32> to vector<1x128xf32>
    %55 = vector.broadcast %54 : vector<1x128xf32> to vector<512x128xf32>
    %56 = arith.addf %51, %55 : vector<512x128xf32>
    %c1 = arith.constant 1 : index
    %c0_26 = arith.constant 0 : index
    %c0_27 = arith.constant 0 : index
    %57 = vector.load %arg5[%c1, %c0_26, %c0_27] : memref<2x2x128xf32, #tpu.memory_space<vmem>>, vector<1x2x128xf32>
    %58 = vector.shape_cast %57 : vector<1x2x128xf32> to vector<2x128xf32>
    %c1_28 = arith.constant 1 : index
    %c0_29 = arith.constant 0 : index
    %59 = vector.load %arg6[%c1_28, %c0_29] : memref<2x128xf32, #tpu.memory_space<vmem>>, vector<1x128xf32>
    %60 = vector.shape_cast %59 : vector<1x128xf32> to vector<128xf32>
    %61 = vector.extract_strided_slice %5 {offsets = [0, 0], sizes = [512, 1], strides = [1, 1]} : vector<512x2xf32> to vector<512x1xf32>
    %62 = vector.extract_strided_slice %58 {offsets = [0, 0], sizes = [1, 128], strides = [1, 1]} : vector<2x128xf32> to vector<1x128xf32>
    %63 = vector.broadcast %61 : vector<512x1xf32> to vector<512x128xf32>
    %64 = vector.broadcast %62 : vector<1x128xf32> to vector<512x128xf32>
    %65 = arith.mulf %63, %64 : vector<512x128xf32>
    %66 = vector.shape_cast %60 : vector<128xf32> to vector<1x128xf32>
    %67 = vector.broadcast %66 : vector<1x128xf32> to vector<512x128xf32>
    %68 = arith.addf %67, %65 : vector<512x128xf32>
    %69 = vector.extract_strided_slice %5 {offsets = [0, 1], sizes = [512, 1], strides = [1, 1]} : vector<512x2xf32> to vector<512x1xf32>
    %70 = vector.extract_strided_slice %58 {offsets = [1, 0], sizes = [1, 128], strides = [1, 1]} : vector<2x128xf32> to vector<1x128xf32>
    %71 = vector.broadcast %69 : vector<512x1xf32> to vector<512x128xf32>
    %72 = vector.broadcast %70 : vector<1x128xf32> to vector<512x128xf32>
    %73 = arith.mulf %71, %72 : vector<512x128xf32>
    %74 = arith.addf %68, %73 : vector<512x128xf32>
    %75 = arith.mulf %56, %74 : vector<512x128xf32>
    %76 = arith.truncf %75 : vector<512x128xf32> to vector<512x128xbf16>
    %c1_30 = arith.constant 1 : index
    %c0_31 = arith.constant 0 : index
    %c0_32 = arith.constant 0 : index
    %77 = vector.load %arg7[%c1_30, %c0_31, %c0_32] : memref<2x128x256xbf16, #tpu.memory_space<vmem>>, vector<1x128x256xbf16>
    %78 = vector.shape_cast %77 : vector<1x128x256xbf16> to vector<128x256xbf16>
    %cst_33 = arith.constant dense<0.000000e+00> : vector<512x256xf32>
    %79 = tpu.matmul %76, %78, %cst_33 {dimension_numbers = #tpu.dot_dimension_numbers<[1], [0], [0], [1], [0, 0, 1, 1], [], []>} : vector<512x128xbf16>, vector<128x256xbf16>, vector<512x256xf32> -> vector<512x256xf32>
    %c1_34 = arith.constant 1 : index
    %c0_35 = arith.constant 0 : index
    %80 = vector.load %arg8[%c1_34, %c0_35] : memref<2x256xf32, #tpu.memory_space<vmem>>, vector<1x256xf32>
    %81 = vector.shape_cast %80 : vector<1x256xf32> to vector<256xf32>
    %82 = vector.shape_cast %81 : vector<256xf32> to vector<1x256xf32>
    %83 = vector.broadcast %82 : vector<1x256xf32> to vector<512x256xf32>
    %84 = arith.addf %79, %83 : vector<512x256xf32>
    %85 = arith.mulf %84, %84 : vector<512x256xf32>
    %86 = arith.mulf %84, %85 : vector<512x256xf32>
    %cst_36 = arith.constant 4.471500e-02 : f32
    %87 = vector.broadcast %cst_36 : f32 to vector<512x256xf32>
    %88 = arith.mulf %87, %86 : vector<512x256xf32>
    %89 = arith.addf %84, %88 : vector<512x256xf32>
    %cst_37 = arith.constant 0.797884583 : f32
    %90 = vector.broadcast %cst_37 : f32 to vector<512x256xf32>
    %91 = arith.mulf %90, %89 : vector<512x256xf32>
    %92 = math.tanh %91 : vector<512x256xf32>
    %cst_38 = arith.constant 1.000000e+00 : f32
    %93 = vector.broadcast %cst_38 : f32 to vector<512x256xf32>
    %94 = arith.addf %93, %92 : vector<512x256xf32>
    %cst_39 = arith.constant 5.000000e-01 : f32
    %95 = vector.broadcast %cst_39 : f32 to vector<512x256xf32>
    %96 = arith.mulf %95, %94 : vector<512x256xf32>
    %97 = arith.mulf %84, %96 : vector<512x256xf32>
    %98 = arith.truncf %97 : vector<512x256xf32> to vector<512x256xbf16>
    %c1_40 = arith.constant 1 : index
    %c0_41 = arith.constant 0 : index
    %c0_42 = arith.constant 0 : index
    %99 = vector.load %arg9[%c1_40, %c0_41, %c0_42] : memref<2x256x128xbf16, #tpu.memory_space<vmem>>, vector<1x256x128xbf16>
    %100 = vector.shape_cast %99 : vector<1x256x128xbf16> to vector<256x128xbf16>
    %cst_43 = arith.constant dense<0.000000e+00> : vector<512x128xf32>
    %101 = tpu.matmul %98, %100, %cst_43 {dimension_numbers = #tpu.dot_dimension_numbers<[1], [0], [0], [1], [0, 0, 1, 1], [], []>} : vector<512x256xbf16>, vector<256x128xbf16>, vector<512x128xf32> -> vector<512x128xf32>
    %102 = arith.addf %56, %101 : vector<512x128xf32>
    %c1_44 = arith.constant 1 : index
    %c0_45 = arith.constant 0 : index
    %103 = vector.load %arg10[%c1_44, %c0_45] : memref<2x128xf32, #tpu.memory_space<vmem>>, vector<1x128xf32>
    %104 = vector.shape_cast %103 : vector<1x128xf32> to vector<128xf32>
    %105 = vector.shape_cast %104 : vector<128xf32> to vector<1x128xf32>
    %106 = vector.broadcast %105 : vector<1x128xf32> to vector<512x128xf32>
    %107 = arith.addf %102, %106 : vector<512x128xf32>
    %cst_46 = arith.constant dense<0.000000e+00> : vector<512xf32>
    %108 = vector.multi_reduction <add>, %107, %cst_46 [1] : vector<512x128xf32> to vector<512xf32>
    %109 = vector.shape_cast %108 : vector<512xf32> to vector<512x1xf32>
    %cst_47 = arith.constant 1.280000e+02 : f32
    %110 = vector.broadcast %cst_47 : f32 to vector<512x1xf32>
    %111 = arith.divf %109, %110 : vector<512x1xf32>
    %112 = vector.broadcast %111 : vector<512x1xf32> to vector<512x128xf32>
    %113 = arith.subf %107, %112 : vector<512x128xf32>
    %114 = arith.mulf %113, %113 : vector<512x128xf32>
    %cst_48 = arith.constant dense<0.000000e+00> : vector<512xf32>
    %115 = vector.multi_reduction <add>, %114, %cst_48 [1] : vector<512x128xf32> to vector<512xf32>
    %116 = vector.shape_cast %115 : vector<512xf32> to vector<512x1xf32>
    %cst_49 = arith.constant 1.280000e+02 : f32
    %117 = vector.broadcast %cst_49 : f32 to vector<512x1xf32>
    %118 = arith.divf %116, %117 : vector<512x1xf32>
    %119 = vector.broadcast %111 : vector<512x1xf32> to vector<512x128xf32>
    %120 = arith.subf %107, %119 : vector<512x128xf32>
    %cst_50 = arith.constant 9.99999974E-6 : f32
    %121 = vector.broadcast %cst_50 : f32 to vector<512x1xf32>
    %122 = arith.addf %118, %121 : vector<512x1xf32>
    %123 = math.rsqrt %122 : vector<512x1xf32>
    %124 = vector.broadcast %123 : vector<512x1xf32> to vector<512x128xf32>
    %125 = arith.mulf %120, %124 : vector<512x128xf32>
    %c0_51 = arith.constant 0 : index
    %c0_52 = arith.constant 0 : index
    %126 = vector.load %arg11[%c0_51, %c0_52] : memref<1x128xf32, #tpu.memory_space<vmem>>, vector<1x128xf32>
    %127 = vector.shape_cast %126 : vector<1x128xf32> to vector<128xf32>
    %128 = vector.shape_cast %127 : vector<128xf32> to vector<1x128xf32>
    %129 = vector.broadcast %128 : vector<1x128xf32> to vector<512x128xf32>
    %130 = arith.mulf %125, %129 : vector<512x128xf32>
    %c0_53 = arith.constant 0 : index
    %c0_54 = arith.constant 0 : index
    %131 = vector.load %arg12[%c0_53, %c0_54] : memref<1x128xf32, #tpu.memory_space<vmem>>, vector<1x128xf32>
    %132 = vector.shape_cast %131 : vector<1x128xf32> to vector<128xf32>
    %133 = vector.shape_cast %132 : vector<128xf32> to vector<1x128xf32>
    %134 = vector.broadcast %133 : vector<1x128xf32> to vector<512x128xf32>
    %135 = arith.addf %130, %134 : vector<512x128xf32>
    %136 = vector.shape_cast %135 : vector<512x128xf32> to vector<8x64x128xf32>
    %c0_55 = arith.constant 0 : index
    %c0_56 = arith.constant 0 : index
    %c0_57 = arith.constant 0 : index
    %c0_58 = arith.constant 0 : index
    %137 = vector.load %arg13[%c0_55, %c0_56, %c0_57, %c0_58] : memref<1x8x64x128xf32, #tpu.memory_space<vmem>>, vector<1x8x64x128xf32>
    %138 = vector.shape_cast %137 : vector<1x8x64x128xf32> to vector<8x64x128xf32>
    %139 = vector.shape_cast %136 : vector<8x64x128xf32> to vector<1x8x64x128xf32>
    tpu.vector_store %arg13[%c0_55, %c0_56, %c0_57, %c0_58], %139 {strides = array<i32>} : memref<1x8x64x128xf32, #tpu.memory_space<vmem>>, vector<1x8x64x128xf32>,
    return
  }
  func.func @transform_0(%arg0: i32, %arg1: i32, %arg2: i32) -> (i32, i32, i32) {
    %c0_i32 = arith.constant 0 : i32
    %c0_i32_0 = arith.constant 0 : i32
    return %arg0, %arg1, %c0_i32 : i32, i32, i32
  }
  func.func @transform_1(%arg0: i32, %arg1: i32, %arg2: i32) -> (i32, i32, i32, i32) {
    %c0_i32 = arith.constant 0 : i32
    %c0_i32_0 = arith.constant 0 : i32
    return %arg0, %arg2, %arg1, %c0_i32 : i32, i32, i32, i32
  }
  func.func @transform_2(%arg0: i32, %arg1: i32, %arg2: i32) -> (i32, i32, i32) {
    %c0_i32 = arith.constant 0 : i32
    %c0_i32_0 = arith.constant 0 : i32
    %c0_i32_1 = arith.constant 0 : i32
    %c0_i32_2 = arith.constant 0 : i32
    return %c0_i32, %c0_i32_0, %c0_i32_1 : i32, i32, i32
  }
  func.func @transform_3(%arg0: i32, %arg1: i32, %arg2: i32) -> (i32, i32) {
    %c0_i32 = arith.constant 0 : i32
    %c0_i32_0 = arith.constant 0 : i32
    %c0_i32_1 = arith.constant 0 : i32
    return %c0_i32, %c0_i32_0 : i32, i32
  }
  func.func @transform_4(%arg0: i32, %arg1: i32, %arg2: i32) -> (i32, i32, i32) {
    %c0_i32 = arith.constant 0 : i32
    %c0_i32_0 = arith.constant 0 : i32
    %c0_i32_1 = arith.constant 0 : i32
    %c0_i32_2 = arith.constant 0 : i32
    return %c0_i32, %c0_i32_0, %c0_i32_1 : i32, i32, i32
  }
  func.func @transform_5(%arg0: i32, %arg1: i32, %arg2: i32) -> (i32, i32) {
    %c0_i32 = arith.constant 0 : i32
    %c0_i32_0 = arith.constant 0 : i32
    %c0_i32_1 = arith.constant 0 : i32
    return %c0_i32, %c0_i32_0 : i32, i32
  }
  func.func @transform_6(%arg0: i32, %arg1: i32, %arg2: i32) -> (i32, i32, i32) {
    %c0_i32 = arith.constant 0 : i32
    %c0_i32_0 = arith.constant 0 : i32
    %c0_i32_1 = arith.constant 0 : i32
    %c0_i32_2 = arith.constant 0 : i32
    return %c0_i32, %c0_i32_0, %c0_i32_1 : i32, i32, i32
  }
  func.func @transform_7(%arg0: i32, %arg1: i32, %arg2: i32) -> (i32, i32) {
    %c0_i32 = arith.constant 0 : i32
    %c0_i32_0 = arith.constant 0 : i32
    %c0_i32_1 = arith.constant 0 : i32
    return %c0_i32, %c0_i32_0 : i32, i32
  }
  func.func @transform_8(%arg0: i32, %arg1: i32, %arg2: i32) -> (i32, i32) {
    %c0_i32 = arith.constant 0 : i32
    %c0_i32_0 = arith.constant 0 : i32
    %c0_i32_1 = arith.constant 0 : i32
    return %c0_i32, %c0_i32_0 : i32, i32
  }
  func.func @transform_9(%arg0: i32, %arg1: i32, %arg2: i32) -> (i32, i32) {
    %c0_i32 = arith.constant 0 : i32
    %c0_i32_0 = arith.constant 0 : i32
    %c0_i32_1 = arith.constant 0 : i32
    return %c0_i32, %c0_i32_0 : i32, i32
  }
  func.func @transform_10(%arg0: i32, %arg1: i32, %arg2: i32) -> (i32, i32, i32, i32) {
    %c0_i32 = arith.constant 0 : i32
    %c0_i32_0 = arith.constant 0 : i32
    return %arg0, %arg2, %arg1, %c0_i32 : i32, i32, i32, i32
  }
}

</mosaic_0001>

<bundles_post_ra>
// kernel: tpu_custom_call.1
= control target key start
LH: loop header
LB: loop body
LE: loop exit
PB: predicated region body
PF: predicated region fallthrough
CT: control target
= control target key end

     0   :  { %15 = vsyncpa [#allocation3], 0  ;;  %s14434_s0 = inlined_call_operand.vmem [shape: f32[2,64,128], index: 0, kind: input, shape index: {}]   ;;  %s14435_s1 = inlined_call_operand.vmem [shape: f32[2,16,64,2], index: 1, kind: input, shape index: {}]   ;;  %s14436_s2 = inlined_call_operand.vmem [shape: f32[2,2,128], index: 2, kind: input, shape index: {}]   ;;  %s14437_s3 = inlined_call_operand.vmem [shape: f32[2,128], index: 3, kind: input, shape index: {}]   ;;  %s14438_s4 = inlined_call_operand.vmem [shape: bf16[2,128,256], index: 4, kind: input, shape index: {}]   ;;  %s14439_s5 = inlined_call_operand.vmem [shape: f32[2,256], index: 5, kind: input, shape index: {}]   ;;  %s14440_s6 = inlined_call_operand.vmem [shape: bf16[2,256,128], index: 6, kind: input, shape index: {}]   ;;  %s14441_s7 = inlined_call_operand.vmem [shape: f32[2,128], index: 7, kind: input, shape index: {}]   ;;  %s14442_s8 = inlined_call_operand.vmem [shape: f32[1,128], index: 8, kind: input, shape index: {}]   ;;  %s14443_s9 = inlined_call_operand.vmem [shape: f32[1,128], index: 9, kind: input, shape index: {}]   ;;  %s14444_s10 = inlined_call_operand.hbm [shape: f32[2,16,64,128], index: 10, kind: output, shape index: {}]  }
   0x1   :  { %17 = vsyncpa [#allocation3 + $0x1], 0  ;;  %s8589_s13 = smov 0   ;;  %s8591_s14 = smov 0  }
   0x2   :  { %s8593_s15 = smov 0   ;;  %s8595_s16 = smov 0  }
   0x3   :  { %s8597_s17 = smov 0   ;;  %s8599_s18 = smov 0  }
   0x4   :  { %s8601_s19 = smov 0   ;;  %s8603_s20 = smov 0  }
   0x5 LB: > { %14654 = sst [smem:[#allocation5_spill]] %s8507_s15  ;;  %s7334_s21 = sadd.s32 4294967295, %s8527_s20   ;;  %s8527_s20 = sphi %s8603_s20, %s23_s20   ;;  %s8523_s19 = sphi %s8601_s19, %s15140_s19   ;;  %s8519_s18 = sphi %s8599_s18, %s15139_s18   ;;  %s8515_s17 = sphi %s8597_s17, %s15138_s17   ;;  %s8511_s16 = sphi %s8595_s16, %s15137_s16   ;;  %s8507_s15 = sphi %s8593_s15, %s15136_s15   ;;  %s8503_s14 = sphi %s8591_s14, %s15142_s14   ;;  %s8499_s13 = sphi %s8589_s13, %s15141_s13  }
   0x6   : > { %14655 = sst [smem:[#allocation6_spill]] %s8519_s18  ;;  %s7335_s22 = sadd.s32 4294967294, %s8527_s20  }
   0x7   : > { %14656 = sst [smem:[#allocation7_spill]] %s8523_s19  ;;  %s35_s23 = sadd.s32 1, %s8519_s18 }
   0x8   : > { %p36_p0 = scmp.ge.s32.totalorder %s35_s23, 2  ;;  %s42_s24 = sadd.s32 1, %s8523_s19 }
   0x9   : > { %p289_p1 = scmp.ne.s32.totalorder %s8507_s15, %s8503_s14  ;;  %p290_p2 = scmp.eq.s32.totalorder %s7334_s21, 3 }
   0xa   : > { %s15144_s23 = smov (%p36_p0, %s35_s23), 0  ;;  %s15146_s24 = smov (!%p36_p0, %s42_s24), %s8523_s19 }
   0xb   : > { %14657 = sst [smem:[#allocation8_spill]] %s15144_s23  ;;  %s273_s25 = ssub.s32 %s8519_s18, %s15144_s23 }
   0xc   : > { %p8640_p3 = por %p290_p2, %p289_p1  ;;  %p44_p4 = scmp.ge.s32.totalorder %s15146_s24, 2 }
   0xd   : > { %p295_p5 = scmp.ne.s32.totalorder %s8503_s14, %s8499_s13  ;;  %p296_p6 = scmp.eq.s32.totalorder %s7335_s22, 3 }
   0xe   : > { %p7338_p7 = scmp.ge.s32.totalorder %s8527_s20, 1  ;;  %s15148_s24 = smov (%p44_p4, %s15146_s24), 0 }
   0xf   : > { %14659 = sst [smem:[#allocation9_spill]] %s15148_s24  ;;  %p8649_p8 = por %p296_p6, %p295_p5 }
  0x10   : > { %p370_p9 = scmp.lt.s32.totalorder %s8527_s20, 5  ;;  %s272_s28 = ssub.s32 %s8523_s19, %s15148_s24 }
  0x11   : > { %s279_s29 = sadd.s32 1, %s8507_s15  ;;  %s274_s30 = sor.u32 %s273_s25, %s272_s28 }
  0x12   : > { %p371_p10 = pnand %p7338_p7, %p370_p9  ;;  %p277_p11 = scmp.eq.s32.totalorder %s274_s30, 0 }
  0x14   : > { %s8658_s11 = scalar_select %p277_p11, %s8507_s15, %s279_s29  }
  0x15   : > { %374 = sbr.rel (%p371_p10) target bundleno = 1776 (0x6f0), region = 60 }
  0x16   : > { %14661 = sst [smem:[#allocation10_spill]] %s8658_s11 }
  0x1a   : > { %p427_p12 = scmp.lt.s32.totalorder %s8515_s17, 1  ;;  %s7342_s12 = sshll.u32 %s8511_s16, 3  ;;  %v14450_v0 = vmov 1   ;;  %v14458_v1 = vmov 0   ;;  %v7663_v2 = vld [vmem:[%s14438_s4 + $0x74] ss:$8 sps:$4 sm:$0xff]   ;;  %v849_v45 = vlaneseq }
  0x1b   : > { %7583 = vset.pattern.permute.xlu1 %v14450_v0  ;;  %7582 = vset.pattern.permute.xlu0 %v14458_v1  ;;  %p440_p13 = scmp.lt.s32.totalorder %s7342_s12, 15  ;;  %v7665_v3 = vld [vmem:[%s14438_s4 + $0x70] ss:$8 sps:$4 sm:$0xff]   ;;  %v7666_v4 = vld [vmem:[%s14438_s4 + $0x64] ss:$8 sps:$4 sm:$0xff]   ;;  %s7474_s19 = sshll.u32 %s8511_s16, 6 }
  0x1c   : > { %s8671_s29 = scalar_select %p427_p12, %s8515_s17, 1  ;;  %1609 = vmatprep.mubr.bf16.mxu0 %v14458_v1  ;;  %3274 = vmatprep.subr.bf16.mxu1 %v14458_v1  ;;  %v7668_v5 = vld [vmem:[%s14438_s4 + $0x60] ss:$8 sps:$4 sm:$0xff]   ;;  %v7669_v6 = vld [vmem:[%s14438_s4 + $0x54] ss:$8 sps:$4 sm:$0xff]   ;;  %v850_v48 = vshrl.u32 %v849_v45, 7 }
  0x1d   : > { %s15150_s12 = smov (!%p440_p13, %s7342_s12), 15  ;;  %1577 = vmatprep.subr.bf16.mxu0 %v7663_v2  ;;  %v7671_v7 = vld [vmem:[%s14438_s4 + $0x50] ss:$8 sps:$4 sm:$0xff]   ;;  %v7672_v9 = vld [vmem:[%s14438_s4 + $0x44] ss:$8 sps:$4 sm:$0xff]   ;;  %s8531_s21 = smov [#allocation2]  }
  0x1e   : > { %s7344_s23 = sshll.u32 %s8671_s29, 7  ;;  %1578 = vmatpush1.bf16.msra.mxu0 %v7665_v3  ;;  %s7343_s25 = sshll.u32 %s15150_s12, 3  ;;  %v7674_v11 = vld [vmem:[%s14438_s4 + $0x40] ss:$8 sps:$4 sm:$0xff]   ;;  %v7675_v12 = vld [vmem:[%s14438_s4 + $0x34] ss:$8 sps:$4 sm:$0xff]  }
  0x1f   : > { %1579 = vmatprep.subr.bf16.mxu0 %v7666_v4  ;;  %s447_s24 = sadd.s32 %s7344_s23, %s7343_s25  ;;  %v7677_v15 = vld [vmem:[%s14438_s4 + $0x30] ss:$8 sps:$4 sm:$0xff]   ;;  %v7678_v16 = vld [vmem:[%s14438_s4 + $0x24] ss:$8 sps:$4 sm:$0xff]   ;;  %v7680_v18 = vld [vmem:[%s14438_s4 + $0x20] ss:$8 sps:$4 sm:$0xff]  }
  0x20   : > { %s7345_s30 = sshll.u32 %s447_s24, 3  ;;  %v7681_v19 = vld [vmem:[%s14438_s4 + $0x14] ss:$8 sps:$4 sm:$0xff]   ;;  %v7683_v20 = vld [vmem:[%s14438_s4 + $0x10] ss:$8 sps:$4 sm:$0xff]   ;;  %v8794_v50 = vsub.s32 0, %v850_v48 }
  0x21   : > { %s8688_s15 = scalar_lea.vmem %s14435_s1, %s7345_s30  ;;  %v7684_v22 = vld [vmem:[%s14438_s4 + $0x4] ss:$8 sps:$4 sm:$0xff]   ;;  %v7686_v24 = vld [vmem:[%s14438_s4] ss:$8 sps:$4 sm:$0xff]   ;;  %v8801_v52 = vsub.s32 1, %v850_v48  ;;  %s7473_s18 = sshll.u32 %s8671_s29, 6 }
  0x22   : > { %1580 = vmatpush1.bf16.msra.mxu0 %v7668_v5  ;;  %v463_v8 = vld [vmem:[%s8688_s15] sm:$0xff]  ;;  %v464_v10 = vld [vmem:[%s8688_s15 + $0x8] sm:$0xff]  ;;  %v465_v13 = vld [vmem:[%s8688_s15 + $0x10] sm:$0xff]  ;;  %14662 = vst [vmem:[#allocation11_spill] sm:$0xff] %v8794_v50  ;;  %s8838_s29 = scalar_lea.vmem %s14434_s0, %s7473_s18  ;;  %s423_s18 = sand.u32 1, %s8503_s14  }
  0x23   : > { %1581 = vmatprep.subr.bf16.mxu0 %v7669_v6  ;;  %986 = vperm.xlu1 %7583, %v463_v8   ;;  %v466_v14 = vld [vmem:[%s8688_s15 + $0x18] sm:$0xff]  ;;  %v468_v17 = vld [vmem:[%s8688_s15 + $0x28] sm:$0xff]  ;;  %v467_v21 = vld [vmem:[%s8688_s15 + $0x20] sm:$0xff]  ;;  %14663 = vst [vmem:[#allocation12_spill] sm:$0xff] %v8801_v52  ;;  %s7469_s12 = sshll.u32 %s8515_s17, 7  ;;  %s14383_s28 = scalar_lea.sflag [#allocation3], %s423_s18 }
  0x24   : > { %531 = vperm.xlu0 %7582, %v463_v8   ;;  %v469_v23 = vld [vmem:[%s8688_s15 + $0x30] sm:$0xff]  ;;  %v472_v25 = vld [vmem:[%s8688_s15 + $0x48] sm:$0xff]  ;;  %v470_v26 = vld [vmem:[%s8688_s15 + $0x38] sm:$0xff]  ;;  %s7220_s23 = sadd.s32 %s7474_s19, %s7469_s12 }
  0x25   : > { %v473_v27 = vld [vmem:[%s8688_s15 + $0x50] sm:$0xff]  ;;  %v476_v28 = vld [vmem:[%s8688_s15 + $0x68] sm:$0xff]  ;;  %v471_v29 = vld [vmem:[%s8688_s15 + $0x40] sm:$0xff]  ;;  %s7470_s16 = sshll.u32 %s7220_s23, 7 }
  0x26   : > { %1582 = vmatpush1.bf16.msra.mxu0 %v7671_v7  ;;  %v477_v30 = vld [vmem:[%s8688_s15 + $0x70] sm:$0xff]  ;;  %v480_v31 = vld [vmem:[%s8688_s15 + $0x88] sm:$0xff]  ;;  %v474_v32 = vld [vmem:[%s8688_s15 + $0x58] sm:$0xff]  ;;  %s14378_s25 = scalar_lea.hbm %s14444_s10, %s7470_s16 }
  0x27   : > { %1583 = vmatprep.subr.bf16.mxu0 %v7672_v9  ;;  %990 = vperm.xlu1 %7583, %v464_v10   ;;  %v481_v33 = vld [vmem:[%s8688_s15 + $0x90] sm:$0xff]  ;;  %v8754_v34 = vld [vmem:[%s8688_s15 + $0xa8] sm:$0xff]  ;;  %v475_v35 = vld [vmem:[%s8688_s15 + $0x60] sm:$0xff] }
  0x28   : > { %536 = vperm.xlu0 %7582, %v464_v10   ;;  %v485_v36 = vld [vmem:[%s8688_s15 + $0xb0] sm:$0xff]  ;;  %v478_v37 = vld [vmem:[%s8688_s15 + $0x78] sm:$0xff]  ;;  %v8765_v38 = vld [vmem:[%s8688_s15 + $0xc8] sm:$0xff] }
  0x29   : > { %v489_v39 = vld [vmem:[%s8688_s15 + $0xd0] sm:$0xff]  ;;  %v8772_v40 = vld [vmem:[%s8688_s15 + $0xe8] sm:$0xff]  ;;  %v479_v41 = vld [vmem:[%s8688_s15 + $0x80] sm:$0xff] }
  0x2a   : > { %1584 = vmatpush1.bf16.msra.mxu0 %v7674_v11  ;;  %v493_v42 = vld [vmem:[%s8688_s15 + $0xf0] sm:$0xff]  ;;  %v482_v43 = vld [vmem:[%s8688_s15 + $0x98] sm:$0xff]  ;;  %v8784_v44 = vld [vmem:[%s8688_s15 + $0x108] sm:$0xff] }
  0x2b   : > { %1585 = vmatprep.subr.bf16.mxu0 %v7675_v12  ;;  %7584 = vset.pattern.permute.xlu1 %v14458_v1  ;;  %v497_v46 = vld [vmem:[%s8688_s15 + $0x110] sm:$0xff]  ;;  %v483_v47 = vld [vmem:[%s8688_s15 + $0xa0] sm:$0xff]  ;;  %v8791_v49 = vld [vmem:[%s8688_s15 + $0x128] sm:$0xff] }
  0x2c   : > { %541 = vperm.xlu0 %7582, %v465_v13   ;;  %546 = vperm.xlu1 %7584, %v466_v14   ;;  %v527_v51 = vld [vmem:[%s14436_s2] sm:$0x3]  ;;  %v501_v54 = vld [vmem:[%s8688_s15 + $0x130] sm:$0xff]  ;;  %v486_v61 = vld [vmem:[%s8688_s15 + $0xb8] sm:$0xff] }
  0x2d   : > { %v8804_v53 = vrot.slane %v527_v51, %v8794_v50  ;;  %v8813_v56 = vld [vmem:[%s14437_s3] ss:$0 sm:$0xff]  ;;  %v8818_v58 = vrot.slane %v527_v51, %v8801_v52  ;;  %v8850_v9 = vld [vmem:[%s8838_s29 + $0x8] sm:$0xff]  ;;  %v509_v48 = vld [vmem:[%s8688_s15 + $0x170] sm:$0xff] }
  0x2e   : > { %1586 = vmatpush1.bf16.msra.mxu0 %v7677_v15  ;;  %v8847_v8 = vld [vmem:[%s8838_s29] sm:$0xff]  ;;  %v8853_v10 = vld [vmem:[%s8688_s15 + $0x148] sm:$0xff] }
  0x2f   : > { %1587 = vmatprep.subr.bf16.mxu0 %v7678_v16 }
  0x30   : > { %556 = vperm.xlu0 %7582, %v468_v17   ;;  %7585 = vset.pattern.permute.xlu1 %v14450_v0 }
  0x31   : > { %998 = vperm.xlu1 %7585, %v466_v14  }
  0x32   : > { %1588 = vmatpush1.bf16.msra.mxu0 %v7680_v18 }
  0x33   : > { %1589 = vmatprep.subr.bf16.mxu0 %v7681_v19  ;;  %v487_v19 = vld [vmem:[%s8688_s15 + $0xc0] sm:$0xff] }
  0x34   : > { %7587 = vset.pattern.permute.xlu0 %v14450_v0 }
  0x35   : > { %994 = vperm.xlu0 %7587, %v465_v13   ;;  %7586 = vset.pattern.permute.xlu1 %v14458_v1 }
  0x36   : > { %1590 = vmatpush1.bf16.msra.mxu0 %v7683_v20  ;;  %551 = vperm.xlu1 %7586, %v467_v21  }
  0x37   : > { %1591 = vmatprep.subr.bf16.mxu0 %v7684_v22 }
  0x39   : > { %1010 = vperm.xlu0 %7587, %v469_v23  }
  0x3a   : > { %1592 = vmatpush1.bf16.msra.mxu0 %v7686_v24  ;;  %7588 = vset.pattern.permute.xlu1 %v14450_v0 }
  0x3b   : > { %1002 = vperm.xlu1 %7588, %v467_v21   ;;  %v505_v21 = vld [vmem:[%s8688_s15 + $0x150] sm:$0xff] }
  0x3d   : > { %7590 = vset.pattern.permute.xlu0 %v14458_v1 }
  0x3e   : > { %561 = vperm.xlu0 %7590, %v469_v23  }
  0x3f   : > { %1006 = vperm.xlu1 %7588, %v468_v17  }
  0x42   : > { %576 = vperm.xlu0 %7590, %v472_v25  }
  0x43   : > { %7589 = vset.pattern.permute.xlu1 %v14458_v1 }
  0x44   : > { %566 = vperm.xlu1 %7589, %v470_v26  }
  0x46   : > { %581 = vperm.xlu0 %7590, %v473_v27  }
  0x48   : > { %7591 = vset.pattern.permute.xlu1 %v14450_v0 }
  0x49   : > { %1014 = vperm.xlu1 %7591, %v470_v26  }
  0x4a   : > { %596 = vperm.xlu0 %7590, %v476_v28  }
  0x4d   : > { %7592 = vset.pattern.permute.xlu1 %v14458_v1 }
  0x4e   : > { %7597 = vset.pattern.permute.xlu0 %v14450_v0  ;;  %571 = vperm.xlu1 %7592, %v471_v29  }
  0x4f   : > { %1026 = vperm.xlu0 %7597, %v473_v27  }
  0x52   : > { %7593 = vset.pattern.permute.xlu1 %v14450_v0 }
  0x53   : > { %1042 = vperm.xlu0 %7597, %v477_v30   ;;  %1018 = vperm.xlu1 %7593, %v471_v29  }
  0x57   : > { %7600 = vset.pattern.permute.xlu0 %v14458_v1  ;;  %1022 = vperm.xlu1 %7593, %v472_v25  }
  0x58   : > { %601 = vperm.xlu0 %7600, %v477_v30   ;;  %v8887_v30 = vld [vmem:[%s8838_s29 + $0x10] sm:$0xff] }
  0x5b   : > { %7594 = vset.pattern.permute.xlu1 %v14458_v1 }
  0x5c   : > { %616 = vperm.xlu0 %7600, %v480_v31   ;;  %586 = vperm.xlu1 %7594, %v474_v32  }
  0x60   : > { %621 = vperm.xlu0 %7600, %v481_v33   ;;  %7595 = vset.pattern.permute.xlu1 %v14450_v0 }
  0x61   : > { %1030 = vperm.xlu1 %7595, %v474_v32  }
  0x64   : > { %636 = vperm.xlu0 %7600, %v8754_v34  }
  0x65   : > { %7596 = vset.pattern.permute.xlu1 %v14458_v1 }
  0x66   : > { %591 = vperm.xlu1 %7596, %v475_v35  }
  0x68   : > { %7607 = vset.pattern.permute.xlu0 %v14450_v0 }
  0x69   : > { %1058 = vperm.xlu0 %7607, %v481_v33  }
  0x6a   : > { %7598 = vset.pattern.permute.xlu1 %v14450_v0 }
  0x6b   : > { %1034 = vperm.xlu1 %7598, %v475_v35  }
  0x6d   : > { %1074 = vperm.xlu0 %7607, %v485_v36  }
  0x6f   : > { %1038 = vperm.xlu1 %7598, %v476_v28   ;;  %v8882_v28 = vld [vmem:[%s8688_s15 + $0x168] sm:$0xff] }
  0x71   : > { %7610 = vset.pattern.permute.xlu0 %v14458_v1 }
  0x72   : > { %641 = vperm.xlu0 %7610, %v485_v36  }
  0x73   : > { %7599 = vset.pattern.permute.xlu1 %v14458_v1 }
  0x74   : > { %606 = vperm.xlu1 %7599, %v478_v37  }
  0x76   : > { %656 = vperm.xlu0 %7610, %v8765_v38  }
  0x78   : > { %7601 = vset.pattern.permute.xlu1 %v14450_v0 }
  0x79   : > { %1046 = vperm.xlu1 %7601, %v478_v37  }
  0x7a   : > { %661 = vperm.xlu0 %7610, %v489_v39  }
  0x7d   : > { %7602 = vset.pattern.permute.xlu1 %v14458_v1 }
  0x7e   : > { %676 = vperm.xlu0 %7610, %v8772_v40   ;;  %611 = vperm.xlu1 %7602, %v479_v41  }
  0x82   : > { %7617 = vset.pattern.permute.xlu0 %v14450_v0  ;;  %7603 = vset.pattern.permute.xlu1 %v14450_v0 }
  0x83   : > { %1090 = vperm.xlu0 %7617, %v489_v39   ;;  %1050 = vperm.xlu1 %7603, %v479_v41  }
  0x87   : > { %1106 = vperm.xlu0 %7617, %v493_v42   ;;  %1054 = vperm.xlu1 %7603, %v480_v31   ;;  %v8890_v31 = vld [vmem:[%s8838_s29 + $0x18] sm:$0xff] }
  0x8b   : > { %7620 = vset.pattern.permute.xlu0 %v14458_v1  ;;  %7604 = vset.pattern.permute.xlu1 %v14458_v1 }
  0x8c   : > { %681 = vperm.xlu0 %7620, %v493_v42   ;;  %626 = vperm.xlu1 %7604, %v482_v43  }
  0x90   : > { %696 = vperm.xlu0 %7620, %v8784_v44   ;;  %7605 = vset.pattern.permute.xlu1 %v14450_v0 }
  0x91   : > { %1062 = vperm.xlu1 %7605, %v482_v43  }
  0x94   : > { %701 = vperm.xlu0 %7620, %v497_v46  }
  0x95   : > { %7606 = vset.pattern.permute.xlu1 %v14458_v1 }
  0x96   : > { %631 = vperm.xlu1 %7606, %v483_v47  }
  0x98   : > { %716 = vperm.xlu0 %7620, %v8791_v49  }
  0x9a   : > { %7608 = vset.pattern.permute.xlu1 %v14450_v0 }
  0x9b   : > { %1066 = vperm.xlu1 %7608, %v483_v47   ;;  %v490_v47 = vld [vmem:[%s8688_s15 + $0xd8] sm:$0xff] }
  0x9c   : > { %7627 = vset.pattern.permute.xlu0 %v14450_v0 }
  0x9d   : > { %1122 = vperm.xlu0 %7627, %v497_v46  }
  0x9e   : > { %v8808_v55 = vpop.permute.xlu1 %986 }
  0x9f   : > { %v8815_v57 = vpop.permute.xlu0 %531  ;;  %1070 = vperm.xlu1 %7608, %v8754_v34   ;;  %v1245_v2 = vmul.f32 %v8818_v58, %v8808_v55 }
  0xa0   : > { %v853_v59 = vmul.f32 %v8804_v53, %v8815_v57 }
  0xa1   : > { %1138 = vperm.xlu0 %7627, %v501_v54  }
  0xa2   : > { %v921_v60 = vadd.f32 %v8813_v56, %v853_v59  ;;  %v8826_v62 = vpop.permute.xlu1 %990 }
  0xa3   : > { %v8828_v63 = vpop.permute.xlu0 %536  ;;  %7609 = vset.pattern.permute.xlu1 %v14458_v1  ;;  %v1246_v5 = vmul.f32 %v8818_v58, %v8826_v62 }
  0xa4   : > { %v854_v3 = vmul.f32 %v8804_v53, %v8828_v63  ;;  %646 = vperm.xlu1 %7609, %v486_v61   ;;  %v1309_v4 = vadd.f32 %v1245_v2, %v921_v60  ;;  %v8923_v60 = vld [vmem:[%s8838_s29 + $0x20] sm:$0xff] }
  0xa5   : > { %7630 = vset.pattern.permute.xlu0 %v14458_v1 }
  0xa6   : > { %v922_v6 = vadd.f32 %v8813_v56, %v854_v3  ;;  %721 = vperm.xlu0 %7630, %v501_v54   ;;  %v1373_v13 = vmul.f32 %v1309_v4, %v8847_v8 }
  0xa7   : > { %v8844_v7 = vpop.permute.xlu0 %541  ;;  %v8855_v12 = vpop.permute.xlu1 %546 }
  0xa8   : > { %v1310_v11 = vadd.f32 %v1246_v5, %v922_v6  ;;  %7611 = vset.pattern.permute.xlu1 %v14450_v0  ;;  %v856_v15 = vmul.f32 %v8804_v53, %v8855_v12  ;;  %v855_v16 = vmul.f32 %v8804_v53, %v8844_v7 }
  0xa9   : > { %1078 = vperm.xlu1 %7611, %v486_v61   ;;  %v8926_v61 = vld [vmem:[%s8838_s29 + $0x28] sm:$0xff] }
  0xaa   : > { %v1374_v14 = vmul.f32 %v1310_v11, %v8850_v9  ;;  %736 = vperm.xlu0 %7630, %v8853_v10   ;;  %v924_v23 = vadd.f32 %v8813_v56, %v856_v15  ;;  %v923_v24 = vadd.f32 %v8813_v56, %v855_v16 }
  0xab   : > { %v8865_v17 = vpop.permute.xlu0 %556 }
  0xac   : > { %v1437_v18 = vpack.c.bf16 %v1374_v14, %v1373_v13  ;;  %v8868_v20 = vpop.permute.xlu1 %998  ;;  %v858_v36 = vmul.f32 %v8804_v53, %v8865_v17 }
  0xad   : > { %v1248_v22 = vmul.f32 %v8818_v58, %v8868_v20  ;;  %7612 = vset.pattern.permute.xlu1 %v14458_v1 }
  0xae   : > { %1610 = vmatmul.mubr.bf16.vlgmr.msra.gmra.mxu0 %v1437_v18  ;;  %651 = vperm.xlu1 %7612, %v487_v19   ;;  %v926_v45 = vadd.f32 %v8813_v56, %v858_v36  ;;  %v491_v18 = vld [vmem:[%s8688_s15 + $0xe0] sm:$0xff] }
  0xaf   : > { %1619 = vmatprep.mubr.bf16.mxu0 %v14458_v1  ;;  %741 = vperm.xlu0 %7630, %v505_v21   ;;  %v1312_v26 = vadd.f32 %v1248_v22, %v924_v23  ;;  %v8949_v22 = vld [vmem:[%s8688_s15 + $0x188] sm:$0xff] }
  0xb0   : > { %v8876_v25 = vpop.permute.xlu0 %994 }
  0xb1   : > { %v1247_v27 = vmul.f32 %v8818_v58, %v8876_v25  ;;  %v8884_v29 = vpop.permute.xlu1 %551  ;;  %v1376_v35 = vmul.f32 %v1312_v26, %v8890_v31  ;;  %v8956_v26 = vld [vmem:[%s8838_s29 + $0x38] sm:$0xff] }
  0xb2   : > { %7613 = vset.pattern.permute.xlu1 %v14450_v0  ;;  %v857_v37 = vmul.f32 %v8804_v53, %v8884_v29 }
  0xb3   : > { %v1311_v32 = vadd.f32 %v1247_v27, %v923_v24  ;;  %1082 = vperm.xlu1 %7613, %v487_v19   ;;  %756 = vperm.xlu0 %7630, %v8882_v28  }
  0xb4   : > { %v8893_v33 = vpop.permute.xlu0 %1010  ;;  %v925_v46 = vadd.f32 %v8813_v56, %v857_v37 }
  0xb5   : > { %v1375_v34 = vmul.f32 %v1311_v32, %v8887_v30  ;;  %v1251_v3 = vmul.f32 %v8818_v58, %v8893_v33 }
  0xb6   : > { %v8902_v39 = vpop.permute.xlu1 %1002 }
  0xb7   : > { %v1438_v41 = vpack.c.bf16 %v1376_v35, %v1375_v34  ;;  %v1249_v42 = vmul.f32 %v8818_v58, %v8902_v39  ;;  %1086 = vperm.xlu1 %7613, %v8765_v38   ;;  %7637 = vset.pattern.permute.xlu0 %v14450_v0  ;;  %v513_v35 = vld [vmem:[%s8688_s15 + $0x190] sm:$0xff] }
  0xb8   : > { %1154 = vperm.xlu0 %7637, %v505_v21   ;;  %v8946_v21 = vld [vmem:[%s8838_s29 + $0x30] sm:$0xff] }
  0xb9   : > { %1620 = vmatmul.mubr.bf16.gmra.mxu0 %v1438_v41  ;;  %v8908_v43 = vpop.permute.xlu0 %561  ;;  %v1313_v54 = vadd.f32 %v1249_v42, %v925_v46  ;;  %v8968_v42 = vld [vmem:[%s8688_s15 + $0x1a8] sm:$0xff] }
  0xba   : > { %1629 = vmatprep.mubr.bf16.mxu0 %v14458_v1  ;;  %v8915_v51 = vpop.permute.xlu1 %1006  ;;  %v859_v59 = vmul.f32 %v8804_v53, %v8908_v43 }
  0xbb   : > { %v1250_v38 = vmul.f32 %v8818_v58, %v8915_v51  ;;  %7614 = vset.pattern.permute.xlu1 %v14458_v1  ;;  %v1377_v6 = vmul.f32 %v1313_v54, %v8923_v60 }
  0xbc   : > { %666 = vperm.xlu1 %7614, %v490_v47   ;;  %1170 = vperm.xlu0 %7637, %v509_v48   ;;  %v927_v5 = vadd.f32 %v8813_v56, %v859_v59 }
  0xbd   : > { %v1314_v2 = vadd.f32 %v1250_v38, %v926_v45  ;;  %v8939_v15 = vpop.permute.xlu0 %576 }
  0xbe   : > { %v1315_v16 = vadd.f32 %v1251_v3, %v927_v5  ;;  %v862_v46 = vmul.f32 %v8804_v53, %v8939_v15 }
  0xbf   : > { %v8930_v4 = vpop.permute.xlu1 %566  ;;  %v1378_v11 = vmul.f32 %v1314_v2, %v8926_v61  ;;  %v494_v2 = vld [vmem:[%s8688_s15 + $0xf8] sm:$0xff] }
  0xc0   : > { %7615 = vset.pattern.permute.xlu1 %v14450_v0  ;;  %7640 = vset.pattern.permute.xlu0 %v14458_v1  ;;  %v860_v13 = vmul.f32 %v8804_v53, %v8930_v4  ;;  %v1379_v32 = vmul.f32 %v1315_v16, %v8946_v21  ;;  %v930_v59 = vadd.f32 %v8813_v56, %v862_v46 }
  0xc1   : > { %1094 = vperm.xlu1 %7615, %v490_v47   ;;  %v1439_v14 = vpack.c.bf16 %v1378_v11, %v1377_v6  ;;  %761 = vperm.xlu0 %7640, %v509_v48   ;;  %v8960_v34 = vpop.permute.xlu0 %581 }
  0xc2   : > { %v928_v23 = vadd.f32 %v8813_v56, %v860_v13  ;;  %v863_v11 = vmul.f32 %v8804_v53, %v8960_v34 }
  0xc3   : > { %1630 = vmatmul.mubr.bf16.gmra.mxu0 %v1439_v14 }
  0xc4   : > { %v8942_v19 = vpop.permute.xlu1 %1014  ;;  %1639 = vmatprep.mubr.bf16.mxu0 %v14458_v1  ;;  %v931_v14 = vadd.f32 %v8813_v56, %v863_v11 }
  0xc5   : > { %v1252_v24 = vmul.f32 %v8818_v58, %v8942_v19  ;;  %7616 = vset.pattern.permute.xlu1 %v14458_v1  ;;  %776 = vperm.xlu0 %7640, %v8949_v22   ;;  %v8976_v48 = vpop.permute.xlu0 %596 }
  0xc6   : > { %671 = vperm.xlu1 %7616, %v491_v18  }
  0xc7   : > { %v1316_v27 = vadd.f32 %v1252_v24, %v928_v23 }
  0xc9   : > { %v8963_v36 = vpop.permute.xlu1 %571  ;;  %v1380_v37 = vmul.f32 %v1316_v27, %v8956_v26  ;;  %781 = vperm.xlu0 %7640, %v513_v35   ;;  %v7687_v27 = vld [vmem:[%s14440_s6 + $0x38] sm:$0xff]  }
  0xca   : > { %7618 = vset.pattern.permute.xlu1 %v14450_v0  ;;  %v861_v45 = vmul.f32 %v8804_v53, %v8963_v36  ;;  %3275 = vmatpush1.bf16.msra.mxu1 %v7687_v27 }
  0xcb   : > { %1098 = vperm.xlu1 %7618, %v491_v18   ;;  %v1440_v41 = vpack.c.bf16 %v1380_v37, %v1379_v32  ;;  %3276 = vmatprep.subr.bf16.mxu1 %v14458_v1 }
  0xcc   : > { %v929_v38 = vadd.f32 %v8813_v56, %v861_v45  ;;  %v7688_v45 = vld [vmem:[%s14440_s6 + $0x30] sm:$0xff]  }
  0xcd   : > { %1640 = vmatmul.mubr.bf16.gmra.mxu0 %v1440_v41  ;;  %796 = vperm.xlu0 %7640, %v8968_v42   ;;  %v495_v41 = vld [vmem:[%s8688_s15 + $0x100] sm:$0xff] }
  0xce   : > { %v8974_v47 = vpop.permute.xlu1 %1018  ;;  %1649 = vmatprep.mubr.bf16.mxu0 %v14458_v1  ;;  %3277 = vmatpush1.bf16.msra.mxu1 %v7688_v45 }
  0xcf   : > { %v1253_v54 = vmul.f32 %v8818_v58, %v8974_v47  ;;  %1102 = vperm.xlu1 %7618, %v8772_v40   ;;  %v8993_v40 = vpop.permute.xlu0 %1026  ;;  %3278 = vmatprep.subr.bf16.mxu1 %v14458_v1 }
  0xd0   : > { %v1255_v24 = vmul.f32 %v8818_v58, %v8993_v40 }
  0xd1   : > { %v1317_v5 = vadd.f32 %v1253_v54, %v929_v38  ;;  %7647 = vset.pattern.permute.xlu0 %v14450_v0 }
  0xd2   : > { %v8986_v3 = vpop.permute.xlu1 %1022  ;;  %1186 = vperm.xlu0 %7647, %v513_v35   ;;  %v1319_v37 = vadd.f32 %v1255_v24, %v931_v14  ;;  %v517_v14 = vld [vmem:[%s8688_s15 + $0x1b0] sm:$0xff]  ;;  %v866_v24 = vmul.f32 %v8804_v53, %v8976_v48 }
  0xd3   : > { %v1254_v6 = vmul.f32 %v8818_v58, %v8986_v3  ;;  %7619 = vset.pattern.permute.xlu1 %v14458_v1  ;;  %v1381_v18 = vmul.f32 %v1317_v5, %v8847_v8  ;;  %v7689_v5 = vld [vmem:[%s14440_s6 + $0x28] sm:$0xff]  }
  0xd4   : > { %686 = vperm.xlu1 %7619, %v494_v2   ;;  %3279 = vmatpush1.bf16.msra.mxu1 %v7689_v5  ;;  %v934_v45 = vadd.f32 %v8813_v56, %v866_v24 }
  0xd5   : > { %v1318_v13 = vadd.f32 %v1254_v6, %v930_v59  ;;  %3280 = vmatprep.subr.bf16.mxu1 %v14458_v1 }
  0xd6   : > { %1202 = vperm.xlu0 %7647, %v517_v14  }
  0xd7   : > { %v8997_v16 = vpop.permute.xlu1 %586  ;;  %v1382_v23 = vmul.f32 %v1318_v13, %v8850_v9  ;;  %v9030_v13 = vpop.permute.xlu0 %1042 }
  0xd8   : > { %7621 = vset.pattern.permute.xlu1 %v14450_v0  ;;  %v864_v32 = vmul.f32 %v8804_v53, %v8997_v16 }
  0xd9   : > { %1110 = vperm.xlu1 %7621, %v494_v2   ;;  %v1441_v35 = vpack.c.bf16 %v1382_v23, %v1381_v18  ;;  %v1383_v2 = vmul.f32 %v1319_v37, %v8887_v30  ;;  %v7690_v23 = vld [vmem:[%s14440_s6 + $0x20] sm:$0xff]   ;;  %v7691_v37 = vld [vmem:[%s14440_s6 + $0x18] sm:$0xff]  }
  0xda   : > { %v932_v54 = vadd.f32 %v8813_v56, %v864_v32  ;;  %3281 = vmatpush1.bf16.msra.mxu1 %v7690_v23  ;;  %7650 = vset.pattern.permute.xlu0 %v14458_v1 }
  0xdb   : > { %1650 = vmatmul.mubr.bf16.gmra.mxu0 %v1441_v35  ;;  %3282 = vmatprep.subr.bf16.mxu1 %v14458_v1 }
  0xdc   : > { %v9014_v46 = vpop.permute.xlu1 %1030  ;;  %1659 = vmatprep.mubr.bf16.mxu0 %v14458_v1  ;;  %801 = vperm.xlu0 %7650, %v517_v14  }
  0xdd   : > { %14664 = vst [vmem:[#allocation13_spill] sm:$0xff] %v9014_v46  ;;  %v1256_v38 = vmul.f32 %v8818_v58, %v9014_v46  ;;  %7622 = vset.pattern.permute.xlu1 %v14458_v1  ;;  %v525_v46 = vld [vmem:[%s8688_s15 + $0x1f0] sm:$0xff] }
  0xde   : > { %691 = vperm.xlu1 %7622, %v495_v41   ;;  %3283 = vmatpush1.bf16.msra.mxu1 %v7691_v37  ;;  %v7693_v37 = vld [vmem:[%s14440_s6 + $0x8] sm:$0xff]  }
  0xdf   : > { %v1320_v59 = vadd.f32 %v1256_v38, %v932_v54  ;;  %v498_v38 = vld [vmem:[%s8688_s15 + $0x118] sm:$0xff]  ;;  %3284 = vmatprep.subr.bf16.mxu1 %v14458_v1 }
  0xe1   : > { %v9026_v6 = vpop.permute.xlu1 %591  ;;  %v1384_v11 = vmul.f32 %v1320_v59, %v8890_v31 }
  0xe2   : > { %14665 = vst [vmem:[#allocation14_spill] sm:$0xff] %v9026_v6  ;;  %7623 = vset.pattern.permute.xlu1 %v14450_v0  ;;  %v865_v27 = vmul.f32 %v8804_v53, %v9026_v6 }
  0xe3   : > { %1114 = vperm.xlu1 %7623, %v495_v41   ;;  %v1442_v18 = vpack.c.bf16 %v1384_v11, %v1383_v2  ;;  %v9051_v41 = vpop.permute.xlu0 %601  ;;  %v7692_v11 = vld [vmem:[%s14440_s6 + $0x10] sm:$0xff]  }
  0xe4   : > { %v933_v54 = vadd.f32 %v8813_v56, %v865_v27  ;;  %v867_v5 = vmul.f32 %v8804_v53, %v9051_v41  ;;  %3285 = vmatpush1.bf16.msra.mxu1 %v7692_v11  ;;  %v499_v11 = vld [vmem:[%s8688_s15 + $0x120] sm:$0xff] }
  0xe5   : > { %1660 = vmatmul.mubr.bf16.gmra.mxu0 %v1442_v18  ;;  %v1259_v18 = vmul.f32 %v8818_v58, %v9030_v13  ;;  %3286 = vmatprep.subr.bf16.mxu1 %v14458_v1 }
  0xe6   : > { %v9041_v32 = vpop.permute.xlu1 %1034  ;;  %1669 = vmatprep.mubr.bf16.mxu0 %v14458_v1  ;;  %v935_v24 = vadd.f32 %v8813_v56, %v867_v5 }
  0xe7   : > { %14666 = vst [vmem:[#allocation15_spill] sm:$0xff] %v9041_v32  ;;  %v1257_v35 = vmul.f32 %v8818_v58, %v9041_v32  ;;  %1118 = vperm.xlu1 %7623, %v8784_v44   ;;  %v9085_v5 = vpop.permute.xlu0 %616  ;;  %v14676_v32 = vmov 0  }
  0xe8   : > { %3287 = vmatpush1.bf16.msra.mxu1 %v7693_v37  ;;  %v7695_v37 = vld [vmem:[%s14440_s6 + $0x78] sm:$0xff]  }
  0xe9   : > { %v1321_v44 = vadd.f32 %v1257_v35, %v933_v54  ;;  %3288 = vmatprep.subr.bf16.mxu1 %v14458_v1 }
  0xea   : > { %v9057_v59 = vpop.permute.xlu1 %1038 }
  0xeb   : > { %14667 = vst [vmem:[#allocation16_spill] sm:$0xff] %v9057_v59  ;;  %v1258_v2 = vmul.f32 %v8818_v58, %v9057_v59  ;;  %7624 = vset.pattern.permute.xlu1 %v14458_v1  ;;  %v1385_v27 = vmul.f32 %v1321_v44, %v8923_v60  ;;  %v1323_v44 = vadd.f32 %v1259_v18, %v935_v24 }
  0xec   : > { %706 = vperm.xlu1 %7624, %v498_v38  }
  0xed   : > { %v1322_v14 = vadd.f32 %v1258_v2, %v934_v45  ;;  %v9081_v45 = vld [vmem:[%s8688_s15 + $0x1c8] sm:$0xff]  ;;  %v1387_v24 = vmul.f32 %v1323_v44, %v8946_v21  ;;  %v7696_v44 = vld [vmem:[%s14440_s6 + $0x70] sm:$0xff]  }
  0xee   : > { %816 = vperm.xlu0 %7650, %v9081_v45  }
  0xef   : > { %v9070_v23 = vpop.permute.xlu1 %606  ;;  %v1386_v35 = vmul.f32 %v1322_v14, %v8926_v61  ;;  %v7694_v14 = vld [vmem:[%s14440_s6] sm:$0xff]  }
  0xf0   : > { %14668 = vst [vmem:[#allocation17_spill] sm:$0xff] %v9070_v23  ;;  %7625 = vset.pattern.permute.xlu1 %v14450_v0  ;;  %v868_v54 = vmul.f32 %v8804_v53, %v9070_v23  ;;  %3289 = vmatpush1.bf16.msra.mxu1 %v7694_v14  ;;  %v14671_v23 = vmov 1  }
  0xf1   : > { %1126 = vperm.xlu1 %7625, %v498_v38   ;;  %v1443_v2 = vpack.c.bf16 %v1386_v35, %v1385_v27  ;;  %v521_v38 = vld [vmem:[%s8688_s15 + $0x1d0] sm:$0xff]  ;;  %3290 = vmatprep.subr.bf16.mxu1 %v14458_v1 }
  0xf2   : > { %v936_v27 = vadd.f32 %v8813_v56, %v868_v54  ;;  %821 = vperm.xlu0 %7650, %v521_v38  }
  0xf3   : > { %1670 = vmatmul.mubr.bf16.gmra.mxu0 %v1443_v2  ;;  %v9105_v2 = vpop.permute.xlu0 %621 }
  0xf4   : > { %v9093_v0 = vpop.permute.xlu1 %1046  ;;  %1679 = vmatprep.mubr.bf16.mxu0 %v14458_v1  ;;  %3291 = vmatpush2.bf16.msra.mxu1 %v7695_v37 }
  0xf5   : > { %14669 = vst [vmem:[#allocation18_spill] sm:$0xff] %v9093_v0  ;;  %v1260_v35 = vmul.f32 %v8818_v58, %v9093_v0  ;;  %7626 = vset.pattern.permute.xlu1 %v14458_v1  ;;  %3292 = vmatprep.subr.bf16.mxu1 %v14458_v1 }
  0xf6   : > { %711 = vperm.xlu1 %7626, %v499_v11   ;;  %7655 = vset.pattern.permute.xlu0 %v14671_v23 }
  0xf7   : > { %v1324_v18 = vadd.f32 %v1260_v35, %v936_v27  ;;  %1218 = vperm.xlu0 %7655, %v521_v38   ;;  %v870_v35 = vmul.f32 %v8804_v53, %v9085_v5  ;;  %v7697_v38 = vld [vmem:[%s14440_s6 + $0x68] sm:$0xff]  }
  0xf8   : > { %3293 = vmatpush2.bf16.msra.mxu1 %v7696_v44 }
  0xf9   : > { %v9108_v54 = vpop.permute.xlu1 %611  ;;  %v1388_v0 = vmul.f32 %v1324_v18, %v8956_v26  ;;  %3294 = vmatprep.subr.bf16.mxu1 %v14458_v1  ;;  %v938_v37 = vadd.f32 %v8813_v56, %v870_v35 }
  0xfa   : > { %14670 = vst [vmem:[#allocation19_spill] sm:$0xff] %v9108_v54  ;;  %7628 = vset.pattern.permute.xlu1 %v14671_v23  ;;  %v869_v27 = vmul.f32 %v8804_v53, %v9108_v54 }
  0xfb   : > { %1130 = vperm.xlu1 %7628, %v499_v11   ;;  %v1444_v14 = vpack.c.bf16 %v1388_v0, %v1387_v24  ;;  %v9123_v0 = vpop.permute.xlu0 %636  ;;  %7658 = vset.pattern.permute.xlu0 %v14458_v1 }
  0xfc   : > { %v937_v24 = vadd.f32 %v8813_v56, %v869_v27  ;;  %3295 = vmatpush2.bf16.msra.mxu1 %v7697_v38  ;;  %v7698_v27 = vld [vmem:[%s14440_s6 + $0x60] sm:$0xff]  }
  0xfd   : > { %1680 = vmatmul.mubr.bf16.gmra.mxu0 %v1444_v14  ;;  %v502_v14 = vld [vmem:[%s8688_s15 + $0x138] sm:$0xff]  ;;  %3296 = vmatprep.subr.bf16.mxu1 %v14458_v1 }
  0xfe   : > { %v9121_v18 = vpop.permute.xlu1 %1050  ;;  %1689 = vmatprep.mubr.bf16.mxu0 %v14458_v1 }
  0xff   : > { %14672 = vst [vmem:[#allocation20_spill] sm:$0xff] %v9121_v18  ;;  %v1261_v11 = vmul.f32 %v8818_v58, %v9121_v18  ;;  %1134 = vperm.xlu1 %7628, %v8791_v49   ;;  %v871_v18 = vmul.f32 %v8804_v53, %v9105_v2  ;;  %v9148_v35 = vpop.permute.xlu0 %1058 }
 0x100   : > { %14674 = vst [vmem:[#allocation22_spill] sm:$0xff] %v9148_v35  ;;  %3297 = vmatpush2.bf16.msra.mxu1 %v7698_v27 }
 0x101   : > { %v1325_v44 = vadd.f32 %v1261_v11, %v937_v24  ;;  %v939_v11 = vadd.f32 %v8813_v56, %v871_v18  ;;  %3298 = vmatprep.subr.bf16.mxu1 %v14676_v32  ;;  %v9163_v18 = vld [vmem:[%s8688_s15 + $0x1e8] sm:$0xff] }
 0x102   : > { %v9137_v54 = vpop.permute.xlu1 %1054  ;;  %836 = vperm.xlu0 %7658, %v9163_v18  }
 0x103   : > { %14673 = vst [vmem:[#allocation21_spill] sm:$0xff] %v9137_v54  ;;  %v1262_v49 = vmul.f32 %v8818_v58, %v9137_v54  ;;  %7629 = vset.pattern.permute.xlu1 %v14458_v1  ;;  %v1389_v54 = vmul.f32 %v1325_v44, %v8847_v8  ;;  %v1263_v1 = vmul.f32 %v8818_v58, %v9148_v35  ;;  %v7700_v35 = vld [vmem:[%s14440_s6 + $0x50] sm:$0xff]  }
 0x104   : > { %726 = vperm.xlu1 %7629, %v502_v14  }
 0x105   : > { %v1326_v38 = vadd.f32 %v1262_v49, %v938_v37  ;;  %v7699_v37 = vld [vmem:[%s14440_s6 + $0x58] sm:$0xff]   ;;  %v1327_v27 = vadd.f32 %v1263_v1, %v939_v11  ;;  %v7701_v11 = vld [vmem:[%s14440_s6 + $0x48] sm:$0xff]  }
 0x106   : > { %3299 = vmatpush2.bf16.msra.mxu1 %v7699_v37  ;;  %841 = vperm.xlu0 %7658, %v525_v46  }
 0x107   : > { %v9151_v24 = vpop.permute.xlu1 %626  ;;  %v1390_v59 = vmul.f32 %v1326_v38, %v8850_v9  ;;  %v503_v38 = vld [vmem:[%s8688_s15 + $0x140] sm:$0xff]  ;;  %3300 = vmatprep.subr.bf16.mxu1 %v14676_v32 }
 0x108   : > { %14675 = vst [vmem:[#allocation23_spill] sm:$0xff] %v9151_v24  ;;  %7631 = vset.pattern.permute.xlu1 %v14671_v23  ;;  %v872_v49 = vmul.f32 %v8804_v53, %v9151_v24 }
 0x109   : > { %1142 = vperm.xlu1 %7631, %v502_v14   ;;  %v1445_v44 = vpack.c.bf16 %v1390_v59, %v1389_v54  ;;  %v1391_v54 = vmul.f32 %v1327_v27, %v8887_v30  ;;  %v7702_v27 = vld [vmem:[%s14440_s6 + $0x40] sm:$0xff]  }
 0x10a   : > { %v940_v14 = vadd.f32 %v8813_v56, %v872_v49  ;;  %3301 = vmatpush2.bf16.msra.mxu1 %v7700_v35  ;;  %7661 = vset.pattern.permute.xlu0 %v14671_v23 }
 0x10b   : > { %1690 = vmatmul.mubr.bf16.gmra.mxu0 %v1445_v44  ;;  %3302 = vmatprep.subr.bf16.mxu1 %v14676_v32  ;;  %v9190_v44 = vpop.permute.xlu0 %1074 }
 0x10c   : > { %v9173_v6 = vpop.permute.xlu1 %1062  ;;  %1699 = vmatprep.mubr.bf16.mxu0 %v14676_v32  ;;  %14679 = vst [vmem:[#allocation26_spill] sm:$0xff] %v9190_v44  ;;  %1234 = vperm.xlu0 %7661, %v525_v46  }
 0x10d   : > { %14677 = vst [vmem:[#allocation24_spill] sm:$0xff] %v9173_v6  ;;  %v1264_v59 = vmul.f32 %v8818_v58, %v9173_v6  ;;  %7632 = vset.pattern.permute.xlu1 %v14676_v32 }
 0x10e   : > { %731 = vperm.xlu1 %7632, %v503_v38   ;;  %3303 = vmatpush2.bf16.msra.mxu1 %v7701_v11 }
 0x10f   : > { %v1328_v1 = vadd.f32 %v1264_v59, %v940_v14  ;;  %3304 = vmatprep.subr.bf16.mxu1 %v14676_v32  ;;  %v874_v14 = vmul.f32 %v8804_v53, %v9123_v0  ;;  %v9208_v46 = vpop.permute.xlu0 %641 }
 0x110   : > { %14681 = vst [vmem:[#allocation28_spill] sm:$0xff] %v9208_v46 }
 0x111   : > { %v9186_v37 = vpop.permute.xlu1 %631  ;;  %v1392_v49 = vmul.f32 %v1328_v1, %v8890_v31 }
 0x112   : > { %14678 = vst [vmem:[#allocation25_spill] sm:$0xff] %v9186_v37  ;;  %7633 = vset.pattern.permute.xlu1 %v14671_v23  ;;  %v873_v59 = vmul.f32 %v8804_v53, %v9186_v37  ;;  %3305 = vmatpush2.bf16.msra.mxu1 %v7702_v27 }
 0x113   : > { %1146 = vperm.xlu1 %7633, %v503_v38   ;;  %v1446_v35 = vpack.c.bf16 %v1392_v49, %v1391_v54  ;;  %7475 = vmatprep.subr.bf16.mxu1 %v14676_v32  ;;  %v942_v54 = vadd.f32 %v8813_v56, %v874_v14  ;;  %v506_v49 = vld [vmem:[%s8688_s15 + $0x158] sm:$0xff]  ;;  %v1267_v14 = vmul.f32 %v8818_v58, %v9190_v44 }
 0x114   : > { %v941_v11 = vadd.f32 %v8813_v56, %v873_v59 }
 0x115   : > { %1700 = vmatmul.mubr.bf16.gmra.mxu0 %v1446_v35 }
 0x116   : > { %v9201_v1 = vpop.permute.xlu1 %1066  ;;  %1709 = vmatprep.mubr.bf16.mxu0 %v14676_v32 }
 0x117   : > { %14680 = vst [vmem:[#allocation27_spill] sm:$0xff] %v9201_v1  ;;  %v1265_v38 = vmul.f32 %v8818_v58, %v9201_v1  ;;  %1150 = vperm.xlu1 %7633, %v8853_v10   ;;  %v875_v10 = vmul.f32 %v8804_v53, %v9208_v46  ;;  %v9230_v46 = vpop.permute.xlu0 %656 }
 0x118   : > { %14684 = vst [vmem:[#allocation31_spill] sm:$0xff] %v9230_v46 }
 0x119   : > { %v1329_v37 = vadd.f32 %v1265_v38, %v941_v11  ;;  %v943_v59 = vadd.f32 %v8813_v56, %v875_v10 }
 0x11a   : > { %v9213_v35 = vpop.permute.xlu1 %1070 }
 0x11b   : > { %14682 = vst [vmem:[#allocation29_spill] sm:$0xff] %v9213_v35  ;;  %v1266_v27 = vmul.f32 %v8818_v58, %v9213_v35  ;;  %7634 = vset.pattern.permute.xlu1 %v14676_v32  ;;  %v1393_v38 = vmul.f32 %v1329_v37, %v8923_v60 }
 0x11c   : > { %746 = vperm.xlu1 %7634, %v506_v49  }
 0x11d   : > { %v1330_v1 = vadd.f32 %v1266_v27, %v942_v54  ;;  %v1331_v54 = vadd.f32 %v1267_v14, %v943_v59  ;;  %v507_v27 = vld [vmem:[%s8688_s15 + $0x160] sm:$0xff] }
 0x11f   : > { %v9222_v6 = vpop.permute.xlu1 %646  ;;  %v1394_v11 = vmul.f32 %v1330_v1, %v8926_v61 }
 0x120   : > { %14683 = vst [vmem:[#allocation30_spill] sm:$0xff] %v9222_v6  ;;  %7635 = vset.pattern.permute.xlu1 %v14671_v23  ;;  %v876_v35 = vmul.f32 %v8804_v53, %v9222_v6 }
 0x121   : > { %1158 = vperm.xlu1 %7635, %v506_v49   ;;  %v1447_v24 = vpack.c.bf16 %v1394_v11, %v1393_v38  ;;  %v1395_v49 = vmul.f32 %v1331_v54, %v8946_v21  ;;  %v9241_v38 = vpop.permute.xlu0 %661  ;;  %v878_v11 = vmul.f32 %v8804_v53, %v9230_v46 }
 0x122   : > { %v944_v37 = vadd.f32 %v8813_v56, %v876_v35  ;;  %14686 = vst [vmem:[#allocation33_spill] sm:$0xff] %v9241_v38  ;;  %v879_v46 = vmul.f32 %v8804_v53, %v9241_v38 }
 0x123   : > { %1710 = vmatmul.mubr.bf16.gmra.mxu0 %v1447_v24 }
 0x124   : > { %v9233_v44 = vpop.permute.xlu1 %1078  ;;  %1719 = vmatprep.mubr.bf16.mxu0 %v14676_v32 }
 0x125   : > { %14685 = vst [vmem:[#allocation32_spill] sm:$0xff] %v9233_v44  ;;  %v1268_v1 = vmul.f32 %v8818_v58, %v9233_v44  ;;  %7636 = vset.pattern.permute.xlu1 %v14676_v32  ;;  %v9253_v54 = vpop.permute.xlu0 %676 }
 0x126   : > { %751 = vperm.xlu1 %7636, %v507_v27   ;;  %14689 = vst [vmem:[#allocation36_spill] sm:$0xff] %v9253_v54 }
 0x127   : > { %v1332_v10 = vadd.f32 %v1268_v1, %v944_v37 }
 0x129   : > { %v9243_v24 = vpop.permute.xlu1 %651  ;;  %v1396_v14 = vmul.f32 %v1332_v10, %v8956_v26  ;;  %v946_v10 = vadd.f32 %v8813_v56, %v878_v11 }
 0x12a   : > { %14687 = vst [vmem:[#allocation34_spill] sm:$0xff] %v9243_v24  ;;  %7638 = vset.pattern.permute.xlu1 %v14671_v23  ;;  %v877_v59 = vmul.f32 %v8804_v53, %v9243_v24 }
 0x12b   : > { %1162 = vperm.xlu1 %7638, %v507_v27   ;;  %v1448_v35 = vpack.c.bf16 %v1396_v14, %v1395_v49  ;;  %v510_v49 = vld [vmem:[%s8688_s15 + $0x178] sm:$0xff] }
 0x12c   : > { %v945_v27 = vadd.f32 %v8813_v56, %v877_v59  ;;  %v947_v59 = vadd.f32 %v8813_v56, %v879_v46 }
 0x12d   : > { %1720 = vmatmul.mubr.bf16.gmra.mxu0 %v1448_v35 }
 0x12e   : > { %v9251_v37 = vpop.permute.xlu1 %1082  ;;  %1729 = vmatprep.mubr.bf16.mxu0 %v14676_v32 }
 0x12f   : > { %14688 = vst [vmem:[#allocation35_spill] sm:$0xff] %v9251_v37  ;;  %v1269_v1 = vmul.f32 %v8818_v58, %v9251_v37  ;;  %1166 = vperm.xlu1 %7638, %v8882_v28   ;;  %v9269_v37 = vpop.permute.xlu0 %1090 }
 0x130   : > { %14691 = vst [vmem:[#allocation38_spill] sm:$0xff] %v9269_v37 }
 0x131   : > { %v1333_v35 = vadd.f32 %v1269_v1, %v945_v27  ;;  %v1271_v27 = vmul.f32 %v8818_v58, %v9269_v37 }
 0x132   : > { %v9262_v14 = vpop.permute.xlu1 %1086 }
 0x133   : > { %14690 = vst [vmem:[#allocation37_spill] sm:$0xff] %v9262_v14  ;;  %v1270_v24 = vmul.f32 %v8818_v58, %v9262_v14  ;;  %7639 = vset.pattern.permute.xlu1 %v14676_v32  ;;  %v1397_v44 = vmul.f32 %v1333_v35, %v8847_v8 }
 0x134   : > { %766 = vperm.xlu1 %7639, %v510_v49  }
 0x135   : > { %v1334_v28 = vadd.f32 %v1270_v24, %v946_v10  ;;  %v1335_v24 = vadd.f32 %v1271_v27, %v947_v59  ;;  %v511_v10 = vld [vmem:[%s8688_s15 + $0x180] sm:$0xff]  ;;  %v882_v59 = vmul.f32 %v8804_v53, %v9253_v54 }
 0x137   : > { %v9272_v11 = vpop.permute.xlu1 %666  ;;  %v1398_v1 = vmul.f32 %v1334_v28, %v8850_v9 }
 0x138   : > { %14692 = vst [vmem:[#allocation39_spill] sm:$0xff] %v9272_v11  ;;  %7641 = vset.pattern.permute.xlu1 %v14671_v23  ;;  %v880_v38 = vmul.f32 %v8804_v53, %v9272_v11  ;;  %v1399_v11 = vmul.f32 %v1335_v24, %v8887_v30 }
 0x139   : > { %1174 = vperm.xlu1 %7641, %v510_v49   ;;  %v1449_v14 = vpack.c.bf16 %v1398_v1, %v1397_v44 }
 0x13a   : > { %v948_v35 = vadd.f32 %v8813_v56, %v880_v38 }
 0x13b   : > { %1730 = vmatmul.mubr.bf16.gmra.mxu0 %v1449_v14  ;;  %v9294_v14 = vpop.permute.xlu0 %1106 }
 0x13c   : > { %v9282_v46 = vpop.permute.xlu1 %1094  ;;  %1739 = vmatprep.mubr.bf16.mxu0 %v14676_v32  ;;  %14695 = vst [vmem:[#allocation42_spill] sm:$0xff] %v9294_v14 }
 0x13d   : > { %14693 = vst [vmem:[#allocation40_spill] sm:$0xff] %v9282_v46  ;;  %v1272_v28 = vmul.f32 %v8818_v58, %v9282_v46  ;;  %7642 = vset.pattern.permute.xlu1 %v14676_v32 }
 0x13e   : > { %771 = vperm.xlu1 %7642, %v511_v10  }
 0x13f   : > { %v1336_v37 = vadd.f32 %v1272_v28, %v948_v35  ;;  %v9306_v24 = vpop.permute.xlu0 %681  ;;  %v514_v35 = vld [vmem:[%s8688_s15 + $0x198] sm:$0xff] }
 0x140   : > { %14697 = vst [vmem:[#allocation44_spill] sm:$0xff] %v9306_v24 }
 0x141   : > { %v9290_v49 = vpop.permute.xlu1 %671  ;;  %v1400_v44 = vmul.f32 %v1336_v37, %v8890_v31 }
 0x142   : > { %14694 = vst [vmem:[#allocation41_spill] sm:$0xff] %v9290_v49  ;;  %7643 = vset.pattern.permute.xlu1 %v14671_v23  ;;  %v881_v1 = vmul.f32 %v8804_v53, %v9290_v49 }
 0x143   : > { %1178 = vperm.xlu1 %7643, %v511_v10   ;;  %v1450_v38 = vpack.c.bf16 %v1400_v44, %v1399_v11  ;;  %v950_v11 = vadd.f32 %v8813_v56, %v882_v59  ;;  %v1275_v59 = vmul.f32 %v8818_v58, %v9294_v14  ;;  %v9328_v54 = vpop.permute.xlu0 %696 }
 0x144   : > { %v949_v10 = vadd.f32 %v8813_v56, %v881_v1  ;;  %14700 = vst [vmem:[#allocation47_spill] sm:$0xff] %v9328_v54 }
 0x145   : > { %1740 = vmatmul.mubr.bf16.gmra.mxu0 %v1450_v38 }
 0x146   : > { %v9300_v27 = vpop.permute.xlu1 %1098  ;;  %1749 = vmatprep.mubr.bf16.mxu0 %v14676_v32 }
 0x147   : > { %14696 = vst [vmem:[#allocation43_spill] sm:$0xff] %v9300_v27  ;;  %v1273_v37 = vmul.f32 %v8818_v58, %v9300_v27  ;;  %1182 = vperm.xlu1 %7643, %v8949_v22   ;;  %v883_v27 = vmul.f32 %v8804_v53, %v9306_v24 }
 0x149   : > { %v1337_v44 = vadd.f32 %v1273_v37, %v949_v10  ;;  %v951_v1 = vadd.f32 %v8813_v56, %v883_v27 }
 0x14a   : > { %v9311_v28 = vpop.permute.xlu1 %1102 }
 0x14b   : > { %14698 = vst [vmem:[#allocation45_spill] sm:$0xff] %v9311_v28  ;;  %v1274_v38 = vmul.f32 %v8818_v58, %v9311_v28  ;;  %7644 = vset.pattern.permute.xlu1 %v14676_v32  ;;  %v1401_v37 = vmul.f32 %v1337_v44, %v8923_v60  ;;  %v9339_v44 = vpop.permute.xlu0 %701 }
 0x14c   : > { %786 = vperm.xlu1 %7644, %v514_v35   ;;  %14702 = vst [vmem:[#allocation49_spill] sm:$0xff] %v9339_v44 }
 0x14d   : > { %v1338_v22 = vadd.f32 %v1274_v38, %v950_v11  ;;  %v1339_v11 = vadd.f32 %v1275_v59, %v951_v1  ;;  %v515_v38 = vld [vmem:[%s8688_s15 + $0x1a0] sm:$0xff]  ;;  %v886_v1 = vmul.f32 %v8804_v53, %v9328_v54 }
 0x14e   : > { %v9566_v54 = vld [vmem:[%s8838_s29 + $0x20] sm:$0xff] }
 0x14f   : > { %v9320_v49 = vpop.permute.xlu1 %686  ;;  %v1402_v10 = vmul.f32 %v1338_v22, %v8926_v61 }
 0x150   : > { %14699 = vst [vmem:[#allocation46_spill] sm:$0xff] %v9320_v49  ;;  %7645 = vset.pattern.permute.xlu1 %v14671_v23  ;;  %v884_v28 = vmul.f32 %v8804_v53, %v9320_v49 }
 0x151   : > { %1190 = vperm.xlu1 %7645, %v514_v35   ;;  %v1451_v24 = vpack.c.bf16 %v1402_v10, %v1401_v37  ;;  %v1403_v35 = vmul.f32 %v1339_v11, %v8946_v21  ;;  %v9351_v21 = vpop.permute.xlu0 %716 }
 0x152   : > { %v952_v60 = vadd.f32 %v8813_v56, %v884_v28  ;;  %14705 = vst [vmem:[#allocation52_spill] sm:$0xff] %v9351_v21 }
 0x153   : > { %1750 = vmatmul.mubr.bf16.gmra.mxu0 %v1451_v24 }
 0x154   : > { %v9331_v14 = vpop.permute.xlu1 %1110  ;;  %1759 = vmatprep.mubr.bf16.mxu0 %v14676_v32 }
 0x155   : > { %14701 = vst [vmem:[#allocation48_spill] sm:$0xff] %v9331_v14  ;;  %v1276_v61 = vmul.f32 %v8818_v58, %v9331_v14  ;;  %7646 = vset.pattern.permute.xlu1 %v14676_v32 }
 0x156   : > { %791 = vperm.xlu1 %7646, %v515_v38  }
 0x157   : > { %v1340_v27 = vadd.f32 %v1276_v61, %v952_v60  ;;  %v518_v60 = vld [vmem:[%s8688_s15 + $0x1b8] sm:$0xff] }
 0x159   : > { %v9341_v22 = vpop.permute.xlu1 %691  ;;  %v1404_v24 = vmul.f32 %v1340_v27, %v8956_v26  ;;  %v7380_v26 = vld [vmem:[%s14436_s2 + $0x2] sm:$0x3] }
 0x15a   : > { %14703 = vst [vmem:[#allocation50_spill] sm:$0xff] %v9341_v22  ;;  %7648 = vset.pattern.permute.xlu1 %v14671_v23  ;;  %v885_v59 = vmul.f32 %v8804_v53, %v9341_v22  ;;  %v9364_v61 = vrot.slane %v7380_v26, %v8794_v50 }
 0x15b   : > { %1194 = vperm.xlu1 %7648, %v515_v38   ;;  %v1452_v28 = vpack.c.bf16 %v1404_v24, %v1403_v35  ;;  %v954_v38 = vadd.f32 %v8813_v56, %v886_v1  ;;  %v9376_v1 = vrot.slane %v7380_v26, %v8801_v52 }
 0x15c   : > { %v953_v11 = vadd.f32 %v8813_v56, %v885_v59  ;;  %14706 = vst [vmem:[#allocation53_spill] sm:$0xff] %v9364_v61 }
 0x15d   : > { %1760 = vmatmul.mubr.bf16.gmra.mxu0 %v1452_v28  ;;  %v887_v28 = vmul.f32 %v8804_v53, %v9339_v44  ;;  %14709 = vst [vmem:[#allocation56_spill] sm:$0xff] %v9376_v1 }
 0x15e   : > { %v9349_v37 = vpop.permute.xlu1 %1114  ;;  %1769 = vmatprep.mubr.bf16.mxu0 %v14676_v32 }
 0x15f   : > { %14704 = vst [vmem:[#allocation51_spill] sm:$0xff] %v9349_v37  ;;  %v1277_v10 = vmul.f32 %v8818_v58, %v9349_v37  ;;  %1198 = vperm.xlu1 %7648, %v8968_v42   ;;  %v9373_v42 = vpop.permute.xlu0 %1122  ;;  %v3703_v37 = vmul.f32 %v9364_v61, %v8815_v57 }
 0x160   : > { %14708 = vst [vmem:[#allocation55_spill] sm:$0xff] %v9373_v42  ;;  %v1279_v57 = vmul.f32 %v8818_v58, %v9373_v42  ;;  %v3708_v42 = vmul.f32 %v9364_v61, %v8865_v17 }
 0x161   : > { %v1341_v35 = vadd.f32 %v1277_v10, %v953_v11  ;;  %v3704_v10 = vmul.f32 %v9364_v61, %v8828_v63  ;;  %v9385_v11 = vld [vmem:[%s14437_s3 + $0x1] ss:$0 sm:$0xff]  ;;  %v3705_v63 = vmul.f32 %v9364_v61, %v8844_v7  ;;  %v3839_v7 = vmul.f32 %v9376_v1, %v8808_v55 }
 0x162   : > { %v9366_v27 = vpop.permute.xlu1 %1118  ;;  %v3841_v55 = vmul.f32 %v9376_v1, %v8876_v25 }
 0x163   : > { %14707 = vst [vmem:[#allocation54_spill] sm:$0xff] %v9366_v27  ;;  %v1278_v24 = vmul.f32 %v8818_v58, %v9366_v27  ;;  %7649 = vset.pattern.permute.xlu1 %v14676_v32  ;;  %v955_v27 = vadd.f32 %v8813_v56, %v887_v28 }
 0x164   : > { %806 = vperm.xlu1 %7649, %v518_v60  }
 0x165   : > { %v1342_v59 = vadd.f32 %v1278_v24, %v954_v38  ;;  %v1405_v38 = vmul.f32 %v1341_v35, %v8847_v8  ;;  %v1485_v24 = vld [vmem:[%s14439_s5] ss:$2 sm:$0x3]  ;;  %v3772_v35 = vadd.f32 %v9385_v11, %v3704_v10  ;;  %v1343_v14 = vadd.f32 %v1279_v57, %v955_v27 }
 0x166   : > { %v9411_v49 = vrot.slane %v1485_v24, %v8794_v50  ;;  %v3773_v10 = vadd.f32 %v9385_v11, %v3705_v63  ;;  %v3776_v63 = vadd.f32 %v9385_v11, %v3708_v42  ;;  %v3707_v42 = vmul.f32 %v9364_v61, %v8884_v29  ;;  %v522_v50 = vld [vmem:[%s8688_s15 + $0x1d8] sm:$0xff] }
 0x167   : > { %v9388_v22 = vpop.permute.xlu1 %706  ;;  %v1406_v26 = vmul.f32 %v1342_v59, %v8850_v9  ;;  %v3771_v9 = vadd.f32 %v9385_v11, %v3703_v37  ;;  %v3706_v59 = vmul.f32 %v9364_v61, %v8855_v12  ;;  %v3840_v37 = vmul.f32 %v9376_v1, %v8826_v62 }
 0x168   : > { %14710 = vst [vmem:[#allocation57_spill] sm:$0xff] %v9388_v22  ;;  %7651 = vset.pattern.permute.xlu1 %v14671_v23  ;;  %v888_v28 = vmul.f32 %v8804_v53, %v9388_v22  ;;  %v3842_v12 = vmul.f32 %v9376_v1, %v8868_v20  ;;  %v9429_v62 = vrot.slane %v1485_v24, %v8801_v52  ;;  %v7703_v24 = vld [vmem:[%s14438_s4 + $0xf0] ss:$8 sps:$4 sm:$0xff]  }
 0x169   : > { %1206 = vperm.xlu1 %7651, %v518_v60   ;;  %v1453_v8 = vpack.c.bf16 %v1406_v26, %v1405_v38  ;;  %v519_v60 = vld [vmem:[%s8688_s15 + $0x1c0] sm:$0xff]  ;;  %v3774_v26 = vadd.f32 %v9385_v11, %v3706_v59  ;;  %v9432_v57 = vadd.f32 %v3839_v7, %v3771_v9  ;;  %v9434_v25 = vadd.f32 %v3840_v37, %v3772_v35  ;;  %v7705_v59 = vld [vmem:[%s14438_s4 + $0xf4] ss:$8 sps:$4 sm:$0xff]  }
 0x16a   : > { %v956_v17 = vadd.f32 %v8813_v56, %v888_v28  ;;  %v1407_v28 = vmul.f32 %v1343_v14, %v8887_v30  ;;  %v9449_v35 = vadd.f32 %v3841_v55, %v3773_v10  ;;  %v3843_v7 = vmul.f32 %v9376_v1, %v8902_v39  ;;  %v9455_v30 = vpop.permute.xlu0 %1138  ;;  %4173 = vmatprep.subr.bf16.mxu0 %v7705_v59 }
 0x16b   : > { %1770 = vmatmul.mubr.bf16.gmra.mxu0 %v1453_v8  ;;  %14712 = vst [vmem:[#allocation59_spill] sm:$0xff] %v9432_v57  ;;  %14713 = vst [vmem:[#allocation60_spill] sm:$0xff] %v9434_v25  ;;  %v9447_v9 = vadd.f32 %v3842_v12, %v3774_v26  ;;  %v3709_v14 = vmul.f32 %v9364_v61, %v8908_v43  ;;  %v3844_v29 = vmul.f32 %v9376_v1, %v8915_v51 }
 0x16c   : > { %v9421_v38 = vpop.permute.xlu1 %1126  ;;  %1779 = vmatprep.mubr.bf16.mxu0 %v14676_v32  ;;  %14715 = vst [vmem:[#allocation62_spill] sm:$0xff] %v9449_v35  ;;  %14716 = vst [vmem:[#allocation63_spill] sm:$0xff] %v9455_v30  ;;  %v3710_v39 = vmul.f32 %v9364_v61, %v8930_v4  ;;  %v3712_v43 = vmul.f32 %v9364_v61, %v8939_v15  ;;  %4174 = vmatpush1.bf16.msra.mxu0 %v7703_v24  ;;  %v523_v35 = vld [vmem:[%s8688_s15 + $0x1e0] sm:$0xff] }
 0x16d   : > { %14711 = vst [vmem:[#allocation58_spill] sm:$0xff] %v9421_v38  ;;  %v1280_v27 = vmul.f32 %v8818_v58, %v9421_v38  ;;  %7652 = vset.pattern.permute.xlu1 %v14676_v32  ;;  %14714 = vst [vmem:[#allocation61_spill] sm:$0xff] %v9447_v9  ;;  %v3713_v4 = vmul.f32 %v9364_v61, %v8960_v34  ;;  %v890_v15 = vmul.f32 %v8804_v53, %v9351_v21 }
 0x16e   : > { %v1611_v20 = vpop.f32.mrf.mxu0  ;;  %811 = vperm.xlu1 %7652, %v519_v60  }
 0x16f   : > { %v1344_v8 = vadd.f32 %v1280_v27, %v956_v17  ;;  %v9438_v56 = vadd.f32 %v1611_v20, %v9411_v49 }
 0x170   : > { %v1613_v37 = vpop.f32.mrf.mxu0 }
 0x171   : > { %v1930_v17 = vmul.f32 %v9438_v56, %v9438_v56  ;;  %v9462_v12 = vadd.f32 %v1613_v37, %v9429_v62  ;;  %v9464_v10 = vpop.permute.xlu1 %711  ;;  %v1408_v55 = vmul.f32 %v1344_v8, %v8890_v31  ;;  %v3775_v8 = vadd.f32 %v9385_v11, %v3707_v42 }
 0x172   : > { %14717 = vst [vmem:[#allocation64_spill] sm:$0xff] %v9464_v10  ;;  %v1615_v27 = vpop.f32.mrf.mxu0  ;;  %7653 = vset.pattern.permute.xlu1 %v14671_v23  ;;  %v889_v24 = vmul.f32 %v8804_v53, %v9464_v10  ;;  %v9489_v37 = vmul.f32 %v9376_v1, %v8893_v33  ;;  %v9498_v42 = vadd.f32 %v3844_v29, %v3776_v63  ;;  %v9506_v33 = vpop.permute.xlu0 %721  ;;  %v9521_v29 = vld [vmem:[%s14437_s3] ss:$0 sm:$0xff] }
 0x173   : > { %v2058_v26 = vmul.f32 %v1930_v17, %v9438_v56  ;;  %v1931_v20 = vmul.f32 %v9462_v12, %v9462_v12  ;;  %v9478_v31 = vadd.f32 %v1615_v27, %v9411_v49  ;;  %1210 = vperm.xlu1 %7653, %v519_v60   ;;  %v1454_v51 = vpack.c.bf16 %v1408_v55, %v1407_v28 }
 0x174   : > { %v1617_v59 = vpop.f32.mrf.mxu0  ;;  %v9496_v34 = vadd.f32 %v3843_v7, %v3775_v8  ;;  %14719 = vst [vmem:[#allocation66_spill] sm:$0xff] %v9498_v42  ;;  %v9501_v55 = vadd.f32 %v9385_v11, %v3709_v14  ;;  %14721 = vst [vmem:[#allocation68_spill] sm:$0xff] %v9506_v33  ;;  %v3781_v14 = vadd.f32 %v9385_v11, %v3713_v4 }
 0x175   : > { %v2186_v17 = vmul.f32 0.044715, %v2058_v26  ;;  %v1932_v60 = vmul.f32 %v9478_v31, %v9478_v31  ;;  %v9494_v28 = vadd.f32 %v1617_v59, %v9429_v62  ;;  %1780 = vmatmul.mubr.bf16.gmra.mxu0 %v1454_v51  ;;  %v2059_v27 = vmul.f32 %v1931_v20, %v9462_v12 }
 0x176   : > { %14718 = vst [vmem:[#allocation65_spill] sm:$0xff] %v9496_v34  ;;  %v9504_v52 = vpop.permute.xlu1 %1130  ;;  %1789 = vmatprep.mubr.bf16.mxu0 %v14676_v32  ;;  %v3778_v26 = vadd.f32 %v9385_v11, %v3710_v39  ;;  %v9511_v51 = vadd.f32 %v9385_v11, %v3712_v43  ;;  %v958_v20 = vadd.f32 %v9521_v29, %v890_v15 }
 0x177   : > { %14720 = vst [vmem:[#allocation67_spill] sm:$0xff] %v9504_v52  ;;  %v2060_v63 = vmul.f32 %v1932_v60, %v9478_v31  ;;  %v1933_v7 = vmul.f32 %v9494_v28, %v9494_v28  ;;  %1214 = vperm.xlu1 %7653, %v9081_v45   ;;  %v957_v39 = vadd.f32 %v9521_v29, %v889_v24  ;;  %v2187_v38 = vmul.f32 0.044715, %v2059_v27 }
 0x178   : > { %v1281_v43 = vmul.f32 %v8818_v58, %v9504_v52  ;;  %v2314_v59 = vadd.f32 %v2186_v17, %v9438_v56  ;;  %v891_v4 = vmul.f32 %v8804_v53, %v9506_v33  ;;  %v3846_v10 = vmul.f32 %v9376_v1, %v8942_v19 }
 0x179   : > { %v1621_v8 = vpop.f32.mrf.mxu0  ;;  %v2188_v60 = vmul.f32 0.044715, %v2060_v63  ;;  %v2061_v45 = vmul.f32 %v1933_v7, %v9494_v28  ;;  %v3711_v17 = vmul.f32 %v9364_v61, %v8963_v36  ;;  %v3716_v63 = vmul.f32 %v9364_v61, %v8976_v48 }
 0x17a   : > { %v1345_v15 = vadd.f32 %v1281_v43, %v957_v39  ;;  %v9535_v24 = vadd.f32 %v1621_v8, %v9411_v49  ;;  %v9537_v22 = vpop.permute.xlu1 %1134  ;;  %v3849_v19 = vmul.f32 %v9376_v1, %v8993_v40  ;;  %v1283_v48 = vmul.f32 %v8818_v58, %v9455_v30  ;;  %v9554_v43 = vpop.permute.xlu0 %736 }
 0x17b   : > { %14722 = vst [vmem:[#allocation69_spill] sm:$0xff] %v9537_v22  ;;  %v1623_v52 = vpop.f32.mrf.mxu0  ;;  %v2189_v7 = vmul.f32 0.044715, %v2061_v45  ;;  %v1282_v33 = vmul.f32 %v8818_v58, %v9537_v22  ;;  %7654 = vset.pattern.permute.xlu1 %v14676_v32  ;;  %v2316_v27 = vadd.f32 %v2188_v60, %v9478_v31  ;;  %14723 = vst [vmem:[#allocation70_spill] sm:$0xff] %v9554_v43  ;;  %v2442_v8 = vmul.f32 0.7978846, %v2314_v59 }
 0x17c   : > { %v9550_v39 = vadd.f32 %v1623_v52, %v9429_v62  ;;  %826 = vperm.xlu1 %7654, %v522_v50   ;;  %v959_v40 = vadd.f32 %v9521_v29, %v891_v4  ;;  %v2315_v60 = vadd.f32 %v2187_v38, %v9462_v12  ;;  %v1934_v52 = vmul.f32 %v9535_v24, %v9535_v24  ;;  %v9577_v38 = vld [vmem:[%s8838_s29 + $0x28] sm:$0xff] }
 0x17d   : > { %v1625_v36 = vpop.f32.mrf.mxu0  ;;  %v1346_v45 = vadd.f32 %v1282_v33, %v958_v20  ;;  %v1409_v30 = vmul.f32 %v9566_v54, %v1345_v15  ;;  %v9581_v46 = vadd.f32 %v3846_v10, %v3778_v26  ;;  %v9584_v6 = vadd.f32 %v9385_v11, %v3716_v63 }
 0x17e   : > { %v9557_v22 = vadd.f32 %v1625_v36, %v9411_v49  ;;  %v1935_v21 = vmul.f32 %v9550_v39, %v9550_v39  ;;  %v2317_v36 = vadd.f32 %v2189_v7, %v9494_v28  ;;  %v2444_v15 = vmul.f32 0.7978846, %v2316_v27  ;;  %v9596_v27 = vpop.permute.xlu0 %741 }
 0x17f   : > { %v1627_v44 = vpop.f32.mrf.mxu0  ;;  %v9574_v59 = vpop.permute.xlu1 %726  ;;  %v1410_v4 = vmul.f32 %v9577_v38, %v1346_v45  ;;  %14725 = vst [vmem:[#allocation72_spill] sm:$0xff] %v9581_v46  ;;  %14726 = vst [vmem:[#allocation73_spill] sm:$0xff] %v9584_v6  ;;  %v9593_v26 = vadd.f32 %v3849_v19, %v3781_v14  ;;  %v2062_v63 = vmul.f32 %v1934_v52, %v9535_v24  ;;  %7743 = vtanh.f32 %v2442_v8 }
 0x180   : > { %v1936_v33 = vmul.f32 %v9557_v22, %v9557_v22  ;;  %v9572_v20 = vadd.f32 %v1627_v44, %v9429_v62  ;;  %14724 = vst [vmem:[#allocation71_spill] sm:$0xff] %v9574_v59  ;;  %v2063_v42 = vmul.f32 %v1935_v21, %v9550_v39  ;;  %7656 = vset.pattern.permute.xlu1 %v14671_v23  ;;  %14728 = vst [vmem:[#allocation75_spill] sm:$0xff] %v9596_v27 }
 0x181   : > { %v3779_v44 = vadd.f32 %v9385_v11, %v3711_v17  ;;  %v892_v45 = vmul.f32 %v8804_v53, %v9574_v59  ;;  %1222 = vperm.xlu1 %7656, %v522_v50   ;;  %v1455_v10 = vpack.c.bf16 %v1410_v4, %v1409_v30  ;;  %14727 = vst [vmem:[#allocation74_spill] sm:$0xff] %v9593_v26  ;;  %v2443_v21 = vmul.f32 0.7978846, %v2315_v60  ;;  %v9623_v4 = vld [vmem:[%s8838_s29 + $0x30] sm:$0xff] }
 0x182   : > { %v1937_v34 = vmul.f32 %v9572_v20, %v9572_v20  ;;  %v1347_v7 = vadd.f32 %v1283_v48, %v959_v40  ;;  %v2064_v46 = vmul.f32 %v1936_v33, %v9557_v22  ;;  %v2445_v25 = vmul.f32 0.7978846, %v2317_v36 }
 0x183   : > { %v1631_v9 = vpop.f32.mrf.mxu0  ;;  %1790 = vmatmul.mubr.bf16.gmra.mxu0 %v1455_v10  ;;  %v9603_v50 = vmul.f32 %v9376_v1, %v9030_v13  ;;  %7745 = vtanh.f32 %v2444_v15  ;;  %v2191_v30 = vmul.f32 0.044715, %v2063_v42  ;;  %v960_v8 = vadd.f32 %v9521_v29, %v892_v45 }
 0x184   : > { %v2065_v17 = vmul.f32 %v1937_v34, %v9572_v20  ;;  %v9606_v14 = vadd.f32 %v1631_v9, %v9411_v49  ;;  %v9608_v19 = vpop.permute.xlu1 %1142  ;;  %1799 = vmatprep.mubr.bf16.mxu0 %v14676_v32  ;;  %v3847_v34 = vmul.f32 %v9376_v1, %v8974_v47  ;;  %v2190_v40 = vmul.f32 0.044715, %v2062_v63 }
 0x185   : > { %14729 = vst [vmem:[#allocation76_spill] sm:$0xff] %v9603_v50  ;;  %14730 = vst [vmem:[#allocation77_spill] sm:$0xff] %v9608_v19  ;;  %v1284_v13 = vmul.f32 %v8818_v58, %v9608_v19  ;;  %7657 = vset.pattern.permute.xlu1 %v14676_v32  ;;  %v1633_v42 = vpop.f32.mrf.mxu0  ;;  %7747 = vtanh.f32 %v2443_v21  ;;  %v2192_v47 = vmul.f32 0.044715, %v2064_v46  ;;  %v1411_v36 = vmul.f32 %v9623_v4, %v1347_v7  ;;  %v9634_v21 = vpop.permute.xlu0 %756  ;;  %v9641_v7 = vld [vmem:[%s8838_s29 + $0x38] sm:$0xff] }
 0x186   : > { %v2193_v48 = vmul.f32 0.044715, %v2065_v17  ;;  %v1938_v9 = vmul.f32 %v9606_v14, %v9606_v14  ;;  %v9620_v60 = vadd.f32 %v1633_v42, %v9429_v62  ;;  %831 = vperm.xlu1 %7657, %v523_v35   ;;  %7749 = vtanh.f32 %v2445_v25  ;;  %14731 = vst [vmem:[#allocation78_spill] sm:$0xff] %v9634_v21  ;;  %14733 = vst [vmem:[#allocation80_spill] sm:$0xff] %v9641_v7 }
 0x187   : > { %v1348_v52 = vadd.f32 %v1284_v13, %v960_v8  ;;  %v1635_v33 = vpop.f32.mrf.mxu0  ;;  %v3848_v15 = vmul.f32 %v9376_v1, %v8986_v3  ;;  %v3717_v45 = vmul.f32 %v9364_v61, %v9051_v41  ;;  %v2319_v10 = vadd.f32 %v2191_v30, %v9550_v39 }
 0x188   : > { %v9632_v63 = vadd.f32 %v1635_v33, %v9411_v49  ;;  %v2321_v46 = vadd.f32 %v2193_v48, %v9572_v20  ;;  %v2066_v17 = vmul.f32 %v1938_v9, %v9606_v14  ;;  %v9646_v41 = vadd.f32 %v9489_v37, %v9501_v55 }
 0x189   : > { %v9638_v8 = vpop.permute.xlu1 %731  ;;  %v1637_v25 = vpop.f32.mrf.mxu0  ;;  %v1412_v3 = vmul.f32 %v9641_v7, %v1348_v52  ;;  %v9648_v30 = vadd.f32 %v3847_v34, %v3779_v44  ;;  %v3714_v13 = vmul.f32 %v9364_v61, %v8997_v16  ;;  %v2318_v48 = vadd.f32 %v2190_v40, %v9535_v24 }
 0x18a   : > { %14732 = vst [vmem:[#allocation79_spill] sm:$0xff] %v9638_v8  ;;  %14734 = vst [vmem:[#allocation81_spill] sm:$0xff] %v9646_v41  ;;  %v1939_v42 = vmul.f32 %v9620_v60, %v9620_v60  ;;  %7659 = vset.pattern.permute.xlu1 %v14671_v23  ;;  %v2320_v9 = vadd.f32 %v2192_v47, %v9557_v22  ;;  %v1940_v52 = vmul.f32 %v9632_v63, %v9632_v63 }
 0x18b   : > { %14735 = vst [vmem:[#allocation82_spill] sm:$0xff] %v9648_v30  ;;  %v9660_v37 = vadd.f32 %v1637_v25, %v9429_v62  ;;  %1226 = vperm.xlu1 %7659, %v523_v35   ;;  %v1456_v55 = vpack.c.bf16 %v1412_v3, %v1411_v36  ;;  %v9663_v44 = vadd.f32 %v3848_v15, %v9511_v51  ;;  %v2447_v34 = vmul.f32 0.7978846, %v2319_v10 }
 0x18c   : > { %v9666_v16 = vadd.f32 %v9385_v11, %v3717_v45  ;;  %v894_v40 = vmul.f32 %v8804_v53, %v9554_v43  ;;  %v2449_v33 = vmul.f32 0.7978846, %v2321_v46  ;;  %v2194_v47 = vmul.f32 0.044715, %v2066_v17 }
 0x18d   : > { %14736 = vst [vmem:[#allocation83_spill] sm:$0xff] %v9663_v44  ;;  %v1941_v19 = vmul.f32 %v9660_v37, %v9660_v37  ;;  %v1641_v59 = vpop.f32.mrf.mxu0  ;;  %1800 = vmatmul.mubr.bf16.gmra.mxu0 %v1456_v55  ;;  %v895_v35 = vmul.f32 %v8804_v53, %v9596_v27  ;;  %v9675_v51 = vadd.f32 %v9385_v11, %v3714_v13  ;;  %v2446_v15 = vmul.f32 0.7978846, %v2318_v48  ;;  %v9694_v13 = vpop.permute.xlu0 %1154  ;;  %v526_v27 = vld [vmem:[%s8688_s15 + $0x1f8] sm:$0xff]  ;;  %s7339_s15 = sshll.u32 %s423_s18, 9 }
 0x18e   : > { %14737 = vst [vmem:[#allocation84_spill] sm:$0xff] %v9666_v16  ;;  %v9679_v36 = vmul.f32 %v9364_v61, %v9085_v5  ;;  %v2067_v45 = vmul.f32 %v1939_v42, %v9620_v60  ;;  %v9682_v10 = vpop.permute.xlu1 %1146  ;;  %1809 = vmatprep.mubr.bf16.mxu0 %v14676_v32  ;;  %v9687_v46 = vmul.f32 %v9364_v61, %v9105_v2  ;;  %v2448_v17 = vmul.f32 0.7978846, %v2320_v9  ;;  %v7744_v48 = vpop.eup %7743  ;;  %v14740_v42 = vld [vmem:[#allocation13_spill] sm:$0xff]  ;;  %s13995_s24 = scalar_lea.vmem [#allocation2], %s7339_s15 }
 0x18f   : > { %14738 = vst [vmem:[#allocation85_spill] sm:$0xff] %v9682_v10  ;;  %v2068_v25 = vmul.f32 %v1940_v52, %v9632_v63  ;;  %v9691_v3 = vadd.f32 %v1641_v59, %v9411_v49  ;;  %1230 = vperm.xlu1 %7659, %v9163_v18   ;;  %v1643_v5 = vpop.f32.mrf.mxu0  ;;  %14739 = vst [vmem:[#allocation86_spill] sm:$0xff] %v9694_v13  ;;  %v9698_v55 = vmul.f32 %v9376_v1, %v14740_v42  ;;  %s7223_s11 = sshll.u32 %s13995_s24, 4  ;;  %s14372_s11 = int_to_ptr.vmem [resolvable:$true] %s7223_s11 }
 0x190   : > { %7751 = vtanh.f32 %v2447_v34  ;;  %v2069_v2 = vmul.f32 %v1941_v19, %v9660_v37  ;;  %v962_v9 = vadd.f32 %v9521_v29, %v894_v40  ;;  %v7746_v43 = vpop.eup %7745  ;;  %v2322_v59 = vadd.f32 %v2194_v47, %v9606_v14  ;;  %s8435_s30 = scalar_lea.vmem %s14372_s11, 8192 }
 0x191   : > { %7753 = vtanh.f32 %v2449_v33  ;;  %v1645_v52 = vpop.f32.mrf.mxu0  ;;  %v9705_v18 = vadd.f32 %v9521_v29, %v895_v35  ;;  %v9709_v26 = vmul.f32 %v8804_v53, %v9634_v21  ;;  %v2195_v42 = vmul.f32 0.044715, %v2067_v45  ;;  %v7706_v45 = vld [vmem:[%s14438_s4 + $0xe0] ss:$8 sps:$4 sm:$0xff]   ;;  %p8436_p0 = scmp.ne.s32.totalorder %s14372_s11, %s8435_s30 }
 0x192   : > { %7755 = vtanh.f32 %v2446_v15  ;;  %v9712_v34 = vadd.f32 %v1643_v5, %v9429_v62  ;;  %v9714_v19 = vpop.permute.xlu1 %1150  ;;  %v9718_v40 = vmul.f32 %v8818_v58, %v9694_v13  ;;  %v7748_v33 = vpop.eup %7747  ;;  %v2196_v47 = vmul.f32 0.044715, %v2068_v25  ;;  %v7708_v5 = vld [vmem:[%s14438_s4 + $0xe4] ss:$8 sps:$4 sm:$0xff]  }
 0x193   : > { %14741 = vst [vmem:[#allocation13_spill] sm:$0xff] %v9714_v19  ;;  %7757 = vtanh.f32 %v2448_v17  ;;  %v893_v35 = vmul.f32 %v8804_v53, %v9638_v8  ;;  %v1942_v21 = vmul.f32 %v9691_v3, %v9691_v3  ;;  %7660 = vset.pattern.permute.xlu1 %v14676_v32  ;;  %v1647_v15 = vpop.f32.mrf.mxu0  ;;  %v7750_v13 = vpop.eup %7749  ;;  %v2197_v17 = vmul.f32 0.044715, %v2069_v2  ;;  %4175 = vmatprep.subr.bf16.mxu0 %v7708_v5  ;;  %p8437_p1 = pnand %p8436_p0, %p8640_p3 }
 0x194   : > { %v9732_v25 = vadd.f32 %v1647_v15, %v9429_v62  ;;  %846 = vperm.xlu1 %7660, %v526_v27   ;;  %v2698_v8 = vadd.f32 1.0, %v7744_v48  ;;  %v2700_v44 = vadd.f32 1.0, %v7746_v43  ;;  %v2450_v30 = vmul.f32 0.7978846, %v2322_v59  ;;  %4176 = vmatpush1.bf16.msra.mxu0 %v7706_v45 }
 0x195   : > { %v1285_v41 = vmul.f32 %v8818_v58, %v9682_v10  ;;  %v9737_v57 = vadd.f32 %v1645_v52, %v9411_v49  ;;  %v1286_v50 = vmul.f32 %v8818_v58, %v9714_v19  ;;  %v2323_v16 = vadd.f32 %v2195_v42, %v9620_v60  ;;  %p8438_p2 = pneg %p8437_p1 }
 0x196   : > { %v1943_v2 = vmul.f32 %v9712_v34, %v9712_v34  ;;  %v1945_v48 = vmul.f32 %v9732_v25, %v9732_v25  ;;  %v2699_v43 = vadd.f32 1.0, %v7748_v33  ;;  %v2324_v59 = vadd.f32 %v2196_v47, %v9632_v63 }
 0x197   : > { %v961_v15 = vadd.f32 %v9521_v29, %v893_v35  ;;  %v2070_v52 = vmul.f32 %v1942_v21, %v9691_v3  ;;  %v2701_v10 = vadd.f32 1.0, %v7750_v13  ;;  %v9749_v6 = vpop.permute.xlu1 %746  ;;  %v2325_v5 = vadd.f32 %v2197_v17, %v9660_v37 }
 0x198   : > { %14742 = vst [vmem:[#allocation87_spill] sm:$0xff] %v9749_v6  ;;  %v2827_v42 = vmul.f32 0.5, %v2699_v43  ;;  %v2826_v19 = vmul.f32 0.5, %v2698_v8  ;;  %v2828_v1 = vmul.f32 0.5, %v2700_v44  ;;  %7662 = vset.pattern.permute.xlu1 %v14671_v23  ;;  %v1944_v33 = vmul.f32 %v9737_v57, %v9737_v57 }
 0x199   : > { %v1349_v7 = vadd.f32 %v1285_v41, %v961_v15  ;;  %v1350_v45 = vadd.f32 %v1286_v50, %v962_v9  ;;  %v2829_v47 = vmul.f32 0.5, %v2701_v10  ;;  %1238 = vperm.xlu1 %7662, %v526_v27   ;;  %7759 = vtanh.f32 %v2450_v30 }
 0x19a   : > { %v2451_v35 = vmul.f32 0.7978846, %v2323_v16  ;;  %v2071_v21 = vmul.f32 %v1943_v2, %v9712_v34  ;;  %v2073_v13 = vmul.f32 %v1945_v48, %v9732_v25  ;;  %v2452_v17 = vmul.f32 0.7978846, %v2324_v59  ;;  %v9768_v48 = vld [vmem:[%s8838_s29] sm:$0xff] }
 0x19b   : > { %v2198_v8 = vmul.f32 0.044715, %v2070_v52  ;;  %v2955_v44 = vmul.f32 %v2827_v42, %v9462_v12  ;;  %v2957_v23 = vmul.f32 %v2829_v47, %v9494_v28  ;;  %v1651_v41 = vpop.f32.mrf.mxu0  ;;  %v2453_v43 = vmul.f32 0.7978846, %v2325_v5  ;;  %14744 = vst [vmem:[#allocation89_spill] sm:$0xff] %v9768_v48  ;;  %v9772_v28 = vld [vmem:[%s8838_s29 + $0x8] sm:$0xff] }
 0x19c   : > { %v2954_v50 = vmul.f32 %v2826_v19, %v9438_v56  ;;  %v2956_v27 = vmul.f32 %v2828_v1, %v9478_v31  ;;  %v9762_v30 = vadd.f32 %v1651_v41, %v9411_v49  ;;  %v9764_v16 = vpop.permute.xlu1 %1158  ;;  %v2072_v9 = vmul.f32 %v1944_v33, %v9737_v57  ;;  %14745 = vst [vmem:[#allocation90_spill] sm:$0xff] %v9772_v28  ;;  %v9775_v19 = vpop.permute.xlu0 %1170 }
 0x19d   : > { %14743 = vst [vmem:[#allocation88_spill] sm:$0xff] %v9764_v16  ;;  %v7752_v10 = vpop.eup %7751  ;;  %v3083_v2 = vpack.c.bf16 %v2957_v23, %v2955_v44  ;;  %v1413_v12 = vmul.f32 %v9768_v48, %v1349_v7  ;;  %v1414_v59 = vmul.f32 %v9772_v28, %v1350_v45  ;;  %v1653_v56 = vpop.f32.mrf.mxu0  ;;  %14746 = vst [vmem:[#allocation91_spill] sm:$0xff] %v9775_v19  ;;  %v2199_v31 = vmul.f32 0.044715, %v2071_v21 }
 0x19e   : > { %v7754_v1 = vpop.eup %7753  ;;  %v2201_v15 = vmul.f32 0.044715, %v2073_v13  ;;  %v896_v52 = vmul.f32 %v8804_v53, %v9749_v6  ;;  %v3082_v5 = vpack.c.bf16 %v2956_v27, %v2954_v50  ;;  %7761 = vtanh.f32 %v2451_v35 }
 0x19f   : > { %v7756_v42 = vpop.eup %7755  ;;  %3306 = vmatprep.mubr.bf16.mxu1 %v3083_v2  ;;  %v1457_v33 = vpack.c.bf16 %v1414_v59, %v1413_v12  ;;  %v1351_v7 = vadd.f32 %v9718_v40, %v9705_v18  ;;  %v9782_v47 = vadd.f32 %v1653_v56, %v9429_v62  ;;  %v1655_v45 = vpop.f32.mrf.mxu0  ;;  %v2326_v23 = vadd.f32 %v2198_v8, %v9691_v3 }
 0x1a0   : > { %v7758_v44 = vpop.eup %7757  ;;  %3307 = vmatmul.mubr.bf16.vlgmr.msra.gmra.mxu1 %v3082_v5  ;;  %v1946_v21 = vmul.f32 %v9762_v30, %v9762_v30  ;;  %v9788_v13 = vadd.f32 %v1655_v45, %v9411_v49  ;;  %v2703_v35 = vadd.f32 1.0, %v7752_v10  ;;  %7763 = vtanh.f32 %v2453_v43  ;;  %v9803_v56 = vpop.permute.xlu0 %761 }
 0x1a1   : > { %v2200_v41 = vmul.f32 0.044715, %v2072_v9  ;;  %1810 = vmatmul.mubr.bf16.gmra.mxu0 %v1457_v33  ;;  %v1288_v18 = vmul.f32 %v8818_v58, %v9764_v16  ;;  %v9792_v40 = vpop.permute.xlu1 %751  ;;  %v1657_v50 = vpop.f32.mrf.mxu0  ;;  %v2705_v27 = vadd.f32 1.0, %v7754_v1  ;;  %7765 = vtanh.f32 %v2452_v17  ;;  %14748 = vst [vmem:[#allocation93_spill] sm:$0xff] %v9803_v56 }
 0x1a2   : > { %14747 = vst [vmem:[#allocation92_spill] sm:$0xff] %v9792_v40  ;;  %v2327_v8 = vadd.f32 %v2199_v31, %v9712_v34  ;;  %v2329_v2 = vadd.f32 %v2201_v15, %v9732_v25  ;;  %v964_v12 = vadd.f32 %v9521_v29, %v896_v52  ;;  %1819 = vmatprep.mubr.bf16.mxu0 %v14676_v32  ;;  %v2831_v9 = vmul.f32 0.5, %v2703_v35  ;;  %v9809_v15 = vld [vmem:[%s8838_s29 + $0x10] sm:$0xff] }
 0x1a3   : > { %v1947_v43 = vmul.f32 %v9782_v47, %v9782_v47  ;;  %v9801_v10 = vadd.f32 %v1657_v50, %v9429_v62  ;;  %v2833_v59 = vmul.f32 0.5, %v2705_v27  ;;  %v2454_v1 = vmul.f32 0.7978846, %v2326_v23 }
 0x1a4   : > { %v2074_v17 = vmul.f32 %v1946_v21, %v9762_v30  ;;  %v1948_v31 = vmul.f32 %v9788_v13, %v9788_v13  ;;  %v1415_v52 = vmul.f32 %v9809_v15, %v1351_v7  ;;  %v2328_v5 = vadd.f32 %v2200_v41, %v9737_v57 }
 0x1a5   : > { %v1352_v33 = vadd.f32 %v1288_v18, %v964_v12  ;;  %v2959_v45 = vmul.f32 %v2831_v9, %v9550_v39  ;;  %v2961_v35 = vmul.f32 %v2833_v59, %v9572_v20  ;;  %v1661_v50 = vpop.f32.mrf.mxu0  ;;  %v2455_v27 = vmul.f32 0.7978846, %v2327_v8  ;;  %v9824_v9 = vld [vmem:[%s8838_s29 + $0x18] sm:$0xff] }
 0x1a6   : > { %v2702_v16 = vadd.f32 1.0, %v7756_v42  ;;  %v2704_v23 = vadd.f32 1.0, %v7758_v44  ;;  %v9815_v21 = vpop.permute.xlu1 %1162  ;;  %v899_v6 = vmul.f32 %v8804_v53, %v9803_v56  ;;  %v7760_v28 = vpop.eup %7759  ;;  %v2457_v48 = vmul.f32 0.7978846, %v2329_v2 }
 0x1a7   : > { %14749 = vst [vmem:[#allocation94_spill] sm:$0xff] %v9815_v21  ;;  %v2075_v7 = vmul.f32 %v1947_v43, %v9782_v47  ;;  %v1949_v41 = vmul.f32 %v9801_v10, %v9801_v10  ;;  %v3085_v39 = vpack.c.bf16 %v2961_v35, %v2959_v45  ;;  %v1663_v18 = vpop.f32.mrf.mxu0  ;;  %v2202_v20 = vmul.f32 0.044715, %v2074_v17 }
 0x1a8   : > { %v2076_v8 = vmul.f32 %v1948_v31, %v9788_v13  ;;  %v2830_v42 = vmul.f32 0.5, %v2702_v16  ;;  %v2832_v44 = vmul.f32 0.5, %v2704_v23  ;;  %7767 = vtanh.f32 %v2454_v1 }
 0x1a9   : > { %v2456_v12 = vmul.f32 0.7978846, %v2328_v5  ;;  %3314 = vmatprep.mubr.bf16.mxu1 %v3085_v39  ;;  %v1416_v59 = vmul.f32 %v9824_v9, %v1352_v33  ;;  %v1665_v2 = vpop.f32.mrf.mxu0  ;;  %v1291_v43 = vmul.f32 %v8818_v58, %v9775_v19  ;;  %7769 = vtanh.f32 %v2455_v27 }
 0x1aa   : > { %v2958_v45 = vmul.f32 %v2830_v42, %v9535_v24  ;;  %v2960_v17 = vmul.f32 %v2832_v44, %v9557_v22  ;;  %v9831_v35 = vpop.permute.xlu1 %1166  ;;  %v967_v16 = vadd.f32 %v9521_v29, %v899_v6  ;;  %v2203_v1 = vmul.f32 0.044715, %v2075_v7 }
 0x1ab   : > { %14750 = vst [vmem:[#allocation95_spill] sm:$0xff] %v9831_v35  ;;  %v897_v31 = vmul.f32 %v8804_v53, %v9792_v40  ;;  %v2077_v5 = vmul.f32 %v1949_v41, %v9801_v10  ;;  %v1458_v33 = vpack.c.bf16 %v1416_v59, %v1415_v52  ;;  %v7762_v23 = vpop.eup %7761  ;;  %7771 = vtanh.f32 %v2457_v48  ;;  %v1667_v24 = vpop.f32.mrf.mxu0 }
 0x1ac   : > { %v2330_v39 = vadd.f32 %v2202_v20, %v9762_v30  ;;  %v2204_v27 = vmul.f32 0.044715, %v2076_v8  ;;  %v3084_v19 = vpack.c.bf16 %v2960_v17, %v2958_v45  ;;  %v9840_v22 = vadd.f32 %v9385_v11, %v9679_v36 }
 0x1ad   : > { %v9844_v6 = vadd.f32 %v9385_v11, %v9687_v46  ;;  %7773 = vtanh.f32 %v2456_v12  ;;  %v9847_v7 = vadd.f32 %v1661_v50, %v9411_v49  ;;  %1820 = vmatmul.mubr.bf16.gmra.mxu0 %v1458_v33  ;;  %v7764_v52 = vpop.eup %7763  ;;  %v9851_v48 = vadd.f32 %v9698_v55, %v9675_v51 }
 0x1ae   : > { %14751 = vst [vmem:[#allocation96_spill] sm:$0xff] %v9840_v22  ;;  %v966_v41 = vadd.f32 %v9521_v29, %v9709_v26  ;;  %3315 = vmatmul.mubr.bf16.gmra.mxu1 %v3084_v19  ;;  %v9856_v36 = vadd.f32 %v1663_v18, %v9429_v62  ;;  %v1355_v20 = vadd.f32 %v1291_v43, %v967_v16  ;;  %v7766_v11 = vpop.eup %7765  ;;  %v2205_v8 = vmul.f32 0.044715, %v2077_v5 }
 0x1af   : > { %14752 = vst [vmem:[#allocation97_spill] sm:$0xff] %v9851_v48  ;;  %v2331_v46 = vadd.f32 %v2203_v1, %v9782_v47  ;;  %v965_v50 = vadd.f32 %v9521_v29, %v897_v31  ;;  %v9861_v42 = vadd.f32 %v1667_v24, %v9429_v62  ;;  %v9863_v44 = vpop.permute.xlu1 %766  ;;  %1829 = vmatprep.mubr.bf16.mxu0 %v14676_v32  ;;  %v2458_v51 = vmul.f32 0.7978846, %v2330_v39 }
 0x1b0   : > { %14753 = vst [vmem:[#allocation98_spill] sm:$0xff] %v9863_v44  ;;  %v2332_v26 = vadd.f32 %v2204_v27, %v9788_v13  ;;  %v9868_v55 = vadd.f32 %v1665_v2, %v9411_v49  ;;  %v2707_v19 = vadd.f32 1.0, %v7762_v23  ;;  %v1950_v18 = vmul.f32 %v9847_v7, %v9847_v7 }
 0x1b1   : > { %v1289_v12 = vmul.f32 %v8818_v58, %v9815_v21  ;;  %v1290_v59 = vmul.f32 %v8818_v58, %v9831_v35  ;;  %v2709_v43 = vadd.f32 1.0, %v7764_v52  ;;  %v1951_v45 = vmul.f32 %v9856_v36, %v9856_v36 }
 0x1b2   : > { %v2835_v17 = vmul.f32 0.5, %v2707_v19  ;;  %v2706_v16 = vadd.f32 1.0, %v7760_v28  ;;  %v2708_v1 = vadd.f32 1.0, %v7766_v11  ;;  %v2459_v31 = vmul.f32 0.7978846, %v2331_v46 }
 0x1b3   : > { %v2333_v2 = vadd.f32 %v2205_v8, %v9801_v10  ;;  %v1953_v5 = vmul.f32 %v9861_v42, %v9861_v42  ;;  %v2837_v33 = vmul.f32 0.5, %v2709_v43  ;;  %v1671_v23 = vpop.f32.mrf.mxu0  ;;  %v2460_v39 = vmul.f32 0.7978846, %v2332_v26  ;;  %v9887_v8 = vpop.permute.xlu0 %776 }
 0x1b4   : > { %v1952_v27 = vmul.f32 %v9868_v55, %v9868_v55  ;;  %v2834_v24 = vmul.f32 0.5, %v2706_v16  ;;  %v2836_v52 = vmul.f32 0.5, %v2708_v1  ;;  %v9883_v35 = vpop.permute.xlu1 %1174  ;;  %v1353_v21 = vadd.f32 %v1289_v12, %v965_v50  ;;  %14755 = vst [vmem:[#allocation100_spill] sm:$0xff] %v9887_v8 }
 0x1b5   : > { %14754 = vst [vmem:[#allocation99_spill] sm:$0xff] %v9883_v35  ;;  %v1354_v19 = vadd.f32 %v1290_v59, %v966_v41  ;;  %v2963_v28 = vmul.f32 %v2835_v17, %v9620_v60  ;;  %v2965_v11 = vmul.f32 %v2837_v33, %v9660_v37  ;;  %v1673_v46 = vpop.f32.mrf.mxu0  ;;  %v7768_v40 = vpop.eup %7767  ;;  %v2078_v43 = vmul.f32 %v1950_v18, %v9847_v7 }
 0x1b6   : > { %v2079_v26 = vmul.f32 %v1951_v45, %v9856_v36  ;;  %v2962_v56 = vmul.f32 %v2834_v24, %v9606_v14  ;;  %v2964_v16 = vmul.f32 %v2836_v52, %v9632_v63  ;;  %v7770_v1 = vpop.eup %7769  ;;  %7775 = vtanh.f32 %v2458_v51 }
 0x1b7   : > { %v2461_v50 = vmul.f32 0.7978846, %v2333_v2  ;;  %v2081_v41 = vmul.f32 %v1953_v5, %v9861_v42  ;;  %v3087_v60 = vpack.c.bf16 %v2965_v11, %v2963_v28  ;;  %v1675_v12 = vpop.f32.mrf.mxu0  ;;  %7777 = vtanh.f32 %v2459_v31 }
 0x1b8   : > { %v2080_v37 = vmul.f32 %v1952_v27, %v9868_v55  ;;  %v3086_v59 = vpack.c.bf16 %v2964_v16, %v2962_v56  ;;  %v9896_v17 = vadd.f32 %v1671_v23, %v9411_v49  ;;  %v7772_v18 = vpop.eup %7771  ;;  %7779 = vtanh.f32 %v2460_v39  ;;  %v9910_v39 = vpop.permute.xlu0 %781 }
 0x1b9   : > { %3322 = vmatprep.mubr.bf16.mxu1 %v3087_v60  ;;  %v1417_v14 = vmul.f32 %v9566_v54, %v1353_v21  ;;  %v1418_v63 = vmul.f32 %v9577_v38, %v1354_v19  ;;  %v9900_v51 = vpop.permute.xlu1 %771  ;;  %v9903_v45 = vmul.f32 %v9623_v4, %v1355_v20  ;;  %v2206_v31 = vmul.f32 0.044715, %v2078_v43  ;;  %v1677_v38 = vpop.f32.mrf.mxu0  ;;  %14757 = vst [vmem:[#allocation102_spill] sm:$0xff] %v9910_v39 }
 0x1ba   : > { %14756 = vst [vmem:[#allocation101_spill] sm:$0xff] %v9900_v51  ;;  %v7774_v2 = vpop.eup %7773  ;;  %v2207_v5 = vmul.f32 0.044715, %v2079_v26  ;;  %3323 = vmatmul.mubr.bf16.gmra.mxu1 %v3086_v59  ;;  %v900_v56 = vmul.f32 %v8804_v53, %v9863_v44  ;;  %v9908_v33 = vadd.f32 %v1673_v46, %v9429_v62  ;;  %7781 = vtanh.f32 %v2461_v50 }
 0x1bb   : > { %v2209_v23 = vmul.f32 0.044715, %v2081_v41  ;;  %v1459_v54 = vpack.c.bf16 %v1418_v63, %v1417_v14  ;;  %v2711_v21 = vadd.f32 1.0, %v7770_v1  ;;  %v2208_v27 = vmul.f32 0.044715, %v2080_v37 }
 0x1bc   : > { %v1954_v4 = vmul.f32 %v9896_v17, %v9896_v17  ;;  %v1292_v20 = vmul.f32 %v8818_v58, %v9883_v35  ;;  %v2713_v24 = vadd.f32 1.0, %v7772_v18  ;;  %v9917_v19 = vadd.f32 %v1675_v12, %v9411_v49 }
 0x1bd   : > { %1830 = vmatmul.mubr.bf16.gmra.mxu0 %v1459_v54  ;;  %v2839_v52 = vmul.f32 0.5, %v2711_v21  ;;  %v2710_v28 = vadd.f32 1.0, %v7768_v40  ;;  %v2712_v11 = vadd.f32 1.0, %v7774_v2  ;;  %v9919_v46 = vpop.f32.mrf.mxu0  ;;  %v2335_v43 = vadd.f32 %v2207_v5, %v9856_v36  ;;  %v7709_v2 = vld [vmem:[%s14438_s4 + $0xd0] ss:$8 sps:$4 sm:$0xff]  }
 0x1be   : > { %v968_v26 = vadd.f32 %v9521_v29, %v900_v56  ;;  %v1955_v16 = vmul.f32 %v9908_v33, %v9908_v33  ;;  %v2841_v1 = vmul.f32 0.5, %v2713_v24  ;;  %1839 = vmatprep.mubr.bf16.mxu0 %v14676_v32  ;;  %v9926_v50 = vpop.permute.xlu1 %1178  ;;  %v2334_v41 = vadd.f32 %v2206_v31, %v9847_v7  ;;  %v7711_v31 = vld [vmem:[%s14438_s4 + $0xd4] ss:$8 sps:$4 sm:$0xff]  }
 0x1bf   : > { %14758 = vst [vmem:[#allocation103_spill] sm:$0xff] %v9926_v50  ;;  %v2337_v60 = vadd.f32 %v2209_v23, %v9861_v42  ;;  %v2838_v40 = vmul.f32 0.5, %v2710_v28  ;;  %v2840_v12 = vmul.f32 0.5, %v2712_v11  ;;  %v1683_v37 = vpop.f32.mrf.mxu0  ;;  %v2082_v59 = vmul.f32 %v1954_v4, %v9896_v17  ;;  %4177 = vmatprep.subr.bf16.mxu0 %v7711_v31 }
 0x1c0   : > { %v1356_v18 = vadd.f32 %v1292_v20, %v968_v26  ;;  %v2967_v14 = vmul.f32 %v2839_v52, %v9712_v34  ;;  %v2969_v63 = vmul.f32 %v2841_v1, %v9732_v25  ;;  %v2336_v5 = vadd.f32 %v2208_v27, %v9868_v55  ;;  %v9944_v34 = vpop.permute.xlu0 %796  ;;  %4178 = vmatpush1.bf16.msra.mxu0 %v7709_v2  ;;  %v14761_v26 = vld [vmem:[#allocation80_spill] sm:$0xff] }
 0x1c1   : > { %v1956_v56 = vmul.f32 %v9917_v19, %v9917_v19  ;;  %v2966_v23 = vmul.f32 %v2838_v40, %v9691_v3  ;;  %v2968_v54 = vmul.f32 %v2840_v12, %v9737_v57  ;;  %14759 = vst [vmem:[#allocation104_spill] sm:$0xff] %v9944_v34  ;;  %v2463_v25 = vmul.f32 0.7978846, %v2335_v43  ;;  %v1685_v57 = vpop.f32.mrf.mxu0  ;;  %v14763_v40 = vld [vmem:[#allocation14_spill] sm:$0xff]  ;;  %v14765_v2 = vld [vmem:[#allocation56_spill] sm:$0xff] }
 0x1c2   : > { %v2083_v21 = vmul.f32 %v1955_v16, %v9908_v33  ;;  %v3089_v4 = vpack.c.bf16 %v2969_v63, %v2967_v14  ;;  %v9948_v20 = vadd.f32 %v1677_v38, %v9429_v62  ;;  %v9952_v27 = vmul.f32 %v9364_v61, %v9123_v0  ;;  %v9959_v1 = vpop.permute.xlu1 %1182  ;;  %v14764_v63 = vld [vmem:[#allocation22_spill] sm:$0xff] }
 0x1c3   : > { %v2465_v24 = vmul.f32 0.7978846, %v2337_v60  ;;  %v3088_v52 = vpack.c.bf16 %v2968_v54, %v2966_v23  ;;  %v902_v3 = vmul.f32 %v8804_v53, %v9887_v8  ;;  %v7776_v28 = vpop.eup %7775  ;;  %v2462_v11 = vmul.f32 0.7978846, %v2334_v41  ;;  %14762 = vst [vmem:[#allocation80_spill] sm:$0xff] %v9959_v1  ;;  %v14766_v54 = vld [vmem:[#allocation15_spill] sm:$0xff] }
 0x1c4   : > { %14760 = vst [vmem:[#allocation105_spill] sm:$0xff] %v9952_v27  ;;  %v2210_v43 = vmul.f32 0.044715, %v2082_v59  ;;  %3330 = vmatprep.mubr.bf16.mxu1 %v3089_v4  ;;  %v1957_v38 = vmul.f32 %v9948_v20, %v9948_v20  ;;  %v1420_v16 = vmul.f32 %v14761_v26, %v1356_v18  ;;  %v7778_v0 = vpop.eup %7777  ;;  %v9963_v60 = vmul.f32 %v9364_v61, %v14763_v40  ;;  %v9981_v26 = vpop.permute.xlu0 %1186 }
 0x1c5   : > { %v2464_v12 = vmul.f32 0.7978846, %v2336_v5  ;;  %v2084_v14 = vmul.f32 %v1956_v56, %v9917_v19  ;;  %3331 = vmatmul.mubr.bf16.gmra.mxu1 %v3088_v52  ;;  %v903_v41 = vmul.f32 %v8804_v53, %v9910_v39  ;;  %v7780_v59 = vpop.eup %7779  ;;  %v9970_v31 = vmul.f32 %v14765_v2, %v14764_v63  ;;  %v1687_v52 = vpop.f32.mrf.mxu0  ;;  %14767 = vst [vmem:[#allocation14_spill] sm:$0xff] %v9981_v26 }
 0x1c6   : > { %7783 = vtanh.f32 %v2463_v25  ;;  %v2211_v18 = vmul.f32 0.044715, %v2083_v21  ;;  %v1460_v23 = vpack.c.bf16 %v1420_v16, %v9903_v45  ;;  %v9975_v4 = vmul.f32 %v14765_v2, %v14766_v54 }
 0x1c7   : > { %7785 = vtanh.f32 %v2465_v24  ;;  %v2085_v5 = vmul.f32 %v1957_v38, %v9948_v20  ;;  %v9979_v56 = vadd.f32 %v1683_v37, %v9429_v62  ;;  %v7782_v40 = vpop.eup %7781  ;;  %v2338_v25 = vadd.f32 %v2210_v43, %v9896_v17  ;;  %v9999_v63 = vpop.permute.xlu1 %786 }
 0x1c8   : > { %7787 = vtanh.f32 %v2462_v11  ;;  %v901_v45 = vmul.f32 %v8804_v53, %v9900_v51  ;;  %1840 = vmatmul.mubr.bf16.gmra.mxu0 %v1460_v23  ;;  %v970_v21 = vadd.f32 %v9521_v29, %v902_v3  ;;  %v2212_v24 = vmul.f32 0.044715, %v2084_v14  ;;  %14768 = vst [vmem:[#allocation22_spill] sm:$0xff] %v9999_v63 }
 0x1c9   : > { %7789 = vtanh.f32 %v2464_v12  ;;  %v9989_v38 = vadd.f32 %v9919_v46, %v9411_v49  ;;  %v971_v37 = vadd.f32 %v9521_v29, %v903_v41  ;;  %1849 = vmatprep.mubr.bf16.mxu0 %v14676_v32  ;;  %v2339_v11 = vadd.f32 %v2211_v18, %v9908_v33 }
 0x1ca   : > { %v1293_v43 = vmul.f32 %v8818_v58, %v9926_v50  ;;  %v9997_v16 = vadd.f32 %v1687_v52, %v9429_v62  ;;  %v1295_v3 = vmul.f32 %v8818_v58, %v9981_v26  ;;  %v2213_v12 = vmul.f32 0.044715, %v2085_v5 }
 0x1cb   : > { %v1959_v46 = vmul.f32 %v9979_v56, %v9979_v56  ;;  %v10006_v14 = vadd.f32 %v1685_v57, %v9411_v49  ;;  %v2715_v41 = vadd.f32 1.0, %v7778_v0  ;;  %v1691_v18 = vpop.f32.mrf.mxu0  ;;  %v2466_v23 = vmul.f32 0.7978846, %v2338_v25 }
 0x1cc   : > { %v969_v54 = vadd.f32 %v9521_v29, %v901_v45  ;;  %v1294_v52 = vmul.f32 %v8818_v58, %v9959_v1  ;;  %v2717_v50 = vadd.f32 1.0, %v7782_v40  ;;  %v2340_v35 = vadd.f32 %v2212_v24, %v9917_v19 }
 0x1cd   : > { %v1958_v5 = vmul.f32 %v9989_v38, %v9989_v38  ;;  %v2843_v51 = vmul.f32 0.5, %v2715_v41  ;;  %v2714_v44 = vadd.f32 1.0, %v7776_v28  ;;  %v1693_v26 = vpop.f32.mrf.mxu0  ;;  %v2467_v8 = vmul.f32 0.7978846, %v2339_v11 }
 0x1ce   : > { %v1357_v57 = vadd.f32 %v1293_v43, %v969_v54  ;;  %v1961_v0 = vmul.f32 %v9997_v16, %v9997_v16  ;;  %v2845_v25 = vmul.f32 0.5, %v2717_v50  ;;  %v2341_v29 = vadd.f32 %v2213_v12, %v9948_v20  ;;  %v10022_v43 = vpop.permute.xlu1 %1190  ;;  %v14770_v54 = vld [vmem:[#allocation16_spill] sm:$0xff] }
 0x1cf   : > { %v2087_v45 = vmul.f32 %v1959_v46, %v9979_v56  ;;  %v1960_v40 = vmul.f32 %v10006_v14, %v10006_v14  ;;  %v2716_v24 = vadd.f32 1.0, %v7780_v59  ;;  %v1695_v1 = vpop.f32.mrf.mxu0  ;;  %v1358_v39 = vadd.f32 %v1294_v52, %v970_v21  ;;  %14769 = vst [vmem:[#allocation15_spill] sm:$0xff] %v10022_v43 }
 0x1d0   : > { %v2971_v41 = vmul.f32 %v2843_v51, %v9782_v47  ;;  %v2973_v28 = vmul.f32 %v2845_v25, %v9801_v10  ;;  %v2842_v11 = vmul.f32 0.5, %v2714_v44  ;;  %v10026_v50 = vmul.f32 %v14765_v2, %v14770_v54 }
 0x1d1   : > { %v2468_v12 = vmul.f32 0.7978846, %v2340_v35  ;;  %v2086_v46 = vmul.f32 %v1958_v5, %v9989_v38  ;;  %v2844_v27 = vmul.f32 0.5, %v2716_v24  ;;  %7791 = vtanh.f32 %v2466_v23  ;;  %v1697_v25 = vpop.f32.mrf.mxu0  ;;  %v14771_v5 = vld [vmem:[#allocation89_spill] sm:$0xff]  ;;  %v14772_v23 = vld [vmem:[#allocation90_spill] sm:$0xff] }
 0x1d2   : > { %v2089_v59 = vmul.f32 %v1961_v0, %v9997_v16  ;;  %v3091_v48 = vpack.c.bf16 %v2973_v28, %v2971_v41  ;;  %v1359_v21 = vadd.f32 %v1295_v3, %v971_v37  ;;  %v2469_v47 = vmul.f32 0.7978846, %v2341_v29 }
 0x1d3   : > { %v7784_v52 = vpop.eup %7783  ;;  %v2215_v51 = vmul.f32 0.044715, %v2087_v45  ;;  %v2970_v10 = vmul.f32 %v2842_v11, %v9762_v30  ;;  %v2972_v44 = vmul.f32 %v2844_v27, %v9788_v13  ;;  %7793 = vtanh.f32 %v2467_v8 }
 0x1d4   : > { %v7786_v22 = vpop.eup %7785  ;;  %v2088_v35 = vmul.f32 %v1960_v40, %v10006_v14  ;;  %3338 = vmatprep.mubr.bf16.mxu1 %v3091_v48  ;;  %v1421_v24 = vmul.f32 %v14771_v5, %v1357_v57  ;;  %v1422_v54 = vmul.f32 %v14772_v23, %v1358_v39  ;;  %7795 = vtanh.f32 %v2468_v12  ;;  %v10042_v40 = vpop.permute.xlu1 %791 }
 0x1d5   : > { %v7788_v0 = vpop.eup %7787  ;;  %v2214_v37 = vmul.f32 0.044715, %v2086_v46  ;;  %v3090_v3 = vpack.c.bf16 %v2972_v44, %v2970_v10  ;;  %v904_v29 = vmul.f32 %v8804_v53, %v9999_v63  ;;  %v10037_v30 = vpop.f32.mrf.mxu0  ;;  %v2217_v27 = vmul.f32 0.044715, %v2089_v59  ;;  %14773 = vst [vmem:[#allocation16_spill] sm:$0xff] %v10042_v40 }
 0x1d6   : > { %v7790_v13 = vpop.eup %7789  ;;  %v1461_v45 = vpack.c.bf16 %v1422_v54, %v1421_v24  ;;  %v10040_v8 = vadd.f32 %v1693_v26, %v9429_v62  ;;  %v2719_v48 = vadd.f32 1.0, %v7784_v52  ;;  %7797 = vtanh.f32 %v2469_v47  ;;  %v10054_v59 = vld [vmem:[%s14437_s3] ss:$0 sm:$0xff]  ;;  %v7714_v44 = vld [vmem:[%s14438_s4 + $0xc4] ss:$8 sps:$4 sm:$0xff]  }
 0x1d7   : > { %v2343_v39 = vadd.f32 %v2215_v51, %v9979_v56  ;;  %3339 = vmatmul.mubr.bf16.gmra.mxu1 %v3090_v3  ;;  %v1296_v57 = vmul.f32 %v8818_v58, %v10022_v43  ;;  %v2721_v41 = vadd.f32 1.0, %v7786_v22  ;;  %v2216_v28 = vmul.f32 0.044715, %v2088_v35  ;;  %v10058_v22 = vpop.f32.mrf.mxu0  ;;  %v7712_v10 = vld [vmem:[%s14438_s4 + $0xc0] ss:$8 sps:$4 sm:$0xff]   ;;  %4179 = vmatprep.subr.bf16.mxu0 %v7714_v44 }
 0x1d8   : > { %v10048_v11 = vadd.f32 %v1691_v18, %v9411_v49  ;;  %1850 = vmatmul.mubr.bf16.gmra.mxu0 %v1461_v45  ;;  %v2847_v12 = vmul.f32 0.5, %v2719_v48  ;;  %v2718_v46 = vadd.f32 1.0, %v7788_v0  ;;  %v2342_v26 = vadd.f32 %v2214_v37, %v9989_v38  ;;  %v10060_v18 = vpop.permute.xlu0 %1202  ;;  %v10080_v48 = vpop.permute.xlu1 %1194 }
 0x1d9   : > { %v972_v52 = vadd.f32 %v10054_v59, %v904_v29  ;;  %v2849_v47 = vmul.f32 0.5, %v2721_v41  ;;  %v2720_v51 = vadd.f32 1.0, %v7790_v13  ;;  %1859 = vmatprep.mubr.bf16.mxu0 %v14676_v32  ;;  %14774 = vst [vmem:[#allocation89_spill] sm:$0xff] %v10060_v18  ;;  %v2345_v35 = vadd.f32 %v2217_v27, %v9997_v16  ;;  %14775 = vst [vmem:[#allocation90_spill] sm:$0xff] %v10080_v48  ;;  %v10087_v41 = vpop.f32.mrf.mxu0 }
 0x1da   : > { %v1963_v5 = vmul.f32 %v10040_v8, %v10040_v8  ;;  %v10072_v24 = vadd.f32 %v1695_v1, %v9411_v49  ;;  %v2846_v23 = vmul.f32 0.5, %v2718_v46  ;;  %v2975_v0 = vmul.f32 %v2847_v12, %v9856_v36  ;;  %4180 = vmatpush1.bf16.msra.mxu0 %v7712_v10 }
 0x1db   : > { %v1360_v54 = vadd.f32 %v1296_v57, %v972_v52  ;;  %v2977_v37 = vmul.f32 %v2849_v47, %v9861_v42  ;;  %v2848_v3 = vmul.f32 0.5, %v2720_v51  ;;  %v2471_v29 = vmul.f32 0.7978846, %v2343_v39  ;;  %v10092_v39 = vld [vmem:[%s14437_s3 + $0x1] ss:$0 sm:$0xff]  ;;  %v14779_v51 = vld [vmem:[#allocation73_spill] sm:$0xff] }
 0x1dc   : > { %v2344_v13 = vadd.f32 %v2216_v28, %v10006_v14  ;;  %v1962_v27 = vmul.f32 %v10048_v11, %v10048_v11  ;;  %v1423_v45 = vmul.f32 %v9809_v15, %v1359_v21  ;;  %v2974_v57 = vmul.f32 %v2846_v23, %v9847_v7  ;;  %v10104_v47 = vpop.permute.xlu0 %801 }
 0x1dd   : > { %v3093_v1 = vpack.c.bf16 %v2977_v37, %v2975_v0  ;;  %v2976_v36 = vmul.f32 %v2848_v3, %v9868_v55  ;;  %v10085_v42 = vadd.f32 %v1697_v25, %v9429_v62  ;;  %v3783_v15 = vadd.f32 %v10092_v39, %v9963_v60  ;;  %14777 = vst [vmem:[#allocation107_spill] sm:$0xff] %v10104_v47  ;;  %v14782_v37 = vld [vmem:[#allocation28_spill] sm:$0xff] }
 0x1de   : > { %v2473_v21 = vmul.f32 0.7978846, %v2345_v35  ;;  %v2091_v28 = vmul.f32 %v1963_v5, %v10040_v8  ;;  %v1964_v7 = vmul.f32 %v10072_v24, %v10072_v24  ;;  %v7792_v55 = vpop.eup %7791  ;;  %v10101_v25 = vadd.f32 %v9970_v31, %v9844_v6  ;;  %v1707_v5 = vpop.f32.mrf.mxu0 }
 0x1df   : > { %v2470_v12 = vmul.f32 0.7978846, %v2342_v26  ;;  %3346 = vmatprep.mubr.bf16.mxu1 %v3093_v1  ;;  %v3092_v46 = vpack.c.bf16 %v2976_v36, %v2974_v57  ;;  %v1424_v52 = vmul.f32 %v9824_v9, %v1360_v54  ;;  %v10107_v60 = vadd.f32 %v9975_v4, %v3783_v15  ;;  %v10119_v54 = vpop.permute.xlu1 %1198  ;;  %v14784_v1 = vld [vmem:[#allocation17_spill] sm:$0xff]  ;;  %v14785_v36 = vld [vmem:[#allocation19_spill] sm:$0xff] }
 0x1e0   : > { %14776 = vst [vmem:[#allocation106_spill] sm:$0xff] %v10101_v25  ;;  %v10111_v10 = vadd.f32 %v10026_v50, %v14779_v51  ;;  %v2472_v44 = vmul.f32 0.7978846, %v2344_v13  ;;  %v906_v35 = vmul.f32 %v8804_v53, %v9944_v34  ;;  %v7794_v6 = vpop.eup %7793  ;;  %7799 = vtanh.f32 %v2471_v29  ;;  %14781 = vst [vmem:[#allocation109_spill] sm:$0xff] %v10119_v54 }
 0x1e1   : > { %14778 = vst [vmem:[#allocation108_spill] sm:$0xff] %v10107_v60  ;;  %v2090_v31 = vmul.f32 %v1962_v27, %v10048_v11  ;;  %3347 = vmatmul.mubr.bf16.gmra.mxu1 %v3092_v46  ;;  %v1965_v9 = vmul.f32 %v10085_v42, %v10085_v42  ;;  %v1462_v26 = vpack.c.bf16 %v1424_v52, %v1423_v45  ;;  %v7796_v4 = vpop.eup %7795  ;;  %7801 = vtanh.f32 %v2473_v21  ;;  %v14786_v21 = vld [vmem:[#allocation84_spill] sm:$0xff] }
 0x1e2   : > { %14780 = vst [vmem:[#allocation73_spill] sm:$0xff] %v10111_v10  ;;  %v2219_v23 = vmul.f32 0.044715, %v2091_v28  ;;  %v2092_v50 = vmul.f32 %v1964_v7, %v10072_v24  ;;  %v907_v0 = vmul.f32 %v8804_v53, %v10104_v47  ;;  %v10125_v3 = vmul.f32 %v9364_v61, %v14782_v37  ;;  %v14787_v28 = vld [vmem:[#allocation76_spill] sm:$0xff] }
 0x1e3   : > { %7803 = vtanh.f32 %v2470_v12  ;;  %v905_v29 = vmul.f32 %v8804_v53, %v10042_v40  ;;  %v10131_v13 = vadd.f32 %v10037_v30, %v9411_v49  ;;  %1860 = vmatmul.mubr.bf16.gmra.mxu0 %v1462_v26  ;;  %v1711_v27 = vpop.f32.mrf.mxu0  ;;  %v7798_v45 = vpop.eup %7797  ;;  %v10135_v57 = vmul.f32 %v9364_v61, %v14784_v1 }
 0x1e4   : > { %14783 = vst [vmem:[#allocation28_spill] sm:$0xff] %v10125_v3  ;;  %v10139_v15 = vmul.f32 %v9364_v61, %v14785_v36  ;;  %7805 = vtanh.f32 %v2472_v44  ;;  %1869 = vmatprep.mubr.bf16.mxu0 %v14676_v32  ;;  %v10144_v7 = vadd.f32 %v14787_v28, %v14786_v21  ;;  %v974_v30 = vadd.f32 %v10054_v59, %v906_v35  ;;  %v10165_v28 = vpop.permute.xlu1 %806 }
 0x1e5   : > { %v2218_v12 = vmul.f32 0.044715, %v2090_v31  ;;  %v2093_v46 = vmul.f32 %v1965_v9, %v10085_v42  ;;  %v2723_v52 = vadd.f32 1.0, %v7794_v6  ;;  %v1713_v51 = vpop.f32.mrf.mxu0  ;;  %v2347_v26 = vadd.f32 %v2219_v23, %v10040_v8  ;;  %14789 = vst [vmem:[#allocation19_spill] sm:$0xff] %v10165_v28 }
 0x1e6   : > { %14788 = vst [vmem:[#allocation17_spill] sm:$0xff] %v10144_v7  ;;  %v2220_v37 = vmul.f32 0.044715, %v2092_v50  ;;  %v1299_v1 = vmul.f32 %v8818_v58, %v10060_v18  ;;  %v975_v44 = vadd.f32 %v10054_v59, %v907_v0  ;;  %v973_v36 = vadd.f32 %v10054_v59, %v905_v29 }
 0x1e7   : > { %v1966_v21 = vmul.f32 %v10131_v13, %v10131_v13  ;;  %v10157_v35 = vadd.f32 %v10058_v22, %v9429_v62  ;;  %v2725_v31 = vadd.f32 1.0, %v7798_v45  ;;  %v10159_v6 = vpop.f32.mrf.mxu0  ;;  %v1297_v9 = vmul.f32 %v8818_v58, %v10080_v48 }
 0x1e8   : > { %v1298_v23 = vmul.f32 %v8818_v58, %v10119_v54  ;;  %v2851_v50 = vmul.f32 0.5, %v2723_v52  ;;  %v2722_v0 = vadd.f32 1.0, %v7792_v55  ;;  %v2346_v29 = vadd.f32 %v2218_v12, %v10048_v11 }
 0x1e9   : > { %v2221_v40 = vmul.f32 0.044715, %v2093_v46  ;;  %v10169_v43 = vadd.f32 %v1707_v5, %v9429_v62  ;;  %v2853_v22 = vmul.f32 0.5, %v2725_v31  ;;  %v2475_v45 = vmul.f32 0.7978846, %v2347_v26  ;;  %v10180_v54 = vpop.f32.mrf.mxu0 }
 0x1ea   : > { %v2348_v63 = vadd.f32 %v2220_v37, %v10072_v24  ;;  %v10174_v48 = vadd.f32 %v10087_v41, %v9411_v49  ;;  %v2724_v47 = vadd.f32 1.0, %v7796_v4  ;;  %v1967_v55 = vmul.f32 %v10157_v35, %v10157_v35 }
 0x1eb   : > { %v2979_v52 = vmul.f32 %v2851_v50, %v9908_v33  ;;  %v2981_v12 = vmul.f32 %v2853_v22, %v9948_v20  ;;  %v2850_v46 = vmul.f32 0.5, %v2722_v0  ;;  %v2094_v5 = vmul.f32 %v1966_v21, %v10131_v13 }
 0x1ec   : > { %v1361_v26 = vadd.f32 %v1297_v9, %v973_v36  ;;  %v1362_v31 = vadd.f32 %v1298_v23, %v974_v30  ;;  %v2852_v37 = vmul.f32 0.5, %v2724_v47  ;;  %v2349_v18 = vadd.f32 %v2221_v40, %v10085_v42  ;;  %v10196_v30 = vpop.permute.xlu1 %1206 }
 0x1ed   : > { %v1969_v41 = vmul.f32 %v10169_v43, %v10169_v43  ;;  %v3095_v4 = vpack.c.bf16 %v2981_v12, %v2979_v52  ;;  %v10186_v34 = vadd.f32 %v1299_v1, %v975_v44  ;;  %v10188_v3 = vpop.f32.mrf.mxu0  ;;  %v7800_v33 = vpop.eup %7799  ;;  %v10190_v20 = vmul.f32 0.7978846, %v2346_v29  ;;  %14790 = vst [vmem:[#allocation84_spill] sm:$0xff] %v10196_v30  ;;  %v10205_v29 = vld [vmem:[%s8838_s29 + $0x20] sm:$0xff] }
 0x1ee   : > { %v1968_v36 = vmul.f32 %v10174_v48, %v10174_v48  ;;  %v2978_v47 = vmul.f32 %v2850_v46, %v9896_v17  ;;  %v2980_v40 = vmul.f32 %v2852_v37, %v9917_v19  ;;  %v7802_v21 = vpop.eup %7801  ;;  %7807 = vtanh.f32 %v2475_v45  ;;  %v10209_v19 = vld [vmem:[%s8838_s29 + $0x28] sm:$0xff] }
 0x1ef   : > { %v10198_v1 = vmul.f32 0.7978846, %v2348_v63  ;;  %v2095_v44 = vmul.f32 %v1967_v55, %v10157_v35  ;;  %3354 = vmatprep.mubr.bf16.mxu1 %v3095_v4  ;;  %v10202_v9 = vadd.f32 %v1711_v27, %v9411_v49  ;;  %v2222_v50 = vmul.f32 0.044715, %v2094_v5  ;;  %v7715_v63 = vld [vmem:[%s14438_s4 + $0xb0] ss:$8 sps:$4 sm:$0xff]   ;;  %v10224_v5 = vpop.f32.mrf.mxu0 }
 0x1f0   : > { %v7804_v23 = vpop.eup %7803  ;;  %v3094_v0 = vpack.c.bf16 %v2980_v40, %v2978_v47  ;;  %v1425_v17 = vmul.f32 %v10205_v29, %v1361_v26  ;;  %v1426_v22 = vmul.f32 %v10209_v19, %v1362_v31  ;;  %v7717_v27 = vld [vmem:[%s14438_s4 + $0xb4] ss:$8 sps:$4 sm:$0xff]   ;;  %v2477_v55 = vmul.f32 0.7978846, %v2349_v18 }
 0x1f1   : > { %v7806_v45 = vpop.eup %7805  ;;  %v2097_v52 = vmul.f32 %v1969_v41, %v10169_v43  ;;  %v1970_v12 = vmul.f32 %v10202_v9, %v10202_v9  ;;  %v10222_v46 = vadd.f32 %v1713_v51, %v9429_v62  ;;  %v2096_v26 = vmul.f32 %v1968_v36, %v10174_v48  ;;  %4181 = vmatprep.subr.bf16.mxu0 %v7717_v27  ;;  %v7718_v36 = vld [vmem:[%s14438_s4 + $0xa0] ss:$8 sps:$4 sm:$0xff]  }
 0x1f2   : > { %3355 = vmatmul.mubr.bf16.gmra.mxu1 %v3094_v0  ;;  %v1463_v31 = vpack.c.bf16 %v1426_v22, %v1425_v17  ;;  %v2727_v37 = vadd.f32 1.0, %v7800_v33  ;;  %v2729_v4 = vadd.f32 1.0, %v7802_v21  ;;  %v2223_v47 = vmul.f32 0.044715, %v2095_v44  ;;  %4182 = vmatpush1.bf16.msra.mxu0 %v7715_v63  ;;  %v7720_v33 = vld [vmem:[%s14438_s4 + $0xa4] ss:$8 sps:$4 sm:$0xff]   ;;  %v10241_v17 = vpop.permute.xlu1 %811 }
 0x1f3   : > { %v908_v18 = vmul.f32 %v8804_v53, %v10165_v28  ;;  %v1971_v41 = vmul.f32 %v10222_v46, %v10222_v46  ;;  %v10233_v51 = vadd.f32 %v10159_v6, %v9411_v49  ;;  %v2726_v44 = vadd.f32 1.0, %v7804_v23  ;;  %14791 = vst [vmem:[#allocation76_spill] sm:$0xff] %v10241_v17  ;;  %v10249_v28 = vpop.f32.mrf.mxu0  ;;  %4183 = vmatprep.subr.bf16.mxu0 %v7720_v33 }
 0x1f4   : > { %1870 = vmatmul.mubr.bf16.gmra.mxu0 %v1463_v31  ;;  %v2855_v40 = vmul.f32 0.5, %v2727_v37  ;;  %v2857_v21 = vmul.f32 0.5, %v2729_v4  ;;  %v2728_v0 = vadd.f32 1.0, %v7806_v45  ;;  %v2225_v22 = vmul.f32 0.044715, %v2097_v52 }
 0x1f5   : > { %v2098_v6 = vmul.f32 %v1970_v12, %v10202_v9  ;;  %v1300_v63 = vmul.f32 %v8818_v58, %v10196_v30  ;;  %v1972_v27 = vmul.f32 %v10233_v51, %v10233_v51  ;;  %1879 = vmatprep.mubr.bf16.mxu0 %v14676_v32  ;;  %v2854_v45 = vmul.f32 0.5, %v2726_v44 }
 0x1f6   : > { %v2983_v31 = vmul.f32 %v2855_v40, %v9979_v56  ;;  %v2985_v23 = vmul.f32 %v2857_v21, %v9997_v16  ;;  %v2856_v37 = vmul.f32 0.5, %v2728_v0  ;;  %7809 = vtanh.f32 %v2477_v55  ;;  %4184 = vmatpush1.bf16.msra.mxu0 %v7718_v36 }
 0x1f7   : > { %v2351_v52 = vadd.f32 %v2223_v47, %v10157_v35  ;;  %v2224_v12 = vmul.f32 0.044715, %v2096_v26  ;;  %v976_v4 = vadd.f32 %v10054_v59, %v908_v18  ;;  %v2099_v30 = vmul.f32 %v1971_v41, %v10222_v46  ;;  %v10264_v26 = vpop.f32.mrf.mxu0  ;;  %v7721_v41 = vld [vmem:[%s14438_s4 + $0x90] ss:$8 sps:$4 sm:$0xff]  }
 0x1f8   : > { %v3097_v25 = vpack.c.bf16 %v2985_v23, %v2983_v31  ;;  %v2982_v7 = vmul.f32 %v2854_v45, %v9989_v38  ;;  %v2984_v33 = vmul.f32 %v2856_v37, %v10006_v14  ;;  %v2353_v56 = vadd.f32 %v2225_v22, %v10169_v43  ;;  %v10268_v14 = vpop.permute.xlu1 %1210  ;;  %v10291_v22 = vld [vmem:[%s8838_s29 + $0x30] sm:$0xff]  ;;  %v10298_v31 = vld [vmem:[%s8838_s29 + $0x38] sm:$0xff] }
 0x1f9   : > { %v1364_v40 = vadd.f32 %v1300_v63, %v976_v4  ;;  %v2100_v16 = vmul.f32 %v1972_v27, %v10233_v51  ;;  %v10262_v55 = vadd.f32 %v10180_v54, %v9429_v62  ;;  %7811 = vtanh.f32 %v10190_v20  ;;  %14792 = vst [vmem:[#allocation110_spill] sm:$0xff] %v10268_v14  ;;  %v7723_v54 = vld [vmem:[%s14438_s4 + $0x94] ss:$8 sps:$4 sm:$0xff]   ;;  %v7726_v4 = vld [vmem:[%s14438_s4 + $0x84] ss:$8 sps:$4 sm:$0xff]  }
 0x1fa   : > { %v2350_v47 = vadd.f32 %v2222_v50, %v10131_v13  ;;  %v2226_v18 = vmul.f32 0.044715, %v2098_v6  ;;  %3362 = vmatprep.mubr.bf16.mxu1 %v3097_v25  ;;  %v3096_v38 = vpack.c.bf16 %v2984_v33, %v2982_v7  ;;  %v3786_v20 = vadd.f32 %v10092_v39, %v10135_v57  ;;  %4185 = vmatprep.subr.bf16.mxu0 %v7723_v54  ;;  %v14796_v54 = vld [vmem:[#allocation20_spill] sm:$0xff] }
 0x1fb   : > { %7813 = vtanh.f32 %v10198_v1  ;;  %v2352_v50 = vadd.f32 %v2224_v12, %v10174_v48  ;;  %v1973_v25 = vmul.f32 %v10262_v55, %v10262_v55  ;;  %v10282_v7 = vpop.f32.mrf.mxu0  ;;  %v10284_v36 = vpop.eup %7807  ;;  %v2479_v21 = vmul.f32 0.7978846, %v2351_v52  ;;  %v14793_v1 = vld [vmem:[#allocation18_spill] sm:$0xff]  ;;  %4186 = vmatpush1.bf16.msra.mxu0 %v7721_v41  ;;  %v7724_v12 = vld [vmem:[%s14438_s4 + $0x80] ss:$8 sps:$4 sm:$0xff]  }
 0x1fc   : > { %v2227_v44 = vmul.f32 0.044715, %v2099_v30  ;;  %3363 = vmatmul.mubr.bf16.gmra.mxu1 %v3096_v38  ;;  %v10288_v0 = vadd.f32 %v10188_v3, %v9411_v49  ;;  %v1427_v57 = vmul.f32 %v10291_v22, %v10186_v34  ;;  %v3854_v6 = vmul.f32 %v14765_v2, %v14793_v1  ;;  %v10306_v52 = vpop.permute.xlu0 %816  ;;  %v10328_v41 = vpop.permute.xlu1 %1214  ;;  %4187 = vmatprep.subr.bf16.mxu0 %v7726_v4 }
 0x1fd   : > { %v2481_v63 = vmul.f32 0.7978846, %v2353_v56  ;;  %v2228_v27 = vmul.f32 0.044715, %v2100_v16  ;;  %v1428_v23 = vmul.f32 %v10298_v31, %v1364_v40  ;;  %v10301_v30 = vpop.f32.mrf.mxu0  ;;  %v3787_v3 = vadd.f32 %v10092_v39, %v10139_v15  ;;  %14794 = vst [vmem:[#allocation18_spill] sm:$0xff] %v10306_v52  ;;  %14795 = vst [vmem:[#allocation111_spill] sm:$0xff] %v10328_v41 }
 0x1fe   : > { %v2478_v45 = vmul.f32 0.7978846, %v2350_v47  ;;  %v2354_v37 = vadd.f32 %v2226_v18, %v10202_v9  ;;  %v1974_v34 = vmul.f32 %v10288_v0, %v10288_v0  ;;  %v2101_v33 = vmul.f32 %v1973_v25, %v10262_v55 }
 0x1ff   : > { %v910_v15 = vmul.f32 %v8804_v53, %v10306_v52  ;;  %v1464_v56 = vpack.c.bf16 %v1428_v23, %v1427_v57  ;;  %v10321_v40 = vadd.f32 %v10224_v5, %v9429_v62  ;;  %v10323_v16 = vpop.f32.mrf.mxu0  ;;  %7815 = vtanh.f32 %v2479_v21  ;;  %v14797_v57 = vld [vmem:[#allocation21_spill] sm:$0xff]  ;;  %4188 = vmatpush1.bf16.msra.mxu0 %v7724_v12  ;;  %v14802_v52 = vld [vmem:[#allocation96_spill] sm:$0xff] }
 0x200   : > { %v2480_v47 = vmul.f32 0.7978846, %v2352_v50  ;;  %v2355_v18 = vadd.f32 %v2227_v44, %v10222_v46  ;;  %v909_v38 = vmul.f32 %v8804_v53, %v10241_v17  ;;  %v3855_v25 = vmul.f32 %v14765_v2, %v14796_v54  ;;  %5871 = vmatprep.subr.bf16.mxu0 %v14676_v32  ;;  %v10366_v17 = vpop.permute.xlu1 %826 }
 0x201   : > { %v3856_v1 = vmul.f32 %v14765_v2, %v14797_v57  ;;  %7817 = vtanh.f32 %v2481_v63  ;;  %v2356_v5 = vadd.f32 %v2228_v27, %v10233_v51  ;;  %1880 = vmatmul.mubr.bf16.gmra.mxu0 %v1464_v56  ;;  %v2482_v50 = vmul.f32 0.7978846, %v2354_v37  ;;  %v10344_v27 = vpop.f32.mrf.mxu0  ;;  %v10348_v56 = vpop.permute.xlu0 %821  ;;  %14801 = vst [vmem:[#allocation113_spill] sm:$0xff] %v10366_v17 }
 0x202   : > { %7819 = vtanh.f32 %v2478_v45  ;;  %v2102_v21 = vmul.f32 %v1974_v34, %v10288_v0  ;;  %v1301_v44 = vmul.f32 %v8818_v58, %v10268_v14  ;;  %1889 = vmatprep.mubr.bf16.mxu0 %v14676_v32  ;;  %v2229_v23 = vmul.f32 0.044715, %v2101_v33  ;;  %14798 = vst [vmem:[#allocation20_spill] sm:$0xff] %v10348_v56 }
 0x203   : > { %v978_v4 = vadd.f32 %v10054_v59, %v910_v15  ;;  %v1975_v54 = vmul.f32 %v10321_v40, %v10321_v40  ;;  %v1302_v63 = vmul.f32 %v8818_v58, %v10328_v41  ;;  %v7810_v45 = vpop.eup %7809  ;;  %7821 = vtanh.f32 %v2480_v47 }
 0x204   : > { %v2483_v37 = vmul.f32 0.7978846, %v2355_v18  ;;  %v977_v34 = vadd.f32 %v10054_v59, %v909_v38  ;;  %v10352_v12 = vadd.f32 %v10249_v28, %v9411_v49  ;;  %v10354_v33 = vadd.f32 %v3854_v6, %v3786_v20 }
 0x205   : > { %v2484_v15 = vmul.f32 0.7978846, %v2356_v5  ;;  %v911_v57 = vmul.f32 %v8804_v53, %v10348_v56  ;;  %v10360_v41 = vadd.f32 %v10264_v26, %v9429_v62  ;;  %v10362_v47 = vpop.f32.mrf.mxu0  ;;  %v10364_v18 = vadd.f32 %v3855_v25, %v3787_v3 }
 0x206   : > { %14799 = vst [vmem:[#allocation21_spill] sm:$0xff] %v10354_v33  ;;  %7823 = vtanh.f32 %v2482_v50  ;;  %v2230_v38 = vmul.f32 0.044715, %v2102_v21  ;;  %v1365_v14 = vadd.f32 %v1301_v44, %v977_v34  ;;  %v7812_v28 = vpop.eup %7811  ;;  %v2357_v20 = vadd.f32 %v2229_v23, %v10262_v55 }
 0x207   : > { %14800 = vst [vmem:[#allocation112_spill] sm:$0xff] %v10364_v18  ;;  %v2103_v6 = vmul.f32 %v1975_v54, %v10321_v40  ;;  %v1366_v5 = vadd.f32 %v1302_v63, %v978_v4  ;;  %v2731_v56 = vadd.f32 1.0, %v10284_v36  ;;  %v10372_v33 = vadd.f32 %v3856_v1, %v14802_v52  ;;  %v10379_v23 = vpop.f32.mrf.mxu0  ;;  %v10383_v4 = vld [vmem:[%s8838_s29] sm:$0xff] }
 0x208   : > { %v7814_v26 = vpop.eup %7813  ;;  %7825 = vtanh.f32 %v2483_v37  ;;  %v1976_v3 = vmul.f32 %v10352_v12, %v10352_v12  ;;  %v2733_v25 = vadd.f32 1.0, %v7810_v45  ;;  %v979_v50 = vadd.f32 %v10054_v59, %v911_v57  ;;  %14804 = vst [vmem:[#allocation114_spill] sm:$0xff] %v10383_v4  ;;  %v10389_v37 = vld [vmem:[%s8838_s29 + $0x8] sm:$0xff] }
 0x209   : > { %14803 = vst [vmem:[#allocation96_spill] sm:$0xff] %v10372_v33  ;;  %7827 = vtanh.f32 %v2484_v15  ;;  %v1977_v21 = vmul.f32 %v10360_v41, %v10360_v41  ;;  %v2859_v44 = vmul.f32 0.5, %v2731_v56  ;;  %v2358_v36 = vadd.f32 %v2230_v38, %v10288_v0  ;;  %14805 = vst [vmem:[#allocation115_spill] sm:$0xff] %v10389_v37  ;;  %v10392_v15 = vpop.permute.xlu0 %1218 }
 0x20a   : > { %v1429_v52 = vmul.f32 %v10383_v4, %v1365_v14  ;;  %v2861_v1 = vmul.f32 0.5, %v2733_v25  ;;  %v2730_v54 = vadd.f32 1.0, %v7812_v28  ;;  %v10386_v63 = vmul.f32 0.7978846, %v2357_v20  ;;  %14806 = vst [vmem:[#allocation116_spill] sm:$0xff] %v10392_v15  ;;  %v10397_v14 = vpop.permute.xlu1 %1222 }
 0x20b   : > { %v2231_v45 = vmul.f32 0.044715, %v2103_v6  ;;  %v1430_v34 = vmul.f32 %v10389_v37, %v1366_v5  ;;  %v2732_v56 = vadd.f32 1.0, %v7814_v26  ;;  %v2104_v57 = vmul.f32 %v1976_v3, %v10352_v12  ;;  %14807 = vst [vmem:[#allocation117_spill] sm:$0xff] %v10397_v14  ;;  %v10406_v26 = vpop.f32.mrf.mxu0 }
 0x20c   : > { %v2987_v38 = vmul.f32 %v2859_v44, %v10040_v8  ;;  %v2989_v33 = vmul.f32 %v2861_v1, %v10085_v42  ;;  %v2858_v18 = vmul.f32 0.5, %v2730_v54  ;;  %v7816_v28 = vpop.eup %7815  ;;  %v2105_v20 = vmul.f32 %v1977_v21, %v10360_v41 }
 0x20d   : > { %v2860_v6 = vmul.f32 0.5, %v2732_v56  ;;  %v912_v25 = vmul.f32 %v8804_v53, %v10366_v17  ;;  %v10404_v5 = vadd.f32 %v10282_v7, %v9411_v49  ;;  %v2486_v8 = vmul.f32 0.7978846, %v2358_v36 }
 0x20e   : > { %v7818_v3 = vpop.eup %7817  ;;  %v1303_v42 = vmul.f32 %v8818_v58, %v10392_v15  ;;  %v3099_v44 = vpack.c.bf16 %v2989_v33, %v2987_v38  ;;  %v2986_v1 = vmul.f32 %v2858_v18, %v10048_v11  ;;  %v1465_v17 = vpack.c.bf16 %v1430_v34, %v1429_v52  ;;  %v10422_v52 = vpop.f32.mrf.mxu0 }
 0x20f   : > { %v7820_v54 = vpop.eup %7819  ;;  %v2988_v21 = vmul.f32 %v2860_v6, %v10072_v24  ;;  %v1978_v56 = vmul.f32 %v10404_v5, %v10404_v5  ;;  %v1304_v7 = vmul.f32 %v8818_v58, %v10397_v14  ;;  %v2359_v10 = vadd.f32 %v2231_v45, %v10321_v40 }
 0x210   : > { %v2232_v60 = vmul.f32 0.044715, %v2104_v57  ;;  %3370 = vmatprep.mubr.bf16.mxu1 %v3099_v44  ;;  %v10419_v36 = vadd.f32 %v10301_v30, %v9429_v62  ;;  %v2735_v33 = vadd.f32 1.0, %v7816_v28  ;;  %v7822_v11 = vpop.eup %7821  ;;  %v2233_v18 = vmul.f32 0.044715, %v2105_v20  ;;  %1890 = vmatmul.mubr.bf16.gmra.mxu0 %v1465_v17  ;;  %v10431_v28 = vpop.permute.xlu1 %831 }
 0x211   : > { %v3098_v38 = vpack.c.bf16 %v2988_v21, %v2986_v1  ;;  %v980_v24 = vadd.f32 %v10054_v59, %v912_v25  ;;  %v2737_v6 = vadd.f32 1.0, %v7818_v3  ;;  %v2106_v34 = vmul.f32 %v1978_v56, %v10404_v5  ;;  %14808 = vst [vmem:[#allocation118_spill] sm:$0xff] %v10431_v28  ;;  %1899 = vmatprep.mubr.bf16.mxu0 %v14676_v32  ;;  %v10436_v1 = vpop.permute.xlu0 %836 }
 0x212   : > { %v1979_v45 = vmul.f32 %v10419_v36, %v10419_v36  ;;  %v2863_v57 = vmul.f32 0.5, %v2735_v33  ;;  %v10429_v30 = vadd.f32 %v10323_v16, %v9411_v49  ;;  %v1367_v17 = vadd.f32 %v1303_v42, %v979_v50  ;;  %14809 = vst [vmem:[#allocation119_spill] sm:$0xff] %v10436_v1 }
 0x213   : > { %v10434_v20 = vpop.eup %7823  ;;  %3371 = vmatmul.mubr.bf16.gmra.mxu1 %v3098_v38  ;;  %v1368_v25 = vadd.f32 %v1304_v7, %v980_v24  ;;  %v2865_v3 = vmul.f32 0.5, %v2737_v6  ;;  %v2734_v44 = vadd.f32 1.0, %v7820_v54  ;;  %v10438_v21 = vpop.f32.mrf.mxu0  ;;  %v2360_v56 = vadd.f32 %v2232_v60, %v10352_v12 }
 0x214   : > { %v2107_v16 = vmul.f32 %v1979_v45, %v10419_v36  ;;  %v1980_v33 = vmul.f32 %v10429_v30, %v10429_v30  ;;  %v2736_v14 = vadd.f32 1.0, %v7822_v11  ;;  %v2361_v50 = vadd.f32 %v2233_v18, %v10360_v41  ;;  %v10456_v45 = vld [vmem:[%s8838_s29 + $0x18] sm:$0xff] }
 0x215   : > { %v10444_v15 = vpop.eup %7825  ;;  %v2991_v42 = vmul.f32 %v2863_v57, %v10157_v35  ;;  %v2993_v54 = vmul.f32 %v2865_v3, %v10169_v43  ;;  %v2862_v7 = vmul.f32 0.5, %v2734_v44  ;;  %v10449_v38 = vpop.f32.mrf.mxu0  ;;  %7829 = vtanh.f32 %v10386_v63 }
 0x216   : > { %v10451_v24 = vpop.eup %7827  ;;  %v2234_v60 = vmul.f32 0.044715, %v2106_v34  ;;  %v2108_v6 = vmul.f32 %v1980_v33, %v10429_v30  ;;  %v2864_v11 = vmul.f32 0.5, %v2736_v14  ;;  %7831 = vtanh.f32 %v2486_v8  ;;  %v10463_v34 = vpop.permute.xlu1 %1226  ;;  %v10466_v14 = vld [vmem:[%s8838_s29 + $0x10] sm:$0xff] }
 0x217   : > { %v1432_v18 = vmul.f32 %v10456_v45, %v1368_v25  ;;  %v2235_v35 = vmul.f32 0.044715, %v2107_v16  ;;  %v3101_v57 = vpack.c.bf16 %v2993_v54, %v2991_v42  ;;  %v10459_v43 = vpop.f32.mrf.mxu0  ;;  %v2487_v3 = vmul.f32 0.7978846, %v2359_v10  ;;  %14810 = vst [vmem:[#allocation120_spill] sm:$0xff] %v10463_v34  ;;  %v10473_v16 = vpop.permute.xlu0 %841 }
 0x218   : > { %v2236_v44 = vmul.f32 0.044715, %v2108_v6  ;;  %v2990_v37 = vmul.f32 %v2862_v7, %v10131_v13  ;;  %v2992_v63 = vmul.f32 %v2864_v11, %v10174_v48  ;;  %v2488_v4 = vmul.f32 0.7978846, %v2360_v56  ;;  %14811 = vst [vmem:[#allocation121_spill] sm:$0xff] %v10473_v16  ;;  %v14812_v7 = vld [vmem:[#allocation23_spill] sm:$0xff] }
 0x219   : > { %v2489_v33 = vmul.f32 0.7978846, %v2361_v50  ;;  %v1431_v8 = vmul.f32 %v10466_v14, %v1367_v17  ;;  %3378 = vmatprep.mubr.bf16.mxu1 %v3101_v57  ;;  %v10471_v25 = vadd.f32 %v10344_v27, %v9429_v62  ;;  %v2362_v10 = vadd.f32 %v2234_v60, %v10404_v5  ;;  %v10487_v54 = vpop.f32.mrf.mxu0 }
 0x21a   : > { %v3100_v13 = vpack.c.bf16 %v2992_v63, %v2990_v37  ;;  %v913_v48 = vmul.f32 %v8804_v53, %v10431_v28  ;;  %v10480_v56 = vadd.f32 %v10362_v47, %v9411_v49  ;;  %v2363_v50 = vadd.f32 %v2235_v35, %v10419_v36  ;;  %v10505_v63 = vpop.permute.xlu1 %1230  ;;  %v14815_v28 = vld [vmem:[#allocation24_spill] sm:$0xff] }
 0x21b   : > { %v1981_v17 = vmul.f32 %v10471_v25, %v10471_v25  ;;  %v914_v27 = vmul.f32 %v8804_v53, %v10436_v1  ;;  %v1466_v42 = vpack.c.bf16 %v1432_v18, %v1431_v8  ;;  %v3722_v37 = vmul.f32 %v9364_v61, %v14812_v7  ;;  %14813 = vst [vmem:[#allocation23_spill] sm:$0xff] %v10505_v63 }
 0x21c   : > { %7833 = vtanh.f32 %v2487_v3  ;;  %v2364_v60 = vadd.f32 %v2236_v44, %v10429_v30  ;;  %3379 = vmatmul.mubr.bf16.gmra.mxu1 %v3100_v13  ;;  %v1982_v47 = vmul.f32 %v10480_v56, %v10480_v56  ;;  %v10497_v11 = vadd.f32 %v10379_v23, %v9429_v62 }
 0x21d   : > { %7835 = vtanh.f32 %v2488_v4  ;;  %v2109_v6 = vmul.f32 %v1981_v17, %v10471_v25  ;;  %1900 = vmatmul.mubr.bf16.gmra.mxu0 %v1466_v42  ;;  %v915_v18 = vmul.f32 %v8804_v53, %v10473_v16  ;;  %v10501_v35 = vpop.f32.mrf.mxu0  ;;  %v2490_v57 = vmul.f32 0.7978846, %v2362_v10  ;;  %v10511_v17 = vpop.permute.xlu0 %1234 }
 0x21e   : > { %7837 = vtanh.f32 %v2489_v33  ;;  %v981_v3 = vadd.f32 %v10054_v59, %v913_v48  ;;  %v2110_v44 = vmul.f32 %v1982_v47, %v10480_v56  ;;  %1909 = vmatprep.mubr.bf16.mxu0 %v14676_v32  ;;  %v2491_v4 = vmul.f32 0.7978846, %v2363_v50  ;;  %14814 = vst [vmem:[#allocation122_spill] sm:$0xff] %v10511_v17 }
 0x21f   : > { %v2237_v8 = vmul.f32 0.044715, %v2109_v6  ;;  %v982_v23 = vadd.f32 %v10054_v59, %v914_v27  ;;  %v1983_v13 = vmul.f32 %v10497_v11, %v10497_v11  ;;  %v2492_v42 = vmul.f32 0.7978846, %v2364_v60  ;;  %v10524_v6 = vpop.f32.mrf.mxu0 }
 0x220   : > { %v2238_v33 = vmul.f32 0.044715, %v2110_v44  ;;  %v1305_v10 = vmul.f32 %v8818_v58, %v10463_v34  ;;  %v10517_v48 = vadd.f32 %v10406_v26, %v9411_v49  ;;  %v983_v27 = vadd.f32 %v10054_v59, %v915_v18 }
 0x221   : > { %v2365_v7 = vadd.f32 %v2237_v8, %v10471_v25  ;;  %v2111_v50 = vmul.f32 %v1983_v13, %v10497_v11  ;;  %v1306_v47 = vmul.f32 %v8818_v58, %v10505_v63  ;;  %v10531_v26 = vadd.f32 %v10422_v52, %v9429_v62 }
 0x222   : > { %v2366_v60 = vadd.f32 %v2238_v33, %v10480_v56  ;;  %v1984_v44 = vmul.f32 %v10517_v48, %v10517_v48  ;;  %v1307_v8 = vmul.f32 %v8818_v58, %v10511_v17  ;;  %v7830_v13 = vpop.eup %7829  ;;  %7839 = vtanh.f32 %v2490_v57 }
 0x223   : > { %v2493_v18 = vmul.f32 0.7978846, %v2365_v7  ;;  %v2239_v34 = vmul.f32 0.044715, %v2111_v50  ;;  %v1370_v16 = vadd.f32 %v1306_v47, %v982_v23  ;;  %v10535_v63 = vpop.eup %7831  ;;  %v10538_v1 = vadd.f32 %v10092_v39, %v3722_v37  ;;  %v10548_v23 = vpop.permute.xlu1 %846 }
 0x224   : > { %7841 = vtanh.f32 %v2491_v4  ;;  %v2112_v33 = vmul.f32 %v1984_v44, %v10517_v48  ;;  %v1985_v52 = vmul.f32 %v10531_v26, %v10531_v26  ;;  %v10545_v61 = vmul.f32 %v14765_v2, %v14815_v28  ;;  %14817 = vst [vmem:[#allocation123_spill] sm:$0xff] %v10548_v23  ;;  %v10550_v50 = vpop.f32.mrf.mxu0 }
 0x225   : > { %7843 = vtanh.f32 %v2492_v42  ;;  %v1369_v57 = vadd.f32 %v1305_v10, %v981_v3  ;;  %v2367_v7 = vadd.f32 %v2239_v34, %v10497_v11  ;;  %v2494_v39 = vmul.f32 0.7978846, %v2366_v60 }
 0x226   : > { %14816 = vst [vmem:[#allocation24_spill] sm:$0xff] %v10545_v61  ;;  %v2240_v37 = vmul.f32 0.044715, %v2112_v33  ;;  %v2113_v4 = vmul.f32 %v1985_v52, %v10531_v26  ;;  %v1371_v47 = vadd.f32 %v1307_v8, %v983_v27  ;;  %7845 = vtanh.f32 %v2493_v18  ;;  %v10560_v8 = vpop.f32.mrf.mxu0 }
 0x227   : > { %v1434_v44 = vmul.f32 %v10209_v19, %v1370_v16  ;;  %v2739_v17 = vadd.f32 1.0, %v10444_v15  ;;  %v2741_v28 = vadd.f32 1.0, %v7830_v13  ;;  %v2738_v34 = vadd.f32 1.0, %v10434_v20 }
 0x228   : > { %v2368_v42 = vadd.f32 %v2240_v37, %v10517_v48  ;;  %v2241_v3 = vmul.f32 0.044715, %v2113_v4  ;;  %v2740_v10 = vadd.f32 1.0, %v10451_v24  ;;  %v2495_v61 = vmul.f32 0.7978846, %v2367_v7  ;;  %v10566_v7 = vpop.permute.xlu1 %1238 }
 0x229   : > { %v7834_v2 = vpop.eup %7833  ;;  %v2867_v60 = vmul.f32 0.5, %v2739_v17  ;;  %v2869_v33 = vmul.f32 0.5, %v2741_v28  ;;  %v916_v27 = vmul.f32 %v8804_v53, %v10548_v23  ;;  %v2866_v13 = vmul.f32 0.5, %v2738_v34  ;;  %14818 = vst [vmem:[#allocation124_spill] sm:$0xff] %v10566_v7 }
 0x22a   : > { %v7836_v19 = vpop.eup %7835  ;;  %v2496_v16 = vmul.f32 0.7978846, %v2368_v42  ;;  %v2369_v15 = vadd.f32 %v2241_v3, %v10531_v26  ;;  %v2868_v18 = vmul.f32 0.5, %v2740_v10  ;;  %7847 = vtanh.f32 %v2494_v39 }
 0x22b   : > { %v7838_v52 = vpop.eup %7837  ;;  %v1433_v20 = vmul.f32 %v10205_v29, %v1369_v57  ;;  %v2995_v24 = vmul.f32 %v2867_v60, %v10222_v46  ;;  %v2997_v17 = vmul.f32 %v2869_v33, %v10262_v55  ;;  %v10568_v37 = vpop.f32.mrf.mxu0  ;;  %v10571_v4 = vmul.f32 %v10291_v22, %v1371_v47 }
 0x22c   : > { %v2497_v53 = vmul.f32 0.7978846, %v2369_v15  ;;  %v2994_v28 = vmul.f32 %v2866_v13, %v10202_v9  ;;  %v2996_v42 = vmul.f32 %v2868_v18, %v10233_v51  ;;  %7849 = vtanh.f32 %v2495_v61 }
 0x22d   : > { %v3103_v39 = vpack.c.bf16 %v2997_v17, %v2995_v24  ;;  %v10577_v29 = vadd.f32 %v10438_v21, %v9411_v49  ;;  %v1467_v46 = vpack.c.bf16 %v1434_v44, %v1433_v20  ;;  %v10579_v55 = vpop.f32.mrf.mxu0  ;;  %7851 = vtanh.f32 %v2496_v16 }
 0x22e   : > { %v3102_v57 = vpack.c.bf16 %v2996_v42, %v2994_v28  ;;  %v984_v3 = vadd.f32 %v10054_v59, %v916_v27  ;;  %v1308_v22 = vmul.f32 %v8818_v58, %v10566_v7  ;;  %v10588_v61 = vadd.f32 %v10449_v38, %v9429_v62 }
 0x22f   : > { %3386 = vmatprep.mubr.bf16.mxu1 %v3103_v39  ;;  %v1986_v9 = vmul.f32 %v10577_v29, %v10577_v29  ;;  %1910 = vmatmul.mubr.bf16.gmra.mxu0 %v1467_v46  ;;  %v2743_v51 = vadd.f32 1.0, %v7834_v2  ;;  %v2745_v21 = vadd.f32 1.0, %v7838_v52  ;;  %v10590_v47 = vpop.eup %7839  ;;  %7853 = vtanh.f32 %v2497_v53  ;;  %v10601_v33 = vpop.f32.mrf.mxu0 }
 0x230   : > { %3387 = vmatmul.mubr.bf16.gmra.mxu1 %v3102_v57  ;;  %v1372_v44 = vadd.f32 %v1308_v22, %v984_v3  ;;  %v10594_v59 = vadd.f32 %v10459_v43, %v9411_v49  ;;  %v2742_v58 = vadd.f32 1.0, %v10535_v63  ;;  %1919 = vmatprep.mubr.bf16.mxu0 %v14676_v32  ;;  %v1987_v2 = vmul.f32 %v10588_v61, %v10588_v61 }
 0x231   : > { %v7842_v34 = vpop.eup %7841  ;;  %v2114_v10 = vmul.f32 %v1986_v9, %v10577_v29  ;;  %v2871_v38 = vmul.f32 0.5, %v2743_v51  ;;  %v2873_v60 = vmul.f32 0.5, %v2745_v21  ;;  %v2744_v63 = vadd.f32 1.0, %v7836_v19 }
 0x232   : > { %v10603_v27 = vpop.eup %7843  ;;  %v1436_v16 = vmul.f32 %v10298_v31, %v1372_v44  ;;  %v1988_v43 = vmul.f32 %v10594_v59, %v10594_v59  ;;  %v2870_v15 = vmul.f32 0.5, %v2742_v58  ;;  %v2115_v18 = vmul.f32 %v1987_v2, %v10588_v61 }
 0x233   : > { %v2242_v13 = vmul.f32 0.044715, %v2114_v10  ;;  %v2999_v52 = vmul.f32 %v2871_v38, %v10321_v40  ;;  %v3001_v20 = vmul.f32 %v2873_v60, %v10360_v41  ;;  %v7846_v24 = vpop.eup %7845  ;;  %v2872_v53 = vmul.f32 0.5, %v2744_v63  ;;  %v10622_v40 = vpop.f32.mrf.mxu0 }
 0x234   : > { %v2116_v17 = vmul.f32 %v1988_v43, %v10594_v59  ;;  %v2998_v28 = vmul.f32 %v2870_v15, %v10288_v0  ;;  %v10615_v31 = vadd.f32 %v10487_v54, %v9429_v62  ;;  %v2243_v42 = vmul.f32 0.044715, %v2115_v18 }
 0x235   : > { %v2370_v19 = vadd.f32 %v2242_v13, %v10577_v29  ;;  %v3105_v39 = vpack.c.bf16 %v3001_v20, %v2999_v52  ;;  %v10620_v46 = vadd.f32 %v10501_v35, %v9411_v49  ;;  %v3000_v57 = vmul.f32 %v2872_v53, %v10352_v12  ;;  %v10635_v51 = vpop.f32.mrf.mxu0 }
 0x236   : > { %v2244_v41 = vmul.f32 0.044715, %v2116_v17  ;;  %v1989_v0 = vmul.f32 %v10615_v31, %v10615_v31  ;;  %v1468_v3 = vpack.c.bf16 %v1436_v16, %v10571_v4  ;;  %v2371_v22 = vadd.f32 %v2243_v42, %v10588_v61 }
 0x237   : > { %v2498_v54 = vmul.f32 0.7978846, %v2370_v19  ;;  %3394 = vmatprep.mubr.bf16.mxu1 %v3105_v39  ;;  %v1990_v9 = vmul.f32 %v10620_v46, %v10620_v46  ;;  %v10633_v35 = vadd.f32 %v10524_v6, %v9429_v62  ;;  %v10637_v21 = vpop.eup %7847  ;;  %v3104_v44 = vpack.c.bf16 %v3000_v57, %v2998_v28  ;;  %v10656_v52 = vpop.f32.mrf.mxu0 }
 0x238   : > { %v2372_v12 = vadd.f32 %v2244_v41, %v10594_v59  ;;  %v2117_v4 = vmul.f32 %v1989_v0, %v10615_v31  ;;  %1920 = vmatmul.mubr.bf16.gmra.mxu0 %v1468_v3  ;;  %v10643_v58 = vadd.f32 %v10550_v50, %v9411_v49  ;;  %v2499_v10 = vmul.f32 0.7978846, %v2371_v22 }
 0x239   : > { %7855 = vtanh.f32 %v2498_v54  ;;  %v2118_v2 = vmul.f32 %v1990_v9, %v10620_v46  ;;  %v1991_v6 = vmul.f32 %v10633_v35, %v10633_v35  ;;  %4205 = vmatprep.mubr.bf16.mxu0 %v14676_v32  ;;  %v7850_v38 = vpop.eup %7849  ;;  %3395 = vmatmul.mubr.bf16.gmra.mxu1 %v3104_v44  ;;  %v10653_v50 = vadd.f32 %v10560_v8, %v9429_v62 }
 0x23a   : > { %v2500_v60 = vmul.f32 0.7978846, %v2372_v12  ;;  %v2245_v16 = vmul.f32 0.044715, %v2117_v4  ;;  %v1992_v43 = vmul.f32 %v10643_v58, %v10643_v58  ;;  %v7852_v63 = vpop.eup %7851  ;;  %7857 = vtanh.f32 %v2499_v10  ;;  %v10667_v12 = vpop.f32.mrf.mxu0 }
 0x23b   : > { %v2246_v15 = vmul.f32 0.044715, %v2118_v2  ;;  %v2119_v13 = vmul.f32 %v1991_v6, %v10633_v35  ;;  %v2747_v18 = vadd.f32 1.0, %v7842_v34  ;;  %v1993_v53 = vmul.f32 %v10653_v50, %v10653_v50 }
 0x23c   : > { %7859 = vtanh.f32 %v2500_v60  ;;  %v2373_v20 = vadd.f32 %v2245_v16, %v10615_v31  ;;  %v2120_v17 = vmul.f32 %v1992_v43, %v10643_v58  ;;  %v7854_v28 = vpop.eup %7853  ;;  %v2749_v42 = vadd.f32 1.0, %v7846_v24 }
 0x23d   : > { %v2374_v8 = vadd.f32 %v2246_v15, %v10620_v46  ;;  %v2247_v19 = vmul.f32 0.044715, %v2119_v13  ;;  %v2875_v39 = vmul.f32 0.5, %v2747_v18  ;;  %v2121_v34 = vmul.f32 %v1993_v53, %v10653_v50  ;;  %v10682_v13 = vpop.f32.mrf.mxu0 }
 0x23e   : > { %v2501_v41 = vmul.f32 0.7978846, %v2373_v20  ;;  %v2248_v57 = vmul.f32 0.044715, %v2120_v17  ;;  %v2746_v0 = vadd.f32 1.0, %v10590_v47  ;;  %v2877_v22 = vmul.f32 0.5, %v2749_v42 }
 0x23f   : > { %v2502_v3 = vmul.f32 0.7978846, %v2374_v8  ;;  %v2375_v54 = vadd.f32 %v2247_v19, %v10633_v35  ;;  %v3003_v9 = vmul.f32 %v2875_v39, %v10419_v36  ;;  %v2249_v4 = vmul.f32 0.044715, %v2121_v34 }
 0x240   : > { %7861 = vtanh.f32 %v2501_v41  ;;  %v2376_v44 = vadd.f32 %v2248_v57, %v10643_v58  ;;  %v2748_v24 = vadd.f32 1.0, %v10603_v27  ;;  %v3005_v2 = vmul.f32 %v2877_v22, %v10471_v25 }
 0x241   : > { %7863 = vtanh.f32 %v2502_v3  ;;  %v2503_v10 = vmul.f32 0.7978846, %v2375_v54  ;;  %v2874_v6 = vmul.f32 0.5, %v2746_v0  ;;  %v2377_v60 = vadd.f32 %v2249_v4, %v10653_v50 }
 0x242   : > { %v2504_v47 = vmul.f32 0.7978846, %v2376_v44  ;;  %v2876_v16 = vmul.f32 0.5, %v2748_v24  ;;  %v10675_v36 = vadd.f32 %v10568_v37, %v9411_v49  ;;  %v3107_v43 = vpack.c.bf16 %v3005_v2, %v3003_v9 }
 0x243   : > { %7865 = vtanh.f32 %v2503_v10  ;;  %v3002_v15 = vmul.f32 %v2874_v6, %v10404_v5  ;;  %v10680_v27 = vadd.f32 %v10579_v55, %v9429_v62  ;;  %v2505_v25 = vmul.f32 0.7978846, %v2377_v60  ;;  %v10693_v55 = vpop.f32.mrf.mxu0 }
 0x244   : > { %7867 = vtanh.f32 %v2504_v47  ;;  %v3004_v18 = vmul.f32 %v2876_v16, %v10429_v30  ;;  %v1994_v20 = vmul.f32 %v10675_v36, %v10675_v36  ;;  %3402 = vmatprep.mubr.bf16.mxu1 %v3107_v43  ;;  %v2751_v17 = vadd.f32 1.0, %v7850_v38 }
 0x245   : > { %v1995_v37 = vmul.f32 %v10680_v27, %v10680_v27  ;;  %v2753_v53 = vadd.f32 1.0, %v7854_v28  ;;  %v10691_v5 = vadd.f32 %v10601_v33, %v9411_v49  ;;  %7869 = vtanh.f32 %v2505_v25  ;;  %v10711_v4 = vpop.f32.mrf.mxu0 }
 0x246   : > { %v10695_v8 = vpop.eup %7855  ;;  %v3106_v19 = vpack.c.bf16 %v3004_v18, %v3002_v15  ;;  %v2122_v30 = vmul.f32 %v1994_v20, %v10675_v36  ;;  %v2750_v42 = vadd.f32 1.0, %v10637_v21  ;;  %v2879_v41 = vmul.f32 0.5, %v2751_v17 }
 0x247   : > { %v2123_v39 = vmul.f32 %v1995_v37, %v10680_v27  ;;  %v2881_v57 = vmul.f32 0.5, %v2753_v53  ;;  %v1996_v38 = vmul.f32 %v10691_v5, %v10691_v5  ;;  %v7858_v28 = vpop.eup %7857  ;;  %v2752_v34 = vadd.f32 1.0, %v7852_v63  ;;  %v1795_v20 = vpop.f32.mrf.mxu0 }
 0x248   : > { %3403 = vmatmul.mubr.bf16.gmra.mxu1 %v3106_v19  ;;  %v2250_v33 = vmul.f32 0.044715, %v2122_v30  ;;  %v2878_v0 = vmul.f32 0.5, %v2750_v42  ;;  %v10704_v3 = vadd.f32 %v10622_v40, %v9429_v62  ;;  %v3007_v21 = vmul.f32 %v2879_v41, %v10497_v11 }
 0x249   : > { %v10706_v54 = vpop.eup %7859  ;;  %v2251_v22 = vmul.f32 0.044715, %v2123_v39  ;;  %v3009_v9 = vmul.f32 %v2881_v57, %v10531_v26  ;;  %v2124_v44 = vmul.f32 %v1996_v38, %v10691_v5  ;;  %v2880_v10 = vmul.f32 0.5, %v2752_v34 }
 0x24a   : > { %v2378_v24 = vadd.f32 %v2250_v33, %v10675_v36  ;;  %v3006_v63 = vmul.f32 %v2878_v0, %v10480_v56  ;;  %v1997_v40 = vmul.f32 %v10704_v3, %v10704_v3  ;;  %v10720_v11 = vadd.f32 %v10635_v51, %v9411_v49 }
 0x24b   : > { %v2379_v2 = vadd.f32 %v2251_v22, %v10680_v27  ;;  %v3109_v6 = vpack.c.bf16 %v3009_v9, %v3007_v21  ;;  %v2252_v47 = vmul.f32 0.044715, %v2124_v44  ;;  %v3008_v60 = vmul.f32 %v2880_v10, %v10517_v48  ;;  %v1797_v22 = vpop.f32.mrf.mxu0 }
 0x24c   : > { %v2506_v26 = vmul.f32 0.7978846, %v2378_v24  ;;  %v2125_v16 = vmul.f32 %v1997_v40, %v10704_v3  ;;  %v10726_v43 = vadd.f32 %v10656_v52, %v9429_v62  ;;  %v1998_v18 = vmul.f32 %v10720_v11, %v10720_v11 }
 0x24d   : > { %v7862_v56 = vpop.eup %7861  ;;  %v2507_v15 = vmul.f32 0.7978846, %v2379_v2  ;;  %3410 = vmatprep.mubr.bf16.mxu1 %v3109_v6  ;;  %v2380_v25 = vadd.f32 %v2252_v47, %v10691_v5  ;;  %v10733_v51 = vadd.f32 %v10667_v12, %v9411_v49  ;;  %v3108_v37 = vpack.c.bf16 %v3008_v60, %v3006_v63  ;;  %v1801_v2 = vpop.f32.mrf.mxu0 }
 0x24e   : > { %v10735_v48 = vpop.eup %7863  ;;  %7871 = vtanh.f32 %v2506_v26  ;;  %v2253_v17 = vmul.f32 0.044715, %v2125_v16  ;;  %v1999_v52 = vmul.f32 %v10726_v43, %v10726_v43  ;;  %v2126_v19 = vmul.f32 %v1998_v18, %v10720_v11 }
 0x24f   : > { %7873 = vtanh.f32 %v2507_v15  ;;  %v2508_v53 = vmul.f32 0.7978846, %v2380_v25  ;;  %v2000_v30 = vmul.f32 %v10733_v51, %v10733_v51  ;;  %v10746_v41 = vadd.f32 %v10682_v13, %v9429_v62 }
 0x250   : > { %v7866_v42 = vpop.eup %7865  ;;  %3411 = vmatmul.mubr.bf16.gmra.mxu1 %v3108_v37  ;;  %v2381_v12 = vadd.f32 %v2253_v17, %v10704_v3  ;;  %v2127_v39 = vmul.f32 %v1999_v52, %v10726_v43  ;;  %v2755_v57 = vadd.f32 1.0, %v7858_v28  ;;  %v2254_v33 = vmul.f32 0.044715, %v2126_v19  ;;  %v1803_v19 = vpop.f32.mrf.mxu0 }
 0x251   : > { %v7868_v38 = vpop.eup %7867  ;;  %7875 = vtanh.f32 %v2508_v53  ;;  %v2128_v34 = vmul.f32 %v2000_v30, %v10733_v51  ;;  %v2757_v0 = vadd.f32 1.0, %v7862_v56  ;;  %v2001_v44 = vmul.f32 %v10746_v41, %v10746_v41 }
 0x252   : > { %v2509_v21 = vmul.f32 0.7978846, %v2381_v12  ;;  %v2255_v9 = vmul.f32 0.044715, %v2127_v39  ;;  %v2883_v24 = vmul.f32 0.5, %v2755_v57  ;;  %v7870_v10 = vpop.eup %7869  ;;  %v2382_v63 = vadd.f32 %v2254_v33, %v10720_v11 }
 0x253   : > { %v2256_v40 = vmul.f32 0.044715, %v2128_v34  ;;  %v2885_v13 = vmul.f32 0.5, %v2757_v0  ;;  %v2754_v28 = vadd.f32 1.0, %v10695_v8  ;;  %v2129_v47 = vmul.f32 %v2001_v44, %v10746_v41  ;;  %v1805_v44 = vpop.f32.mrf.mxu0 }
 0x254   : > { %7877 = vtanh.f32 %v2509_v21  ;;  %v2383_v6 = vadd.f32 %v2255_v9, %v10726_v43  ;;  %v3011_v26 = vmul.f32 %v2883_v24, %v10588_v61  ;;  %v2510_v60 = vmul.f32 0.7978846, %v2382_v63 }
 0x255   : > { %v2384_v16 = vadd.f32 %v2256_v40, %v10733_v51  ;;  %v3013_v56 = vmul.f32 %v2885_v13, %v10615_v31  ;;  %v2756_v15 = vadd.f32 1.0, %v10706_v54  ;;  %v2257_v18 = vmul.f32 0.044715, %v2129_v47 }
 0x256   : > { %v2511_v25 = vmul.f32 0.7978846, %v2383_v6  ;;  %v2882_v37 = vmul.f32 0.5, %v2754_v28  ;;  %v10761_v8 = vadd.f32 %v10693_v55, %v9411_v49  ;;  %7879 = vtanh.f32 %v2510_v60 }
 0x257   : > { %v2512_v17 = vmul.f32 0.7978846, %v2384_v16  ;;  %v3111_v52 = vpack.c.bf16 %v3013_v56, %v3011_v26  ;;  %v2884_v53 = vmul.f32 0.5, %v2756_v15  ;;  %v2385_v61 = vadd.f32 %v2257_v18, %v10746_v41 }
 0x258   : > { %7881 = vtanh.f32 %v2511_v25  ;;  %v3010_v30 = vmul.f32 %v2882_v37, %v10577_v29  ;;  %v2002_v31 = vmul.f32 %v10761_v8, %v10761_v8  ;;  %v10770_v55 = vadd.f32 %v10711_v4, %v9429_v62 }
 0x259   : > { %7883 = vtanh.f32 %v2512_v17  ;;  %3418 = vmatprep.mubr.bf16.mxu1 %v3111_v52  ;;  %v3012_v54 = vmul.f32 %v2884_v53, %v10594_v59  ;;  %v2759_v12 = vadd.f32 1.0, %v7866_v42  ;;  %v2513_v39 = vmul.f32 0.7978846, %v2385_v61 }
 0x25a   : > { %v2130_v57 = vmul.f32 %v2002_v31, %v10761_v8  ;;  %v2761_v33 = vadd.f32 1.0, %v7870_v10  ;;  %v10774_v34 = vadd.f32 %v1795_v20, %v9411_v49  ;;  %v2003_v21 = vmul.f32 %v10770_v55, %v10770_v55 }
 0x25b   : > { %v10776_v29 = vpop.eup %7871  ;;  %v3110_v0 = vpack.c.bf16 %v3012_v54, %v3010_v30  ;;  %v2887_v9 = vmul.f32 0.5, %v2759_v12  ;;  %v2758_v59 = vadd.f32 1.0, %v10735_v48  ;;  %7885 = vtanh.f32 %v2513_v39 }
 0x25c   : > { %v7874_v4 = vpop.eup %7873  ;;  %v2258_v42 = vmul.f32 0.044715, %v2130_v57  ;;  %v2889_v24 = vmul.f32 0.5, %v2761_v33  ;;  %v2004_v10 = vmul.f32 %v10774_v34, %v10774_v34  ;;  %v2131_v20 = vmul.f32 %v2003_v21, %v10770_v55 }
 0x25d   : > { %3419 = vmatmul.mubr.bf16.gmra.mxu1 %v3110_v0  ;;  %v3015_v63 = vmul.f32 %v2887_v9, %v10633_v35  ;;  %v2760_v40 = vadd.f32 1.0, %v7868_v38  ;;  %v2886_v13 = vmul.f32 0.5, %v2758_v59  ;;  %v10791_v26 = vadd.f32 %v1797_v22, %v9429_v62  ;;  %v1807_v35 = vpop.f32.mrf.mxu0 }
 0x25e   : > { %v10785_v28 = vpop.eup %7875  ;;  %v2386_v6 = vadd.f32 %v2258_v42, %v10761_v8  ;;  %v3017_v48 = vmul.f32 %v2889_v24, %v10653_v50  ;;  %v2132_v47 = vmul.f32 %v2004_v10, %v10774_v34  ;;  %v2259_v60 = vmul.f32 0.044715, %v2131_v20 }
 0x25f   : > { %v2888_v16 = vmul.f32 0.5, %v2760_v40  ;;  %v3014_v56 = vmul.f32 %v2886_v13, %v10620_v46  ;;  %v10795_v15 = vadd.f32 %v1801_v2, %v9411_v49  ;;  %v2005_v37 = vmul.f32 %v10791_v26, %v10791_v26 }
 0x260   : > { %v2514_v38 = vmul.f32 0.7978846, %v2386_v6  ;;  %v3113_v25 = vpack.c.bf16 %v3017_v48, %v3015_v63  ;;  %v2260_v18 = vmul.f32 0.044715, %v2132_v47  ;;  %v3308_v50 = vpop.f32.mrf.mxu1  ;;  %v2387_v52 = vadd.f32 %v2259_v60, %v10770_v55 }
 0x261   : > { %v7878_v17 = vpop.eup %7877  ;;  %v3016_v22 = vmul.f32 %v2888_v16, %v10643_v58  ;;  %v2006_v53 = vmul.f32 %v10795_v15, %v10795_v15  ;;  %v10804_v46 = vadd.f32 %v1803_v19, %v9429_v62  ;;  %v1811_v2 = vpop.f32.mrf.mxu0  ;;  %v2133_v30 = vmul.f32 %v2005_v37, %v10791_v26 }
 0x262   : > { %7887 = vtanh.f32 %v2514_v38  ;;  %3426 = vmatprep.mubr.bf16.mxu1 %v3113_v25  ;;  %v2388_v61 = vadd.f32 %v2260_v18, %v10774_v34  ;;  %v10809_v31 = vadd.f32 %v1805_v44, %v9411_v49  ;;  %v3310_v54 = vpop.f32.mrf.mxu1  ;;  %v2515_v12 = vmul.f32 0.7978846, %v2387_v52 }
 0x263   : > { %v3112_v39 = vpack.c.bf16 %v3016_v22, %v3014_v56  ;;  %v2134_v58 = vmul.f32 %v2006_v53, %v10795_v15  ;;  %v2007_v57 = vmul.f32 %v10804_v46, %v10804_v46  ;;  %v10814_v19 = vpop.eup %7879  ;;  %v2261_v0 = vmul.f32 0.044715, %v2133_v30  ;;  %v1813_v44 = vpop.f32.mrf.mxu0 }
 0x264   : > { %v2516_v33 = vmul.f32 0.7978846, %v2388_v61  ;;  %v2008_v21 = vmul.f32 %v10809_v31, %v10809_v31  ;;  %v10819_v9 = vadd.f32 %v1807_v35, %v9429_v62  ;;  %v3311_v59 = vpop.f32.mrf.mxu1  ;;  %7889 = vtanh.f32 %v2515_v12 }
 0x265   : > { %v7882_v42 = vpop.eup %7881  ;;  %3427 = vmatmul.mubr.bf16.gmra.mxu1 %v3112_v39  ;;  %v2262_v24 = vmul.f32 0.044715, %v2134_v58  ;;  %v2135_v10 = vmul.f32 %v2007_v57, %v10804_v46  ;;  %v2763_v20 = vadd.f32 1.0, %v7874_v4  ;;  %v2389_v40 = vadd.f32 %v2261_v0, %v10791_v26  ;;  %v1815_v18 = vpop.f32.mrf.mxu0  ;;  %v14819_v0 = vld [vmem:[#allocation114_spill] sm:$0xff] }
 0x266   : > { %v10822_v63 = vpop.eup %7883  ;;  %7891 = vtanh.f32 %v2516_v33  ;;  %v2136_v13 = vmul.f32 %v2008_v21, %v10809_v31  ;;  %v2009_v6 = vmul.f32 %v10819_v9, %v10819_v9  ;;  %v3313_v48 = vpop.f32.mrf.mxu1  ;;  %v2765_v16 = vadd.f32 1.0, %v7878_v17 }
 0x267   : > { %v2390_v47 = vadd.f32 %v2262_v24, %v10795_v15  ;;  %v2263_v60 = vmul.f32 0.044715, %v2135_v10  ;;  %v2891_v56 = vmul.f32 0.5, %v2763_v20  ;;  %v2517_v35 = vmul.f32 0.7978846, %v2389_v40  ;;  %v1817_v24 = vpop.f32.mrf.mxu0 }
 0x268   : > { %v2264_v38 = vmul.f32 0.044715, %v2136_v13  ;;  %v2137_v4 = vmul.f32 %v2009_v6, %v10819_v9  ;;  %v2762_v25 = vadd.f32 1.0, %v10776_v29  ;;  %v7886_v37 = vpop.eup %7885  ;;  %v2893_v53 = vmul.f32 0.5, %v2765_v16  ;;  %v10839_v29 = vld [vmem:[%s14441_s7] ss:$0 sm:$0xff] }
 0x269   : > { %v2518_v52 = vmul.f32 0.7978846, %v2390_v47  ;;  %v2391_v22 = vadd.f32 %v2263_v60, %v10804_v46  ;;  %v3019_v61 = vmul.f32 %v2891_v56, %v10680_v27  ;;  %7893 = vtanh.f32 %v2517_v35  ;;  %v14821_v60 = vld [vmem:[#allocation115_spill] sm:$0xff] }
 0x26a   : > { %v2392_v30 = vadd.f32 %v2264_v38, %v10809_v31  ;;  %v2265_v54 = vmul.f32 0.044715, %v2137_v4  ;;  %v2764_v17 = vadd.f32 1.0, %v10785_v28  ;;  %v3021_v39 = vmul.f32 %v2893_v53, %v10704_v3 }
 0x26b   : > { %7895 = vtanh.f32 %v2518_v52  ;;  %v2519_v12 = vmul.f32 0.7978846, %v2391_v22  ;;  %v2890_v58 = vmul.f32 0.5, %v2762_v25  ;;  %v3563_v21 = vadd.f32 %v14819_v0, %v3308_v50 }
 0x26c   : > { %v2520_v57 = vmul.f32 0.7978846, %v2392_v30  ;;  %v2393_v33 = vadd.f32 %v2265_v54, %v10819_v9  ;;  %v2892_v27 = vmul.f32 0.5, %v2764_v17  ;;  %v3115_v10 = vpack.c.bf16 %v3021_v39, %v3019_v61  ;;  %v14824_v39 = vld [vmem:[#allocation60_spill] sm:$0xff] }
 0x26d   : > { %7897 = vtanh.f32 %v2519_v12  ;;  %v3018_v28 = vmul.f32 %v2890_v58, %v10675_v36  ;;  %v10845_v20 = vadd.f32 %v1811_v2, %v9411_v49  ;;  %v10849_v13 = vadd.f32 %v10839_v29, %v3563_v21  ;;  %v1821_v48 = vpop.f32.mrf.mxu0 }
 0x26e   : > { %7899 = vtanh.f32 %v2520_v57  ;;  %v2521_v3 = vmul.f32 0.7978846, %v2393_v33  ;;  %v3020_v40 = vmul.f32 %v2892_v27, %v10691_v5  ;;  %v3316_v6 = vpop.f32.mrf.mxu1  ;;  %3434 = vmatprep.mubr.bf16.mxu1 %v3115_v10  ;;  %v3564_v36 = vadd.f32 %v14821_v60, %v3311_v59  ;;  %v14822_v5 = vld [vmem:[#allocation59_spill] sm:$0xff] }
 0x26f   : > { %14820 = vst [vmem:[#allocation114_spill] sm:$0xff] %v10849_v13  ;;  %v10851_v47 = vpop.eup %7887  ;;  %v2010_v50 = vmul.f32 %v10845_v20, %v10845_v20  ;;  %v10857_v2 = vadd.f32 %v1813_v44, %v9429_v62  ;;  %v2767_v16 = vadd.f32 1.0, %v7882_v42  ;;  %v3967_v35 = vmul.f32 %v14822_v5, %v10849_v13  ;;  %v1823_v54 = vpop.f32.mrf.mxu0  ;;  %v14951_v13 = vld [vmem:[#allocation15_spill] sm:$0xff] }
 0x270   : > { %7901 = vtanh.f32 %v2521_v3  ;;  %v3114_v56 = vpack.c.bf16 %v3020_v40, %v3018_v28  ;;  %v2769_v38 = vadd.f32 1.0, %v7886_v37  ;;  %v3318_v4 = vpop.f32.mrf.mxu1  ;;  %v10863_v52 = vadd.f32 %v10839_v29, %v3564_v36 }
 0x271   : > { %v2138_v25 = vmul.f32 %v2010_v50, %v10845_v20  ;;  %v2011_v22 = vmul.f32 %v10857_v2, %v10857_v2  ;;  %v2895_v59 = vmul.f32 0.5, %v2767_v16  ;;  %v10867_v53 = vpop.eup %7889  ;;  %v10870_v42 = vadd.f32 %v1815_v18, %v9411_v49  ;;  %v1825_v60 = vpop.f32.mrf.mxu0 }
 0x272   : > { %14823 = vst [vmem:[#allocation115_spill] sm:$0xff] %v10863_v52  ;;  %3435 = vmatmul.mubr.bf16.gmra.mxu1 %v3114_v56  ;;  %v2897_v44 = vmul.f32 0.5, %v2769_v38  ;;  %v2766_v61 = vadd.f32 1.0, %v10814_v19  ;;  %v2768_v37 = vadd.f32 1.0, %v10822_v63  ;;  %v3319_v30 = vpop.f32.mrf.mxu1  ;;  %v3968_v58 = vmul.f32 %v14824_v39, %v10863_v52  ;;  %v14827_v39 = vld [vmem:[#allocation62_spill] sm:$0xff] }
 0x273   : > { %v10874_v17 = vpop.eup %7891  ;;  %v2266_v12 = vmul.f32 0.044715, %v2138_v25  ;;  %v2139_v57 = vmul.f32 %v2011_v22, %v10857_v2  ;;  %v3023_v33 = vmul.f32 %v2895_v59, %v10726_v43  ;;  %v2012_v18 = vmul.f32 %v10870_v42, %v10870_v42 }
 0x274   : > { %v3025_v27 = vmul.f32 %v2897_v44, %v10746_v41  ;;  %v2894_v19 = vmul.f32 0.5, %v2766_v61  ;;  %v2896_v0 = vmul.f32 0.5, %v2768_v37  ;;  %v3321_v63 = vpop.f32.mrf.mxu1  ;;  %v4031_v10 = vpack.c.bf16 %v3968_v58, %v3967_v35  ;;  %v1827_v61 = vpop.f32.mrf.mxu0 }
 0x275   : > { %v2394_v21 = vadd.f32 %v2266_v12, %v10845_v20  ;;  %v2267_v28 = vmul.f32 0.044715, %v2139_v57  ;;  %v10885_v3 = vadd.f32 %v1817_v24, %v9429_v62  ;;  %v2140_v50 = vmul.f32 %v2012_v18, %v10870_v42  ;;  %v14828_v18 = vld [vmem:[#allocation61_spill] sm:$0xff] }
 0x276   : > { %v3117_v40 = vpack.c.bf16 %v3025_v27, %v3023_v33  ;;  %v3022_v43 = vmul.f32 %v2894_v19, %v10720_v11  ;;  %v3024_v41 = vmul.f32 %v2896_v0, %v10733_v51  ;;  %v7894_v36 = vpop.eup %7893  ;;  %v3565_v35 = vadd.f32 %v10466_v14, %v3316_v6  ;;  %4206 = vmatmul.mubr.bf16.vlgmr.msra.gmra.mxu0 %v4031_v10 }
 0x277   : > { %v2522_v16 = vmul.f32 0.7978846, %v2394_v21  ;;  %v2395_v56 = vadd.f32 %v2267_v28, %v10857_v2  ;;  %v2013_v5 = vmul.f32 %v10885_v3, %v10885_v3  ;;  %v2268_v38 = vmul.f32 0.044715, %v2140_v50  ;;  %4215 = vmatprep.mubr.bf16.mxu0 %v14676_v32 }
 0x278   : > { %v10894_v24 = vpop.eup %7895  ;;  %3442 = vmatprep.mubr.bf16.mxu1 %v3117_v40  ;;  %v3116_v4 = vpack.c.bf16 %v3024_v41, %v3022_v43  ;;  %v10897_v11 = vadd.f32 %v1821_v48, %v9411_v49  ;;  %v3566_v51 = vadd.f32 %v10456_v45, %v3319_v30  ;;  %v10903_v59 = vadd.f32 %v10839_v29, %v3565_v35 }
 0x279   : > { %7903 = vtanh.f32 %v2522_v16  ;;  %v2523_v25 = vmul.f32 0.7978846, %v2395_v56  ;;  %v2141_v22 = vmul.f32 %v2013_v5, %v10885_v3  ;;  %v2396_v6 = vadd.f32 %v2268_v38, %v10870_v42 }
 0x27a   : > { %14825 = vst [vmem:[#allocation59_spill] sm:$0xff] %v10903_v59  ;;  %v10905_v14 = vpop.eup %7897  ;;  %3443 = vmatmul.mubr.bf16.gmra.mxu1 %v3116_v4  ;;  %v2014_v48 = vmul.f32 %v10897_v11, %v10897_v11  ;;  %v10911_v44 = vadd.f32 %v10839_v29, %v3566_v51  ;;  %v10914_v45 = vadd.f32 %v1823_v54, %v9429_v62  ;;  %v3324_v37 = vpop.f32.mrf.mxu1  ;;  %v2771_v40 = vadd.f32 1.0, %v10867_v53  ;;  %v10943_v53 = vld [vmem:[%s8838_s29 + $0x20] sm:$0xff] }
 0x27b   : > { %v10916_v30 = vpop.eup %7899  ;;  %7905 = vtanh.f32 %v2523_v25  ;;  %v2269_v12 = vmul.f32 0.044715, %v2141_v22  ;;  %v3969_v58 = vmul.f32 %v14827_v39, %v10903_v59  ;;  %v10921_v57 = vadd.f32 %v1825_v60, %v9411_v49 }
 0x27c   : > { %14826 = vst [vmem:[#allocation60_spill] sm:$0xff] %v10911_v44  ;;  %v2524_v33 = vmul.f32 0.7978846, %v2396_v6  ;;  %v2142_v27 = vmul.f32 %v2014_v48, %v10897_v11  ;;  %v3970_v19 = vmul.f32 %v14828_v18, %v10911_v44  ;;  %v2015_v54 = vmul.f32 %v10914_v45, %v10914_v45  ;;  %v3326_v0 = vpop.f32.mrf.mxu1 }
 0x27d   : > { %v10928_v63 = vpop.eup %7901  ;;  %v2397_v21 = vadd.f32 %v2269_v12, %v10885_v3  ;;  %v2016_v10 = vmul.f32 %v10921_v57, %v10921_v57  ;;  %v10934_v28 = vadd.f32 %v1827_v61, %v9429_v62  ;;  %v1831_v50 = vpop.f32.mrf.mxu0  ;;  %v2773_v38 = vadd.f32 1.0, %v7894_v36 }
 0x27e   : > { %7907 = vtanh.f32 %v2524_v33  ;;  %v2270_v43 = vmul.f32 0.044715, %v2142_v27  ;;  %v4032_v41 = vpack.c.bf16 %v3970_v19, %v3969_v58  ;;  %v2143_v60 = vmul.f32 %v2015_v54, %v10914_v45  ;;  %v3327_v16 = vpop.f32.mrf.mxu1 }
 0x27f   : > { %v2525_v56 = vmul.f32 0.7978846, %v2397_v21  ;;  %v2144_v5 = vmul.f32 %v2016_v10, %v10921_v57  ;;  %v2017_v35 = vmul.f32 %v10934_v28, %v10934_v28  ;;  %v1833_v4 = vpop.f32.mrf.mxu0  ;;  %v2899_v22 = vmul.f32 0.5, %v2771_v40  ;;  %v14830_v10 = vld [vmem:[#allocation65_spill] sm:$0xff] }
 0x280   : > { %v2398_v51 = vadd.f32 %v2270_v43, %v10897_v11  ;;  %v2271_v25 = vmul.f32 0.044715, %v2143_v60  ;;  %v3567_v6 = vadd.f32 %v10943_v53, %v3324_v37  ;;  %4216 = vmatmul.mubr.bf16.gmra.mxu0 %v4032_v41  ;;  %v3329_v48 = vpop.f32.mrf.mxu1  ;;  %v2901_v39 = vmul.f32 0.5, %v2773_v38 }
 0x281   : > { %7909 = vtanh.f32 %v2525_v56  ;;  %v2272_v61 = vmul.f32 0.044715, %v2144_v5  ;;  %v2145_v12 = vmul.f32 %v2017_v35, %v10934_v28  ;;  %4225 = vmatprep.mubr.bf16.mxu0 %v14676_v32  ;;  %v3027_v33 = vmul.f32 %v2899_v22, %v10770_v55  ;;  %v1835_v18 = vpop.f32.mrf.mxu0 }
 0x282   : > { %v2526_v58 = vmul.f32 0.7978846, %v2398_v51  ;;  %v2399_v36 = vadd.f32 %v2271_v25, %v10914_v45  ;;  %v10951_v27 = vadd.f32 %v10839_v29, %v3567_v6  ;;  %v3029_v54 = vmul.f32 %v2901_v39, %v10791_v26  ;;  %v10963_v26 = vld [vmem:[%s8838_s29 + $0x28] sm:$0xff] }
 0x283   : > { %v2400_v37 = vadd.f32 %v2272_v61, %v10921_v57  ;;  %v2273_v19 = vmul.f32 0.044715, %v2145_v12  ;;  %v2770_v0 = vadd.f32 1.0, %v10851_v47  ;;  %v2772_v43 = vadd.f32 1.0, %v10874_v17  ;;  %v1837_v25 = vpop.f32.mrf.mxu0 }
 0x284   : > { %14829 = vst [vmem:[#allocation62_spill] sm:$0xff] %v10951_v27  ;;  %7911 = vtanh.f32 %v2526_v58  ;;  %v2527_v21 = vmul.f32 0.7978846, %v2399_v36  ;;  %v3971_v40 = vmul.f32 %v14830_v10, %v10951_v27  ;;  %v3119_v60 = vpack.c.bf16 %v3029_v54, %v3027_v33 }
 0x285   : > { %v2528_v55 = vmul.f32 0.7978846, %v2400_v37  ;;  %v2401_v41 = vadd.f32 %v2273_v19, %v10934_v28  ;;  %v2898_v56 = vmul.f32 0.5, %v2770_v0  ;;  %v3332_v5 = vpop.f32.mrf.mxu1  ;;  %v2900_v38 = vmul.f32 0.5, %v2772_v43  ;;  %v14832_v37 = vld [vmem:[#allocation66_spill] sm:$0xff] }
 0x286   : > { %v10960_v35 = vpop.eup %7903  ;;  %7913 = vtanh.f32 %v2527_v21  ;;  %v3568_v47 = vadd.f32 %v10963_v26, %v3327_v16  ;;  %v10967_v51 = vadd.f32 %v1831_v50, %v9411_v49  ;;  %3450 = vmatprep.mubr.bf16.mxu1 %v3119_v60  ;;  %v10971_v6 = vadd.f32 %v1833_v4, %v9429_v62 }
 0x287   : > { %7915 = vtanh.f32 %v2528_v55  ;;  %v2529_v17 = vmul.f32 0.7978846, %v2401_v41  ;;  %v3026_v22 = vmul.f32 %v2898_v56, %v10761_v8  ;;  %v3334_v48 = vpop.f32.mrf.mxu1  ;;  %v3028_v12 = vmul.f32 %v2900_v38, %v10774_v34  ;;  %v10997_v55 = vld [vmem:[%s8838_s29 + $0x30] sm:$0xff] }
 0x288   : > { %v10973_v61 = vpop.eup %7905  ;;  %v10977_v39 = vadd.f32 %v10839_v29, %v3568_v47  ;;  %v2018_v50 = vmul.f32 %v10967_v51, %v10967_v51  ;;  %v2775_v16 = vadd.f32 1.0, %v10905_v14  ;;  %v1841_v58 = vpop.f32.mrf.mxu0  ;;  %v2019_v8 = vmul.f32 %v10971_v6, %v10971_v6 }
 0x289   : > { %7917 = vtanh.f32 %v2529_v17  ;;  %v2777_v4 = vadd.f32 1.0, %v10928_v63  ;;  %v10986_v36 = vadd.f32 %v1835_v18, %v9411_v49  ;;  %v3335_v34 = vpop.f32.mrf.mxu1  ;;  %v3118_v33 = vpack.c.bf16 %v3028_v12, %v3026_v22 }
 0x28a   : > { %14831 = vst [vmem:[#allocation61_spill] sm:$0xff] %v10977_v39  ;;  %v3972_v19 = vmul.f32 %v14832_v37, %v10977_v39  ;;  %v2146_v54 = vmul.f32 %v2018_v50, %v10967_v51  ;;  %v2903_v0 = vmul.f32 0.5, %v2775_v16  ;;  %v1843_v14 = vpop.f32.mrf.mxu0  ;;  %v2147_v10 = vmul.f32 %v2019_v8, %v10971_v6  ;;  %v14834_v37 = vld [vmem:[#allocation81_spill] sm:$0xff] }
 0x28b   : > { %v10991_v21 = vpop.eup %7907  ;;  %v2905_v43 = vmul.f32 0.5, %v2777_v4  ;;  %v2020_v63 = vmul.f32 %v10986_v36, %v10986_v36  ;;  %v3569_v18 = vadd.f32 %v10997_v55, %v3332_v5  ;;  %v3337_v41 = vpop.f32.mrf.mxu1  ;;  %3451 = vmatmul.mubr.bf16.gmra.mxu1 %v3118_v33  ;;  %v2774_v47 = vadd.f32 1.0, %v10894_v24 }
 0x28c   : > { %v4033_v60 = vpack.c.bf16 %v3972_v19, %v3971_v40  ;;  %v2274_v56 = vmul.f32 0.044715, %v2146_v54  ;;  %v3031_v38 = vmul.f32 %v2903_v0, %v10804_v46  ;;  %v2275_v17 = vmul.f32 0.044715, %v2147_v10  ;;  %v1845_v46 = vpop.f32.mrf.mxu0 }
 0x28d   : > { %v3033_v22 = vmul.f32 %v2905_v43, %v10819_v9  ;;  %v2148_v48 = vmul.f32 %v2020_v63, %v10986_v36  ;;  %v11005_v12 = vadd.f32 %v10839_v29, %v3569_v18  ;;  %v2776_v5 = vadd.f32 1.0, %v10916_v30  ;;  %v7727_v9 = vld [vmem:[%s14440_s6 + $0xb8] sm:$0xff]  }
 0x28e   : > { %v7910_v50 = vpop.eup %7909  ;;  %v2402_v16 = vadd.f32 %v2274_v56, %v10967_v51  ;;  %v2902_v8 = vmul.f32 0.5, %v2774_v47  ;;  %v11010_v40 = vadd.f32 %v1837_v25, %v9429_v62  ;;  %4226 = vmatmul.mubr.bf16.gmra.mxu0 %v4033_v60  ;;  %v2403_v24 = vadd.f32 %v2275_v17, %v10971_v6  ;;  %7491 = vmatpush1.bf16.msra.mxu1 %v7727_v9  ;;  %v11026_v18 = vld [vmem:[%s8838_s29 + $0x38] sm:$0xff]  ;;  %v1847_v47 = vpop.f32.mrf.mxu0 }
 0x28f   : > { %14833 = vst [vmem:[#allocation65_spill] sm:$0xff] %v11005_v12  ;;  %v3121_v4 = vpack.c.bf16 %v3033_v22, %v3031_v38  ;;  %v2276_v33 = vmul.f32 0.044715, %v2148_v48  ;;  %v3973_v19 = vmul.f32 %v14834_v37, %v11005_v12  ;;  %4235 = vmatprep.mubr.bf16.mxu0 %v14676_v32  ;;  %v2904_v54 = vmul.f32 0.5, %v2776_v5  ;;  %5872 = vmatpush1.bf16.msra.mxu0 %v7727_v9 }
 0x290   : > { %v2530_v30 = vmul.f32 0.7978846, %v2402_v16  ;;  %v3030_v25 = vmul.f32 %v2902_v8, %v10795_v15  ;;  %v2021_v0 = vmul.f32 %v11010_v40, %v11010_v40  ;;  %v2531_v43 = vmul.f32 0.7978846, %v2403_v24  ;;  %7476 = vmatprep.subr.bf16.mxu1 %v14676_v32  ;;  %5873 = vmatprep.subr.bf16.mxu0 %v14676_v32  ;;  %v14836_v8 = vld [vmem:[#allocation72_spill] sm:$0xff] }
 0x291   : > { %v11022_v10 = vpop.eup %7911  ;;  %3458 = vmatprep.mubr.bf16.mxu1 %v3121_v4  ;;  %v2404_v63 = vadd.f32 %v2276_v33, %v10986_v36  ;;  %v3570_v41 = vadd.f32 %v11026_v18, %v3335_v34  ;;  %v11030_v60 = vadd.f32 %v1841_v58, %v9411_v49  ;;  %v3032_v15 = vmul.f32 %v2904_v54, %v10809_v31 }
 0x292   : > { %7919 = vtanh.f32 %v2530_v30  ;;  %v2149_v56 = vmul.f32 %v2021_v0, %v11010_v40  ;;  %v11036_v38 = vadd.f32 %v1843_v14, %v9429_v62  ;;  %v11051_v5 = vadd.f32 %v1845_v46, %v9411_v49 }
 0x293   : > { %v11039_v17 = vpop.eup %7913  ;;  %7921 = vtanh.f32 %v2531_v43  ;;  %v2532_v34 = vmul.f32 0.7978846, %v2404_v63  ;;  %v11042_v58 = vadd.f32 %v10839_v29, %v3570_v41  ;;  %v2022_v22 = vmul.f32 %v11030_v60, %v11030_v60 }
 0x294   : > { %v11046_v48 = vpop.eup %7915  ;;  %v3120_v31 = vpack.c.bf16 %v3032_v15, %v3030_v25  ;;  %v2277_v16 = vmul.f32 0.044715, %v2149_v56  ;;  %v2023_v14 = vmul.f32 %v11036_v38, %v11036_v38  ;;  %v11057_v4 = vadd.f32 %v1847_v47, %v9429_v62 }
 0x295   : > { %14835 = vst [vmem:[#allocation66_spill] sm:$0xff] %v11042_v58  ;;  %7923 = vtanh.f32 %v2532_v34  ;;  %v3974_v9 = vmul.f32 %v14836_v8, %v11042_v58  ;;  %v2150_v24 = vmul.f32 %v2022_v22, %v11030_v60  ;;  %v2024_v46 = vmul.f32 %v11051_v5, %v11051_v5 }
 0x296   : > { %v11059_v33 = vpop.eup %7917  ;;  %3459 = vmatmul.mubr.bf16.gmra.mxu1 %v3120_v31  ;;  %v2405_v37 = vadd.f32 %v2277_v16, %v11010_v40  ;;  %v2151_v30 = vmul.f32 %v2023_v14, %v11036_v38  ;;  %v2779_v54 = vadd.f32 1.0, %v10973_v61  ;;  %v2025_v43 = vmul.f32 %v11057_v4, %v11057_v4  ;;  %v11072_v61 = vld [vmem:[%s8838_s29] sm:$0xff] }
 0x297   : > { %v4034_v25 = vpack.c.bf16 %v3974_v9, %v3973_v19  ;;  %v2278_v0 = vmul.f32 0.044715, %v2150_v24  ;;  %v2781_v63 = vadd.f32 1.0, %v7910_v50  ;;  %v3340_v41 = vpop.f32.mrf.mxu1  ;;  %v2152_v47 = vmul.f32 %v2024_v46, %v11051_v5 }
 0x298   : > { %v2533_v15 = vmul.f32 0.7978846, %v2405_v37  ;;  %v2279_v56 = vmul.f32 0.044715, %v2151_v30  ;;  %v2907_v34 = vmul.f32 0.5, %v2779_v54  ;;  %v1851_v22 = vpop.f32.mrf.mxu0  ;;  %v2153_v16 = vmul.f32 %v2025_v43, %v11057_v4 }
 0x299   : > { %v2406_v31 = vadd.f32 %v2278_v0, %v11030_v60  ;;  %v2909_v14 = vmul.f32 0.5, %v2781_v63  ;;  %4236 = vmatmul.mubr.bf16.gmra.mxu0 %v4034_v25  ;;  %v3571_v19 = vadd.f32 %v11072_v61, %v3340_v41  ;;  %v3342_v8 = vpop.f32.mrf.mxu1  ;;  %v2280_v9 = vmul.f32 0.044715, %v2152_v47 }
 0x29a   : > { %7925 = vtanh.f32 %v2533_v15  ;;  %v2407_v50 = vadd.f32 %v2279_v56, %v11036_v38  ;;  %v3035_v24 = vmul.f32 %v2907_v34, %v10857_v2  ;;  %v1853_v37 = vpop.f32.mrf.mxu0  ;;  %4245 = vmatprep.mubr.bf16.mxu0 %v14676_v32  ;;  %v2281_v46 = vmul.f32 0.044715, %v2153_v16  ;;  %v14838_v2 = vld [vmem:[#allocation24_spill] sm:$0xff]  ;;  %v7728_v16 = vld [vmem:[%s14440_s6 + $0xb0] sm:$0xff]  }
 0x29b   : > { %v2534_v30 = vmul.f32 0.7978846, %v2406_v31  ;;  %v3037_v54 = vmul.f32 %v2909_v14, %v10885_v3  ;;  %v11080_v25 = vadd.f32 %v10839_v29, %v3571_v19  ;;  %v3343_v0 = vpop.f32.mrf.mxu1  ;;  %v2408_v63 = vadd.f32 %v2280_v9, %v11051_v5  ;;  %7492 = vmatpush1.bf16.msra.mxu1 %v7728_v16  ;;  %5874 = vmatpush1.bf16.msra.mxu0 %v7728_v16  ;;  %v14841_v16 = vld [vmem:[#allocation83_spill] sm:$0xff] }
 0x29c   : > { %v2535_v43 = vmul.f32 0.7978846, %v2407_v50  ;;  %v2778_v41 = vadd.f32 1.0, %v10960_v35  ;;  %v2780_v15 = vadd.f32 1.0, %v10991_v21  ;;  %v11087_v56 = vadd.f32 %v14838_v2, %v10538_v1  ;;  %v1855_v31 = vpop.f32.mrf.mxu0  ;;  %v14839_v35 = vld [vmem:[#allocation82_spill] sm:$0xff]  ;;  %v11098_v50 = vld [vmem:[%s8838_s29 + $0x8] sm:$0xff]  ;;  %7477 = vmatprep.subr.bf16.mxu1 %v14676_v32  ;;  %5875 = vmatprep.subr.bf16.mxu0 %v14676_v32 }
 0x29d   : > { %14837 = vst [vmem:[#allocation81_spill] sm:$0xff] %v11080_v25  ;;  %7927 = vtanh.f32 %v2534_v30  ;;  %v2409_v47 = vadd.f32 %v2281_v46, %v11057_v4  ;;  %v3123_v3 = vpack.c.bf16 %v3037_v54, %v3035_v24  ;;  %v3345_v34 = vpop.f32.mrf.mxu1  ;;  %v3975_v14 = vmul.f32 %v14839_v35, %v11080_v25  ;;  %v7729_v46 = vld [vmem:[%s14440_s6 + $0xa8] sm:$0xff]  }
 0x29e   : > { %7929 = vtanh.f32 %v2535_v43  ;;  %v2906_v19 = vmul.f32 0.5, %v2778_v41  ;;  %v2908_v21 = vmul.f32 0.5, %v2780_v15  ;;  %v3572_v9 = vadd.f32 %v11098_v50, %v3343_v0 }
 0x29f   : > { %v11095_v8 = vpop.eup %7919  ;;  %v2537_v1 = vmul.f32 0.7978846, %v2409_v47  ;;  %3466 = vmatprep.mubr.bf16.mxu1 %v3123_v3  ;;  %v11102_v24 = vadd.f32 %v1851_v22, %v9411_v49  ;;  %v11105_v30 = vadd.f32 %v1853_v37, %v9429_v62  ;;  %v11112_v43 = vmul.f32 0.7978846, %v2408_v63  ;;  %7493 = vmatpush1.bf16.msra.mxu1 %v7729_v46 }
 0x2a0   : > { %v11110_v54 = vpop.eup %7921  ;;  %v3034_v41 = vmul.f32 %v2906_v19, %v10845_v20  ;;  %v3036_v15 = vmul.f32 %v2908_v21, %v10870_v42  ;;  %v2783_v0 = vadd.f32 1.0, %v11039_v17  ;;  %v11119_v22 = vadd.f32 %v10839_v29, %v3572_v9  ;;  %v1857_v20 = vpop.f32.mrf.mxu0  ;;  %5876 = vmatpush1.bf16.msra.mxu0 %v7729_v46  ;;  %7478 = vmatprep.subr.bf16.mxu1 %v14676_v32 }
 0x2a1   : > { %7931 = vtanh.f32 %v2537_v1  ;;  %v2026_v37 = vmul.f32 %v11102_v24, %v11102_v24  ;;  %v2027_v63 = vmul.f32 %v11105_v30, %v11105_v30  ;;  %v3348_v2 = vpop.f32.mrf.mxu1  ;;  %v2785_v47 = vadd.f32 1.0, %v11059_v33  ;;  %v11137_v1 = vld [vmem:[%s8838_s29 + $0x10] sm:$0xff]  ;;  %5877 = vmatprep.subr.bf16.mxu0 %v14676_v32 }
 0x2a2   : > { %14840 = vst [vmem:[#allocation72_spill] sm:$0xff] %v11119_v22  ;;  %v11126_v42 = vpop.eup %7923  ;;  %v3122_v17 = vpack.c.bf16 %v3036_v15, %v3034_v41  ;;  %v2911_v3 = vmul.f32 0.5, %v2783_v0  ;;  %v11130_v34 = vadd.f32 %v1855_v31, %v9411_v49  ;;  %v3976_v35 = vmul.f32 %v14841_v16, %v11119_v22 }
 0x2a3   : > { %v2154_v19 = vmul.f32 %v2026_v37, %v11102_v24  ;;  %v2155_v21 = vmul.f32 %v2027_v63, %v11105_v30  ;;  %v3573_v9 = vadd.f32 %v11137_v1, %v3348_v2  ;;  %v3350_v44 = vpop.f32.mrf.mxu1  ;;  %v1861_v25 = vpop.f32.mrf.mxu0  ;;  %v2913_v33 = vmul.f32 0.5, %v2785_v47 }
 0x2a4   : > { %3467 = vmatmul.mubr.bf16.gmra.mxu1 %v3122_v17  ;;  %v3039_v41 = vmul.f32 %v2911_v3, %v10914_v45  ;;  %v2028_v31 = vmul.f32 %v11130_v34, %v11130_v34  ;;  %v2782_v15 = vadd.f32 1.0, %v11022_v10  ;;  %v4035_v0 = vpack.c.bf16 %v3976_v35, %v3975_v14  ;;  %v14843_v35 = vld [vmem:[#allocation74_spill] sm:$0xff] }
 0x2a5   : > { %v2282_v37 = vmul.f32 0.044715, %v2154_v19  ;;  %v2283_v63 = vmul.f32 0.044715, %v2155_v21  ;;  %v11145_v16 = vadd.f32 %v10839_v29, %v3573_v9  ;;  %v3351_v2 = vpop.f32.mrf.mxu1  ;;  %v1863_v44 = vpop.f32.mrf.mxu0  ;;  %v3041_v45 = vmul.f32 %v2913_v33, %v10934_v28 }
 0x2a6   : > { %v2156_v17 = vmul.f32 %v2028_v31, %v11130_v34  ;;  %v2784_v47 = vadd.f32 1.0, %v11046_v48  ;;  %v2910_v10 = vmul.f32 0.5, %v2782_v15  ;;  %v11157_v21 = vadd.f32 %v1857_v20, %v9429_v62  ;;  %4246 = vmatmul.mubr.bf16.gmra.mxu0 %v4035_v0  ;;  %v7730_v15 = vld [vmem:[%s14440_s6 + $0xa0] sm:$0xff]  }
 0x2a7   : > { %14842 = vst [vmem:[#allocation24_spill] sm:$0xff] %v11145_v16  ;;  %v7926_v46 = vpop.eup %7925  ;;  %v2410_v14 = vadd.f32 %v2282_v37, %v11102_v24  ;;  %v2411_v3 = vadd.f32 %v2283_v63, %v11105_v30  ;;  %v3977_v19 = vmul.f32 %v14843_v35, %v11145_v16  ;;  %v3353_v9 = vpop.f32.mrf.mxu1  ;;  %v3125_v33 = vpack.c.bf16 %v3041_v45, %v3039_v41  ;;  %v11167_v35 = vld [vmem:[%s8838_s29 + $0x18] sm:$0xff] }
 0x2a8   : > { %v1865_v28 = vpop.f32.mrf.mxu0  ;;  %v2284_v31 = vmul.f32 0.044715, %v2156_v17  ;;  %v2912_v22 = vmul.f32 0.5, %v2784_v47  ;;  %v3038_v48 = vmul.f32 %v2910_v10, %v10897_v11  ;;  %4255 = vmatprep.mubr.bf16.mxu0 %v14676_v32  ;;  %v2029_v20 = vmul.f32 %v11157_v21, %v11157_v21  ;;  %7494 = vmatpush1.bf16.msra.mxu1 %v7730_v15 }
 0x2a9   : > { %v2538_v37 = vmul.f32 0.7978846, %v2410_v14  ;;  %v2539_v63 = vmul.f32 0.7978846, %v2411_v3  ;;  %v3574_v0 = vadd.f32 %v11167_v35, %v3351_v2  ;;  %3474 = vmatprep.mubr.bf16.mxu1 %v3125_v33  ;;  %v11175_v17 = vadd.f32 %v1861_v25, %v9411_v49  ;;  %5878 = vmatpush1.bf16.msra.mxu0 %v7730_v15 }
 0x2aa   : > { %v11170_v41 = vpop.eup %7927  ;;  %v2412_v11 = vadd.f32 %v2284_v31, %v11130_v34  ;;  %v3040_v45 = vmul.f32 %v2912_v22, %v10921_v57  ;;  %v11178_v47 = vadd.f32 %v1863_v44, %v9429_v62  ;;  %7933 = vtanh.f32 %v11112_v43  ;;  %v1867_v9 = vpop.f32.mrf.mxu0  ;;  %7479 = vmatprep.subr.bf16.mxu1 %v14676_v32  ;;  %5879 = vmatprep.subr.bf16.mxu0 %v14676_v32  ;;  %v14845_v44 = vld [vmem:[#allocation97_spill] sm:$0xff] }
 0x2ab   : > { %v11180_v10 = vpop.eup %7929  ;;  %v2157_v14 = vmul.f32 %v2029_v20, %v11157_v21  ;;  %v11185_v2 = vadd.f32 %v10839_v29, %v3574_v0  ;;  %v11188_v3 = vadd.f32 %v1865_v28, %v9411_v49  ;;  %7935 = vtanh.f32 %v2538_v37 }
 0x2ac   : > { %v2540_v57 = vmul.f32 0.7978846, %v2412_v11  ;;  %v3124_v25 = vpack.c.bf16 %v3040_v45, %v3038_v48  ;;  %v2030_v22 = vmul.f32 %v11175_v17, %v11175_v17  ;;  %v2031_v28 = vmul.f32 %v11178_v47, %v11178_v47 }
 0x2ad   : > { %14844 = vst [vmem:[#allocation82_spill] sm:$0xff] %v11185_v2  ;;  %v2285_v43 = vmul.f32 0.044715, %v2157_v14  ;;  %v3978_v33 = vmul.f32 %v14845_v44, %v11185_v2  ;;  %v2032_v31 = vmul.f32 %v11188_v3, %v11188_v3  ;;  %7937 = vtanh.f32 %v2539_v63 }
 0x2ae   : > { %v11200_v15 = vpop.eup %7931  ;;  %3475 = vmatmul.mubr.bf16.gmra.mxu1 %v3124_v25  ;;  %v2158_v48 = vmul.f32 %v2030_v22, %v11175_v17  ;;  %v11204_v37 = vadd.f32 %v1867_v9, %v9429_v62  ;;  %v2787_v20 = vadd.f32 1.0, %v11110_v54  ;;  %v2159_v45 = vmul.f32 %v2031_v28, %v11178_v47 }
 0x2af   : > { %v2413_v0 = vadd.f32 %v2285_v43, %v11157_v21  ;;  %v4036_v11 = vpack.c.bf16 %v3978_v33, %v3977_v19  ;;  %v2160_v14 = vmul.f32 %v2032_v31, %v11188_v3  ;;  %v2789_v63 = vadd.f32 1.0, %v7926_v46  ;;  %v7731_v46 = vld [vmem:[%s14440_s6 + $0x98] sm:$0xff]  }
 0x2b0   : > { %v2286_v44 = vmul.f32 0.044715, %v2158_v48  ;;  %v2033_v2 = vmul.f32 %v11204_v37, %v11204_v37  ;;  %v2915_v25 = vmul.f32 0.5, %v2787_v20  ;;  %7939 = vtanh.f32 %v2540_v57  ;;  %7495 = vmatpush1.bf16.msra.mxu1 %v7731_v46  ;;  %5880 = vmatpush1.bf16.msra.mxu0 %v7731_v46 }
 0x2b1   : > { %v2541_v22 = vmul.f32 0.7978846, %v2413_v0  ;;  %v2287_v16 = vmul.f32 0.044715, %v2159_v45  ;;  %v2288_v9 = vmul.f32 0.044715, %v2160_v14  ;;  %4256 = vmatmul.mubr.bf16.gmra.mxu0 %v4036_v11  ;;  %7480 = vmatprep.subr.bf16.mxu1 %v14676_v32 }
 0x2b2   : > { %v2414_v54 = vadd.f32 %v2286_v44, %v11175_v17  ;;  %v2161_v43 = vmul.f32 %v2033_v2, %v11204_v37  ;;  %v2917_v19 = vmul.f32 0.5, %v2789_v63  ;;  %v3043_v33 = vmul.f32 %v2915_v25, %v10971_v6  ;;  %v3356_v28 = vpop.f32.mrf.mxu1  ;;  %4265 = vmatprep.mubr.bf16.mxu0 %v14676_v32  ;;  %5881 = vmatprep.subr.bf16.mxu0 %v14676_v32 }
 0x2b3   : > { %7941 = vtanh.f32 %v2541_v22  ;;  %v2415_v57 = vadd.f32 %v2287_v16, %v11178_v47  ;;  %v2416_v31 = vadd.f32 %v2288_v9, %v11188_v3  ;;  %v3575_v48 = vadd.f32 %v10943_v53, %v3356_v28  ;;  %v14847_v9 = vld [vmem:[#allocation108_spill] sm:$0xff] }
 0x2b4   : > { %v2542_v20 = vmul.f32 0.7978846, %v2414_v54  ;;  %v2289_v0 = vmul.f32 0.044715, %v2161_v43  ;;  %v3045_v2 = vmul.f32 %v2917_v19, %v11010_v40  ;;  %v2786_v6 = vadd.f32 1.0, %v11095_v8  ;;  %v3358_v11 = vpop.f32.mrf.mxu1  ;;  %v1871_v45 = vpop.f32.mrf.mxu0 }
 0x2b5   : > { %v2543_v14 = vmul.f32 0.7978846, %v2415_v57  ;;  %v2544_v44 = vmul.f32 0.7978846, %v2416_v31  ;;  %v11225_v63 = vadd.f32 %v10839_v29, %v3575_v48  ;;  %v2788_v16 = vadd.f32 1.0, %v11126_v42 }
 0x2b6   : > { %7943 = vtanh.f32 %v2542_v20  ;;  %v2417_v53 = vadd.f32 %v2289_v0, %v11204_v37  ;;  %v3127_v40 = vpack.c.bf16 %v3045_v2, %v3043_v33  ;;  %v2914_v8 = vmul.f32 0.5, %v2786_v6  ;;  %v3359_v25 = vpop.f32.mrf.mxu1  ;;  %v1873_v22 = vpop.f32.mrf.mxu0 }
 0x2b7   : > { %14846 = vst [vmem:[#allocation83_spill] sm:$0xff] %v11225_v63  ;;  %7945 = vtanh.f32 %v2543_v14  ;;  %v3979_v54 = vmul.f32 %v14847_v9, %v11225_v63  ;;  %v2916_v43 = vmul.f32 0.5, %v2788_v16  ;;  %v3576_v19 = vadd.f32 %v10963_v26, %v3359_v25  ;;  %v7934_v28 = vpop.eup %7933  ;;  %v14940_v63 = vld [vmem:[#allocation95_spill] sm:$0xff] }
 0x2b8   : > { %7947 = vtanh.f32 %v2544_v44  ;;  %v2545_v42 = vmul.f32 0.7978846, %v2417_v53  ;;  %3482 = vmatprep.mubr.bf16.mxu1 %v3127_v40  ;;  %v3042_v46 = vmul.f32 %v2914_v8, %v10967_v51  ;;  %v11236_v57 = vadd.f32 %v1871_v45, %v9411_v49  ;;  %v3361_v33 = vpop.f32.mrf.mxu1  ;;  %v1875_v31 = vpop.f32.mrf.mxu0 }
 0x2b9   : > { %v11238_v48 = vpop.eup %7935  ;;  %v3044_v20 = vmul.f32 %v2916_v43, %v10986_v36  ;;  %v11242_v0 = vadd.f32 %v10839_v29, %v3576_v19  ;;  %v11245_v26 = vadd.f32 %v1873_v22, %v9429_v62  ;;  %v2791_v2 = vadd.f32 1.0, %v11180_v10  ;;  %v14849_v36 = vld [vmem:[#allocation73_spill] sm:$0xff] }
 0x2ba   : > { %7949 = vtanh.f32 %v2545_v42  ;;  %v2034_v51 = vmul.f32 %v11236_v57, %v11236_v57  ;;  %v2793_v6 = vadd.f32 1.0, %v11200_v15  ;;  %v11252_v11 = vadd.f32 %v1875_v31, %v9411_v49  ;;  %v7938_v45 = vpop.eup %7937  ;;  %v1877_v22 = vpop.f32.mrf.mxu0 }
 0x2bb   : > { %14848 = vst [vmem:[#allocation74_spill] sm:$0xff] %v11242_v0  ;;  %v3126_v14 = vpack.c.bf16 %v3044_v20, %v3042_v46  ;;  %v3980_v44 = vmul.f32 %v14849_v36, %v11242_v0  ;;  %v2035_v16 = vmul.f32 %v11245_v26, %v11245_v26  ;;  %v2919_v53 = vmul.f32 0.5, %v2791_v2 }
 0x2bc   : > { %v2162_v10 = vmul.f32 %v2034_v51, %v11236_v57  ;;  %v2921_v40 = vmul.f32 0.5, %v2793_v6  ;;  %v2036_v8 = vmul.f32 %v11252_v11, %v11252_v11  ;;  %v3364_v25 = vpop.f32.mrf.mxu1  ;;  %v2790_v15 = vadd.f32 1.0, %v11170_v41 }
 0x2bd   : > { %3483 = vmatmul.mubr.bf16.gmra.mxu1 %v3126_v14  ;;  %v4037_v9 = vpack.c.bf16 %v3980_v44, %v3979_v54  ;;  %v2163_v43 = vmul.f32 %v2035_v16, %v11245_v26  ;;  %v3047_v19 = vmul.f32 %v2919_v53, %v11036_v38  ;;  %v3577_v42 = vadd.f32 %v10997_v55, %v3364_v25  ;;  %v11265_v46 = vpop.eup %7939  ;;  %v14851_v53 = vld [vmem:[#allocation17_spill] sm:$0xff] }
 0x2be   : > { %v2290_v33 = vmul.f32 0.044715, %v2162_v10  ;;  %v3049_v31 = vmul.f32 %v2921_v40, %v11057_v4  ;;  %v2164_v20 = vmul.f32 %v2036_v8, %v11252_v11  ;;  %v2792_v2 = vadd.f32 1.0, %v7934_v28  ;;  %v3366_v51 = vpop.f32.mrf.mxu1 }
 0x2bf   : > { %v2291_v6 = vmul.f32 0.044715, %v2163_v43  ;;  %v11270_v41 = vadd.f32 %v10839_v29, %v3577_v42  ;;  %v2918_v54 = vmul.f32 0.5, %v2790_v15  ;;  %v11273_v14 = vadd.f32 %v1877_v22, %v9429_v62  ;;  %4266 = vmatmul.mubr.bf16.gmra.mxu0 %v4037_v9 }
 0x2c0   : > { %v7942_v38 = vpop.eup %7941  ;;  %v2418_v55 = vadd.f32 %v2290_v33, %v11236_v57  ;;  %v3129_v36 = vpack.c.bf16 %v3049_v31, %v3047_v19  ;;  %v2292_v44 = vmul.f32 0.044715, %v2164_v20  ;;  %v2920_v16 = vmul.f32 0.5, %v2792_v2  ;;  %v3367_v4 = vpop.f32.mrf.mxu1  ;;  %4275 = vmatprep.mubr.bf16.mxu0 %v14676_v32 }
 0x2c1   : > { %14850 = vst [vmem:[#allocation97_spill] sm:$0xff] %v11270_v41  ;;  %v2419_v28 = vadd.f32 %v2291_v6, %v11245_v26  ;;  %v3981_v10 = vmul.f32 %v14851_v53, %v11270_v41  ;;  %v3046_v40 = vmul.f32 %v2918_v54, %v11030_v60  ;;  %v2037_v8 = vmul.f32 %v11273_v14, %v11273_v14  ;;  %v1881_v25 = vpop.f32.mrf.mxu0 }
 0x2c2   : > { %v2546_v15 = vmul.f32 0.7978846, %v2418_v55  ;;  %3490 = vmatprep.mubr.bf16.mxu1 %v3129_v36  ;;  %v2420_v22 = vadd.f32 %v2292_v44, %v11252_v11  ;;  %v3048_v9 = vmul.f32 %v2920_v16, %v11051_v5  ;;  %v3578_v43 = vadd.f32 %v11026_v18, %v3367_v4  ;;  %v3369_v19 = vpop.f32.mrf.mxu1 }
 0x2c3   : > { %v11286_v42 = vpop.eup %7943  ;;  %v2547_v33 = vmul.f32 0.7978846, %v2419_v28  ;;  %v2165_v31 = vmul.f32 %v2037_v8, %v11273_v14  ;;  %v11290_v60 = vadd.f32 %v1881_v25, %v9411_v49  ;;  %v1883_v20 = vpop.f32.mrf.mxu0  ;;  %v2795_v2 = vadd.f32 1.0, %v7938_v45  ;;  %v14853_v45 = vld [vmem:[#allocation21_spill] sm:$0xff] }
 0x2c4   : > { %v7946_v51 = vpop.eup %7945  ;;  %7951 = vtanh.f32 %v2546_v15  ;;  %v2548_v6 = vmul.f32 0.7978846, %v2420_v22  ;;  %v3128_v54 = vpack.c.bf16 %v3048_v9, %v3046_v40  ;;  %v11293_v55 = vadd.f32 %v10839_v29, %v3578_v43 }
 0x2c5   : > { %v7948_v5 = vpop.eup %7947  ;;  %7953 = vtanh.f32 %v2547_v33  ;;  %v2293_v18 = vmul.f32 0.044715, %v2165_v31  ;;  %v2038_v36 = vmul.f32 %v11290_v60, %v11290_v60  ;;  %v11298_v44 = vadd.f32 %v1883_v20, %v9429_v62  ;;  %v1885_v16 = vpop.f32.mrf.mxu0 }
 0x2c6   : > { %14852 = vst [vmem:[#allocation108_spill] sm:$0xff] %v11293_v55  ;;  %7955 = vtanh.f32 %v2548_v6  ;;  %3491 = vmatmul.mubr.bf16.gmra.mxu1 %v3128_v54  ;;  %v3982_v4 = vmul.f32 %v14853_v45, %v11293_v55  ;;  %v11303_v28 = vadd.f32 %v1885_v16, %v9411_v49  ;;  %v2797_v29 = vadd.f32 1.0, %v7942_v38 }
 0x2c7   : > { %v7950_v53 = vpop.eup %7949  ;;  %v2421_v40 = vadd.f32 %v2293_v18, %v11273_v14  ;;  %v2166_v8 = vmul.f32 %v2038_v36, %v11290_v60  ;;  %v2039_v25 = vmul.f32 %v11298_v44, %v11298_v44  ;;  %v1887_v15 = vpop.f32.mrf.mxu0  ;;  %v2923_v22 = vmul.f32 0.5, %v2795_v2 }
 0x2c8   : > { %v4038_v9 = vpack.c.bf16 %v3982_v4, %v3981_v10  ;;  %v2040_v43 = vmul.f32 %v11303_v28, %v11303_v28  ;;  %v11312_v19 = vadd.f32 %v1887_v15, %v9429_v62  ;;  %v2925_v33 = vmul.f32 0.5, %v2797_v29 }
 0x2c9   : > { %v2549_v31 = vmul.f32 0.7978846, %v2421_v40  ;;  %v2294_v38 = vmul.f32 0.044715, %v2166_v8  ;;  %v2167_v20 = vmul.f32 %v2039_v25, %v11298_v44  ;;  %v3051_v6 = vmul.f32 %v2923_v22, %v11105_v30  ;;  %v14854_v22 = vld [vmem:[#allocation25_spill] sm:$0xff] }
 0x2ca   : > { %v2168_v54 = vmul.f32 %v2040_v43, %v11303_v28  ;;  %v2041_v18 = vmul.f32 %v11312_v19, %v11312_v19  ;;  %v3053_v10 = vmul.f32 %v2925_v33, %v11157_v21  ;;  %4276 = vmatmul.mubr.bf16.gmra.mxu0 %v4038_v9  ;;  %v2794_v2 = vadd.f32 1.0, %v11238_v48  ;;  %v14855_v48 = vld [vmem:[#allocation53_spill] sm:$0xff] }
 0x2cb   : > { %7957 = vtanh.f32 %v2549_v31  ;;  %v2422_v36 = vadd.f32 %v2294_v38, %v11290_v60  ;;  %v2295_v16 = vmul.f32 0.044715, %v2167_v20  ;;  %v2796_v45 = vadd.f32 1.0, %v11265_v46  ;;  %4285 = vmatprep.mubr.bf16.mxu0 %v14676_v32 }
 0x2cc   : > { %v2296_v4 = vmul.f32 0.044715, %v2168_v54  ;;  %v2169_v30 = vmul.f32 %v2041_v18, %v11312_v19  ;;  %v3131_v29 = vpack.c.bf16 %v3053_v10, %v3051_v6  ;;  %v2922_v40 = vmul.f32 0.5, %v2794_v2 }
 0x2cd   : > { %v2550_v8 = vmul.f32 0.7978846, %v2422_v36  ;;  %v2423_v25 = vadd.f32 %v2295_v16, %v11298_v44  ;;  %v2924_v21 = vmul.f32 0.5, %v2796_v45  ;;  %v2799_v15 = vadd.f32 1.0, %v7946_v51 }
 0x2ce   : > { %v11328_v9 = vmul.f32 %v14855_v48, %v14854_v22  ;;  %v2424_v43 = vadd.f32 %v2296_v4, %v11303_v28  ;;  %v2297_v33 = vmul.f32 0.044715, %v2169_v30  ;;  %3498 = vmatprep.mubr.bf16.mxu1 %v3131_v29  ;;  %v2801_v46 = vadd.f32 1.0, %v7950_v53 }
 0x2cf   : > { %v2551_v31 = vmul.f32 0.7978846, %v2423_v25  ;;  %v3050_v38 = vmul.f32 %v2922_v40, %v11102_v24  ;;  %v3052_v20 = vmul.f32 %v2924_v21, %v11130_v34  ;;  %v2927_v6 = vmul.f32 0.5, %v2799_v15 }
 0x2d0   : > { %7959 = vtanh.f32 %v2550_v8  ;;  %v2425_v54 = vadd.f32 %v2297_v33, %v11312_v19  ;;  %v2929_v18 = vmul.f32 0.5, %v2801_v46  ;;  %v2798_v51 = vadd.f32 1.0, %v11286_v42  ;;  %v1891_v16 = vpop.f32.mrf.mxu0 }
 0x2d1   : > { %v7952_v10 = vpop.eup %7951  ;;  %7961 = vtanh.f32 %v2551_v31  ;;  %v2552_v2 = vmul.f32 0.7978846, %v2424_v43  ;;  %v3130_v36 = vpack.c.bf16 %v3052_v20, %v3050_v38  ;;  %v2800_v45 = vadd.f32 1.0, %v7948_v5  ;;  %v11351_v20 = vld [vmem:[%s14441_s7] ss:$0 sm:$0xff] }
 0x2d2   : > { %v7954_v4 = vpop.eup %7953  ;;  %v2553_v53 = vmul.f32 0.7978846, %v2425_v54  ;;  %v11336_v30 = vadd.f32 %v1891_v16, %v9411_v49  ;;  %v3055_v24 = vmul.f32 %v2927_v6, %v11178_v47  ;;  %v3057_v34 = vmul.f32 %v2929_v18, %v11204_v37  ;;  %v1893_v8 = vpop.f32.mrf.mxu0 }
 0x2d3   : > { %v7956_v29 = vpop.eup %7955  ;;  %v3372_v40 = vpop.f32.mrf.mxu1  ;;  %3499 = vmatmul.mubr.bf16.gmra.mxu1 %v3130_v36  ;;  %v2926_v42 = vmul.f32 0.5, %v2798_v51  ;;  %v2928_v25 = vmul.f32 0.5, %v2800_v45  ;;  %v2803_v21 = vadd.f32 1.0, %v7954_v4  ;;  %v2802_v15 = vadd.f32 1.0, %v7952_v10 }
 0x2d4   : > { %7963 = vtanh.f32 %v2553_v53  ;;  %v3579_v5 = vadd.f32 %v11072_v61, %v3372_v40  ;;  %v2042_v22 = vmul.f32 %v11336_v30, %v11336_v30  ;;  %v11344_v43 = vadd.f32 %v1893_v8, %v9429_v62  ;;  %v1895_v37 = vpop.f32.mrf.mxu0 }
 0x2d5   : > { %v3374_v47 = vpop.f32.mrf.mxu1  ;;  %v3133_v33 = vpack.c.bf16 %v3057_v34, %v3055_v24  ;;  %v3054_v46 = vmul.f32 %v2926_v42, %v11175_v17  ;;  %v3056_v31 = vmul.f32 %v2928_v25, %v11188_v3  ;;  %v2931_v38 = vmul.f32 0.5, %v2803_v21  ;;  %v7732_v17 = vld [vmem:[%s14440_s6 + $0x90] sm:$0xff]  }
 0x2d6   : > { %v11354_v61 = vadd.f32 %v11351_v20, %v3579_v5  ;;  %v2170_v6 = vmul.f32 %v2042_v22, %v11336_v30  ;;  %v2043_v54 = vmul.f32 %v11344_v43, %v11344_v43  ;;  %v11360_v18 = vadd.f32 %v1895_v37, %v9411_v49  ;;  %v1897_v10 = vpop.f32.mrf.mxu0  ;;  %7496 = vmatpush1.bf16.msra.mxu1 %v7732_v17  ;;  %v14859_v37 = vld [vmem:[#allocation96_spill] sm:$0xff] }
 0x2d7   : > { %7965 = vtanh.f32 %v2552_v2  ;;  %v3375_v3 = vpop.f32.mrf.mxu1  ;;  %3506 = vmatprep.mubr.bf16.mxu1 %v3133_v33  ;;  %v3132_v51 = vpack.c.bf16 %v3056_v31, %v3054_v46  ;;  %v2804_v36 = vadd.f32 1.0, %v7956_v29  ;;  %v2930_v16 = vmul.f32 0.5, %v2802_v15  ;;  %5882 = vmatpush1.bf16.msra.mxu0 %v7732_v17 }
 0x2d8   : > { %14856 = vst [vmem:[#allocation73_spill] sm:$0xff] %v11354_v61  ;;  %v7958_v45 = vpop.eup %7957  ;;  %v3580_v4 = vadd.f32 %v11098_v50, %v3375_v3  ;;  %v2298_v53 = vmul.f32 0.044715, %v2170_v6  ;;  %v2171_v24 = vmul.f32 %v2043_v54, %v11344_v43  ;;  %v3059_v34 = vmul.f32 %v2931_v38, %v11245_v26  ;;  %7481 = vmatprep.subr.bf16.mxu1 %v14676_v32  ;;  %v14857_v50 = vld [vmem:[#allocation112_spill] sm:$0xff] }
 0x2d9   : > { %v3377_v40 = vpop.f32.mrf.mxu1  ;;  %v2044_v2 = vmul.f32 %v11360_v18, %v11360_v18  ;;  %v11371_v8 = vadd.f32 %v1897_v10, %v9429_v62  ;;  %v2805_v42 = vadd.f32 1.0, %v7958_v45  ;;  %v2932_v29 = vmul.f32 0.5, %v2804_v36  ;;  %5883 = vmatprep.subr.bf16.mxu0 %v14676_v32 }
 0x2da   : > { %v3983_v25 = vmul.f32 %v14857_v50, %v11354_v61  ;;  %v11378_v26 = vadd.f32 %v11351_v20, %v3580_v4  ;;  %v2426_v21 = vadd.f32 %v2298_v53, %v11336_v30  ;;  %v2299_v15 = vmul.f32 0.044715, %v2171_v24 }
 0x2db   : > { %v2172_v5 = vmul.f32 %v2044_v2, %v11360_v18  ;;  %3507 = vmatmul.mubr.bf16.gmra.mxu1 %v3132_v51  ;;  %v2045_v22 = vmul.f32 %v11371_v8, %v11371_v8  ;;  %v2933_v47 = vmul.f32 0.5, %v2805_v42  ;;  %v3058_v33 = vmul.f32 %v2930_v16, %v11236_v57 }
 0x2dc   : > { %14858 = vst [vmem:[#allocation17_spill] sm:$0xff] %v11378_v26  ;;  %v3984_v46 = vmul.f32 %v14859_v37, %v11378_v26  ;;  %v2554_v31 = vmul.f32 0.7978846, %v2426_v21  ;;  %v2427_v38 = vadd.f32 %v2299_v15, %v11344_v43  ;;  %v3380_v6 = vpop.f32.mrf.mxu1  ;;  %v3060_v54 = vmul.f32 %v2932_v29, %v11252_v11  ;;  %v14927_v26 = vld [vmem:[#allocation89_spill] sm:$0xff] }
 0x2dd   : > { %v11389_v17 = vpop.eup %7959  ;;  %v2300_v3 = vmul.f32 0.044715, %v2172_v5  ;;  %v3581_v51 = vadd.f32 %v11137_v1, %v3380_v6  ;;  %v2173_v10 = vmul.f32 %v2045_v22, %v11371_v8  ;;  %v1901_v36 = vpop.f32.mrf.mxu0  ;;  %v3061_v45 = vmul.f32 %v2933_v47, %v11273_v14  ;;  %v14861_v5 = vld [vmem:[#allocation106_spill] sm:$0xff] }
 0x2de   : > { %v7962_v57 = vpop.eup %7961  ;;  %v4039_v16 = vpack.c.bf16 %v3984_v46, %v3983_v25  ;;  %7967 = vtanh.f32 %v2554_v31  ;;  %v2555_v4 = vmul.f32 0.7978846, %v2427_v38  ;;  %v3382_v53 = vpop.f32.mrf.mxu1  ;;  %v11395_v24 = vadd.f32 %v1901_v36, %v9411_v49 }
 0x2df   : > { %v2428_v11 = vadd.f32 %v2300_v3, %v11360_v18  ;;  %v11399_v40 = vadd.f32 %v11351_v20, %v3581_v51  ;;  %v2301_v2 = vmul.f32 0.044715, %v2173_v10  ;;  %v1903_v1 = vpop.f32.mrf.mxu0  ;;  %v3135_v42 = vpack.c.bf16 %v3061_v45, %v3059_v34  ;;  %v7733_v10 = vld [vmem:[%s14440_s6 + $0x88] sm:$0xff]  }
 0x2e0   : > { %7969 = vtanh.f32 %v2555_v4  ;;  %4286 = vmatmul.mubr.bf16.gmra.mxu0 %v4039_v16  ;;  %v3383_v29 = vpop.f32.mrf.mxu1  ;;  %v2046_v14 = vmul.f32 %v11395_v24, %v11395_v24  ;;  %v11404_v50 = vadd.f32 %v1903_v1, %v9429_v62  ;;  %v3134_v25 = vpack.c.bf16 %v3060_v54, %v3058_v33  ;;  %7497 = vmatpush1.bf16.msra.mxu1 %v7733_v10 }
 0x2e1   : > { %14860 = vst [vmem:[#allocation21_spill] sm:$0xff] %v11399_v40  ;;  %v7964_v21 = vpop.eup %7963  ;;  %v2556_v15 = vmul.f32 0.7978846, %v2428_v11  ;;  %v3985_v22 = vmul.f32 %v14861_v5, %v11399_v40  ;;  %v2429_v47 = vadd.f32 %v2301_v2, %v11371_v8  ;;  %v3582_v37 = vadd.f32 %v11167_v35, %v3383_v29  ;;  %v1905_v34 = vpop.f32.mrf.mxu0  ;;  %4295 = vmatprep.mubr.bf16.mxu0 %v14676_v32  ;;  %v11443_v5 = vld [vmem:[%s14437_s3 + $0x1] ss:$0 sm:$0xff] }
 0x2e2   : > { %3514 = vmatprep.mubr.bf16.mxu1 %v3135_v42  ;;  %v2174_v46 = vmul.f32 %v2046_v14, %v11395_v24  ;;  %v3385_v31 = vpop.f32.mrf.mxu1  ;;  %v2047_v38 = vmul.f32 %v11404_v50, %v11404_v50  ;;  %v11415_v33 = vadd.f32 %v1905_v34, %v9411_v49  ;;  %v2807_v6 = vadd.f32 1.0, %v7962_v57  ;;  %5884 = vmatpush1.bf16.msra.mxu0 %v7733_v10 }
 0x2e3   : > { %7971 = vtanh.f32 %v2556_v15  ;;  %v2557_v54 = vmul.f32 0.7978846, %v2429_v47  ;;  %v11418_v3 = vadd.f32 %v11351_v20, %v3582_v37  ;;  %v1907_v35 = vpop.f32.mrf.mxu0  ;;  %3515 = vmatmul.mubr.bf16.gmra.mxu1 %v3134_v25  ;;  %v2809_v51 = vadd.f32 1.0, %v7964_v21  ;;  %7482 = vmatprep.subr.bf16.mxu1 %v14676_v32  ;;  %v14863_v47 = vld [vmem:[#allocation105_spill] sm:$0xff] }
 0x2e4   : > { %v7966_v36 = vpop.eup %7965  ;;  %v2302_v45 = vmul.f32 0.044715, %v2174_v46  ;;  %v2175_v16 = vmul.f32 %v2047_v38, %v11404_v50  ;;  %v2048_v4 = vmul.f32 %v11415_v33, %v11415_v33  ;;  %v11427_v57 = vadd.f32 %v1907_v35, %v9429_v62  ;;  %5885 = vmatprep.subr.bf16.mxu0 %v14676_v32 }
 0x2e5   : > { %14862 = vst [vmem:[#allocation25_spill] sm:$0xff] %v11418_v3  ;;  %7973 = vtanh.f32 %v2557_v54  ;;  %v3986_v53 = vmul.f32 %v11087_v56, %v11418_v3  ;;  %v2935_v11 = vmul.f32 0.5, %v2807_v6  ;;  %v2937_v2 = vmul.f32 0.5, %v2809_v51  ;;  %v14864_v6 = vld [vmem:[#allocation26_spill] sm:$0xff]  ;;  %v14865_v54 = vld [vmem:[#allocation56_spill] sm:$0xff] }
 0x2e6   : > { %v2430_v1 = vadd.f32 %v2302_v45, %v11395_v24  ;;  %v2303_v42 = vmul.f32 0.044715, %v2175_v16  ;;  %v2176_v29 = vmul.f32 %v2048_v4, %v11415_v33  ;;  %v2049_v14 = vmul.f32 %v11427_v57, %v11427_v57  ;;  %v14866_v4 = vld [vmem:[#allocation27_spill] sm:$0xff] }
 0x2e7   : > { %v4040_v25 = vpack.c.bf16 %v3986_v53, %v3985_v22  ;;  %v3063_v21 = vmul.f32 %v2935_v11, %v11298_v44  ;;  %v3065_v56 = vmul.f32 %v2937_v2, %v11312_v19  ;;  %v2806_v15 = vadd.f32 1.0, %v11389_v17  ;;  %v7734_v17 = vld [vmem:[%s14440_s6 + $0x80] sm:$0xff]   ;;  %v14867_v53 = vld [vmem:[#allocation28_spill] sm:$0xff] }
 0x2e8   : > { %v3792_v37 = vadd.f32 %v11443_v5, %v14863_v47  ;;  %v2558_v34 = vmul.f32 0.7978846, %v2430_v1  ;;  %v2304_v46 = vmul.f32 0.044715, %v2176_v29  ;;  %v2177_v31 = vmul.f32 %v2049_v14, %v11427_v57  ;;  %7498 = vmatpush1.bf16.msra.mxu1 %v7734_v17  ;;  %v14868_v1 = vld [vmem:[#allocation29_spill] sm:$0xff]  ;;  %v14869_v29 = vld [vmem:[#allocation30_spill] sm:$0xff]  ;;  %5886 = vmatpush1.bf16.msra.mxu0 %v7734_v17 }
 0x2e9   : > { %v2431_v22 = vadd.f32 %v2303_v42, %v11404_v50  ;;  %4296 = vmatmul.mubr.bf16.gmra.mxu0 %v4040_v25  ;;  %v3137_v44 = vpack.c.bf16 %v3065_v56, %v3063_v21  ;;  %v2808_v38 = vadd.f32 1.0, %v7966_v36  ;;  %v2934_v19 = vmul.f32 0.5, %v2806_v15  ;;  %7483 = vmatprep.subr.bf16.mxu1 %v14676_v32 }
 0x2ea   : > { %v3861_v35 = vmul.f32 %v14865_v54, %v14864_v6  ;;  %7975 = vtanh.f32 %v2558_v34  ;;  %v2432_v51 = vadd.f32 %v2304_v46, %v11415_v33  ;;  %v2305_v10 = vmul.f32 0.044715, %v2177_v31  ;;  %4305 = vmatprep.mubr.bf16.mxu0 %v14676_v32  ;;  %v7735_v46 = vld [vmem:[%s14440_s6 + $0xf8] sm:$0xff]   ;;  %5887 = vmatprep.subr.bf16.mxu0 %v14676_v32 }
 0x2eb   : > { %v7968_v45 = vpop.eup %7967  ;;  %v3791_v16 = vadd.f32 %v11443_v5, %v11328_v9  ;;  %v3859_v36 = vmul.f32 %v14865_v54, %v14866_v4  ;;  %v3793_v11 = vadd.f32 %v11443_v5, %v14867_v53  ;;  %3522 = vmatprep.mubr.bf16.mxu1 %v3137_v44  ;;  %v2936_v2 = vmul.f32 0.5, %v2808_v38 }
 0x2ec   : > { %v3860_v42 = vmul.f32 %v14865_v54, %v14868_v1  ;;  %v3726_v14 = vmul.f32 %v14855_v48, %v14869_v29  ;;  %v2560_v25 = vmul.f32 0.7978846, %v2432_v51  ;;  %v2433_v21 = vadd.f32 %v2305_v10, %v11427_v57  ;;  %7499 = vmatpush2.bf16.msra.mxu1 %v7735_v46  ;;  %5888 = vmatpush2.bf16.msra.mxu0 %v7735_v46 }
 0x2ed   : > { %v7970_v9 = vpop.eup %7969  ;;  %v2810_v56 = vadd.f32 1.0, %v7968_v45  ;;  %v2559_v15 = vmul.f32 0.7978846, %v2431_v22  ;;  %v3062_v47 = vmul.f32 %v2934_v19, %v11290_v60  ;;  %v3064_v34 = vmul.f32 %v2936_v2, %v11303_v28  ;;  %7484 = vmatprep.subr.bf16.mxu1 %v14676_v32  ;;  %5889 = vmatprep.subr.bf16.mxu0 %v14676_v32 }
 0x2ee   : > { %7977 = vtanh.f32 %v2560_v25  ;;  %v2561_v31 = vmul.f32 0.7978846, %v2433_v21  ;;  %v3923_v44 = vadd.f32 %v3859_v36, %v3791_v16  ;;  %v11474_v6 = vadd.f32 %v3861_v35, %v3793_v11  ;;  %v11484_v35 = vld [vmem:[%s8838_s29 + $0x20] sm:$0xff]  ;;  %v14870_v11 = vld [vmem:[#allocation32_spill] sm:$0xff] }
 0x2ef   : > { %v1911_v38 = vpop.f32.mrf.mxu0  ;;  %v3136_v17 = vpack.c.bf16 %v3064_v34, %v3062_v47  ;;  %v2811_v51 = vadd.f32 1.0, %v7970_v9  ;;  %v3924_v60 = vadd.f32 %v3860_v42, %v3792_v37  ;;  %v11477_v28 = vadd.f32 %v11443_v5, %v3726_v14  ;;  %v7736_v37 = vld [vmem:[%s14440_s6 + $0xf0] sm:$0xff]  }
 0x2f0   : > { %v7972_v22 = vpop.eup %7971  ;;  %v3388_v19 = vpop.f32.mrf.mxu1  ;;  %v11480_v10 = vadd.f32 %v1911_v38, %v9411_v49  ;;  %v2938_v45 = vmul.f32 0.5, %v2810_v56  ;;  %7979 = vtanh.f32 %v2559_v15  ;;  %v3862_v2 = vmul.f32 %v14865_v54, %v14870_v11  ;;  %7500 = vmatpush2.bf16.msra.mxu1 %v7736_v37  ;;  %5890 = vmatpush2.bf16.msra.mxu0 %v7736_v37 }
 0x2f1   : > { %v2812_v16 = vadd.f32 1.0, %v7972_v22  ;;  %v3583_v4 = vadd.f32 %v11484_v35, %v3388_v19  ;;  %v1913_v36 = vpop.f32.mrf.mxu0  ;;  %3523 = vmatmul.mubr.bf16.gmra.mxu1 %v3136_v17  ;;  %7981 = vtanh.f32 %v2561_v31  ;;  %v2939_v56 = vmul.f32 0.5, %v2811_v51  ;;  %7485 = vmatprep.subr.bf16.mxu1 %v14676_v32  ;;  %v11511_v17 = vld [vmem:[%s8838_s29 + $0x28] sm:$0xff] }
 0x2f2   : > { %v7974_v53 = vpop.eup %7973  ;;  %v3390_v1 = vpop.f32.mrf.mxu1  ;;  %v2050_v42 = vmul.f32 %v11480_v10, %v11480_v10  ;;  %v11496_v29 = vadd.f32 %v1913_v36, %v9429_v62  ;;  %v3066_v31 = vmul.f32 %v2938_v45, %v11336_v30  ;;  %5891 = vmatprep.subr.bf16.mxu0 %v14676_v32 }
 0x2f3   : > { %v2940_v14 = vmul.f32 0.5, %v2812_v16  ;;  %v11499_v25 = vadd.f32 %v11351_v20, %v3583_v4  ;;  %v1915_v21 = vpop.f32.mrf.mxu0  ;;  %v2813_v9 = vadd.f32 1.0, %v7974_v53  ;;  %v7737_v16 = vld [vmem:[%s14440_s6 + $0xe8] sm:$0xff]   ;;  %v3067_v1 = vmul.f32 %v2939_v56, %v11344_v43  ;;  %v7738_v56 = vld [vmem:[%s14440_s6 + $0xe0] sm:$0xff]  }
 0x2f4   : > { %v3391_v15 = vpop.f32.mrf.mxu1  ;;  %v2178_v47 = vmul.f32 %v2050_v42, %v11480_v10  ;;  %v2051_v34 = vmul.f32 %v11496_v29, %v11496_v29  ;;  %v11505_v46 = vadd.f32 %v1915_v21, %v9411_v49  ;;  %7501 = vmatpush2.bf16.msra.mxu1 %v7737_v16  ;;  %5892 = vmatpush2.bf16.msra.mxu0 %v7737_v16 }
 0x2f5   : > { %14871 = vst [vmem:[#allocation53_spill] sm:$0xff] %v11499_v25  ;;  %v3068_v38 = vmul.f32 %v2940_v14, %v11360_v18  ;;  %v3584_v51 = vadd.f32 %v11511_v17, %v3391_v15  ;;  %v1917_v22 = vpop.f32.mrf.mxu0  ;;  %v2941_v19 = vmul.f32 0.5, %v2813_v9  ;;  %v3987_v53 = vmul.f32 %v3923_v44, %v11499_v25  ;;  %7486 = vmatprep.subr.bf16.mxu1 %v14676_v32 }
 0x2f6   : > { %v2306_v4 = vmul.f32 0.044715, %v2178_v47  ;;  %v3393_v36 = vpop.f32.mrf.mxu1  ;;  %v2179_v37 = vmul.f32 %v2051_v34, %v11496_v29  ;;  %v2052_v30 = vmul.f32 %v11505_v46, %v11505_v46  ;;  %v11522_v18 = vadd.f32 %v1917_v22, %v9429_v62  ;;  %5893 = vmatprep.subr.bf16.mxu0 %v14676_v32 }
 0x2f7   : > { %v7976_v45 = vpop.eup %7975  ;;  %v11526_v11 = vadd.f32 %v11351_v20, %v3584_v51  ;;  %v3069_v42 = vmul.f32 %v2941_v19, %v11371_v8  ;;  %v3138_v47 = vpack.c.bf16 %v3068_v38, %v3066_v31  ;;  %v11545_v36 = vld [vmem:[%s8838_s29 + $0x30] sm:$0xff] }
 0x2f8   : > { %v2434_v14 = vadd.f32 %v2306_v4, %v11480_v10  ;;  %v2307_v21 = vmul.f32 0.044715, %v2179_v37  ;;  %v2180_v9 = vmul.f32 %v2052_v30, %v11505_v46  ;;  %v1921_v15 = vpop.f32.mrf.mxu0  ;;  %v2053_v34 = vmul.f32 %v11522_v18, %v11522_v18  ;;  %5894 = vmatpush2.bf16.msra.mxu0 %v7738_v56  ;;  %7502 = vmatpush2.bf16.msra.mxu1 %v7738_v56 }
 0x2f9   : > { %14872 = vst [vmem:[#allocation112_spill] sm:$0xff] %v11526_v11  ;;  %v3988_v44 = vmul.f32 %v3924_v60, %v11526_v11  ;;  %v11537_v43 = vadd.f32 %v1921_v15, %v9411_v49  ;;  %v3139_v8 = vpack.c.bf16 %v3069_v42, %v3067_v1  ;;  %v2814_v31 = vadd.f32 1.0, %v7976_v45  ;;  %v3396_v19 = vpop.f32.mrf.mxu1  ;;  %7487 = vmatprep.subr.bf16.mxu1 %v14676_v32 }
 0x2fa   : > { %v2562_v38 = vmul.f32 0.7978846, %v2434_v14  ;;  %v2435_v51 = vadd.f32 %v2307_v21, %v11496_v29  ;;  %v2308_v22 = vmul.f32 0.044715, %v2180_v9  ;;  %v1923_v60 = vpop.f32.mrf.mxu0  ;;  %v3585_v37 = vadd.f32 %v11545_v36, %v3396_v19  ;;  %5895 = vmatprep.subr.bf16.mxu0 %v14676_v32 }
 0x2fb   : > { %v7978_v16 = vpop.eup %7977  ;;  %v4041_v4 = vpack.c.bf16 %v3988_v44, %v3987_v53  ;;  %v2181_v30 = vmul.f32 %v2053_v34, %v11522_v18  ;;  %v2054_v1 = vmul.f32 %v11537_v43, %v11537_v43  ;;  %3530 = vmatprep.mubr.bf16.mxu1 %v3139_v8  ;;  %v3926_v45 = vadd.f32 %v3862_v2, %v11477_v28  ;;  %v3398_v21 = vpop.f32.mrf.mxu1  ;;  %v7739_v28 = vld [vmem:[%s14440_s6 + $0xd8] sm:$0xff]  }
 0x2fc   : > { %v2816_v42 = vadd.f32 1.0, %v7978_v16  ;;  %7983 = vtanh.f32 %v2562_v38  ;;  %v2563_v14 = vmul.f32 0.7978846, %v2435_v51  ;;  %v1925_v9 = vpop.f32.mrf.mxu0  ;;  %3531 = vmatmul.mubr.bf16.gmra.mxu1 %v3138_v47  ;;  %v2436_v53 = vadd.f32 %v2308_v22, %v11505_v46  ;;  %5896 = vmatpush2.bf16.msra.mxu0 %v7739_v28 }
 0x2fd   : > { %v11554_v15 = vadd.f32 %v11351_v20, %v3585_v37  ;;  %v2309_v44 = vmul.f32 0.044715, %v2181_v30  ;;  %4306 = vmatmul.mubr.bf16.gmra.mxu0 %v4041_v4  ;;  %v2182_v34 = vmul.f32 %v2054_v1, %v11537_v43  ;;  %v7980_v2 = vpop.eup %7979  ;;  %v2942_v8 = vmul.f32 0.5, %v2814_v31  ;;  %v3399_v47 = vpop.f32.mrf.mxu1  ;;  %v11570_v37 = vld [vmem:[%s8838_s29 + $0x38] sm:$0xff]  ;;  %7503 = vmatpush2.bf16.msra.mxu1 %v7739_v28 }
 0x2fe   : > { %7985 = vtanh.f32 %v2563_v14  ;;  %v11561_v38 = vadd.f32 %v1923_v60, %v9429_v62  ;;  %v11564_v51 = vadd.f32 %v1925_v9, %v9411_v49  ;;  %v1927_v22 = vpop.f32.mrf.mxu0  ;;  %4315 = vmatprep.mubr.bf16.mxu0 %v14676_v32  ;;  %v7982_v56 = vpop.eup %7981  ;;  %v2944_v19 = vmul.f32 0.5, %v2816_v42  ;;  %5897 = vmatprep.subr.bf16.mxu0 %v14676_v32 }
 0x2ff   : > { %14873 = vst [vmem:[#allocation96_spill] sm:$0xff] %v11554_v15  ;;  %v2564_v16 = vmul.f32 0.7978846, %v2436_v53  ;;  %v2437_v4 = vadd.f32 %v2309_v44, %v11522_v18  ;;  %v3586_v31 = vadd.f32 %v11570_v37, %v3399_v47  ;;  %v3989_v49 = vmul.f32 %v11474_v6, %v11554_v15  ;;  %v3401_v30 = vpop.f32.mrf.mxu1  ;;  %v7740_v6 = vld [vmem:[%s14440_s6 + $0xd0] sm:$0xff]   ;;  %7488 = vmatprep.subr.bf16.mxu1 %v14676_v32 }
 0x300   : > { %v2310_v60 = vmul.f32 0.044715, %v2182_v34  ;;  %v2055_v1 = vmul.f32 %v11561_v38, %v11561_v38  ;;  %v2056_v42 = vmul.f32 %v11564_v51, %v11564_v51  ;;  %v11584_v9 = vadd.f32 %v1927_v22, %v9429_v62  ;;  %5898 = vmatpush2.bf16.msra.mxu0 %v7740_v6 }
 0x301   : > { %7987 = vtanh.f32 %v2564_v16  ;;  %v2565_v14 = vmul.f32 0.7978846, %v2437_v4  ;;  %v11581_v21 = vadd.f32 %v11351_v20, %v3586_v31  ;;  %v2815_v47 = vadd.f32 1.0, %v7980_v2  ;;  %7504 = vmatpush2.bf16.msra.mxu1 %v7740_v6  ;;  %v7741_v2 = vld [vmem:[%s14440_s6 + $0xc8] sm:$0xff]   ;;  %5899 = vmatprep.subr.bf16.mxu0 %v14676_v32 }
 0x302   : > { %v2438_v53 = vadd.f32 %v2310_v60, %v11537_v43  ;;  %v2183_v44 = vmul.f32 %v2055_v1, %v11561_v38  ;;  %v2184_v34 = vmul.f32 %v2056_v42, %v11564_v51  ;;  %v2057_v28 = vmul.f32 %v11584_v9, %v11584_v9  ;;  %7489 = vmatprep.subr.bf16.mxu1 %v14676_v32 }
 0x303   : > { %14874 = vst [vmem:[#allocation106_spill] sm:$0xff] %v11581_v21  ;;  %7989 = vtanh.f32 %v2565_v14  ;;  %v3990_v62 = vmul.f32 %v3926_v45, %v11581_v21  ;;  %v2817_v22 = vadd.f32 1.0, %v7982_v56  ;;  %v2943_v1 = vmul.f32 0.5, %v2815_v47  ;;  %v14875_v45 = vld [vmem:[#allocation31_spill] sm:$0xff] }
 0x304   : > { %v2566_v16 = vmul.f32 0.7978846, %v2438_v53  ;;  %v2311_v4 = vmul.f32 0.044715, %v2183_v44  ;;  %v2312_v31 = vmul.f32 0.044715, %v2184_v34  ;;  %v2185_v60 = vmul.f32 %v2057_v28, %v11584_v9  ;;  %5900 = vmatpush2.bf16.msra.mxu0 %v7741_v2 }
 0x305   : > { %v4042_v30 = vpack.c.bf16 %v3990_v62, %v3989_v49  ;;  %v2945_v15 = vmul.f32 0.5, %v2817_v22  ;;  %v3728_v42 = vmul.f32 %v14855_v48, %v14875_v45  ;;  %v3072_v56 = vmul.f32 %v2944_v19, %v11415_v33  ;;  %v14876_v53 = vld [vmem:[#allocation34_spill] sm:$0xff]  ;;  %7505 = vmatpush2.bf16.msra.mxu1 %v7741_v2  ;;  %5901 = vmatprep.subr.bf16.mxu0 %v14676_v32  ;;  %v14878_v45 = vld [vmem:[#allocation37_spill] sm:$0xff] }
 0x306   : > { %v2439_v14 = vadd.f32 %v2311_v4, %v11561_v38  ;;  %v2440_v49 = vadd.f32 %v2312_v31, %v11564_v51  ;;  %v3727_v6 = vmul.f32 %v14855_v48, %v14876_v53  ;;  %v2313_v44 = vmul.f32 0.044715, %v2185_v60  ;;  %v11616_v31 = vld [vmem:[%s8838_s29] sm:$0xff]  ;;  %7490 = vmatprep.subr.bf16.mxu1 %v14676_v32 }
 0x307   : > { %4316 = vmatmul.mubr.bf16.gmra.mxu0 %v4042_v30  ;;  %v3071_v34 = vmul.f32 %v2943_v1, %v11404_v50  ;;  %v3073_v47 = vmul.f32 %v2945_v15, %v11427_v57  ;;  %v3070_v62 = vmul.f32 %v2942_v8, %v11395_v24  ;;  %7991 = vtanh.f32 %v2566_v16  ;;  %v7742_v24 = vld [vmem:[%s14440_s6 + $0xc0] sm:$0xff]  }
 0x308   : > { %v2567_v33 = vmul.f32 0.7978846, %v2439_v14  ;;  %v2568_v19 = vmul.f32 0.7978846, %v2440_v49  ;;  %v3404_v28 = vpop.f32.mrf.mxu1  ;;  %4325 = vmatprep.mubr.bf16.mxu0 %v14676_v32  ;;  %v2441_v4 = vadd.f32 %v2313_v44, %v11584_v9  ;;  %v14877_v50 = vld [vmem:[#allocation35_spill] sm:$0xff]  ;;  %v3796_v1 = vadd.f32 %v11443_v5, %v3728_v42  ;;  %5902 = vmatpush2.bf16.msra.mxu0 %v7742_v24 }
 0x309   : > { %v7984_v22 = vpop.eup %7983  ;;  %v3587_v30 = vadd.f32 %v11616_v31, %v3404_v28  ;;  %v3141_v60 = vpack.c.bf16 %v3073_v47, %v3071_v34  ;;  %v3863_v57 = vmul.f32 %v14865_v54, %v14877_v50  ;;  %v3140_v8 = vpack.c.bf16 %v3072_v56, %v3070_v62  ;;  %v11634_v56 = vld [vmem:[%s8838_s29 + $0x8] sm:$0xff]  ;;  %7506 = vmatpush2.bf16.msra.mxu1 %v7742_v24 }
 0x30a   : > { %7993 = vtanh.f32 %v2567_v33  ;;  %v3406_v15 = vpop.f32.mrf.mxu1  ;;  %v3864_v2 = vmul.f32 %v14865_v54, %v14878_v45  ;;  %v2569_v14 = vmul.f32 0.7978846, %v2441_v4  ;;  %v3795_v49 = vadd.f32 %v11443_v5, %v3727_v6  ;;  %v14880_v33 = vld [vmem:[#allocation33_spill] sm:$0xff] }
 0x30b   : > { %v7986_v16 = vpop.eup %7985  ;;  %7995 = vtanh.f32 %v2568_v19  ;;  %3538 = vmatprep.mubr.bf16.mxu1 %v3141_v60  ;;  %v11631_v53 = vadd.f32 %v11351_v20, %v3587_v30  ;;  %v3729_v19 = vmul.f32 %v14855_v48, %v14880_v33  ;;  %v2818_v6 = vadd.f32 1.0, %v7984_v22  ;;  %v14882_v15 = vld [vmem:[#allocation39_spill] sm:$0xff] }
 0x30c   : > { %v3407_v44 = vpop.f32.mrf.mxu1  ;;  %3539 = vmatmul.mubr.bf16.gmra.mxu1 %v3140_v8  ;;  %v2819_v34 = vadd.f32 1.0, %v7986_v16  ;;  %7997 = vtanh.f32 %v2569_v14  ;;  %v3927_v62 = vadd.f32 %v3863_v57, %v3795_v49  ;;  %v3928_v4 = vadd.f32 %v3864_v2, %v3796_v1  ;;  %v11647_v49 = vld [vmem:[%s8838_s29 + $0x10] sm:$0xff] }
 0x30d   : > { %14879 = vst [vmem:[#allocation105_spill] sm:$0xff] %v11631_v53  ;;  %v3588_v42 = vadd.f32 %v11634_v56, %v3407_v44  ;;  %v3730_v8 = vmul.f32 %v14855_v48, %v14882_v15  ;;  %v3797_v2 = vadd.f32 %v11443_v5, %v3729_v19  ;;  %v2946_v44 = vmul.f32 0.5, %v2818_v6  ;;  %v11661_v19 = vld [vmem:[%s8838_s29 + $0x18] sm:$0xff] }
 0x30e   : > { %v7988_v47 = vpop.eup %7987  ;;  %v3409_v28 = vpop.f32.mrf.mxu1  ;;  %v3991_v16 = vmul.f32 %v3927_v62, %v11631_v53  ;;  %v2947_v45 = vmul.f32 0.5, %v2819_v34 }
 0x30f   : > { %v2820_v30 = vadd.f32 1.0, %v7988_v47  ;;  %v11640_v60 = vadd.f32 %v11351_v20, %v3588_v42  ;;  %v14883_v47 = vld [vmem:[#allocation40_spill] sm:$0xff]  ;;  %v14884_v28 = vld [vmem:[#allocation38_spill] sm:$0xff] }
 0x310   : > { %v7990_v50 = vpop.eup %7989  ;;  %v3412_v24 = vpop.f32.mrf.mxu1  ;;  %v3866_v33 = vmul.f32 %v14865_v54, %v14883_v47  ;;  %v3865_v62 = vmul.f32 %v14865_v54, %v14884_v28 }
 0x311   : > { %14881 = vst [vmem:[#allocation26_spill] sm:$0xff] %v11640_v60  ;;  %v2948_v14 = vmul.f32 0.5, %v2820_v30  ;;  %v3992_v57 = vmul.f32 %v3928_v4, %v11640_v60  ;;  %v3589_v22 = vadd.f32 %v11647_v49, %v3412_v24  ;;  %v2821_v1 = vadd.f32 1.0, %v7990_v50 }
 0x312   : > { %v3414_v42 = vpop.f32.mrf.mxu1  ;;  %v3798_v4 = vadd.f32 %v11443_v5, %v3730_v8  ;;  %v3075_v24 = vmul.f32 %v2947_v45, %v11496_v29 }
 0x313   : > { %v4043_v34 = vpack.c.bf16 %v3992_v57, %v3991_v16  ;;  %v2949_v30 = vmul.f32 0.5, %v2821_v1  ;;  %v3076_v15 = vmul.f32 %v2948_v14, %v11505_v46  ;;  %v11658_v50 = vadd.f32 %v11351_v20, %v3589_v22 }
 0x314   : > { %v3415_v60 = vpop.f32.mrf.mxu1  ;;  %v7992_v53 = vpop.eup %7991  ;;  %v3074_v16 = vmul.f32 %v2946_v44, %v11480_v10  ;;  %v3930_v8 = vadd.f32 %v3866_v33, %v3798_v4  ;;  %v3929_v14 = vadd.f32 %v3865_v62, %v3797_v2  ;;  %v14887_v62 = vld [vmem:[#allocation36_spill] sm:$0xff] }
 0x315   : > { %14885 = vst [vmem:[#allocation56_spill] sm:$0xff] %v11658_v50  ;;  %4326 = vmatmul.mubr.bf16.gmra.mxu0 %v4043_v34  ;;  %v3590_v6 = vadd.f32 %v11661_v19, %v3415_v60  ;;  %v3077_v42 = vmul.f32 %v2949_v30, %v11522_v18  ;;  %v2822_v28 = vadd.f32 1.0, %v7992_v53  ;;  %v3732_v30 = vmul.f32 %v14855_v48, %v14887_v62 }
 0x316   : > { %v3417_v57 = vpop.f32.mrf.mxu1  ;;  %4335 = vmatprep.mubr.bf16.mxu0 %v14676_v32  ;;  %v3142_v34 = vpack.c.bf16 %v3076_v15, %v3074_v16  ;;  %v3993_v29 = vmul.f32 %v3929_v14, %v11658_v50  ;;  %v14889_v14 = vld [vmem:[#allocation43_spill] sm:$0xff]  ;;  %v14923_v50 = vld [vmem:[#allocation69_spill] sm:$0xff] }
 0x317   : > { %v7994_v46 = vpop.eup %7993  ;;  %v11669_v22 = vadd.f32 %v11351_v20, %v3590_v6  ;;  %v3143_v1 = vpack.c.bf16 %v3077_v42, %v3075_v24  ;;  %v2950_v4 = vmul.f32 0.5, %v2822_v28  ;;  %v14888_v6 = vld [vmem:[#allocation41_spill] sm:$0xff] }
 0x318   : > { %v7996_v47 = vpop.eup %7995  ;;  %v2823_v60 = vadd.f32 1.0, %v7994_v46  ;;  %v3731_v24 = vmul.f32 %v14855_v48, %v14888_v6  ;;  %v14896_v6 = vld [vmem:[#allocation46_spill] sm:$0xff] }
 0x319   : > { %14886 = vst [vmem:[#allocation27_spill] sm:$0xff] %v11669_v22  ;;  %v2824_v21 = vadd.f32 1.0, %v7996_v47  ;;  %v3994_v18 = vmul.f32 %v3930_v8, %v11669_v22  ;;  %3546 = vmatprep.mubr.bf16.mxu1 %v3143_v1  ;;  %v7998_v10 = vpop.eup %7997  ;;  %v3800_v8 = vadd.f32 %v11443_v5, %v3732_v30  ;;  %v3867_v1 = vmul.f32 %v14865_v54, %v14889_v14  ;;  %v14890_v47 = vld [vmem:[#allocation45_spill] sm:$0xff] }
 0x31a   : > { %3547 = vmatmul.mubr.bf16.gmra.mxu1 %v3142_v34  ;;  %v2825_v33 = vadd.f32 1.0, %v7998_v10  ;;  %v2951_v2 = vmul.f32 0.5, %v2823_v60  ;;  %v3868_v28 = vmul.f32 %v14865_v54, %v14890_v47  ;;  %v3078_v34 = vmul.f32 %v2950_v4, %v11537_v43  ;;  %v14894_v43 = vld [vmem:[#allocation47_spill] sm:$0xff]  ;;  %v14895_v4 = vld [vmem:[#allocation49_spill] sm:$0xff]  ;;  %v14899_v47 = vld [vmem:[#allocation42_spill] sm:$0xff] }
 0x31b   : > { %v2952_v45 = vmul.f32 0.5, %v2824_v21  ;;  %v4044_v44 = vpack.c.bf16 %v3994_v18, %v3993_v29  ;;  %v3799_v29 = vadd.f32 %v11443_v5, %v3731_v24  ;;  %v3736_v30 = vmul.f32 %v14855_v48, %v14894_v43 }
 0x31c   : > { %v2953_v15 = vmul.f32 0.5, %v2825_v33  ;;  %v3079_v57 = vmul.f32 %v2951_v2, %v11561_v38  ;;  %v14892_v33 = vld [vmem:[#allocation44_spill] sm:$0xff]  ;;  %v3734_v24 = vmul.f32 %v14855_v48, %v14896_v6 }
 0x31d   : > { %4336 = vmatmul.mubr.bf16.gmra.mxu0 %v4044_v44  ;;  %v3420_v53 = vpop.f32.mrf.mxu1  ;;  %v3080_v42 = vmul.f32 %v2952_v45, %v11564_v51  ;;  %v3931_v45 = vadd.f32 %v3867_v1, %v3799_v29  ;;  %v3932_v44 = vadd.f32 %v3868_v28, %v3800_v8  ;;  %v3733_v2 = vmul.f32 %v14855_v48, %v14892_v33  ;;  %v14898_v8 = vld [vmem:[#allocation75_spill] sm:$0xff] }
 0x31e   : > { %v3591_v16 = vadd.f32 %v11484_v35, %v3420_v53  ;;  %4345 = vmatprep.mubr.bf16.mxu0 %v14676_v32  ;;  %v3081_v46 = vmul.f32 %v2953_v15, %v11584_v9  ;;  %v3737_v53 = vmul.f32 %v14855_v48, %v14895_v4  ;;  %v3745_v14 = vmul.f32 %v14855_v48, %v14898_v8  ;;  %v14906_v8 = vld [vmem:[#allocation86_spill] sm:$0xff] }
 0x31f   : > { %v3422_v21 = vpop.f32.mrf.mxu1  ;;  %v3144_v9 = vpack.c.bf16 %v3080_v42, %v3078_v34  ;;  %v3869_v28 = vmul.f32 %v14865_v54, %v14899_v47  ;;  %v3801_v34 = vadd.f32 %v11443_v5, %v3733_v2  ;;  %v3802_v4 = vadd.f32 %v11443_v5, %v3734_v24 }
 0x320   : > { %v3145_v60 = vpack.c.bf16 %v3081_v46, %v3079_v57  ;;  %v11690_v18 = vadd.f32 %v11351_v20, %v3591_v16  ;;  %v14897_v57 = vld [vmem:[#allocation52_spill] sm:$0xff] }
 0x321   : > { %v3423_v51 = vpop.f32.mrf.mxu1  ;;  %v3740_v46 = vmul.f32 %v14855_v48, %v14897_v57 }
 0x322   : > { %14891 = vst [vmem:[#allocation28_spill] sm:$0xff] %v11690_v18  ;;  %v3592_v38 = vadd.f32 %v11511_v17, %v3423_v51  ;;  %3554 = vmatprep.mubr.bf16.mxu1 %v3145_v60  ;;  %v3995_v42 = vmul.f32 %v3931_v45, %v11690_v18  ;;  %v14900_v51 = vld [vmem:[#allocation48_spill] sm:$0xff] }
 0x323   : > { %v3425_v10 = vpop.f32.mrf.mxu1  ;;  %3555 = vmatmul.mubr.bf16.gmra.mxu1 %v3144_v9  ;;  %v3870_v60 = vmul.f32 %v14865_v54, %v14900_v51  ;;  %v3805_v9 = vadd.f32 %v11443_v5, %v3737_v53  ;;  %v3808_v53 = vadd.f32 %v11443_v5, %v3740_v46  ;;  %v14907_v51 = vld [vmem:[#allocation93_spill] sm:$0xff] }
 0x324   : > { %v11696_v62 = vadd.f32 %v11351_v20, %v3592_v38  ;;  %v3804_v38 = vadd.f32 %v11443_v5, %v3736_v30  ;;  %v14901_v10 = vld [vmem:[#allocation55_spill] sm:$0xff] }
 0x325   : > { %v3428_v15 = vpop.f32.mrf.mxu1  ;;  %v3873_v45 = vmul.f32 %v14865_v54, %v14901_v10  ;;  %v3934_v47 = vadd.f32 %v3870_v60, %v3802_v4  ;;  %v14911_v60 = vld [vmem:[#allocation100_spill] sm:$0xff] }
 0x326   : > { %14893 = vst [vmem:[#allocation29_spill] sm:$0xff] %v11696_v62  ;;  %v3996_v16 = vmul.f32 %v3932_v44, %v11696_v62  ;;  %v3593_v21 = vadd.f32 %v11545_v36, %v3428_v15  ;;  %v14902_v44 = vld [vmem:[#allocation68_spill] sm:$0xff]  ;;  %v14903_v15 = vld [vmem:[#allocation70_spill] sm:$0xff]  ;;  %v3752_v4 = vmul.f32 %v14855_v48, %v14911_v60 }
 0x327   : > { %v3430_v1 = vpop.f32.mrf.mxu1  ;;  %v3741_v33 = vmul.f32 %v14855_v48, %v14902_v44  ;;  %v3744_v2 = vmul.f32 %v14855_v48, %v14903_v15  ;;  %v11741_v46 = vadd.f32 %v3873_v45, %v3805_v9  ;;  %v14910_v15 = vld [vmem:[#allocation102_spill] sm:$0xff] }
 0x328   : > { %v4045_v29 = vpack.c.bf16 %v3996_v16, %v3995_v42  ;;  %v11726_v6 = vadd.f32 %v11351_v20, %v3593_v21  ;;  %v3813_v42 = vadd.f32 %v11443_v5, %v3745_v14  ;;  %v14905_v16 = vld [vmem:[#allocation78_spill] sm:$0xff]  ;;  %v3881_v1 = vmul.f32 %v14865_v54, %v14906_v8  ;;  %v14909_v14 = vld [vmem:[#allocation63_spill] sm:$0xff] }
 0x329   : > { %v3431_v43 = vpop.f32.mrf.mxu1  ;;  %v3748_v57 = vmul.f32 %v14855_v48, %v14905_v16  ;;  %v3749_v21 = vmul.f32 %v14855_v48, %v14907_v51  ;;  %v3877_v44 = vmul.f32 %v14865_v54, %v14909_v14  ;;  %v3753_v16 = vmul.f32 %v14855_v48, %v14910_v15  ;;  %v14912_v9 = vld [vmem:[#allocation50_spill] sm:$0xff]  ;;  %v14915_v15 = vld [vmem:[#allocation91_spill] sm:$0xff] }
 0x32a   : > { %14904 = vst [vmem:[#allocation30_spill] sm:$0xff] %v11726_v6  ;;  %4346 = vmatmul.mubr.bf16.gmra.mxu0 %v4045_v29  ;;  %v3594_v30 = vadd.f32 %v11570_v37, %v3431_v43  ;;  %v3933_v29 = vadd.f32 %v3869_v28, %v3801_v34  ;;  %v3809_v43 = vadd.f32 %v11443_v5, %v3741_v33  ;;  %v14919_v62 = vld [vmem:[#allocation58_spill] sm:$0xff] }
 0x32b   : > { %v3433_v24 = vpop.f32.mrf.mxu1  ;;  %4355 = vmatprep.mubr.bf16.mxu0 %v14676_v32  ;;  %v11749_v8 = vadd.f32 %v11443_v5, %v3744_v2  ;;  %v3735_v45 = vmul.f32 %v14855_v48, %v14912_v9  ;;  %v11760_v33 = vadd.f32 %v3881_v1, %v3813_v42  ;;  %v14914_v2 = vld [vmem:[#allocation57_spill] sm:$0xff]  ;;  %v3885_v60 = vmul.f32 %v14865_v54, %v14915_v15  ;;  %v14918_v1 = vld [vmem:[#allocation14_spill] sm:$0xff] }
 0x32c   : > { %v11739_v10 = vadd.f32 %v11351_v20, %v3594_v30  ;;  %v3997_v28 = vmul.f32 %v3933_v29, %v11726_v6  ;;  %v11758_v30 = vadd.f32 %v11443_v5, %v3748_v57  ;;  %v14913_v24 = vld [vmem:[#allocation104_spill] sm:$0xff]  ;;  %v3738_v14 = vmul.f32 %v14855_v48, %v14914_v2  ;;  %v14917_v6 = vld [vmem:[#allocation54_spill] sm:$0xff]  ;;  %v7398_v2 = vld [vmem:[%s14439_s5 + $0x1] ss:$2 sm:$0x3] }
 0x32d   : > { %v3756_v51 = vmul.f32 %v14855_v48, %v14913_v24  ;;  %v3817_v29 = vadd.f32 %v11443_v5, %v3749_v21  ;;  %v3872_v57 = vmul.f32 %v14865_v54, %v14917_v6  ;;  %v3821_v42 = vadd.f32 %v11443_v5, %v3753_v16  ;;  %v14920_v21 = vld [vmem:[#allocation64_spill] sm:$0xff] }
 0x32e   : > { %14908 = vst [vmem:[#allocation32_spill] sm:$0xff] %v11739_v10  ;;  %v3998_v34 = vmul.f32 %v3934_v47, %v11739_v10  ;;  %v14916_v10 = vld [vmem:[#allocation51_spill] sm:$0xff]  ;;  %v3889_v24 = vmul.f32 %v14865_v54, %v14918_v1  ;;  %v3874_v15 = vmul.f32 %v14865_v54, %v14919_v62  ;;  %v3803_v16 = vadd.f32 %v11443_v5, %v3735_v45 }
 0x32f   : > { %v3871_v9 = vmul.f32 %v14865_v54, %v14916_v10  ;;  %v11784_v10 = vadd.f32 %v11443_v5, %v3752_v4  ;;  %v14921_v1 = vld [vmem:[#allocation71_spill] sm:$0xff]  ;;  %v11792_v22 = vadd.f32 %v11443_v5, %v3756_v51  ;;  %v3936_v25 = vadd.f32 %v3872_v57, %v3804_v38  ;;  %v14925_v51 = vld [vmem:[#allocation77_spill] sm:$0xff] }
 0x330   : > { %v4046_v47 = vpack.c.bf16 %v3998_v34, %v3997_v28  ;;  %v3739_v28 = vmul.f32 %v14855_v48, %v14920_v21  ;;  %v11786_v34 = vadd.f32 %v3877_v44, %v3809_v43  ;;  %v3742_v18 = vmul.f32 %v14855_v48, %v14921_v1  ;;  %v14922_v4 = vld [vmem:[#allocation67_spill] sm:$0xff] }
 0x331   : > { %v3806_v21 = vadd.f32 %v11443_v5, %v3738_v14  ;;  %v3876_v44 = vmul.f32 %v14865_v54, %v14923_v50  ;;  %v14924_v45 = vld [vmem:[#allocation11_spill] sm:$0xff]  ;;  %v3935_v1 = vadd.f32 %v3871_v9, %v3803_v16  ;;  %v3878_v3 = vmul.f32 %v14865_v54, %v14925_v51 }
 0x332   : > { %4356 = vmatmul.mubr.bf16.gmra.mxu0 %v4046_v47  ;;  %v3436_v6 = vpop.f32.mrf.mxu1  ;;  %v3875_v47 = vmul.f32 %v14865_v54, %v14922_v4  ;;  %v11802_v11 = vrot.slane %v7398_v2, %v14924_v45  ;;  %v3807_v14 = vadd.f32 %v11443_v5, %v3739_v28  ;;  %v11813_v4 = vmul.f32 %v14865_v54, %v14927_v26  ;;  %v14929_v9 = vld [vmem:[#allocation107_spill] sm:$0xff] }
 0x333   : > { %v3595_v62 = vadd.f32 %v11616_v31, %v3436_v6  ;;  %4365 = vmatprep.mubr.bf16.mxu0 %v14676_v32  ;;  %v11806_v6 = vadd.f32 %v3889_v24, %v3821_v42  ;;  %v11808_v40 = vadd.f32 %v3874_v15, %v3806_v21  ;;  %v3810_v45 = vadd.f32 %v11443_v5, %v3742_v18  ;;  %v14931_v26 = vld [vmem:[#allocation79_spill] sm:$0xff] }
 0x334   : > { %v3438_v43 = vpop.f32.mrf.mxu1  ;;  %14928 = vst [vmem:[#allocation34_spill] sm:$0xff] %v11813_v4  ;;  %v11820_v38 = vmul.f32 %v14855_v48, %v14929_v9  ;;  %v11826_v15 = vadd.f32 %v3875_v47, %v3807_v14  ;;  %v11828_v28 = vadd.f32 %v3876_v44, %v3808_v53  ;;  %v14932_v21 = vld [vmem:[#allocation87_spill] sm:$0xff]  ;;  %v14935_v44 = vld [vmem:[#allocation85_spill] sm:$0xff] }
 0x335   : > { %14926 = vst [vmem:[#allocation31_spill] sm:$0xff] %v11806_v6  ;;  %v11815_v43 = vadd.f32 %v3885_v60, %v3817_v29  ;;  %v11823_v57 = vadd.f32 %v11351_v20, %v3595_v62  ;;  %v3743_v60 = vmul.f32 %v14855_v48, %v14931_v26  ;;  %v11835_v16 = vadd.f32 %v3878_v3, %v3810_v45  ;;  %v14936_v9 = vld [vmem:[#allocation13_spill] sm:$0xff] }
 0x336   : > { %v3439_v50 = vpop.f32.mrf.mxu1  ;;  %v4207_v24 = vpop.f32.mrf.mxu0  ;;  %v3746_v62 = vmul.f32 %v14855_v48, %v14932_v21  ;;  %v3879_v14 = vmul.f32 %v14865_v54, %v14935_v44  ;;  %v3880_v26 = vmul.f32 %v14865_v54, %v14936_v9  ;;  %v14938_v21 = vld [vmem:[#allocation88_spill] sm:$0xff]  ;;  %v14939_v9 = vld [vmem:[#allocation94_spill] sm:$0xff] }
 0x337   : > { %14930 = vst [vmem:[#allocation35_spill] sm:$0xff] %v11823_v57  ;;  %v3596_v42 = vadd.f32 %v11634_v56, %v3439_v50  ;;  %v11833_v18 = vadd.f32 %v4207_v24, %v11802_v11  ;;  %v14934_v50 = vld [vmem:[#allocation12_spill] sm:$0xff]  ;;  %v3811_v61 = vadd.f32 %v11443_v5, %v3743_v60  ;;  %v3883_v55 = vmul.f32 %v14865_v54, %v14939_v9 }
 0x338   : > { %v3441_v29 = vpop.f32.mrf.mxu1  ;;  %v11843_v47 = vrot.slane %v7398_v2, %v14934_v50  ;;  %v4209_v53 = vpop.f32.mrf.mxu0  ;;  %v14937_v24 = vld [vmem:[#allocation92_spill] sm:$0xff]  ;;  %v3999_v2 = vmul.f32 %v3935_v1, %v11823_v57  ;;  %v3884_v1 = vmul.f32 %v14865_v54, %v14940_v63  ;;  %v11877_v57 = vadd.f32 %v3880_v26, %v11749_v8  ;;  %v11884_v63 = vld [vmem:[%s14441_s7] ss:$0 sm:$0xff] }
 0x339   : > { %v11840_v51 = vadd.f32 %v11351_v20, %v3596_v42  ;;  %v3747_v3 = vmul.f32 %v14855_v48, %v14937_v24  ;;  %v4526_v29 = vmul.f32 %v11833_v18, %v11833_v18  ;;  %v3882_v20 = vmul.f32 %v14865_v54, %v14938_v21 }
 0x33a   : > { %v3444_v45 = vpop.f32.mrf.mxu1  ;;  %v4211_v44 = vpop.f32.mrf.mxu0  ;;  %v3814_v21 = vadd.f32 %v11443_v5, %v3746_v62 }
 0x33b   : > { %14933 = vst [vmem:[#allocation37_spill] sm:$0xff] %v11840_v51  ;;  %v4000_v42 = vmul.f32 %v3936_v25, %v11840_v51  ;;  %v3597_v50 = vadd.f32 %v11647_v49, %v3444_v45  ;;  %v4654_v41 = vmul.f32 %v4526_v29, %v11833_v18  ;;  %v11863_v0 = vadd.f32 %v4211_v44, %v11802_v11 }
 0x33c   : > { %v3446_v24 = vpop.f32.mrf.mxu1  ;;  %v11869_v45 = vadd.f32 %v4209_v53, %v11843_v47  ;;  %v11871_v51 = vadd.f32 %v3879_v14, %v3811_v61  ;;  %v3815_v60 = vadd.f32 %v11443_v5, %v3747_v3  ;;  %v4213_v44 = vpop.f32.mrf.mxu0  ;;  %v11879_v62 = vadd.f32 %v3882_v20, %v3814_v21  ;;  %v14943_v14 = vld [vmem:[#allocation98_spill] sm:$0xff] }
 0x33d   : > { %v4047_v25 = vpack.c.bf16 %v4000_v42, %v3999_v2  ;;  %v4782_v24 = vmul.f32 0.044715, %v4654_v41  ;;  %v4528_v29 = vmul.f32 %v11863_v0, %v11863_v0  ;;  %v11887_v61 = vadd.f32 %v11884_v63, %v3597_v50  ;;  %v14944_v50 = vld [vmem:[#allocation101_spill] sm:$0xff] }
 0x33e   : > { %14941 = vst [vmem:[#allocation33_spill] sm:$0xff] %v11869_v45  ;;  %v3447_v9 = vpop.f32.mrf.mxu1  ;;  %v11890_v53 = vadd.f32 %v3883_v55, %v3815_v60  ;;  %v3750_v3 = vmul.f32 %v14855_v48, %v14943_v14  ;;  %v11898_v42 = vadd.f32 %v3884_v1, %v11758_v30  ;;  %v3751_v21 = vmul.f32 %v14855_v48, %v14944_v50  ;;  %v14946_v60 = vld [vmem:[#allocation99_spill] sm:$0xff]  ;;  %v14949_v1 = vld [vmem:[#allocation22_spill] sm:$0xff] }
 0x33f   : > { %14942 = vst [vmem:[#allocation39_spill] sm:$0xff] %v11887_v61  ;;  %4366 = vmatmul.mubr.bf16.gmra.mxu0 %v4047_v25  ;;  %v3598_v41 = vadd.f32 %v11661_v19, %v3447_v9  ;;  %v4910_v8 = vadd.f32 %v4782_v24, %v11833_v18  ;;  %v4656_v20 = vmul.f32 %v4528_v29, %v11863_v0 }
 0x340   : > { %v3449_v26 = vpop.f32.mrf.mxu1  ;;  %4375 = vmatprep.mubr.bf16.mxu0 %v14676_v32  ;;  %v4217_v2 = vpop.f32.mrf.mxu0  ;;  %v4527_v25 = vmul.f32 %v11869_v45, %v11869_v45  ;;  %v3886_v9 = vmul.f32 %v14865_v54, %v14946_v60  ;;  %v11910_v14 = vadd.f32 %v4213_v44, %v11843_v47  ;;  %v3754_v50 = vmul.f32 %v14855_v48, %v14949_v1  ;;  %v14950_v60 = vld [vmem:[#allocation80_spill] sm:$0xff] }
 0x341   : > { %v11903_v55 = vadd.f32 %v11884_v63, %v3598_v41  ;;  %v5038_v24 = vmul.f32 0.7978846, %v4910_v8  ;;  %v4784_v29 = vmul.f32 0.044715, %v4656_v20  ;;  %v14948_v26 = vld [vmem:[#allocation103_spill] sm:$0xff]  ;;  %v4001_v41 = vmul.f32 %v11741_v46, %v11887_v61 }
 0x342   : > { %14947 = vst [vmem:[#allocation38_spill] sm:$0xff] %v11910_v14  ;;  %v3887_v30 = vmul.f32 %v14865_v54, %v14948_v26  ;;  %v3818_v52 = vadd.f32 %v11443_v5, %v3750_v3  ;;  %v3888_v8 = vmul.f32 %v14865_v54, %v14950_v60  ;;  %v4219_v20 = vpop.f32.mrf.mxu0  ;;  %v3819_v26 = vadd.f32 %v11443_v5, %v3751_v21  ;;  %v14953_v21 = vld [vmem:[#allocation18_spill] sm:$0xff] }
 0x343   : > { %14945 = vst [vmem:[#allocation40_spill] sm:$0xff] %v11903_v55  ;;  %v4002_v59 = vmul.f32 %v11808_v40, %v11903_v55  ;;  %7999 = vtanh.f32 %v5038_v24  ;;  %v4912_v44 = vadd.f32 %v4784_v29, %v11863_v0  ;;  %v3890_v1 = vmul.f32 %v14865_v54, %v14951_v13  ;;  %v14952_v40 = vld [vmem:[#allocation16_spill] sm:$0xff] }
 0x344   : > { %v4655_v46 = vmul.f32 %v4527_v25, %v11869_v45  ;;  %v11928_v61 = vadd.f32 %v3886_v9, %v3818_v52  ;;  %v3755_v3 = vmul.f32 %v14855_v48, %v14952_v40  ;;  %v4529_v24 = vmul.f32 %v11910_v14, %v11910_v14  ;;  %v14955_v9 = vld [vmem:[#allocation76_spill] sm:$0xff] }
 0x345   : > { %v4048_v58 = vpack.c.bf16 %v4002_v59, %v4001_v41  ;;  %v5040_v55 = vmul.f32 0.7978846, %v4912_v44  ;;  %v11934_v60 = vadd.f32 %v3887_v30, %v3819_v26  ;;  %v3822_v29 = vadd.f32 %v11443_v5, %v3754_v50  ;;  %v14954_v59 = vld [vmem:[#allocation19_spill] sm:$0xff]  ;;  %v4221_v30 = vpop.f32.mrf.mxu0  ;;  %v14957_v44 = vld [vmem:[#allocation90_spill] sm:$0xff]  ;;  %v14959_v40 = vld [vmem:[#allocation84_spill] sm:$0xff] }
 0x346   : > { %v3760_v12 = vmul.f32 %v14855_v48, %v14953_v21  ;;  %v11940_v13 = vadd.f32 %v4217_v2, %v11802_v11  ;;  %v11943_v52 = vadd.f32 %v3888_v8, %v11784_v10  ;;  %v3758_v25 = vmul.f32 %v14855_v48, %v14954_v59  ;;  %v14958_v2 = vld [vmem:[#allocation109_spill] sm:$0xff]  ;;  %v14960_v59 = vld [vmem:[#allocation110_spill] sm:$0xff] }
 0x347   : > { %4376 = vmatmul.mubr.bf16.gmra.mxu0 %v4048_v58  ;;  %v3759_v41 = vmul.f32 %v14855_v48, %v14955_v9  ;;  %8001 = vtanh.f32 %v5040_v55  ;;  %v11950_v50 = vadd.f32 %v3890_v1, %v3822_v29  ;;  %v3891_v58 = vmul.f32 %v14865_v54, %v14957_v44  ;;  %v14961_v29 = vld [vmem:[#allocation20_spill] sm:$0xff]  ;;  %v14962_v44 = vld [vmem:[#allocation111_spill] sm:$0xff] }
 0x348   : > { %4385 = vmatprep.mubr.bf16.mxu0 %v14676_v32  ;;  %v3892_v26 = vmul.f32 %v14865_v54, %v14958_v2  ;;  %v4783_v10 = vmul.f32 0.044715, %v4655_v46  ;;  %v3823_v8 = vadd.f32 %v11443_v5, %v3755_v3  ;;  %v3894_v21 = vmul.f32 %v14865_v54, %v14959_v40  ;;  %v14963_v40 = vld [vmem:[#allocation113_spill] sm:$0xff] }
 0x349   : > { %14956 = vst [vmem:[#allocation36_spill] sm:$0xff] %v11950_v50  ;;  %v3895_v55 = vmul.f32 %v14865_v54, %v14960_v59  ;;  %v4657_v9 = vmul.f32 %v4529_v24, %v11910_v14  ;;  %v3828_v1 = vadd.f32 %v11443_v5, %v3760_v12  ;;  %v3761_v39 = vmul.f32 %v14855_v48, %v14961_v29  ;;  %v4223_v12 = vpop.f32.mrf.mxu0 }
 0x34a   : > { %v3896_v27 = vmul.f32 %v14865_v54, %v14962_v44  ;;  %v4530_v46 = vmul.f32 %v11940_v13, %v11940_v13  ;;  %v3826_v3 = vadd.f32 %v11443_v5, %v3758_v25  ;;  %v3827_v2 = vadd.f32 %v11443_v5, %v3759_v41 }
 0x34b   : > { %v3762_v59 = vmul.f32 %v14855_v48, %v14963_v40  ;;  %v3452_v7 = vpop.f32.mrf.mxu1  ;;  %v11974_v24 = vadd.f32 %v4219_v20, %v11843_v47  ;;  %v11976_v23 = vadd.f32 %v3891_v58, %v3823_v8  ;;  %v11979_v29 = vadd.f32 %v3892_v26, %v11792_v22 }
 0x34c   : > { %v4911_v44 = vadd.f32 %v4783_v10, %v11869_v45  ;;  %v3599_v50 = vadd.f32 %v11484_v35, %v3452_v7  ;;  %v11985_v25 = vadd.f32 %v11443_v5, %v11820_v38  ;;  %v11987_v41 = vadd.f32 %v3894_v21, %v3826_v3  ;;  %v14967_v35 = vld [vmem:[#allocation116_spill] sm:$0xff] }
 0x34d   : > { %14964 = vst [vmem:[#allocation41_spill] sm:$0xff] %v11974_v24  ;;  %v11989_v40 = vadd.f32 %v3895_v55, %v3827_v2  ;;  %v4785_v20 = vmul.f32 0.044715, %v4657_v9  ;;  %v3454_v6 = vpop.f32.mrf.mxu1  ;;  %v11992_v58 = vadd.f32 %v11443_v5, %v3761_v39  ;;  %v11994_v22 = vadd.f32 %v3896_v27, %v3828_v1  ;;  %v14971_v55 = vld [vmem:[#allocation117_spill] sm:$0xff] }
 0x34e   : > { %v4227_v4 = vpop.f32.mrf.mxu0  ;;  %v4658_v26 = vmul.f32 %v4530_v46, %v11940_v13  ;;  %v12002_v38 = vmul.f32 %v14865_v54, %v14967_v35  ;;  %v12005_v10 = vadd.f32 %v11443_v5, %v3762_v59  ;;  %v12008_v6 = vadd.f32 %v11884_v63, %v3599_v50 }
 0x34f   : > { %14965 = vst [vmem:[#allocation43_spill] sm:$0xff] %v11989_v40  ;;  %14966 = vst [vmem:[#allocation45_spill] sm:$0xff] %v11994_v22  ;;  %v11998_v7 = vadd.f32 %v4227_v4, %v11802_v11  ;;  %v3455_v8 = vpop.f32.mrf.mxu1  ;;  %v4531_v27 = vmul.f32 %v11974_v24, %v11974_v24  ;;  %v12014_v4 = vmul.f32 %v14865_v54, %v14971_v55  ;;  %v12016_v9 = vmul.f32 0.7978846, %v4911_v44 }
 0x350   : > { %14968 = vst [vmem:[#allocation44_spill] sm:$0xff] %v12002_v38  ;;  %14969 = vst [vmem:[#allocation47_spill] sm:$0xff] %v12005_v10  ;;  %v4229_v39 = vpop.f32.mrf.mxu0  ;;  %v8000_v21 = vpop.eup %7999  ;;  %v3600_v1 = vadd.f32 %v11511_v17, %v3455_v8  ;;  %v4913_v50 = vadd.f32 %v4785_v20, %v11910_v14  ;;  %v12023_v2 = vadd.f32 %v4221_v30, %v11802_v11  ;;  %v4786_v55 = vmul.f32 0.044715, %v4658_v26 }
 0x351   : > { %14970 = vst [vmem:[#allocation49_spill] sm:$0xff] %v12008_v6  ;;  %14972 = vst [vmem:[#allocation46_spill] sm:$0xff] %v12014_v4  ;;  %v4534_v5 = vmul.f32 %v11998_v7, %v11998_v7  ;;  %v5294_v46 = vadd.f32 1.0, %v8000_v21  ;;  %v3457_v3 = vpop.f32.mrf.mxu1  ;;  %v12026_v59 = vadd.f32 %v4229_v39, %v11843_v47  ;;  %v4003_v20 = vmul.f32 %v11826_v15, %v12008_v6 }
 0x352   : > { %v4231_v35 = vpop.f32.mrf.mxu0  ;;  %v12029_v44 = vadd.f32 %v11884_v63, %v3600_v1  ;;  %v4659_v30 = vmul.f32 %v4531_v27, %v11974_v24  ;;  %v4532_v15 = vmul.f32 %v12023_v2, %v12023_v2  ;;  %v12050_v27 = vadd.f32 %v4223_v12, %v11843_v47 }
 0x353   : > { %v4662_v17 = vmul.f32 %v4534_v5, %v11998_v7  ;;  %v12033_v8 = vadd.f32 %v4231_v35, %v11802_v11  ;;  %v5422_v21 = vmul.f32 0.5, %v5294_v46  ;;  %v4535_v39 = vmul.f32 %v12026_v59, %v12026_v59 }
 0x354   : > { %14973 = vst [vmem:[#allocation52_spill] sm:$0xff] %v12029_v44  ;;  %v4233_v3 = vpop.f32.mrf.mxu0  ;;  %v8002_v45 = vpop.eup %8001  ;;  %v4004_v26 = vmul.f32 %v11828_v28, %v12029_v44  ;;  %14974 = vst [vmem:[#allocation75_spill] sm:$0xff] %v12050_v27  ;;  %v4914_v38 = vadd.f32 %v4786_v55, %v11940_v13 }
 0x355   : > { %v4790_v1 = vmul.f32 0.044715, %v4662_v17  ;;  %v4536_v5 = vmul.f32 %v12033_v8, %v12033_v8  ;;  %v12045_v35 = vadd.f32 %v4233_v3, %v11843_v47  ;;  %v5296_v46 = vadd.f32 1.0, %v8002_v45 }
 0x356   : > { %v3460_v6 = vpop.f32.mrf.mxu1  ;;  %v4663_v22 = vmul.f32 %v4535_v39, %v12026_v59  ;;  %v4049_v40 = vpack.c.bf16 %v4004_v26, %v4003_v20  ;;  %v5041_v3 = vmul.f32 0.7978846, %v4913_v50  ;;  %v12059_v12 = vmul.f32 %v5422_v21, %v11833_v18 }
 0x357   : > { %v3601_v28 = vadd.f32 %v11545_v36, %v3460_v6  ;;  %v4918_v17 = vadd.f32 %v4790_v1, %v11998_v7  ;;  %v4664_v44 = vmul.f32 %v4536_v5, %v12033_v8  ;;  %v5424_v14 = vmul.f32 0.5, %v5296_v46 }
 0x358   : > { %v3462_v4 = vpop.f32.mrf.mxu1  ;;  %v4791_v45 = vmul.f32 0.044715, %v4663_v22  ;;  %v4537_v10 = vmul.f32 %v12045_v35, %v12045_v35  ;;  %14975 = vst [vmem:[#allocation42_spill] sm:$0xff] %v12059_v12  ;;  %4386 = vmatmul.mubr.bf16.gmra.mxu0 %v4049_v40  ;;  %v4787_v18 = vmul.f32 0.044715, %v4659_v30  ;;  %v4660_v5 = vmul.f32 %v4532_v15, %v12023_v2 }
 0x359   : > { %v5046_v39 = vmul.f32 0.7978846, %v4918_v17  ;;  %v4792_v20 = vmul.f32 0.044715, %v4664_v44  ;;  %v4237_v36 = vpop.f32.mrf.mxu0  ;;  %v12063_v6 = vmul.f32 %v5424_v14, %v11863_v0  ;;  %4395 = vmatprep.mubr.bf16.mxu0 %v14676_v32  ;;  %v12072_v55 = vadd.f32 %v11884_v63, %v3601_v28 }
 0x35a   : > { %v3463_v26 = vpop.f32.mrf.mxu1  ;;  %v4919_v50 = vadd.f32 %v4791_v45, %v12026_v59  ;;  %v4665_v22 = vmul.f32 %v4537_v10, %v12045_v35  ;;  %v12069_v4 = vadd.f32 %v4237_v36, %v11802_v11 }
 0x35b   : > { %14976 = vst [vmem:[#allocation48_spill] sm:$0xff] %v12063_v6  ;;  %14977 = vst [vmem:[#allocation55_spill] sm:$0xff] %v12072_v55  ;;  %8003 = vtanh.f32 %v5046_v39  ;;  %v3602_v40 = vadd.f32 %v11570_v37, %v3463_v26  ;;  %v4239_v44 = vpop.f32.mrf.mxu0  ;;  %v4920_v10 = vadd.f32 %v4792_v20, %v12033_v8  ;;  %v4915_v20 = vadd.f32 %v4787_v18, %v11974_v24 }
 0x35c   : > { %v5047_v14 = vmul.f32 0.7978846, %v4919_v50  ;;  %v3465_v21 = vpop.f32.mrf.mxu1  ;;  %v4793_v1 = vmul.f32 0.044715, %v4665_v22  ;;  %v4538_v30 = vmul.f32 %v12069_v4, %v12069_v4  ;;  %v12085_v28 = vadd.f32 %v4239_v44, %v11843_v47 }
 0x35d   : > { %v12080_v46 = vadd.f32 %v11884_v63, %v3602_v40  ;;  %v4241_v37 = vpop.f32.mrf.mxu0  ;;  %v5048_v17 = vmul.f32 0.7978846, %v4920_v10  ;;  %v4005_v15 = vmul.f32 %v11786_v34, %v12072_v55  ;;  %v4533_v18 = vmul.f32 %v12050_v27, %v12050_v27 }
 0x35e   : > { %8005 = vtanh.f32 %v5047_v14  ;;  %v4921_v45 = vadd.f32 %v4793_v1, %v12045_v35  ;;  %v12089_v39 = vadd.f32 %v4241_v37, %v11802_v11  ;;  %v4666_v26 = vmul.f32 %v4538_v30, %v12069_v4  ;;  %v14979_v30 = vld [vmem:[#allocation118_spill] sm:$0xff] }
 0x35f   : > { %14978 = vst [vmem:[#allocation68_spill] sm:$0xff] %v12080_v46  ;;  %v4006_v36 = vmul.f32 %v11835_v16, %v12080_v46  ;;  %v4243_v50 = vpop.f32.mrf.mxu0  ;;  %8007 = vtanh.f32 %v5048_v17  ;;  %v4539_v40 = vmul.f32 %v12085_v28, %v12085_v28  ;;  %v5042_v16 = vmul.f32 0.7978846, %v4914_v38 }
 0x360   : > { %v5049_v22 = vmul.f32 0.7978846, %v4921_v45  ;;  %v4540_v44 = vmul.f32 %v12089_v39, %v12089_v39  ;;  %v4794_v21 = vmul.f32 0.044715, %v4666_v26  ;;  %v12104_v34 = vadd.f32 %v4243_v50, %v11843_v47 }
 0x361   : > { %v4050_v14 = vpack.c.bf16 %v4006_v36, %v4005_v15  ;;  %v4667_v10 = vmul.f32 %v4539_v40, %v12085_v28  ;;  %v12110_v37 = vmul.f32 %v14855_v48, %v14979_v30  ;;  %v4788_v17 = vmul.f32 0.044715, %v4660_v5 }
 0x362   : > { %8009 = vtanh.f32 %v5049_v22  ;;  %v4668_v1 = vmul.f32 %v4540_v44, %v12089_v39  ;;  %v4922_v45 = vadd.f32 %v4794_v21, %v12069_v4  ;;  %v4541_v15 = vmul.f32 %v12104_v34, %v12104_v34 }
 0x363   : > { %4396 = vmatmul.mubr.bf16.gmra.mxu0 %v4050_v14  ;;  %8011 = vtanh.f32 %v12016_v9  ;;  %v5043_v36 = vmul.f32 0.7978846, %v4915_v20  ;;  %v4795_v26 = vmul.f32 0.044715, %v4667_v10  ;;  %v4661_v44 = vmul.f32 %v4533_v18, %v12050_v27  ;;  %v14980_v20 = vld [vmem:[#allocation119_spill] sm:$0xff] }
 0x364   : > { %v3468_v38 = vpop.f32.mrf.mxu1  ;;  %v4796_v50 = vmul.f32 0.044715, %v4668_v1  ;;  %4405 = vmatprep.mubr.bf16.mxu0 %v14676_v32  ;;  %8013 = vtanh.f32 %v5041_v3  ;;  %v5050_v22 = vmul.f32 0.7978846, %v4922_v45  ;;  %v4669_v5 = vmul.f32 %v4541_v15, %v12104_v34 }
 0x365   : > { %v3603_v40 = vadd.f32 %v11616_v31, %v3468_v38  ;;  %8015 = vtanh.f32 %v5042_v16  ;;  %v4923_v14 = vadd.f32 %v4795_v26, %v12085_v28  ;;  %v12124_v10 = vmul.f32 %v14855_v48, %v14980_v20 }
 0x366   : > { %v3470_v21 = vpop.f32.mrf.mxu1  ;;  %v4924_v9 = vadd.f32 %v4796_v50, %v12089_v39  ;;  %v4916_v1 = vadd.f32 %v4788_v17, %v12023_v2  ;;  %8017 = vtanh.f32 %v5050_v22  ;;  %v4797_v3 = vmul.f32 0.044715, %v4669_v5  ;;  %v4247_v30 = vpop.f32.mrf.mxu0 }
 0x367   : > { %8019 = vtanh.f32 %v5043_v36  ;;  %v5051_v45 = vmul.f32 0.7978846, %v4923_v14  ;;  %v12128_v18 = vadd.f32 %v4247_v30, %v11802_v11  ;;  %v12131_v26 = vadd.f32 %v11884_v63, %v3603_v40 }
 0x368   : > { %v8004_v31 = vpop.eup %8003  ;;  %v5052_v16 = vmul.f32 0.7978846, %v4924_v9  ;;  %v3471_v15 = vpop.f32.mrf.mxu1  ;;  %v4925_v21 = vadd.f32 %v4797_v3, %v12104_v34  ;;  %v4789_v22 = vmul.f32 0.044715, %v4661_v44  ;;  %v12140_v20 = vmul.f32 0.7978846, %v4916_v1 }
 0x369   : > { %v5302_v38 = vadd.f32 1.0, %v8004_v31  ;;  %14981 = vst [vmem:[#allocation70_spill] sm:$0xff] %v12131_v26  ;;  %v3604_v50 = vadd.f32 %v11634_v56, %v3471_v15  ;;  %v4249_v17 = vpop.f32.mrf.mxu0  ;;  %8021 = vtanh.f32 %v5051_v45  ;;  %v4542_v36 = vmul.f32 %v12128_v18, %v12128_v18 }
 0x36a   : > { %v3473_v5 = vpop.f32.mrf.mxu1  ;;  %v12138_v14 = vadd.f32 %v4249_v17, %v11843_v47  ;;  %8023 = vtanh.f32 %v5052_v16  ;;  %v5053_v56 = vmul.f32 0.7978846, %v4925_v21  ;;  %v4007_v1 = vmul.f32 %v11871_v51, %v12131_v26 }
 0x36b   : > { %v8006_v9 = vpop.eup %8005  ;;  %v12143_v40 = vadd.f32 %v11884_v63, %v3604_v50  ;;  %v4251_v30 = vpop.f32.mrf.mxu0  ;;  %v4670_v3 = vmul.f32 %v4542_v36, %v12128_v18  ;;  %v5430_v17 = vmul.f32 0.5, %v5302_v38 }
 0x36c   : > { %v4543_v44 = vmul.f32 %v12138_v14, %v12138_v14  ;;  %v12149_v31 = vadd.f32 %v4251_v30, %v11802_v11  ;;  %v5303_v45 = vadd.f32 1.0, %v8006_v9  ;;  %v8008_v15 = vpop.eup %8007  ;;  %8025 = vtanh.f32 %v5053_v56 }
 0x36d   : > { %14982 = vst [vmem:[#allocation78_spill] sm:$0xff] %v12143_v40  ;;  %v4008_v16 = vmul.f32 %v11877_v57, %v12143_v40  ;;  %v4253_v50 = vpop.f32.mrf.mxu0  ;;  %v5304_v21 = vadd.f32 1.0, %v8008_v15  ;;  %v4798_v36 = vmul.f32 0.044715, %v4670_v3 }
 0x36e   : > { %v3476_v5 = vpop.f32.mrf.mxu1  ;;  %v4671_v0 = vmul.f32 %v4543_v44, %v12138_v14  ;;  %v4544_v30 = vmul.f32 %v12149_v31, %v12149_v31  ;;  %v12160_v55 = vadd.f32 %v4253_v50, %v11843_v47  ;;  %v5431_v51 = vmul.f32 0.5, %v5303_v45 }
 0x36f   : > { %v8010_v46 = vpop.eup %8009  ;;  %v4051_v9 = vpack.c.bf16 %v4008_v16, %v4007_v1  ;;  %v3605_v38 = vadd.f32 %v11647_v49, %v3476_v5  ;;  %v5432_v26 = vmul.f32 0.5, %v5304_v21  ;;  %v4926_v56 = vadd.f32 %v4798_v36, %v12128_v18 }
 0x370   : > { %v3478_v57 = vpop.f32.mrf.mxu1  ;;  %v4799_v15 = vmul.f32 0.044715, %v4671_v0  ;;  %v4672_v3 = vmul.f32 %v4544_v30, %v12149_v31  ;;  %v12164_v40 = vpop.eup %8011  ;;  %v12167_v44 = vadd.f32 %v4789_v22, %v12050_v27  ;;  %v12170_v1 = vmul.f32 %v5430_v17, %v11998_v7 }
 0x371   : > { %14983 = vst [vmem:[#allocation86_spill] sm:$0xff] %v12164_v40  ;;  %v12173_v49 = vadd.f32 %v11884_v63, %v3605_v38  ;;  %4406 = vmatmul.mubr.bf16.gmra.mxu0 %v4051_v9  ;;  %v4545_v45 = vmul.f32 %v12160_v55, %v12160_v55  ;;  %v4257_v16 = vpop.f32.mrf.mxu0  ;;  %v12177_v50 = vpop.eup %8013  ;;  %v5054_v0 = vmul.f32 0.7978846, %v4926_v56  ;;  %v5305_v22 = vadd.f32 1.0, %v8010_v46 }
 0x372   : > { %v3479_v21 = vpop.f32.mrf.mxu1  ;;  %v4927_v5 = vadd.f32 %v4799_v15, %v12138_v14  ;;  %v4800_v36 = vmul.f32 0.044715, %v4672_v3  ;;  %4415 = vmatprep.mubr.bf16.mxu0 %v14676_v32  ;;  %v12181_v7 = vpop.eup %8015  ;;  %v12186_v9 = vadd.f32 %v4257_v16, %v11802_v11  ;;  %v12189_v57 = vmul.f32 %v5431_v51, %v12026_v59 }
 0x373   : > { %14984 = vst [vmem:[#allocation93_spill] sm:$0xff] %v12173_v49  ;;  %v3606_v17 = vadd.f32 %v11661_v19, %v3479_v21  ;;  %v4673_v30 = vmul.f32 %v4545_v45, %v12160_v55  ;;  %v4259_v38 = vpop.f32.mrf.mxu0  ;;  %v8018_v56 = vpop.eup %8017  ;;  %v12192_v15 = vmul.f32 %v5432_v26, %v12033_v8  ;;  %8027 = vtanh.f32 %v5054_v0 }
 0x374   : > { %v5055_v3 = vmul.f32 0.7978846, %v4927_v5  ;;  %v3481_v46 = vpop.f32.mrf.mxu1  ;;  %v4928_v12 = vadd.f32 %v4800_v36, %v12149_v31  ;;  %v12195_v6 = vpop.eup %8019  ;;  %v5306_v19 = vadd.f32 1.0, %v8018_v56  ;;  %v4546_v59 = vmul.f32 %v12186_v9, %v12186_v9 }
 0x375   : > { %14985 = vst [vmem:[#allocation63_spill] sm:$0xff] %v12195_v6  ;;  %v12198_v45 = vadd.f32 %v11884_v63, %v3606_v17  ;;  %v4801_v16 = vmul.f32 0.044715, %v4673_v30  ;;  %v4261_v51 = vpop.f32.mrf.mxu0  ;;  %v12203_v8 = vadd.f32 %v4259_v38, %v11843_v47  ;;  %v4009_v5 = vmul.f32 %v11760_v33, %v12173_v49 }
 0x376   : > { %8029 = vtanh.f32 %v5055_v3  ;;  %v5056_v21 = vmul.f32 0.7978846, %v4928_v12  ;;  %v12206_v26 = vadd.f32 %v4261_v51, %v11802_v11  ;;  %v8022_v0 = vpop.eup %8021  ;;  %v4674_v30 = vmul.f32 %v4546_v59, %v12186_v9 }
 0x377   : > { %14986 = vst [vmem:[#allocation102_spill] sm:$0xff] %v12198_v45  ;;  %v4010_v36 = vmul.f32 %v11879_v62, %v12198_v45  ;;  %v4929_v17 = vadd.f32 %v4801_v16, %v12160_v55  ;;  %v4263_v56 = vpop.f32.mrf.mxu0  ;;  %v8024_v3 = vpop.eup %8023  ;;  %v4547_v12 = vmul.f32 %v12203_v8, %v12203_v8  ;;  %v5434_v33 = vmul.f32 0.5, %v5306_v19 }
 0x378   : > { %8031 = vtanh.f32 %v5056_v21  ;;  %v4548_v38 = vmul.f32 %v12206_v26, %v12206_v26  ;;  %v12219_v46 = vadd.f32 %v4263_v56, %v11843_v47  ;;  %v5308_v51 = vadd.f32 1.0, %v8024_v3 }
 0x379   : > { %v4052_v49 = vpack.c.bf16 %v4010_v36, %v4009_v5  ;;  %v5057_v62 = vmul.f32 0.7978846, %v4929_v17  ;;  %v8026_v45 = vpop.eup %8025  ;;  %v4802_v16 = vmul.f32 0.044715, %v4674_v30  ;;  %v4675_v59 = vmul.f32 %v4547_v12, %v12203_v8 }
 0x37a   : > { %v4676_v24 = vmul.f32 %v4548_v38, %v12206_v26  ;;  %v4549_v21 = vmul.f32 %v12219_v46, %v12219_v46  ;;  %v5436_v27 = vmul.f32 0.5, %v5308_v51  ;;  %v5433_v6 = vmul.f32 0.5, %v5305_v22 }
 0x37b   : > { %8033 = vtanh.f32 %v5057_v62  ;;  %4416 = vmatmul.mubr.bf16.gmra.mxu0 %v4052_v49  ;;  %v5307_v56 = vadd.f32 1.0, %v8022_v0  ;;  %v4930_v19 = vadd.f32 %v4802_v16, %v12186_v9  ;;  %v4803_v3 = vmul.f32 0.044715, %v4675_v59  ;;  %v12232_v49 = vld [vmem:[%s8838_s29 + $0x20] sm:$0xff] }
 0x37c   : > { %v4804_v5 = vmul.f32 0.044715, %v4676_v24  ;;  %v4677_v36 = vmul.f32 %v4549_v21, %v12219_v46  ;;  %4425 = vmatprep.mubr.bf16.mxu0 %v14676_v32  ;;  %v5682_v17 = vpack.c.bf16 %v12192_v15, %v12170_v1  ;;  %v5561_v12 = vmul.f32 %v5433_v6, %v12045_v35 }
 0x37d   : > { %v3484_v30 = vpop.f32.mrf.mxu1  ;;  %v5309_v38 = vadd.f32 1.0, %v8026_v45  ;;  %v5435_v51 = vmul.f32 0.5, %v5307_v56  ;;  %v5058_v62 = vmul.f32 0.7978846, %v4930_v19  ;;  %v4931_v0 = vadd.f32 %v4803_v3, %v12203_v8 }
 0x37e   : > { %v3607_v22 = vadd.f32 %v12232_v49, %v3484_v30  ;;  %v4932_v24 = vadd.f32 %v4804_v5, %v12206_v26  ;;  %v12238_v16 = vmul.f32 %v5434_v33, %v12069_v4  ;;  %v4805_v21 = vmul.f32 0.044715, %v4677_v36 }
 0x37f   : > { %v3486_v59 = vpop.f32.mrf.mxu1  ;;  %v5683_v1 = vpack.c.bf16 %v5561_v12, %v12189_v57  ;;  %v4267_v15 = vpop.f32.mrf.mxu0  ;;  %v5437_v35 = vmul.f32 0.5, %v5309_v38  ;;  %v5564_v6 = vmul.f32 %v5436_v27, %v12089_v39  ;;  %v5059_v56 = vmul.f32 0.7978846, %v4931_v0  ;;  %v12254_v39 = vld [vmem:[%s8838_s29 + $0x28] sm:$0xff] }
 0x380   : > { %v12243_v45 = vadd.f32 %v11884_v63, %v3607_v22  ;;  %v5060_v19 = vmul.f32 0.7978846, %v4932_v24  ;;  %v8028_v3 = vpop.eup %8027  ;;  %v4933_v5 = vadd.f32 %v4805_v21, %v12219_v46  ;;  %v12247_v4 = vadd.f32 %v4267_v15, %v11802_v11 }
 0x381   : > { %v3487_v30 = vpop.f32.mrf.mxu1  ;;  %5919 = vmatprep.mubr.bf16.mxu1 %v5683_v1  ;;  %v4269_v33 = vpop.f32.mrf.mxu0  ;;  %v5563_v57 = vmul.f32 %v5435_v51, %v12085_v28  ;;  %v5565_v36 = vmul.f32 %v5437_v35, %v12104_v34  ;;  %v5310_v12 = vadd.f32 1.0, %v8028_v3  ;;  %8035 = vtanh.f32 %v5058_v62 }
 0x382   : > { %14987 = vst [vmem:[#allocation100_spill] sm:$0xff] %v12243_v45  ;;  %v4011_v27 = vmul.f32 %v11890_v53, %v12243_v45  ;;  %v3608_v38 = vadd.f32 %v12254_v39, %v3487_v30  ;;  %5920 = vmatmul.mubr.bf16.vlgmr.msra.gmra.mxu1 %v5682_v17  ;;  %8037 = vtanh.f32 %v5060_v19  ;;  %v5061_v0 = vmul.f32 0.7978846, %v4933_v5 }
 0x383   : > { %v8030_v22 = vpop.eup %8029  ;;  %v3489_v24 = vpop.f32.mrf.mxu1  ;;  %v4550_v59 = vmul.f32 %v12247_v4, %v12247_v4  ;;  %v12260_v28 = vadd.f32 %v4269_v33, %v11843_v47  ;;  %8039 = vtanh.f32 %v5059_v56  ;;  %v5685_v51 = vpack.c.bf16 %v5565_v36, %v5563_v57  ;;  %v12276_v33 = vld [vmem:[%s8838_s29 + $0x30] sm:$0xff] }
 0x384   : > { %v4271_v34 = vpop.f32.mrf.mxu0  ;;  %v12263_v53 = vadd.f32 %v11884_v63, %v3608_v38  ;;  %v5438_v21 = vmul.f32 0.5, %v5310_v12  ;;  %8041 = vtanh.f32 %v5061_v0  ;;  %v5311_v5 = vadd.f32 1.0, %v8030_v22 }
 0x385   : > { %v12266_v62 = vadd.f32 %v4271_v34, %v11802_v11  ;;  %v8032_v17 = vpop.eup %8031  ;;  %v4678_v1 = vmul.f32 %v4550_v59, %v12247_v4  ;;  %v4551_v15 = vmul.f32 %v12260_v28, %v12260_v28  ;;  %5927 = vmatprep.mubr.bf16.mxu1 %v5685_v51  ;;  %8043 = vtanh.f32 %v12140_v20 }
 0x386   : > { %14988 = vst [vmem:[#allocation50_spill] sm:$0xff] %v12263_v53  ;;  %v4273_v35 = vpop.f32.mrf.mxu0  ;;  %v5312_v19 = vadd.f32 1.0, %v8032_v17  ;;  %v4012_v56 = vmul.f32 %v11898_v42, %v12263_v53  ;;  %v3492_v3 = vpop.f32.mrf.mxu1  ;;  %v5684_v22 = vpack.c.bf16 %v5564_v6, %v12238_v16  ;;  %v12296_v6 = vld [vmem:[%s8838_s29 + $0x38] sm:$0xff] }
 0x387   : > { %v4552_v30 = vmul.f32 %v12266_v62, %v12266_v62  ;;  %v3609_v57 = vadd.f32 %v12276_v33, %v3492_v3  ;;  %v4806_v36 = vmul.f32 0.044715, %v4678_v1  ;;  %v4679_v12 = vmul.f32 %v4551_v15, %v12260_v28 }
 0x388   : > { %v12281_v38 = vadd.f32 %v4273_v35, %v11843_v47  ;;  %v8034_v0 = vpop.eup %8033  ;;  %v4053_v42 = vpack.c.bf16 %v4012_v56, %v4011_v27  ;;  %v3494_v24 = vpop.f32.mrf.mxu1  ;;  %v12293_v15 = vmul.f32 %v5438_v21, %v12128_v18  ;;  %v5440_v20 = vmul.f32 0.5, %v5312_v19 }
 0x389   : > { %v4680_v59 = vmul.f32 %v4552_v30, %v12266_v62  ;;  %v12287_v34 = vadd.f32 %v11884_v63, %v3609_v57  ;;  %v4934_v51 = vadd.f32 %v4806_v36, %v12247_v4  ;;  %v4807_v17 = vmul.f32 0.044715, %v4679_v12 }
 0x38a   : > { %v4553_v1 = vmul.f32 %v12281_v38, %v12281_v38  ;;  %4426 = vmatmul.mubr.bf16.gmra.mxu0 %v4053_v42  ;;  %v3495_v27 = vpop.f32.mrf.mxu1  ;;  %5928 = vmatmul.mubr.bf16.gmra.mxu1 %v5684_v22  ;;  %v4277_v56 = vpop.f32.mrf.mxu0  ;;  %v5313_v3 = vadd.f32 1.0, %v8034_v0  ;;  %v5439_v36 = vmul.f32 0.5, %v5311_v5 }
 0x38b   : > { %14989 = vst [vmem:[#allocation104_spill] sm:$0xff] %v12287_v34  ;;  %v4808_v35 = vmul.f32 0.044715, %v4680_v59  ;;  %v5062_v16 = vmul.f32 0.7978846, %v4934_v51  ;;  %v3610_v30 = vadd.f32 %v12296_v6, %v3495_v27  ;;  %v4935_v57 = vadd.f32 %v4807_v17, %v12260_v28  ;;  %4435 = vmatprep.mubr.bf16.mxu0 %v14676_v32 }
 0x38c   : > { %v4013_v18 = vmul.f32 %v11815_v43, %v12287_v34  ;;  %v3497_v21 = vpop.f32.mrf.mxu1  ;;  %v4681_v12 = vmul.f32 %v4553_v1, %v12281_v38  ;;  %v12306_v0 = vadd.f32 %v4277_v56, %v11802_v11  ;;  %v4279_v42 = vpop.f32.mrf.mxu0  ;;  %v5441_v27 = vmul.f32 0.5, %v5313_v3 }
 0x38d   : > { %v4936_v19 = vadd.f32 %v4808_v35, %v12266_v62  ;;  %8045 = vtanh.f32 %v5062_v16  ;;  %v12309_v24 = vadd.f32 %v11884_v63, %v3610_v30  ;;  %v5063_v59 = vmul.f32 0.7978846, %v4935_v57 }
 0x38e   : > { %v12312_v22 = vadd.f32 %v4279_v42, %v11843_v47  ;;  %v4809_v51 = vmul.f32 0.044715, %v4681_v12  ;;  %v4554_v43 = vmul.f32 %v12306_v0, %v12306_v0  ;;  %v4281_v17 = vpop.f32.mrf.mxu0  ;;  %v8036_v1 = vpop.eup %8035  ;;  %v5568_v57 = vmul.f32 %v5440_v20, %v12149_v31 }
 0x38f   : > { %14990 = vst [vmem:[#allocation57_spill] sm:$0xff] %v12309_v24  ;;  %v5064_v5 = vmul.f32 0.7978846, %v4936_v19  ;;  %v4014_v35 = vmul.f32 %v11928_v61, %v12309_v24  ;;  %8047 = vtanh.f32 %v5063_v59  ;;  %v12321_v16 = vadd.f32 %v4281_v17, %v11802_v11  ;;  %v8038_v30 = vpop.eup %8037 }
 0x390   : > { %v4555_v56 = vmul.f32 %v12312_v22, %v12312_v22  ;;  %v4937_v21 = vadd.f32 %v4809_v51, %v12281_v38  ;;  %v4682_v19 = vmul.f32 %v4554_v43, %v12306_v0  ;;  %v4283_v3 = vpop.f32.mrf.mxu0  ;;  %v8040_v12 = vpop.eup %8039  ;;  %v5316_v42 = vadd.f32 1.0, %v8038_v30  ;;  %v12337_v30 = vld [vmem:[%s8838_s29] sm:$0xff] }
 0x391   : > { %8049 = vtanh.f32 %v5064_v5  ;;  %v4054_v34 = vpack.c.bf16 %v4014_v35, %v4013_v18  ;;  %v4556_v59 = vmul.f32 %v12321_v16, %v12321_v16  ;;  %v8042_v17 = vpop.eup %8041  ;;  %v12330_v31 = vadd.f32 %v4283_v3, %v11843_v47  ;;  %14991 = vst [vmem:[#allocation91_spill] sm:$0xff] %v12337_v30 }
 0x392   : > { %v4683_v61 = vmul.f32 %v4555_v56, %v12312_v22  ;;  %v5065_v24 = vmul.f32 0.7978846, %v4937_v21  ;;  %v4810_v53 = vmul.f32 0.044715, %v4682_v19  ;;  %v5567_v20 = vmul.f32 %v5439_v36, %v12138_v14  ;;  %v8044_v14 = vpop.eup %8043 }
 0x393   : > { %v5314_v5 = vadd.f32 1.0, %v8036_v1  ;;  %4436 = vmatmul.mubr.bf16.gmra.mxu0 %v4054_v34  ;;  %v3500_v51 = vpop.f32.mrf.mxu1  ;;  %v4684_v18 = vmul.f32 %v4556_v59, %v12321_v16  ;;  %v5569_v35 = vmul.f32 %v5441_v27, %v12160_v55  ;;  %v4557_v19 = vmul.f32 %v12330_v31, %v12330_v31 }
 0x394   : > { %v4811_v43 = vmul.f32 0.044715, %v4683_v61  ;;  %8051 = vtanh.f32 %v5065_v24  ;;  %v4938_v56 = vadd.f32 %v4810_v53, %v12306_v0  ;;  %v3611_v21 = vadd.f32 %v12337_v30, %v3500_v51  ;;  %4445 = vmatprep.mubr.bf16.mxu0 %v14676_v32 }
 0x395   : > { %v5045_v34 = vmul.f32 0.7978846, %v12167_v44  ;;  %v5444_v36 = vmul.f32 0.5, %v5316_v42  ;;  %v3502_v1 = vpop.f32.mrf.mxu1  ;;  %v4812_v3 = vmul.f32 0.044715, %v4684_v18  ;;  %v5687_v55 = vpack.c.bf16 %v5569_v35, %v5567_v20  ;;  %v12352_v42 = vld [vmem:[%s8838_s29 + $0x8] sm:$0xff] }
 0x396   : > { %v5066_v24 = vmul.f32 0.7978846, %v4938_v56  ;;  %v4939_v53 = vadd.f32 %v4811_v43, %v12312_v22  ;;  %v4685_v27 = vmul.f32 %v4557_v19, %v12330_v31  ;;  %v5686_v61 = vpack.c.bf16 %v5568_v57, %v12293_v15 }
 0x397   : > { %v5442_v59 = vmul.f32 0.5, %v5314_v5  ;;  %v4940_v51 = vadd.f32 %v4812_v3, %v12321_v16  ;;  %v3503_v45 = vpop.f32.mrf.mxu1  ;;  %5935 = vmatprep.mubr.bf16.mxu1 %v5687_v55  ;;  %v5315_v30 = vadd.f32 1.0, %v8040_v12  ;;  %v5317_v40 = vadd.f32 1.0, %v8042_v17 }
 0x398   : > { %8053 = vtanh.f32 %v5066_v24  ;;  %v12349_v44 = vadd.f32 %v11884_v63, %v3611_v21  ;;  %v3612_v20 = vadd.f32 %v12352_v42, %v3503_v45  ;;  %v4813_v43 = vmul.f32 0.044715, %v4685_v27  ;;  %5936 = vmatmul.mubr.bf16.gmra.mxu1 %v5686_v61 }
 0x399   : > { %v5298_v18 = vadd.f32 1.0, %v12181_v7  ;;  %v5068_v15 = vmul.f32 0.7978846, %v4940_v51  ;;  %v3505_v57 = vpop.f32.mrf.mxu1  ;;  %v5443_v5 = vmul.f32 0.5, %v5315_v30  ;;  %v5445_v35 = vmul.f32 0.5, %v5317_v40 }
 0x39a   : > { %v8046_v56 = vpop.eup %8045  ;;  %v5572_v12 = vmul.f32 %v5444_v36, %v12206_v26  ;;  %v5067_v17 = vmul.f32 0.7978846, %v4939_v53  ;;  %v12358_v21 = vadd.f32 %v11884_v63, %v3612_v20  ;;  %v4941_v19 = vadd.f32 %v4813_v43, %v12330_v31  ;;  %v12369_v36 = vld [vmem:[%s8838_s29 + $0x10] sm:$0xff] }
 0x39b   : > { %v5318_v1 = vadd.f32 1.0, %v8046_v56  ;;  %8055 = vtanh.f32 %v5068_v15  ;;  %v3508_v45 = vpop.f32.mrf.mxu1  ;;  %v5571_v3 = vmul.f32 %v5443_v5, %v12203_v8  ;;  %v5573_v7 = vmul.f32 %v5445_v35, %v12219_v46 }
 0x39c   : > { %v8048_v55 = vpop.eup %8047  ;;  %v5570_v30 = vmul.f32 %v5442_v59, %v12186_v9  ;;  %v4015_v40 = vmul.f32 %v11934_v60, %v12349_v44  ;;  %v4016_v26 = vmul.f32 %v11943_v52, %v12358_v21  ;;  %v3613_v24 = vadd.f32 %v12369_v36, %v3508_v45  ;;  %v12375_v60 = vld [vmem:[%s14437_s3 + $0x1] ss:$0 sm:$0xff] }
 0x39d   : > { %v5426_v27 = vmul.f32 0.5, %v5298_v18  ;;  %v5069_v61 = vmul.f32 0.7978846, %v4941_v19  ;;  %v3510_v51 = vpop.f32.mrf.mxu1  ;;  %v5689_v8 = vpack.c.bf16 %v5573_v7, %v5571_v3  ;;  %v5319_v20 = vadd.f32 1.0, %v8048_v55  ;;  %v14993_v3 = vld [vmem:[#allocation34_spill] sm:$0xff] }
 0x39e   : > { %v8050_v53 = vpop.eup %8049  ;;  %v5300_v46 = vadd.f32 1.0, %v8044_v14  ;;  %v4055_v9 = vpack.c.bf16 %v4016_v26, %v4015_v40  ;;  %v5688_v59 = vpack.c.bf16 %v5572_v12, %v5570_v30  ;;  %v12379_v52 = vadd.f32 %v12375_v60, %v12124_v10  ;;  %v14992_v14 = vld [vmem:[#allocation121_spill] sm:$0xff]  ;;  %v12389_v12 = vld [vmem:[%s8838_s29 + $0x18] sm:$0xff] }
 0x39f   : > { %v5320_v43 = vadd.f32 1.0, %v8050_v53  ;;  %v5446_v15 = vmul.f32 0.5, %v5318_v1  ;;  %8057 = vtanh.f32 %v5067_v17  ;;  %v12382_v18 = vadd.f32 %v11884_v63, %v3613_v24  ;;  %v3511_v57 = vpop.f32.mrf.mxu1  ;;  %5943 = vmatprep.mubr.bf16.mxu1 %v5689_v8  ;;  %v14994_v53 = vld [vmem:[#allocation31_spill] sm:$0xff] }
 0x3a0   : > { %v12386_v5 = vmul.f32 %v14855_v48, %v14992_v14  ;;  %8059 = vtanh.f32 %v5045_v34  ;;  %v4287_v56 = vpop.f32.mrf.mxu0  ;;  %4446 = vmatmul.mubr.bf16.gmra.mxu0 %v4055_v9  ;;  %v3614_v10 = vadd.f32 %v12389_v12, %v3511_v57  ;;  %5944 = vmatmul.mubr.bf16.gmra.mxu1 %v5688_v59  ;;  %v5447_v45 = vmul.f32 0.5, %v5319_v20 }
 0x3a1   : > { %v5448_v35 = vmul.f32 0.5, %v5320_v43  ;;  %v8052_v19 = vpop.eup %8051  ;;  %8061 = vtanh.f32 %v5069_v61  ;;  %v12393_v17 = vadd.f32 %v4287_v56, %v11802_v11  ;;  %v3513_v1 = vpop.f32.mrf.mxu1  ;;  %4455 = vmatprep.mubr.bf16.mxu0 %v14676_v32  ;;  %v12398_v34 = vadd.f32 %v14993_v3, %v11985_v25 }
 0x3a2   : > { %v12401_v7 = vmul.f32 %v5426_v27, %v11940_v13  ;;  %v5428_v55 = vmul.f32 0.5, %v5300_v46  ;;  %v12404_v30 = vadd.f32 %v11884_v63, %v3614_v10  ;;  %v4289_v40 = vpop.f32.mrf.mxu0  ;;  %v5321_v26 = vadd.f32 1.0, %v8052_v19  ;;  %v14995_v27 = vld [vmem:[#allocation36_spill] sm:$0xff]  ;;  %v12428_v10 = vld [vmem:[%s14441_s7] ss:$0 sm:$0xff] }
 0x3a3   : > { %v5574_v24 = vmul.f32 %v5446_v15, %v12247_v4  ;;  %v4017_v61 = vmul.f32 %v14994_v53, %v12382_v18  ;;  %v4558_v51 = vmul.f32 %v12393_v17, %v12393_v17  ;;  %v12412_v25 = vadd.f32 %v4289_v40, %v11843_v47  ;;  %v3516_v8 = vpop.f32.mrf.mxu1 }
 0x3a4   : > { %v5576_v13 = vmul.f32 %v5448_v35, %v12266_v62  ;;  %v4018_v63 = vmul.f32 %v14995_v27, %v12404_v30  ;;  %v4291_v20 = vpop.f32.mrf.mxu0  ;;  %v3615_v46 = vadd.f32 %v12232_v49, %v3516_v8  ;;  %v5449_v43 = vmul.f32 0.5, %v5321_v26 }
 0x3a5   : > { %v8054_v4 = vpop.eup %8053  ;;  %v4686_v9 = vmul.f32 %v4558_v51, %v12393_v17  ;;  %v4559_v59 = vmul.f32 %v12412_v25, %v12412_v25  ;;  %v12422_v15 = vadd.f32 %v4291_v20, %v11802_v11  ;;  %v3518_v57 = vpop.f32.mrf.mxu1  ;;  %v5575_v14 = vmul.f32 %v5447_v45, %v12260_v28 }
 0x3a6   : > { %v5322_v62 = vadd.f32 1.0, %v8054_v4  ;;  %v4056_v35 = vpack.c.bf16 %v4018_v63, %v4017_v61  ;;  %v4293_v56 = vpop.f32.mrf.mxu0  ;;  %v12431_v19 = vadd.f32 %v12428_v10, %v3615_v46  ;;  %v5577_v1 = vmul.f32 %v5449_v43, %v12281_v38 }
 0x3a7   : > { %v4814_v3 = vmul.f32 0.044715, %v4686_v9  ;;  %v4687_v40 = vmul.f32 %v4559_v59, %v12412_v25  ;;  %v4560_v26 = vmul.f32 %v12422_v15, %v12422_v15  ;;  %v12438_v28 = vadd.f32 %v4293_v56, %v11843_v47  ;;  %v3519_v45 = vpop.f32.mrf.mxu1 }
 0x3a8   : > { %v8056_v53 = vpop.eup %8055  ;;  %v12441_v61 = vmul.f32 %v5428_v55, %v12023_v2  ;;  %4456 = vmatmul.mubr.bf16.gmra.mxu0 %v4056_v35  ;;  %v3616_v51 = vadd.f32 %v12254_v39, %v3519_v45  ;;  %v5691_v8 = vpack.c.bf16 %v5577_v1, %v5575_v14  ;;  %v5690_v27 = vpack.c.bf16 %v5576_v13, %v5574_v24 }
 0x3a9   : > { %v5324_v38 = vadd.f32 1.0, %v8056_v53  ;;  %v4942_v63 = vadd.f32 %v4814_v3, %v12393_v17  ;;  %v4815_v20 = vmul.f32 0.044715, %v4687_v40  ;;  %v4688_v46 = vmul.f32 %v4560_v26, %v12422_v15  ;;  %v4297_v43 = vpop.f32.mrf.mxu0  ;;  %v3521_v4 = vpop.f32.mrf.mxu1  ;;  %4465 = vmatprep.mubr.bf16.mxu0 %v14676_v32 }
 0x3aa   : > { %v5450_v9 = vmul.f32 0.5, %v5322_v62  ;;  %v4561_v2 = vmul.f32 %v12438_v28, %v12438_v28  ;;  %v12450_v55 = vadd.f32 %v4297_v43, %v11802_v11  ;;  %v12453_v59 = vadd.f32 %v12428_v10, %v3616_v51  ;;  %5951 = vmatprep.mubr.bf16.mxu1 %v5691_v8 }
 0x3ab   : > { %v5070_v24 = vmul.f32 0.7978846, %v4942_v63  ;;  %v4943_v13 = vadd.f32 %v4815_v20, %v12412_v25  ;;  %v4816_v57 = vmul.f32 0.044715, %v4688_v46  ;;  %v4019_v14 = vmul.f32 %v11976_v23, %v12431_v19  ;;  %v4299_v35 = vpop.f32.mrf.mxu0  ;;  %5952 = vmatmul.mubr.bf16.gmra.mxu1 %v5690_v27 }
 0x3ac   : > { %14996 = vst [vmem:[#allocation51_spill] sm:$0xff] %v12453_v59  ;;  %v8058_v62 = vpop.eup %8057  ;;  %v4689_v56 = vmul.f32 %v4561_v2, %v12438_v28  ;;  %v4562_v1 = vmul.f32 %v12450_v55, %v12450_v55  ;;  %v12462_v3 = vadd.f32 %v4299_v35, %v11843_v47  ;;  %v4020_v40 = vmul.f32 %v11979_v29, %v12453_v59 }
 0x3ad   : > { %v12466_v26 = vpop.eup %8059  ;;  %v5452_v45 = vmul.f32 0.5, %v5324_v38  ;;  %8063 = vtanh.f32 %v5070_v24  ;;  %v5071_v53 = vmul.f32 0.7978846, %v4943_v13  ;;  %v4944_v23 = vadd.f32 %v4816_v57, %v12422_v15  ;;  %v4301_v51 = vpop.f32.mrf.mxu0 }
 0x3ae   : > { %v8062_v8 = vpop.eup %8061  ;;  %v4817_v27 = vmul.f32 0.044715, %v4689_v56  ;;  %v4690_v63 = vmul.f32 %v4562_v1, %v12450_v55  ;;  %v4563_v20 = vmul.f32 %v12462_v3, %v12462_v3  ;;  %v12473_v46 = vadd.f32 %v4301_v51, %v11802_v11 }
 0x3af   : > { %8065 = vtanh.f32 %v5071_v53  ;;  %v5072_v29 = vmul.f32 0.7978846, %v4944_v23  ;;  %v4057_v43 = vpack.c.bf16 %v4020_v40, %v4019_v14  ;;  %v4303_v4 = vpop.f32.mrf.mxu0  ;;  %v5323_v38 = vadd.f32 1.0, %v8058_v62 }
 0x3b0   : > { %v4945_v2 = vadd.f32 %v4817_v27, %v12438_v28  ;;  %v4818_v24 = vmul.f32 0.044715, %v4690_v63  ;;  %v4691_v13 = vmul.f32 %v4563_v20, %v12462_v3  ;;  %v4564_v57 = vmul.f32 %v12473_v46, %v12473_v46 }
 0x3b1   : > { %8067 = vtanh.f32 %v5072_v29  ;;  %v12480_v35 = vadd.f32 %v4303_v4, %v11843_v47  ;;  %v3524_v56 = vpop.f32.mrf.mxu1  ;;  %4466 = vmatmul.mubr.bf16.gmra.mxu0 %v4057_v43  ;;  %v5325_v1 = vadd.f32 1.0, %v8062_v8  ;;  %v5451_v53 = vmul.f32 0.5, %v5323_v38 }
 0x3b2   : > { %v5073_v23 = vmul.f32 0.7978846, %v4945_v2  ;;  %v4946_v14 = vadd.f32 %v4818_v24, %v12450_v55  ;;  %v4819_v62 = vmul.f32 0.044715, %v4691_v13  ;;  %v4692_v40 = vmul.f32 %v4564_v57, %v12473_v46  ;;  %4475 = vmatprep.mubr.bf16.mxu0 %v14676_v32 }
 0x3b3   : > { %v5580_v51 = vmul.f32 %v5452_v45, %v12321_v16  ;;  %v4565_v27 = vmul.f32 %v12480_v35, %v12480_v35  ;;  %v3617_v63 = vadd.f32 %v12276_v33, %v3524_v56  ;;  %v3526_v20 = vpop.f32.mrf.mxu1  ;;  %v5453_v29 = vmul.f32 0.5, %v5325_v1 }
 0x3b4   : > { %8069 = vtanh.f32 %v5073_v23  ;;  %v5074_v8 = vmul.f32 0.7978846, %v4946_v14  ;;  %v4947_v43 = vadd.f32 %v4819_v62, %v12462_v3  ;;  %v4820_v4 = vmul.f32 0.044715, %v4692_v40 }
 0x3b5   : > { %v5578_v38 = vmul.f32 %v5450_v9, %v12306_v0  ;;  %v4693_v2 = vmul.f32 %v4565_v27, %v12480_v35  ;;  %v3527_v24 = vpop.f32.mrf.mxu1  ;;  %v5579_v13 = vmul.f32 %v5451_v53, %v12312_v22  ;;  %v5581_v16 = vmul.f32 %v5453_v29, %v12330_v31  ;;  %v14999_v53 = vld [vmem:[#allocation120_spill] sm:$0xff]  ;;  %v15001_v29 = vld [vmem:[#allocation122_spill] sm:$0xff] }
 0x3b6   : > { %v4948_v45 = vadd.f32 %v4820_v4, %v12473_v46  ;;  %v12496_v33 = vadd.f32 %v12428_v10, %v3617_v63  ;;  %v3618_v57 = vadd.f32 %v12296_v6, %v3527_v24  ;;  %v5297_v56 = vadd.f32 1.0, %v12177_v50  ;;  %v15000_v50 = vld [vmem:[#allocation23_spill] sm:$0xff] }
 0x3b7   : > { %v5075_v1 = vmul.f32 0.7978846, %v4947_v43  ;;  %v4821_v23 = vmul.f32 0.044715, %v4693_v2  ;;  %v3529_v14 = vpop.f32.mrf.mxu1  ;;  %v5693_v0 = vpack.c.bf16 %v5581_v16, %v5579_v13  ;;  %v5692_v9 = vpack.c.bf16 %v5580_v51, %v5578_v38  ;;  %v15003_v16 = vld [vmem:[#allocation47_spill] sm:$0xff] }
 0x3b8   : > { %14997 = vst [vmem:[#allocation54_spill] sm:$0xff] %v12496_v33  ;;  %8071 = vtanh.f32 %v5074_v8  ;;  %v5076_v62 = vmul.f32 0.7978846, %v4948_v45  ;;  %v12501_v22 = vadd.f32 %v12428_v10, %v3618_v57  ;;  %v3899_v40 = vmul.f32 %v14865_v54, %v14999_v53  ;;  %v15004_v45 = vld [vmem:[#allocation46_spill] sm:$0xff]  ;;  %v15006_v53 = vld [vmem:[#allocation91_spill] sm:$0xff] }
 0x3b9   : > { %v3833_v27 = vadd.f32 %v12375_v60, %v12386_v5  ;;  %v3900_v63 = vmul.f32 %v14865_v54, %v15000_v50  ;;  %v4949_v20 = vadd.f32 %v4821_v23, %v12480_v35  ;;  %5959 = vmatprep.mubr.bf16.mxu1 %v5693_v0  ;;  %v3901_v8 = vmul.f32 %v14865_v54, %v15001_v29  ;;  %v15002_v5 = vld [vmem:[#allocation44_spill] sm:$0xff]  ;;  %v15005_v14 = vld [vmem:[#allocation86_spill] sm:$0xff]  ;;  %v15007_v29 = vld [vmem:[#allocation123_spill] sm:$0xff] }
 0x3ba   : > { %14998 = vst [vmem:[#allocation14_spill] sm:$0xff] %v12501_v22  ;;  %v8064_v51 = vpop.eup %8063  ;;  %8073 = vtanh.f32 %v5076_v62  ;;  %v4021_v43 = vmul.f32 %v12398_v34, %v12496_v33  ;;  %v4022_v4 = vmul.f32 %v11987_v41, %v12501_v22  ;;  %5960 = vmatmul.mubr.bf16.gmra.mxu1 %v5692_v9  ;;  %v12520_v38 = vadd.f32 %v15002_v5, %v11992_v58 }
 0x3bb   : > { %v3831_v2 = vadd.f32 %v12375_v60, %v12110_v37  ;;  %8075 = vtanh.f32 %v5075_v1  ;;  %v5077_v24 = vmul.f32 0.7978846, %v4949_v20  ;;  %v12526_v57 = vadd.f32 %v15004_v45, %v15003_v16  ;;  %v15010_v45 = vld [vmem:[#allocation38_spill] sm:$0xff] }
 0x3bc   : > { %v8066_v13 = vpop.eup %8065  ;;  %v4058_v23 = vpack.c.bf16 %v4022_v4, %v4021_v43  ;;  %v3532_v34 = vpop.f32.mrf.mxu1  ;;  %v5295_v0 = vadd.f32 1.0, %v15005_v14  ;;  %v5425_v41 = vmul.f32 0.5, %v5297_v56  ;;  %v5326_v62 = vadd.f32 1.0, %v8064_v51 }
 0x3bd   : > { %v12529_v9 = vadd.f32 %v3899_v40, %v3831_v2  ;;  %8077 = vtanh.f32 %v5077_v24  ;;  %v4307_v58 = vpop.f32.mrf.mxu0  ;;  %v3619_v50 = vadd.f32 %v15006_v53, %v3532_v34  ;;  %v12533_v1 = vadd.f32 %v3900_v63, %v12379_v52  ;;  %v15008_v40 = vld [vmem:[#allocation124_spill] sm:$0xff]  ;;  %v15009_v52 = vld [vmem:[#allocation63_spill] sm:$0xff] }
 0x3be   : > { %v8068_v37 = vpop.eup %8067  ;;  %v12535_v20 = vadd.f32 %v3901_v8, %v3833_v27  ;;  %v12539_v43 = vmul.f32 %v14855_v48, %v15007_v29  ;;  %v12542_v4 = vadd.f32 %v4307_v58, %v11802_v11  ;;  %4476 = vmatmul.mubr.bf16.gmra.mxu0 %v4058_v23  ;;  %v3534_v56 = vpop.f32.mrf.mxu1  ;;  %v12546_v51 = vmul.f32 %v14865_v54, %v15008_v40 }
 0x3bf   : > { %v5328_v5 = vadd.f32 1.0, %v8068_v37  ;;  %v4309_v2 = vpop.f32.mrf.mxu0  ;;  %v5327_v24 = vadd.f32 1.0, %v8066_v13  ;;  %4485 = vmatprep.mubr.bf16.mxu0 %v14676_v32  ;;  %v5299_v27 = vadd.f32 1.0, %v15009_v52  ;;  %v12555_v16 = vmul.f32 0.5, %v5295_v0 }
 0x3c0   : > { %v4566_v48 = vmul.f32 %v12542_v4, %v12542_v4  ;;  %v12553_v63 = vadd.f32 %v4309_v2, %v11843_v47  ;;  %v3535_v8 = vpop.f32.mrf.mxu1  ;;  %v12558_v23 = vmul.f32 %v5425_v41, %v15010_v45  ;;  %v5454_v34 = vmul.f32 0.5, %v5326_v62 }
 0x3c1   : > { %v8070_v54 = vpop.eup %8069  ;;  %v5456_v14 = vmul.f32 0.5, %v5328_v5  ;;  %v4311_v13 = vpop.f32.mrf.mxu0  ;;  %v12561_v58 = vadd.f32 %v12428_v10, %v3619_v50  ;;  %v3620_v53 = vadd.f32 %v12352_v42, %v3535_v8  ;;  %v5455_v5 = vmul.f32 0.5, %v5327_v24 }
 0x3c2   : > { %v4694_v37 = vmul.f32 %v4566_v48, %v12542_v4  ;;  %v4567_v29 = vmul.f32 %v12553_v63, %v12553_v63  ;;  %v12568_v0 = vadd.f32 %v4311_v13, %v11802_v11  ;;  %v3537_v56 = vpop.f32.mrf.mxu1  ;;  %v5329_v41 = vadd.f32 1.0, %v8070_v54  ;;  %v15013_v13 = vld [vmem:[#allocation43_spill] sm:$0xff] }
 0x3c3   : > { %15011 = vst [vmem:[#allocation58_spill] sm:$0xff] %v12561_v58  ;;  %v4313_v40 = vpop.f32.mrf.mxu0  ;;  %v12571_v62 = vadd.f32 %v12428_v10, %v3620_v53  ;;  %v12574_v50 = vadd.f32 1.0, %v12466_v26  ;;  %v12576_v2 = vmul.f32 0.5, %v5299_v27  ;;  %v5584_v42 = vmul.f32 %v5456_v14, %v12422_v15  ;;  %v15014_v26 = vld [vmem:[#allocation45_spill] sm:$0xff] }
 0x3c4   : > { %v4822_v52 = vmul.f32 0.044715, %v4694_v37  ;;  %v4695_v48 = vmul.f32 %v4567_v29, %v12553_v63  ;;  %v4568_v8 = vmul.f32 %v12568_v0, %v12568_v0  ;;  %v12583_v54 = vadd.f32 %v4313_v40, %v11843_v47 }
 0x3c5   : > { %15012 = vst [vmem:[#allocation64_spill] sm:$0xff] %v12571_v62  ;;  %v8072_v45 = vpop.eup %8071  ;;  %v4023_v24 = vmul.f32 %v15013_v13, %v12561_v58  ;;  %v4024_v53 = vmul.f32 %v15014_v26, %v12571_v62  ;;  %v5457_v27 = vmul.f32 0.5, %v5329_v41  ;;  %v5582_v56 = vmul.f32 %v5454_v34, %v12393_v17 }
 0x3c6   : > { %v4950_v15 = vadd.f32 %v4822_v52, %v12542_v4  ;;  %v4823_v14 = vmul.f32 0.044715, %v4695_v48  ;;  %v4696_v37 = vmul.f32 %v4568_v8, %v12568_v0  ;;  %v4569_v31 = vmul.f32 %v12583_v54, %v12583_v54 }
 0x3c7   : > { %v8074_v29 = vpop.eup %8073  ;;  %v4317_v40 = vpop.f32.mrf.mxu0  ;;  %v4059_v22 = vpack.c.bf16 %v4024_v53, %v4023_v24  ;;  %v5583_v33 = vmul.f32 %v5455_v5, %v12412_v25  ;;  %v5585_v13 = vmul.f32 %v5457_v27, %v12438_v28  ;;  %v5330_v26 = vadd.f32 1.0, %v8072_v45 }
 0x3c8   : > { %v8076_v58 = vpop.eup %8075  ;;  %v5078_v41 = vmul.f32 0.7978846, %v4950_v15  ;;  %v4951_v17 = vadd.f32 %v4823_v14, %v12553_v63  ;;  %v5694_v34 = vpack.c.bf16 %v5584_v42, %v5582_v56  ;;  %v4824_v52 = vmul.f32 0.044715, %v4696_v37 }
 0x3c9   : > { %v4697_v48 = vmul.f32 %v4569_v31, %v12583_v54  ;;  %v12599_v8 = vadd.f32 %v4317_v40, %v11802_v11  ;;  %v4319_v62 = vpop.f32.mrf.mxu0  ;;  %v5695_v59 = vpack.c.bf16 %v5585_v13, %v5583_v33  ;;  %4486 = vmatmul.mubr.bf16.gmra.mxu0 %v4059_v22  ;;  %v5332_v53 = vadd.f32 1.0, %v8074_v29 }
 0x3ca   : > { %v8078_v24 = vpop.eup %8077  ;;  %8079 = vtanh.f32 %v5078_v41  ;;  %v5079_v25 = vmul.f32 0.7978846, %v4951_v17  ;;  %v12602_v28 = vadd.f32 %v4319_v62, %v11843_v47  ;;  %4495 = vmatprep.mubr.bf16.mxu0 %v14676_v32  ;;  %v4952_v5 = vadd.f32 %v4824_v52, %v12568_v0 }
 0x3cb   : > { %v4825_v42 = vmul.f32 0.044715, %v4697_v48  ;;  %v4570_v31 = vmul.f32 %v12599_v8, %v12599_v8  ;;  %v4321_v45 = vpop.f32.mrf.mxu0  ;;  %5967 = vmatprep.mubr.bf16.mxu1 %v5695_v59  ;;  %v5331_v27 = vadd.f32 1.0, %v8076_v58  ;;  %v5458_v33 = vmul.f32 0.5, %v5330_v26 }
 0x3cc   : > { %v4571_v22 = vmul.f32 %v12602_v28, %v12602_v28  ;;  %v12611_v56 = vadd.f32 %v4321_v45, %v11802_v11  ;;  %5968 = vmatmul.mubr.bf16.gmra.mxu1 %v5694_v34  ;;  %v3540_v62 = vpop.f32.mrf.mxu1  ;;  %v5333_v15 = vadd.f32 1.0, %v8078_v24  ;;  %8081 = vtanh.f32 %v5079_v25 }
 0x3cd   : > { %v5080_v14 = vmul.f32 0.7978846, %v4952_v5  ;;  %v4698_v37 = vmul.f32 %v4570_v31, %v12599_v8  ;;  %v4323_v29 = vpop.f32.mrf.mxu0  ;;  %v3621_v40 = vadd.f32 %v12369_v36, %v3540_v62  ;;  %v5460_v13 = vmul.f32 0.5, %v5332_v53 }
 0x3ce   : > { %v4699_v59 = vmul.f32 %v4571_v22, %v12602_v28  ;;  %v4572_v58 = vmul.f32 %v12611_v56, %v12611_v56  ;;  %v12619_v26 = vadd.f32 %v4323_v29, %v11843_v47  ;;  %v3542_v41 = vpop.f32.mrf.mxu1  ;;  %v4953_v17 = vadd.f32 %v4825_v42, %v12583_v54 }
 0x3cf   : > { %8083 = vtanh.f32 %v5080_v14  ;;  %v4826_v34 = vmul.f32 0.044715, %v4698_v37  ;;  %v5459_v52 = vmul.f32 0.5, %v5331_v27  ;;  %v5461_v25 = vmul.f32 0.5, %v5333_v15 }
 0x3d0   : > { %v4827_v48 = vmul.f32 0.044715, %v4699_v59  ;;  %v4700_v24 = vmul.f32 %v4572_v58, %v12611_v56  ;;  %v4573_v36 = vmul.f32 %v12619_v26, %v12619_v26  ;;  %v3543_v53 = vpop.f32.mrf.mxu1  ;;  %v12627_v31 = vadd.f32 %v12428_v10, %v3621_v40 }
 0x3d1   : > { %v4954_v5 = vadd.f32 %v4826_v34, %v12599_v8  ;;  %v3622_v45 = vadd.f32 %v12389_v12, %v3543_v53  ;;  %v5429_v22 = vmul.f32 0.5, %v12574_v50  ;;  %v5586_v42 = vmul.f32 %v5458_v33, %v12450_v55 }
 0x3d2   : > { %v5588_v27 = vmul.f32 %v5460_v13, %v12473_v46  ;;  %v4828_v62 = vmul.f32 0.044715, %v4700_v24  ;;  %v4701_v14 = vmul.f32 %v4573_v36, %v12619_v26  ;;  %v3545_v37 = vpop.f32.mrf.mxu1  ;;  %v5587_v59 = vmul.f32 %v5459_v52, %v12462_v3 }
 0x3d3   : > { %v5082_v29 = vmul.f32 0.7978846, %v4954_v5  ;;  %v12635_v15 = vadd.f32 %v12428_v10, %v3622_v45  ;;  %v5589_v40 = vmul.f32 %v5461_v25, %v12480_v35  ;;  %v5081_v58 = vmul.f32 0.7978846, %v4953_v17 }
 0x3d4   : > { %v4955_v12 = vadd.f32 %v4827_v48, %v12602_v28  ;;  %v4956_v50 = vadd.f32 %v4828_v62, %v12611_v56  ;;  %v4829_v55 = vmul.f32 0.044715, %v4701_v14  ;;  %v4025_v46 = vmul.f32 %v12520_v38, %v12627_v31  ;;  %v15016_v38 = vld [vmem:[#allocation33_spill] sm:$0xff] }
 0x3d5   : > { %15015 = vst [vmem:[#allocation71_spill] sm:$0xff] %v12635_v15  ;;  %8085 = vtanh.f32 %v5082_v29  ;;  %v4327_v33 = vpop.f32.mrf.mxu0  ;;  %v4026_v13 = vmul.f32 %v12526_v57, %v12635_v15  ;;  %v5697_v41 = vpack.c.bf16 %v5589_v40, %v5587_v59  ;;  %v5696_v17 = vpack.c.bf16 %v5588_v27, %v5586_v42  ;;  %v15017_v57 = vld [vmem:[#allocation75_spill] sm:$0xff]  ;;  %v15018_v62 = vld [vmem:[#allocation41_spill] sm:$0xff] }
 0x3d6   : > { %v5084_v34 = vmul.f32 0.7978846, %v4956_v50  ;;  %v4957_v3 = vadd.f32 %v4829_v55, %v12619_v26  ;;  %v12647_v35 = vadd.f32 %v4327_v33, %v11802_v11  ;;  %v3834_v48 = vadd.f32 %v12375_v60, %v12539_v43 }
 0x3d7   : > { %v8080_v52 = vpop.eup %8079  ;;  %v4060_v24 = vpack.c.bf16 %v4026_v13, %v4025_v46  ;;  %v4329_v36 = vpop.f32.mrf.mxu0  ;;  %5975 = vmatprep.mubr.bf16.mxu1 %v5697_v41  ;;  %v12653_v53 = vmul.f32 %v12555_v16, %v15016_v38  ;;  %v12656_v25 = vmul.f32 %v5429_v22, %v15017_v57  ;;  %v5083_v45 = vmul.f32 0.7978846, %v4955_v12 }
 0x3d8   : > { %v5334_v5 = vadd.f32 1.0, %v8080_v52  ;;  %8087 = vtanh.f32 %v5084_v34  ;;  %v4574_v42 = vmul.f32 %v12647_v35, %v12647_v35  ;;  %5976 = vmatmul.mubr.bf16.gmra.mxu1 %v5696_v17  ;;  %v5085_v27 = vmul.f32 0.7978846, %v4957_v3 }
 0x3d9   : > { %8089 = vtanh.f32 %v5081_v58  ;;  %v12661_v60 = vadd.f32 %v4329_v36, %v11843_v47  ;;  %v4331_v43 = vpop.f32.mrf.mxu0  ;;  %4496 = vmatmul.mubr.bf16.gmra.mxu0 %v4060_v24  ;;  %v12665_v16 = vmul.f32 %v12576_v2, %v15018_v62  ;;  %v8082_v22 = vpop.eup %8081  ;;  %v12668_v14 = vadd.f32 %v12546_v51, %v3834_v48 }
 0x3da   : > { %v4702_v37 = vmul.f32 %v4574_v42, %v12647_v35  ;;  %v12672_v29 = vadd.f32 %v4331_v43, %v11802_v11  ;;  %v3548_v59 = vpop.f32.mrf.mxu1  ;;  %4505 = vmatprep.mubr.bf16.mxu0 %v14676_v32  ;;  %v5462_v58 = vmul.f32 0.5, %v5334_v5  ;;  %8091 = vtanh.f32 %v5083_v45 }
 0x3db   : > { %v4575_v2 = vmul.f32 %v12661_v60, %v12661_v60  ;;  %v4333_v12 = vpop.f32.mrf.mxu0  ;;  %v3623_v50 = vadd.f32 %v12232_v49, %v3548_v59  ;;  %8093 = vtanh.f32 %v5085_v27  ;;  %v5335_v52 = vadd.f32 1.0, %v8082_v22 }
 0x3dc   : > { %v8084_v55 = vpop.eup %8083  ;;  %v4830_v46 = vmul.f32 0.044715, %v4702_v37  ;;  %v4576_v33 = vmul.f32 %v12672_v29, %v12672_v29  ;;  %v12685_v13 = vadd.f32 %v4333_v12, %v11843_v47  ;;  %v3550_v41 = vpop.f32.mrf.mxu1  ;;  %v12696_v57 = vmul.f32 %v5462_v58, %v12542_v4 }
 0x3dd   : > { %v5336_v34 = vadd.f32 1.0, %v8084_v55  ;;  %v4703_v3 = vmul.f32 %v4575_v2, %v12661_v60  ;;  %v4337_v17 = vpop.f32.mrf.mxu0  ;;  %v12699_v45 = vadd.f32 %v12428_v10, %v3623_v50 }
 0x3de   : > { %v4958_v49 = vadd.f32 %v4830_v46, %v12647_v35  ;;  %v4704_v48 = vmul.f32 %v4576_v33, %v12672_v29  ;;  %v4577_v24 = vmul.f32 %v12685_v13, %v12685_v13  ;;  %v12693_v36 = vadd.f32 %v4337_v17, %v11802_v11  ;;  %v3551_v38 = vpop.f32.mrf.mxu1 }
 0x3df   : > { %v4831_v5 = vmul.f32 0.044715, %v4703_v3  ;;  %15019 = vst [vmem:[#allocation67_spill] sm:$0xff] %v12699_v45  ;;  %v4339_v42 = vpop.f32.mrf.mxu0  ;;  %v3624_v27 = vadd.f32 %v12254_v39, %v3551_v38  ;;  %v5464_v2 = vmul.f32 0.5, %v5336_v34 }
 0x3e0   : > { %v5086_v43 = vmul.f32 0.7978846, %v4958_v49  ;;  %v4832_v62 = vmul.f32 0.044715, %v4704_v48  ;;  %v4705_v22 = vmul.f32 %v4577_v24, %v12685_v13  ;;  %v4578_v37 = vmul.f32 %v12693_v36, %v12693_v36  ;;  %v3553_v59 = vpop.f32.mrf.mxu1 }
 0x3e1   : > { %v4959_v12 = vadd.f32 %v4831_v5, %v12661_v60  ;;  %v12707_v4 = vadd.f32 %v4339_v42, %v11843_v47  ;;  %v4341_v58 = vpop.f32.mrf.mxu0  ;;  %v12710_v50 = vadd.f32 %v12428_v10, %v3624_v27  ;;  %v4027_v27 = vmul.f32 %v12529_v9, %v12699_v45 }
 0x3e2   : > { %v8086_v55 = vpop.eup %8085  ;;  %8095 = vtanh.f32 %v5086_v43  ;;  %v4960_v39 = vadd.f32 %v4832_v62, %v12672_v29  ;;  %v4833_v46 = vmul.f32 0.044715, %v4705_v22  ;;  %v4706_v33 = vmul.f32 %v4578_v37, %v12693_v36 }
 0x3e3   : > { %15020 = vst [vmem:[#allocation69_spill] sm:$0xff] %v12710_v50  ;;  %v5338_v41 = vadd.f32 1.0, %v8086_v55  ;;  %v5087_v3 = vmul.f32 0.7978846, %v4959_v12  ;;  %v4579_v34 = vmul.f32 %v12707_v4, %v12707_v4  ;;  %v12717_v17 = vadd.f32 %v4341_v58, %v11802_v11  ;;  %v3556_v5 = vpop.f32.mrf.mxu1  ;;  %v4343_v22 = vpop.f32.mrf.mxu0 }
 0x3e4   : > { %v5088_v49 = vmul.f32 0.7978846, %v4960_v39  ;;  %v4961_v48 = vadd.f32 %v4833_v46, %v12685_v13  ;;  %v4834_v24 = vmul.f32 0.044715, %v4706_v33  ;;  %v4028_v38 = vmul.f32 %v12533_v1, %v12710_v50 }
 0x3e5   : > { %v8088_v42 = vpop.eup %8087  ;;  %v4707_v43 = vmul.f32 %v4579_v34, %v12707_v4  ;;  %v4580_v62 = vmul.f32 %v12717_v17, %v12717_v17  ;;  %v5463_v37 = vmul.f32 0.5, %v5335_v52  ;;  %v3558_v39 = vpop.f32.mrf.mxu1  ;;  %v5592_v1 = vmul.f32 %v5464_v2, %v12568_v0 }
 0x3e6   : > { %v8090_v59 = vpop.eup %8089  ;;  %v5340_v12 = vadd.f32 1.0, %v8088_v42  ;;  %8097 = vtanh.f32 %v5088_v49  ;;  %v5089_v58 = vmul.f32 0.7978846, %v4961_v48  ;;  %v4962_v55 = vadd.f32 %v4834_v24, %v12693_v36 }
 0x3e7   : > { %v4835_v46 = vmul.f32 0.044715, %v4707_v43  ;;  %v4708_v33 = vmul.f32 %v4580_v62, %v12717_v17  ;;  %v4061_v9 = vpack.c.bf16 %v4028_v38, %v4027_v27  ;;  %v12730_v51 = vmul.f32 0.5, %v5338_v41  ;;  %v3559_v52 = vpop.f32.mrf.mxu1  ;;  %v8092_v42 = vpop.eup %8091 }
 0x3e8   : > { %8099 = vtanh.f32 %v5087_v3  ;;  %v5090_v34 = vmul.f32 0.7978846, %v4962_v55  ;;  %v12733_v40 = vadd.f32 %v4343_v22, %v11843_v47  ;;  %v5337_v24 = vadd.f32 1.0, %v8090_v59  ;;  %v8094_v0 = vpop.eup %8093 }
 0x3e9   : > { %8101 = vtanh.f32 %v5089_v58  ;;  %v4963_v49 = vadd.f32 %v4835_v46, %v12707_v4  ;;  %v4836_v48 = vmul.f32 0.044715, %v4708_v33  ;;  %4506 = vmatmul.mubr.bf16.gmra.mxu0 %v4061_v9  ;;  %v5468_v2 = vmul.f32 0.5, %v5340_v12  ;;  %v3561_v27 = vpop.f32.mrf.mxu1  ;;  %v8431_v58 = vld [vmem:[%s8838_s29 + $0x30] sm:$0xff]  ;;  %s8439_s29 = sshll.u32 %s8531_s21, 4  ;;  %s8440_s29 = int_to_ptr.vmem [resolvable:$false] %s8439_s29 }
 0x3ea   : > { %8103 = vtanh.f32 %v5090_v34  ;;  %v4581_v41 = vmul.f32 %v12733_v40, %v12733_v40  ;;  %v5591_v3 = vmul.f32 %v5463_v37, %v12553_v63  ;;  %v4347_v38 = vpop.f32.mrf.mxu0  ;;  %4515 = vmatprep.mubr.bf16.mxu0 %v14676_v32  ;;  %v5465_v62 = vmul.f32 0.5, %v5337_v24  ;;  %s8441_s22 = scalar_lea.vmem %s8440_s29, 16384  ;;  %p8442_p4 = scmp.lt.s32.totalorder %s14372_s11, %s8440_s29 }
 0x3eb   : > { %v4964_v43 = vadd.f32 %v4836_v48, %v12717_v17  ;;  %v5698_v22 = vpack.c.bf16 %v5592_v1, %v12696_v57  ;;  %v3625_v59 = vadd.f32 %v8431_v58, %v3556_v5  ;;  %v5091_v55 = vmul.f32 0.7978846, %v4963_v49  ;;  %p8443_p5 = scmp.lt.s32.totalorder %s8441_s22, %s8435_s30 }
 0x3ec   : > { %v4709_v12 = vmul.f32 %v4581_v41, %v12733_v40  ;;  %v12745_v39 = vadd.f32 %v4347_v38, %v11802_v11  ;;  %v3626_v46 = vadd.f32 %v12296_v6, %v3559_v52  ;;  %v4349_v63 = vpop.f32.mrf.mxu0  ;;  %v5593_v33 = vmul.f32 %v5465_v62, %v12583_v54 }
 0x3ed   : > { %v5092_v37 = vmul.f32 0.7978846, %v4964_v43  ;;  %v12750_v32 = vadd.f32 %v12428_v10, %v3625_v59  ;;  %v5339_v9 = vadd.f32 1.0, %v8092_v42  ;;  %v12758_v1 = vadd.f32 %v4349_v63, %v11843_v47  ;;  %p8444_p6 = por %p8443_p5, %p8442_p4 }
 0x3ee   : > { %v4837_v34 = vmul.f32 0.044715, %v4709_v12  ;;  %v4582_v57 = vmul.f32 %v12745_v39, %v12745_v39  ;;  %v12755_v5 = vadd.f32 %v12428_v10, %v3626_v46  ;;  %v4351_v49 = vpop.f32.mrf.mxu0  ;;  %v5699_v52 = vpack.c.bf16 %v5593_v33, %v5591_v3 }
 0x3ef   : > { %15021 = vst [vmem:[#allocation11_spill] sm:$0xff] %v12750_v32  ;;  %v8096_v6 = vpop.eup %8095  ;;  %8105 = vtanh.f32 %v5092_v37  ;;  %v4029_v54 = vmul.f32 %v12535_v20, %v12750_v32  ;;  %v5341_v48 = vadd.f32 1.0, %v8094_v0  ;;  %v4583_v27 = vmul.f32 %v12758_v1, %v12758_v1  ;;  %p8445_p7 = pnand %p8444_p6, %p8438_p2 }
 0x3f0   : > { %15022 = vst [vmem:[#allocation77_spill] sm:$0xff] %v12755_v5  ;;  %v5342_v24 = vadd.f32 1.0, %v8096_v6  ;;  %v4965_v42 = vadd.f32 %v4837_v34, %v12733_v40  ;;  %v4710_v41 = vmul.f32 %v4582_v57, %v12745_v39  ;;  %v4030_v10 = vmul.f32 %v12668_v14, %v12755_v5  ;;  %v4353_v38 = vpop.f32.mrf.mxu0  ;;  %5983 = vmatprep.mubr.bf16.mxu1 %v5699_v52 }
 0x3f1   : > { %v5467_v43 = vmul.f32 0.5, %v5339_v9  ;;  %v5469_v62 = vmul.f32 0.5, %v5341_v48  ;;  %v12769_v3 = vadd.f32 %v4351_v49, %v11802_v11  ;;  %v5596_v20 = vmul.f32 %v5468_v2, %v12611_v56  ;;  %5984 = vmatmul.mubr.bf16.gmra.mxu1 %v5698_v22 }
 0x3f2   : > { %v5093_v0 = vmul.f32 0.7978846, %v4965_v42  ;;  %v4838_v58 = vmul.f32 0.044715, %v4710_v41  ;;  %v4062_v59 = vpack.c.bf16 %v4030_v10, %v4029_v54  ;;  %v4357_v12 = vpop.f32.mrf.mxu0  ;;  %v4711_v14 = vmul.f32 %v4583_v27, %v12758_v1 }
 0x3f3   : > { %v8098_v46 = vpop.eup %8097  ;;  %v5595_v63 = vmul.f32 %v5467_v43, %v12602_v28  ;;  %v5597_v37 = vmul.f32 %v5469_v62, %v12619_v26  ;;  %v4584_v33 = vmul.f32 %v12769_v3, %v12769_v3  ;;  %v5470_v9 = vmul.f32 0.5, %v5342_v24 }
 0x3f4   : > { %v5344_v34 = vadd.f32 1.0, %v8098_v46  ;;  %8107 = vtanh.f32 %v5091_v55  ;;  %v4966_v56 = vadd.f32 %v4838_v58, %v12745_v39  ;;  %4516 = vmatmul.mubr.bf16.gmra.mxu0 %v4062_v59  ;;  %v4359_v2 = vpop.f32.mrf.mxu0  ;;  %v4839_v57 = vmul.f32 0.044715, %v4711_v14 }
 0x3f5   : > { %v8100_v22 = vpop.eup %8099  ;;  %8109 = vtanh.f32 %v5093_v0  ;;  %v5701_v49 = vpack.c.bf16 %v5597_v37, %v5595_v63  ;;  %v4712_v6 = vmul.f32 %v4584_v33, %v12769_v3  ;;  %v15023_v28 = vpack.c.bf16 %v12558_v23, %v12653_v53 }
 0x3f6   : > { %v8102_v26 = vpop.eup %8101  ;;  %v5594_v52 = vmul.f32 %v12730_v51, %v12599_v8  ;;  %v5094_v54 = vmul.f32 0.7978846, %v4966_v56  ;;  %v12785_v55 = vadd.f32 %v4353_v38, %v11843_v47  ;;  %v12788_v48 = vadd.f32 %v4357_v12, %v11802_v11  ;;  %v4361_v24 = vpop.f32.mrf.mxu0 }
 0x3f7   : > { %5903 = vmatprep.mubr.bf16.mxu0 %v15023_v28  ;;  %v8104_v42 = vpop.eup %8103  ;;  %v4967_v41 = vadd.f32 %v4839_v57, %v12758_v1  ;;  %5991 = vmatprep.mubr.bf16.mxu1 %v5701_v49  ;;  %v4840_v10 = vmul.f32 0.044715, %v4712_v6  ;;  %v12792_v23 = vadd.f32 %v4359_v2, %v11843_v47  ;;  %v12795_v53 = vadd.f32 %v4361_v24, %v11802_v11  ;;  %v15024_v57 = vld [vmem:[#allocation48_spill] sm:$0xff]  ;;  %v15025_v49 = vld [vmem:[#allocation42_spill] sm:$0xff] }
 0x3f8   : > { %v12798_v8 = vmul.f32 %v5470_v9, %v12647_v35  ;;  %v5346_v51 = vadd.f32 1.0, %v8104_v42  ;;  %v5700_v38 = vpack.c.bf16 %v5596_v20, %v5594_v52  ;;  %v4585_v27 = vmul.f32 %v12785_v55, %v12785_v55  ;;  %v4363_v43 = vpop.f32.mrf.mxu0 }
 0x3f9   : > { %v5472_v62 = vmul.f32 0.5, %v5344_v34  ;;  %v4968_v0 = vadd.f32 %v4840_v10, %v12769_v3  ;;  %v4586_v58 = vmul.f32 %v12788_v48, %v12788_v48  ;;  %v4587_v59 = vmul.f32 %v12792_v23, %v12792_v23 }
 0x3fa   : > { %8111 = vtanh.f32 %v5094_v54  ;;  %5992 = vmatmul.mubr.bf16.gmra.mxu1 %v5700_v38  ;;  %v4713_v35 = vmul.f32 %v4585_v27, %v12785_v55  ;;  %v4588_v20 = vmul.f32 %v12795_v53, %v12795_v53  ;;  %v12811_v12 = vadd.f32 %v4363_v43, %v11843_v47 }
 0x3fb   : > { %v5095_v46 = vmul.f32 0.7978846, %v4967_v41  ;;  %v5096_v14 = vmul.f32 0.7978846, %v4968_v0  ;;  %v4714_v63 = vmul.f32 %v4586_v58, %v12788_v48  ;;  %v4715_v37 = vmul.f32 %v4587_v59, %v12792_v23 }
 0x3fc   : > { %v8106_v33 = vpop.eup %8105  ;;  %v5474_v9 = vmul.f32 0.5, %v5346_v51  ;;  %v4841_v34 = vmul.f32 0.044715, %v4713_v35  ;;  %v4716_v56 = vmul.f32 %v4588_v20, %v12795_v53  ;;  %v4589_v2 = vmul.f32 %v12811_v12, %v12811_v12 }
 0x3fd   : > { %v15026_v6 = vpack.c.bf16 %v15024_v57, %v15025_v49  ;;  %v5348_v28 = vadd.f32 1.0, %v8106_v33  ;;  %8113 = vtanh.f32 %v5096_v14  ;;  %v4842_v52 = vmul.f32 0.044715, %v4714_v63 }
 0x3fe   : > { %v4843_v54 = vmul.f32 0.044715, %v4715_v37  ;;  %v15027_v24 = vpack.c.bf16 %v12656_v25, %v12665_v16  ;;  %v4969_v42 = vadd.f32 %v4841_v34, %v12785_v55  ;;  %v4844_v41 = vmul.f32 0.044715, %v4716_v56 }
 0x3ff   : > { %5904 = vmatmul.mubr.bf16.vlgmr.msra.gmra.mxu0 %v15026_v6  ;;  %v4717_v10 = vmul.f32 %v4589_v2, %v12811_v12  ;;  %v5343_v51 = vadd.f32 1.0, %v8100_v22  ;;  %v5476_v38 = vmul.f32 0.5, %v5348_v28  ;;  %v4970_v27 = vadd.f32 %v4842_v52, %v12788_v48  ;;  %v4367_v58 = vpop.f32.mrf.mxu0 }
 0x400   : > { %5911 = vmatprep.mubr.bf16.mxu0 %v15027_v24  ;;  %v4971_v43 = vadd.f32 %v4843_v54, %v12792_v23  ;;  %v5345_v0 = vadd.f32 1.0, %v8102_v26  ;;  %v5097_v59 = vmul.f32 0.7978846, %v4969_v42  ;;  %v4972_v35 = vadd.f32 %v4844_v41, %v12795_v53 }
 0x401   : > { %v4845_v20 = vmul.f32 0.044715, %v4717_v10  ;;  %v5471_v14 = vmul.f32 0.5, %v5343_v51  ;;  %v8108_v25 = vpop.eup %8107  ;;  %v5600_v16 = vmul.f32 %v5472_v62, %v12672_v29  ;;  %8115 = vtanh.f32 %v5095_v46  ;;  %v4369_v33 = vpop.f32.mrf.mxu0 }
 0x402   : > { %v5098_v63 = vmul.f32 0.7978846, %v4970_v27  ;;  %v5473_v37 = vmul.f32 0.5, %v5345_v0  ;;  %v8110_v22 = vpop.eup %8109  ;;  %v12831_v34 = vmul.f32 %v5474_v9, %v12693_v36  ;;  %v12834_v56 = vmul.f32 %v5476_v38, %v12717_v17 }
 0x403   : > { %v5099_v26 = vmul.f32 0.7978846, %v4971_v43  ;;  %v4973_v2 = vadd.f32 %v4845_v20, %v12811_v12  ;;  %v5100_v57 = vmul.f32 0.7978846, %v4972_v35  ;;  %v5599_v49 = vmul.f32 %v5471_v14, %v12661_v60  ;;  %v4371_v62 = vpop.f32.mrf.mxu0 }
 0x404   : > { %v5601_v6 = vmul.f32 %v5473_v37, %v12685_v13  ;;  %v12840_v29 = vadd.f32 %v4367_v58, %v11802_v11  ;;  %8117 = vtanh.f32 %v5097_v59  ;;  %v12843_v36 = vadd.f32 %v4369_v33, %v11843_v47 }
 0x405   : > { %v5101_v46 = vmul.f32 0.7978846, %v4973_v2  ;;  %v15028_v17 = vpack.c.bf16 %v12441_v61, %v12401_v7  ;;  %v5347_v9 = vadd.f32 1.0, %v8108_v25  ;;  %8119 = vtanh.f32 %v5098_v63  ;;  %v4373_v52 = vpop.f32.mrf.mxu0 }
 0x406   : > { %v5703_v28 = vpack.c.bf16 %v5601_v6, %v5599_v49  ;;  %v4590_v60 = vmul.f32 %v12840_v29, %v12840_v29  ;;  %v5349_v13 = vadd.f32 1.0, %v8110_v22  ;;  %8121 = vtanh.f32 %v5099_v26 }
 0x407   : > { %5912 = vmatmul.mubr.bf16.gmra.mxu0 %v15028_v17  ;;  %v5702_v54 = vpack.c.bf16 %v5600_v16, %v12798_v8  ;;  %v4591_v24 = vmul.f32 %v12843_v36, %v12843_v36  ;;  %v5475_v42 = vmul.f32 0.5, %v5347_v9  ;;  %v8112_v41 = vpop.eup %8111  ;;  %8123 = vtanh.f32 %v5100_v57  ;;  %v4377_v51 = vpop.f32.mrf.mxu0 }
 0x408   : > { %5999 = vmatprep.mubr.bf16.mxu1 %v5703_v28  ;;  %v4718_v7 = vmul.f32 %v4590_v60, %v12840_v29  ;;  %v5477_v61 = vmul.f32 0.5, %v5349_v13  ;;  %v12855_v10 = vadd.f32 %v4371_v62, %v11802_v11  ;;  %8125 = vtanh.f32 %v5101_v46 }
 0x409   : > { %6000 = vmatmul.mubr.bf16.gmra.mxu1 %v5702_v54  ;;  %v4719_v38 = vmul.f32 %v4591_v24, %v12843_v36  ;;  %v5603_v8 = vmul.f32 %v5475_v42, %v12707_v4  ;;  %v12860_v27 = vadd.f32 %v4373_v52, %v11843_v47  ;;  %v12866_v59 = vadd.f32 %v4377_v51, %v11802_v11  ;;  %v4379_v35 = vpop.f32.mrf.mxu0 }
 0x40a   : > { %v4846_v43 = vmul.f32 0.044715, %v4718_v7  ;;  %v5605_v0 = vmul.f32 %v5477_v61, %v12733_v40  ;;  %v4592_v58 = vmul.f32 %v12855_v10, %v12855_v10  ;;  %v8114_v20 = vpop.eup %8113  ;;  %v5350_v14 = vadd.f32 1.0, %v8112_v41 }
 0x40b   : > { %v4847_v25 = vmul.f32 0.044715, %v4719_v38  ;;  %v4593_v16 = vmul.f32 %v12860_v27, %v12860_v27  ;;  %v12871_v4 = vadd.f32 %v4379_v35, %v11843_v47  ;;  %v5704_v33 = vpack.c.bf16 %v12834_v56, %v12831_v34  ;;  %v4381_v22 = vpop.f32.mrf.mxu0 }
 0x40c   : > { %v4974_v63 = vadd.f32 %v4846_v43, %v12840_v29  ;;  %v5705_v37 = vpack.c.bf16 %v5605_v0, %v5603_v8  ;;  %v4720_v40 = vmul.f32 %v4592_v58, %v12855_v10  ;;  %v4594_v57 = vmul.f32 %v12866_v59, %v12866_v59 }
 0x40d   : > { %v4975_v26 = vadd.f32 %v4847_v25, %v12843_v36  ;;  %v4721_v2 = vmul.f32 %v4593_v16, %v12860_v27  ;;  %v4595_v49 = vmul.f32 %v12871_v4, %v12871_v4  ;;  %v5352_v6 = vadd.f32 1.0, %v8114_v20  ;;  %v4383_v13 = vpop.f32.mrf.mxu0 }
 0x40e   : > { %v5102_v62 = vmul.f32 0.7978846, %v4974_v63  ;;  %6007 = vmatprep.mubr.bf16.mxu1 %v5705_v37  ;;  %v4848_v46 = vmul.f32 0.044715, %v4720_v40  ;;  %v12884_v17 = vadd.f32 %v4381_v22, %v11802_v11  ;;  %v8116_v9 = vpop.eup %8115  ;;  %v4722_v28 = vmul.f32 %v4594_v57, %v12866_v59 }
 0x40f   : > { %v5103_v34 = vmul.f32 0.7978846, %v4975_v26  ;;  %v4849_v56 = vmul.f32 0.044715, %v4721_v2  ;;  %v4723_v60 = vmul.f32 %v4595_v49, %v12871_v4  ;;  %v5478_v24 = vmul.f32 0.5, %v5350_v14 }
 0x410   : > { %8127 = vtanh.f32 %v5102_v62  ;;  %v4976_v52 = vadd.f32 %v4848_v46, %v12855_v10  ;;  %v4596_v54 = vmul.f32 %v12884_v17, %v12884_v17  ;;  %v4850_v41 = vmul.f32 0.044715, %v4722_v28 }
 0x411   : > { %8129 = vtanh.f32 %v5103_v34  ;;  %6008 = vmatmul.mubr.bf16.gmra.mxu1 %v5704_v33  ;;  %v4977_v42 = vadd.f32 %v4849_v56, %v12860_v27  ;;  %v8118_v7 = vpop.eup %8117  ;;  %v4851_v51 = vmul.f32 0.044715, %v4723_v60  ;;  %v12894_v8 = vadd.f32 %v4383_v13, %v11843_v47 }
 0x412   : > { %v5104_v61 = vmul.f32 0.7978846, %v4976_v52  ;;  %v4724_v38 = vmul.f32 %v4596_v54, %v12884_v17  ;;  %v8120_v43 = vpop.eup %8119  ;;  %v5480_v0 = vmul.f32 0.5, %v5352_v6  ;;  %v4978_v35 = vadd.f32 %v4850_v41, %v12866_v59 }
 0x413   : > { %v5105_v58 = vmul.f32 0.7978846, %v4977_v42  ;;  %v5351_v20 = vadd.f32 1.0, %v8116_v9  ;;  %v8122_v14 = vpop.eup %8121  ;;  %v4597_v37 = vmul.f32 %v12894_v8, %v12894_v8  ;;  %v4979_v33 = vadd.f32 %v4851_v51, %v12871_v4 }
 0x414   : > { %8131 = vtanh.f32 %v5104_v61  ;;  %v4852_v25 = vmul.f32 0.044715, %v4724_v38  ;;  %v8124_v16 = vpop.eup %8123  ;;  %v5106_v63 = vmul.f32 0.7978846, %v4978_v35  ;;  %v5353_v26 = vadd.f32 1.0, %v8118_v7 }
 0x415   : > { %8133 = vtanh.f32 %v5105_v58  ;;  %v8126_v40 = vpop.eup %8125  ;;  %v5606_v2 = vmul.f32 %v5478_v24, %v12745_v39  ;;  %v5608_v57 = vmul.f32 %v5480_v0, %v12769_v3  ;;  %v4725_v49 = vmul.f32 %v4597_v37, %v12894_v8 }
 0x416   : > { %v4980_v22 = vadd.f32 %v4852_v25, %v12884_v17  ;;  %v5479_v6 = vmul.f32 0.5, %v5351_v20  ;;  %v5354_v62 = vadd.f32 1.0, %v8120_v43  ;;  %v5356_v46 = vadd.f32 1.0, %v8124_v16 }
 0x417   : > { %v5481_v34 = vmul.f32 0.5, %v5353_v26  ;;  %8135 = vtanh.f32 %v5106_v63  ;;  %v4853_v56 = vmul.f32 0.044715, %v4725_v49  ;;  %v5355_v28 = vadd.f32 1.0, %v8122_v14 }
 0x418   : > { %v5108_v9 = vmul.f32 0.7978846, %v4980_v22  ;;  %v5357_v60 = vadd.f32 1.0, %v8126_v40  ;;  %v5107_v13 = vmul.f32 0.7978846, %v4979_v33  ;;  %v5607_v52 = vmul.f32 %v5479_v6, %v12758_v1  ;;  %v4387_v39 = vpop.f32.mrf.mxu0 }
 0x419   : > { %v5609_v54 = vmul.f32 %v5481_v34, %v12785_v55  ;;  %v4981_v3 = vadd.f32 %v4853_v56, %v12894_v8  ;;  %v12908_v24 = vadd.f32 %v4387_v39, %v11802_v11  ;;  %v5483_v42 = vmul.f32 0.5, %v5355_v28 }
 0x41a   : > { %8137 = vtanh.f32 %v5108_v9  ;;  %v5485_v41 = vmul.f32 0.5, %v5357_v60  ;;  %v5482_v7 = vmul.f32 0.5, %v5354_v62  ;;  %v5484_v61 = vmul.f32 0.5, %v5356_v46  ;;  %v4389_v38 = vpop.f32.mrf.mxu0 }
 0x41b   : > { %v5707_v51 = vpack.c.bf16 %v5609_v54, %v5607_v52  ;;  %v5109_v0 = vmul.f32 0.7978846, %v4981_v3  ;;  %v5706_v58 = vpack.c.bf16 %v5608_v57, %v5606_v2  ;;  %v4598_v1 = vmul.f32 %v12908_v24, %v12908_v24 }
 0x41c   : > { %v12913_v55 = vadd.f32 %v4389_v38, %v11843_v47  ;;  %8139 = vtanh.f32 %v5107_v13  ;;  %v5611_v14 = vmul.f32 %v5483_v42, %v12792_v23  ;;  %v5613_v25 = vmul.f32 %v5485_v41, %v12811_v12  ;;  %v4391_v16 = vpop.f32.mrf.mxu0 }
 0x41d   : > { %v8128_v43 = vpop.eup %8127  ;;  %6015 = vmatprep.mubr.bf16.mxu1 %v5707_v51  ;;  %8141 = vtanh.f32 %v5109_v0  ;;  %v4726_v63 = vmul.f32 %v4598_v1, %v12908_v24  ;;  %v12921_v40 = vadd.f32 %v4391_v16, %v11802_v11  ;;  %v5612_v33 = vmul.f32 %v5484_v61, %v12795_v53 }
 0x41e   : > { %v8130_v35 = vpop.eup %8129  ;;  %v5358_v20 = vadd.f32 1.0, %v8128_v43  ;;  %6016 = vmatmul.mubr.bf16.gmra.mxu1 %v5706_v58  ;;  %v4599_v37 = vmul.f32 %v12913_v55, %v12913_v55  ;;  %v5709_v22 = vpack.c.bf16 %v5613_v25, %v5611_v14  ;;  %v4393_v26 = vpop.f32.mrf.mxu0  ;;  %v5610_v46 = vmul.f32 %v5482_v7, %v12788_v48 }
 0x41f   : > { %v5359_v2 = vadd.f32 1.0, %v8130_v35  ;;  %v4854_v23 = vmul.f32 0.044715, %v4726_v63  ;;  %v4600_v49 = vmul.f32 %v12921_v40, %v12921_v40  ;;  %v12928_v6 = vadd.f32 %v4393_v26, %v11843_v47 }
 0x420   : > { %v4727_v12 = vmul.f32 %v4599_v37, %v12913_v55  ;;  %v5486_v9 = vmul.f32 0.5, %v5358_v20  ;;  %6023 = vmatprep.mubr.bf16.mxu1 %v5709_v22  ;;  %v5708_v52 = vpack.c.bf16 %v5612_v33, %v5610_v46 }
 0x421   : > { %v8132_v57 = vpop.eup %8131  ;;  %v5487_v53 = vmul.f32 0.5, %v5359_v2  ;;  %v4982_v56 = vadd.f32 %v4854_v23, %v12908_v24  ;;  %v4728_v60 = vmul.f32 %v4600_v49, %v12921_v40  ;;  %v4601_v13 = vmul.f32 %v12928_v6, %v12928_v6 }
 0x422   : > { %v8134_v62 = vpop.eup %8133  ;;  %v5360_v34 = vadd.f32 1.0, %v8132_v57  ;;  %v4855_v28 = vmul.f32 0.044715, %v4727_v12  ;;  %v5614_v61 = vmul.f32 %v5486_v9, %v12840_v29 }
 0x423   : > { %v4397_v54 = vpop.f32.mrf.mxu0  ;;  %v5361_v39 = vadd.f32 1.0, %v8134_v62  ;;  %v5110_v42 = vmul.f32 0.7978846, %v4982_v56  ;;  %v4856_v48 = vmul.f32 0.044715, %v4728_v60  ;;  %v4729_v51 = vmul.f32 %v4601_v13, %v12928_v6 }
 0x424   : > { %v5488_v3 = vmul.f32 0.5, %v5360_v34  ;;  %v4983_v41 = vadd.f32 %v4855_v28, %v12913_v55  ;;  %v8136_v7 = vpop.eup %8135  ;;  %v12939_v38 = vadd.f32 %v4397_v54, %v11802_v11  ;;  %v5615_v0 = vmul.f32 %v5487_v53, %v12843_v36 }
 0x425   : > { %v4399_v43 = vpop.f32.mrf.mxu0  ;;  %8143 = vtanh.f32 %v5110_v42  ;;  %v4984_v35 = vadd.f32 %v4856_v48, %v12921_v40  ;;  %v5489_v20 = vmul.f32 0.5, %v5361_v39  ;;  %v4857_v25 = vmul.f32 0.044715, %v4729_v51 }
 0x426   : > { %v5111_v1 = vmul.f32 0.7978846, %v4983_v41  ;;  %6024 = vmatmul.mubr.bf16.gmra.mxu1 %v5708_v52  ;;  %v4602_v29 = vmul.f32 %v12939_v38, %v12939_v38  ;;  %v12946_v16 = vadd.f32 %v4399_v43, %v11843_v47  ;;  %v5616_v37 = vmul.f32 %v5488_v3, %v12855_v10 }
 0x427   : > { %v8138_v58 = vpop.eup %8137  ;;  %v4401_v63 = vpop.f32.mrf.mxu0  ;;  %v5112_v36 = vmul.f32 0.7978846, %v4984_v35  ;;  %v5362_v22 = vadd.f32 1.0, %v8136_v7  ;;  %v4985_v26 = vadd.f32 %v4857_v25, %v12928_v6  ;;  %v5617_v62 = vmul.f32 %v5489_v20, %v12860_v27 }
 0x428   : > { %v5364_v14 = vadd.f32 1.0, %v8138_v58  ;;  %8145 = vtanh.f32 %v5111_v1  ;;  %v12950_v33 = vadd.f32 %v4401_v63, %v11802_v11  ;;  %v4730_v2 = vmul.f32 %v4602_v29, %v12939_v38 }
 0x429   : > { %v4603_v57 = vmul.f32 %v12946_v16, %v12946_v16  ;;  %v4403_v23 = vpop.f32.mrf.mxu0  ;;  %v8140_v12 = vpop.eup %8139  ;;  %8147 = vtanh.f32 %v5112_v36  ;;  %v5113_v34 = vmul.f32 0.7978846, %v4985_v26  ;;  %v5711_v13 = vpack.c.bf16 %v5617_v62, %v5615_v0 }
 0x42a   : > { %v4604_v49 = vmul.f32 %v12950_v33, %v12950_v33  ;;  %v12959_v10 = vadd.f32 %v4403_v23, %v11843_v47  ;;  %v8142_v46 = vpop.eup %8141  ;;  %v5492_v9 = vmul.f32 0.5, %v5364_v14  ;;  %v4858_v53 = vmul.f32 0.044715, %v4730_v2 }
 0x42b   : > { %v4731_v56 = vmul.f32 %v4603_v57, %v12946_v16  ;;  %v5710_v52 = vpack.c.bf16 %v5616_v37, %v5614_v61  ;;  %8149 = vtanh.f32 %v5113_v34  ;;  %v5363_v3 = vadd.f32 1.0, %v8140_v12  ;;  %6031 = vmatprep.mubr.bf16.mxu1 %v5711_v13 }
 0x42c   : > { %v4732_v28 = vmul.f32 %v4604_v49, %v12950_v33  ;;  %v4605_v60 = vmul.f32 %v12959_v10, %v12959_v10  ;;  %v4986_v54 = vadd.f32 %v4858_v53, %v12939_v38  ;;  %v5365_v41 = vadd.f32 1.0, %v8142_v46 }
 0x42d   : > { %v4859_v39 = vmul.f32 0.044715, %v4731_v56  ;;  %v5491_v51 = vmul.f32 0.5, %v5363_v3  ;;  %v5490_v43 = vmul.f32 0.5, %v5362_v22  ;;  %v5620_v1 = vmul.f32 %v5492_v9, %v12884_v17 }
 0x42e   : > { %v4860_v42 = vmul.f32 0.044715, %v4732_v28  ;;  %v4733_v27 = vmul.f32 %v4605_v60, %v12959_v10  ;;  %v5114_v48 = vmul.f32 0.7978846, %v4986_v54  ;;  %6032 = vmatmul.mubr.bf16.gmra.mxu1 %v5710_v52  ;;  %v5493_v61 = vmul.f32 0.5, %v5365_v41 }
 0x42f   : > { %v4987_v7 = vadd.f32 %v4859_v39, %v12946_v16  ;;  %v5619_v22 = vmul.f32 %v5491_v51, %v12871_v4  ;;  %v5618_v26 = vmul.f32 %v5490_v43, %v12866_v59 }
 0x430   : > { %v4988_v58 = vadd.f32 %v4860_v42, %v12950_v33  ;;  %v4861_v0 = vmul.f32 0.044715, %v4733_v27  ;;  %8151 = vtanh.f32 %v5114_v48  ;;  %v5621_v29 = vmul.f32 %v5493_v61, %v12894_v8 }
 0x431   : > { %v4407_v35 = vpop.f32.mrf.mxu0  ;;  %v5115_v37 = vmul.f32 0.7978846, %v4987_v7  ;;  %v5712_v46 = vpack.c.bf16 %v5620_v1, %v5618_v26 }
 0x432   : > { %v5116_v20 = vmul.f32 0.7978846, %v4988_v58  ;;  %v4989_v14 = vadd.f32 %v4861_v0, %v12959_v10  ;;  %v12973_v25 = vadd.f32 %v4407_v35, %v11802_v11  ;;  %v8144_v63 = vpop.eup %8143  ;;  %v5713_v12 = vpack.c.bf16 %v5621_v29, %v5619_v22 }
 0x433   : > { %v4409_v36 = vpop.f32.mrf.mxu0  ;;  %v5366_v9 = vadd.f32 1.0, %v8144_v63 }
 0x434   : > { %8153 = vtanh.f32 %v5116_v20  ;;  %v5117_v2 = vmul.f32 0.7978846, %v4989_v14  ;;  %v4606_v17 = vmul.f32 %v12973_v25, %v12973_v25  ;;  %v12981_v23 = vadd.f32 %v4409_v36, %v11843_v47  ;;  %6039 = vmatprep.mubr.bf16.mxu1 %v5713_v12 }
 0x435   : > { %v8146_v57 = vpop.eup %8145  ;;  %v4411_v49 = vpop.f32.mrf.mxu0  ;;  %8155 = vtanh.f32 %v5115_v37  ;;  %v5494_v43 = vmul.f32 0.5, %v5366_v9 }
 0x436   : > { %v4734_v8 = vmul.f32 %v4606_v17, %v12973_v25  ;;  %v12985_v62 = vadd.f32 %v4411_v49, %v11802_v11  ;;  %v8148_v4 = vpop.eup %8147  ;;  %v4607_v59 = vmul.f32 %v12981_v23, %v12981_v23  ;;  %v5367_v53 = vadd.f32 1.0, %v8146_v57  ;;  %6040 = vmatmul.mubr.bf16.gmra.mxu1 %v5712_v46 }
 0x437   : > { %v4413_v34 = vpop.f32.mrf.mxu0  ;;  %v5368_v56 = vadd.f32 1.0, %v8148_v4  ;;  %8157 = vtanh.f32 %v5117_v2 }
 0x438   : > { %v4862_v28 = vmul.f32 0.044715, %v4734_v8  ;;  %v4608_v60 = vmul.f32 %v12985_v62, %v12985_v62  ;;  %v4735_v13 = vmul.f32 %v4607_v59, %v12981_v23  ;;  %v12993_v52 = vadd.f32 %v4413_v34, %v11843_v47  ;;  %v8150_v39 = vpop.eup %8149 }
 0x439   : > { %v5495_v54 = vmul.f32 0.5, %v5367_v53  ;;  %v5496_v27 = vmul.f32 0.5, %v5368_v56  ;;  %v5369_v51 = vadd.f32 1.0, %v8150_v39 }
 0x43a   : > { %v4990_v3 = vadd.f32 %v4862_v28, %v12973_v25  ;;  %v4736_v42 = vmul.f32 %v4608_v60, %v12985_v62  ;;  %v4863_v41 = vmul.f32 0.044715, %v4735_v13  ;;  %v4609_v48 = vmul.f32 %v12993_v52, %v12993_v52 }
 0x43b   : > { %v4417_v7 = vpop.f32.mrf.mxu0  ;;  %v5497_v14 = vmul.f32 0.5, %v5369_v51  ;;  %v5623_v29 = vmul.f32 %v5495_v54, %v12913_v55  ;;  %v5624_v26 = vmul.f32 %v5496_v27, %v12921_v40  ;;  %v5622_v60 = vmul.f32 %v5494_v43, %v12908_v24 }
 0x43c   : > { %v5118_v58 = vmul.f32 0.7978846, %v4990_v3  ;;  %v4864_v0 = vmul.f32 0.044715, %v4736_v42  ;;  %v13000_v61 = vadd.f32 %v4417_v7, %v11802_v11  ;;  %v4991_v1 = vadd.f32 %v4863_v41, %v12981_v23  ;;  %v7463_v3 = vld [vmem:[%s14441_s7 + $0x1] ss:$0 sm:$0xff] }
 0x43d   : > { %v4737_v35 = vmul.f32 %v4609_v48, %v12993_v52  ;;  %v4419_v20 = vpop.f32.mrf.mxu0  ;;  %v8152_v63 = vpop.eup %8151  ;;  %v5625_v12 = vmul.f32 %v5497_v14, %v12928_v6  ;;  %v15029_v48 = vld [vmem:[#allocation62_spill] sm:$0xff] }
 0x43e   : > { %8159 = vtanh.f32 %v5118_v58  ;;  %v4992_v37 = vadd.f32 %v4864_v0, %v12985_v62  ;;  %v4610_v36 = vmul.f32 %v13000_v61, %v13000_v61  ;;  %v13009_v22 = vadd.f32 %v4419_v20, %v11843_v47 }
 0x43f   : > { %v5119_v2 = vmul.f32 0.7978846, %v4991_v1  ;;  %v4865_v17 = vmul.f32 0.044715, %v4737_v35  ;;  %v4421_v57 = vpop.f32.mrf.mxu0  ;;  %v5370_v9 = vadd.f32 1.0, %v8152_v63  ;;  %v5715_v34 = vpack.c.bf16 %v5625_v12, %v5623_v29 }
 0x440   : > { %v5120_v49 = vmul.f32 0.7978846, %v4992_v37  ;;  %v4738_v55 = vmul.f32 %v4610_v36, %v13000_v61  ;;  %v4611_v8 = vmul.f32 %v13009_v22, %v13009_v22  ;;  %v13017_v46 = vadd.f32 %v4421_v57, %v11802_v11  ;;  %v15030_v36 = vld [vmem:[#allocation61_spill] sm:$0xff] }
 0x441   : > { %v8154_v4 = vpop.eup %8153  ;;  %8161 = vtanh.f32 %v5119_v2  ;;  %v4993_v59 = vadd.f32 %v4865_v17, %v12993_v52  ;;  %v4423_v40 = vpop.f32.mrf.mxu0  ;;  %6047 = vmatprep.mubr.bf16.mxu1 %v5715_v34  ;;  %v5714_v0 = vpack.c.bf16 %v5624_v26, %v5622_v60  ;;  %v5498_v1 = vmul.f32 0.5, %v5370_v9 }
 0x442   : > { %v5372_v53 = vadd.f32 1.0, %v8154_v4  ;;  %8163 = vtanh.f32 %v5120_v49  ;;  %v4866_v56 = vmul.f32 0.044715, %v4738_v55  ;;  %v4739_v6 = vmul.f32 %v4611_v8, %v13009_v22  ;;  %v5921_v28 = vpop.f32.mrf.mxu1  ;;  %v8156_v42 = vpop.eup %8155 }
 0x443   : > { %v5121_v13 = vmul.f32 0.7978846, %v4993_v59  ;;  %v4612_v54 = vmul.f32 %v13017_v46, %v13017_v46  ;;  %v13025_v39 = vadd.f32 %v4423_v40, %v11843_v47  ;;  %v6164_v7 = vadd.f32 %v5921_v28, %v15029_v48  ;;  %6048 = vmatmul.mubr.bf16.gmra.mxu1 %v5714_v0 }
 0x444   : > { %v4994_v27 = vadd.f32 %v4866_v56, %v13000_v61  ;;  %v4867_v41 = vmul.f32 0.044715, %v4739_v6  ;;  %v5923_v51 = vpop.f32.mrf.mxu1  ;;  %v8158_v24 = vpop.eup %8157  ;;  %v5500_v35 = vmul.f32 0.5, %v5372_v53  ;;  %v5371_v17 = vadd.f32 1.0, %v8156_v42 }
 0x445   : > { %8165 = vtanh.f32 %v5121_v13  ;;  %v4740_v43 = vmul.f32 %v4612_v54, %v13017_v46  ;;  %v4613_v58 = vmul.f32 %v13025_v39, %v13025_v39  ;;  %v13036_v14 = vadd.f32 %v7463_v3, %v6164_v7 }
 0x446   : > { %v4995_v20 = vadd.f32 %v4867_v41, %v13009_v22  ;;  %v5924_v29 = vpop.f32.mrf.mxu1  ;;  %v5122_v57 = vmul.f32 0.7978846, %v4994_v27  ;;  %v5373_v49 = vadd.f32 1.0, %v8158_v24  ;;  %v5499_v4 = vmul.f32 0.5, %v5371_v17 }
 0x447   : > { %v4868_v63 = vmul.f32 0.044715, %v4740_v43  ;;  %v4741_v37 = vmul.f32 %v4613_v58, %v13025_v39  ;;  %v6165_v2 = vadd.f32 %v5924_v29, %v15030_v36  ;;  %6301 = vadd.xlane.f32.xlu0 %v13036_v14  ;;  %v5626_v9 = vmul.f32 %v5498_v1, %v12939_v38 }
 0x448   : > { %v5926_v12 = vpop.f32.mrf.mxu1  ;;  %v5628_v59 = vmul.f32 %v5500_v35, %v12950_v33  ;;  %v5501_v34 = vmul.f32 0.5, %v5373_v49  ;;  %v5123_v6 = vmul.f32 0.7978846, %v4995_v20  ;;  %8167 = vtanh.f32 %v5122_v57  ;;  %v15031_v33 = vld [vmem:[#allocation65_spill] sm:$0xff] }
 0x449   : > { %v4996_v26 = vadd.f32 %v4868_v63, %v13017_v46  ;;  %v4869_v55 = vmul.f32 0.044715, %v4741_v37  ;;  %v13042_v8 = vadd.f32 %v7463_v3, %v6165_v2  ;;  %v5627_v42 = vmul.f32 %v5499_v4, %v12946_v16 }
 0x44a   : > { %v4427_v40 = vpop.f32.mrf.mxu0  ;;  %v5929_v53 = vpop.f32.mrf.mxu1  ;;  %v5629_v38 = vmul.f32 %v5501_v34, %v12959_v10  ;;  %v5716_v16 = vpack.c.bf16 %v5628_v59, %v5626_v9 }
 0x44b   : > { %v8160_v56 = vpop.eup %8159  ;;  %v5124_v28 = vmul.f32 0.7978846, %v4996_v26  ;;  %v4997_v60 = vadd.f32 %v4869_v55, %v13025_v39  ;;  %v13048_v13 = vadd.f32 %v4427_v40, %v11802_v11  ;;  %6303 = vadd.xlane.f32.xlu1 %v13042_v8  ;;  %v6166_v27 = vadd.f32 %v5929_v53, %v15031_v33 }
 0x44c   : > { %v4429_v54 = vpop.f32.mrf.mxu0  ;;  %v5931_v41 = vpop.f32.mrf.mxu1  ;;  %v5374_v43 = vadd.f32 1.0, %v8160_v56  ;;  %v5717_v58 = vpack.c.bf16 %v5629_v38, %v5627_v42 }
 0x44d   : > { %8169 = vtanh.f32 %v5124_v28  ;;  %v5125_v48 = vmul.f32 0.7978846, %v4997_v60  ;;  %v4614_v7 = vmul.f32 %v13048_v13, %v13048_v13  ;;  %v13057_v51 = vadd.f32 %v4429_v54, %v11843_v47 }
 0x44e   : > { %v8162_v24 = vpop.eup %8161  ;;  %v4431_v0 = vpop.f32.mrf.mxu0  ;;  %v13059_v1 = vadd.f32 %v7463_v3, %v6166_v27  ;;  %8171 = vtanh.f32 %v5123_v6  ;;  %6055 = vmatprep.mubr.bf16.mxu1 %v5717_v58  ;;  %v5502_v26 = vmul.f32 0.5, %v5374_v43 }
 0x44f   : > { %v13061_v35 = vpop.f32.mrf.mxu1  ;;  %v8164_v10 = vpop.eup %8163  ;;  %v4742_v20 = vmul.f32 %v4614_v7, %v13048_v13  ;;  %v4615_v29 = vmul.f32 %v13057_v51, %v13057_v51  ;;  %v13067_v63 = vadd.f32 %v4431_v0, %v11802_v11  ;;  %8173 = vtanh.f32 %v5125_v48  ;;  %6056 = vmatmul.mubr.bf16.gmra.mxu1 %v5716_v16 }
 0x450   : > { %v5376_v37 = vadd.f32 1.0, %v8164_v10  ;;  %v4433_v36 = vpop.f32.mrf.mxu0  ;;  %6305 = vadd.xlane.f32.xlu0 %v13059_v1  ;;  %v5375_v4 = vadd.f32 1.0, %v8162_v24  ;;  %v5630_v7 = vmul.f32 %v5502_v26, %v12973_v25 }
 0x451   : > { %v5934_v3 = vpop.f32.mrf.mxu1  ;;  %v4870_v2 = vmul.f32 0.044715, %v4742_v20  ;;  %v4743_v17 = vmul.f32 %v4615_v29, %v13057_v51  ;;  %v4616_v57 = vmul.f32 %v13067_v63, %v13067_v63  ;;  %v13074_v12 = vadd.f32 %v4433_v36, %v11843_v47 }
 0x452   : > { %v8166_v49 = vpop.eup %8165  ;;  %v5504_v55 = vmul.f32 0.5, %v5376_v37  ;;  %v5503_v41 = vmul.f32 0.5, %v5375_v4 }
 0x453   : > { %v4998_v9 = vadd.f32 %v4870_v2, %v13048_v13  ;;  %v4871_v59 = vmul.f32 0.044715, %v4743_v17  ;;  %v4744_v40 = vmul.f32 %v4616_v57, %v13067_v63  ;;  %v4617_v34 = vmul.f32 %v13074_v12, %v13074_v12  ;;  %v4437_v53 = vpop.f32.mrf.mxu0 }
 0x454   : > { %v13081_v56 = vadd.f32 %v4437_v53, %v11802_v11  ;;  %v5377_v6 = vadd.f32 1.0, %v8166_v49  ;;  %v5632_v24 = vmul.f32 %v5504_v55, %v12985_v62  ;;  %v5631_v55 = vmul.f32 %v5503_v41, %v12981_v23 }
 0x455   : > { %v5126_v28 = vmul.f32 0.7978846, %v4998_v9  ;;  %v4999_v60 = vadd.f32 %v4871_v59, %v13057_v51  ;;  %v4872_v54 = vmul.f32 0.044715, %v4744_v40  ;;  %v4745_v42 = vmul.f32 %v4617_v34, %v13074_v12  ;;  %v4439_v38 = vpop.f32.mrf.mxu0  ;;  %v8168_v37 = vpop.eup %8167 }
 0x456   : > { %v4618_v33 = vmul.f32 %v13081_v56, %v13081_v56  ;;  %v13088_v27 = vadd.f32 %v4439_v38, %v11843_v47  ;;  %v5505_v48 = vmul.f32 0.5, %v5377_v6 }
 0x457   : > { %v5000_v43 = vadd.f32 %v4872_v54, %v13067_v63  ;;  %v4873_v58 = vmul.f32 0.044715, %v4745_v42  ;;  %v4441_v0 = vpop.f32.mrf.mxu0  ;;  %8175 = vtanh.f32 %v5126_v28  ;;  %v5127_v36 = vmul.f32 0.7978846, %v4999_v60 }
 0x458   : > { %v4746_v16 = vmul.f32 %v4618_v33, %v13081_v56  ;;  %v4619_v10 = vmul.f32 %v13088_v27, %v13088_v27  ;;  %v13097_v20 = vadd.f32 %v4441_v0, %v11802_v11  ;;  %v13099_v29 = vpop.f32.mrf.mxu1  ;;  %v5633_v2 = vmul.f32 %v5505_v48, %v12993_v52 }
 0x459   : > { %v5128_v25 = vmul.f32 0.7978846, %v5000_v43  ;;  %v5001_v62 = vadd.f32 %v4873_v58, %v13074_v12  ;;  %v4443_v3 = vpop.f32.mrf.mxu0  ;;  %v5378_v42 = vadd.f32 1.0, %v8168_v37  ;;  %v5718_v48 = vpack.c.bf16 %v5632_v24, %v5630_v7 }
 0x45a   : > { %v8170_v17 = vpop.eup %8169  ;;  %v4874_v57 = vmul.f32 0.044715, %v4746_v16  ;;  %v4747_v49 = vmul.f32 %v4619_v10, %v13088_v27  ;;  %v4620_v26 = vmul.f32 %v13097_v20, %v13097_v20  ;;  %v5939_v4 = vpop.f32.mrf.mxu1  ;;  %v13108_v40 = vadd.f32 %v4443_v3, %v11843_v47 }
 0x45b   : > { %v5380_v9 = vadd.f32 1.0, %v8170_v17  ;;  %8177 = vtanh.f32 %v5128_v25  ;;  %v5129_v59 = vmul.f32 0.7978846, %v5001_v62  ;;  %v8172_v34 = vpop.eup %8171  ;;  %v5719_v28 = vpack.c.bf16 %v5633_v2, %v5631_v55 }
 0x45c   : > { %v5002_v53 = vadd.f32 %v4874_v57, %v13081_v56  ;;  %v4875_v52 = vmul.f32 0.044715, %v4747_v49  ;;  %v4748_v6 = vmul.f32 %v4620_v26, %v13097_v20  ;;  %v13112_v60 = vpop.f32.mrf.mxu1  ;;  %v8174_v54 = vpop.eup %8173  ;;  %8179 = vtanh.f32 %v5127_v36 }
 0x45d   : > { %v4621_v23 = vmul.f32 %v13108_v40, %v13108_v40  ;;  %6063 = vmatprep.mubr.bf16.mxu1 %v5719_v28  ;;  %v5508_v0 = vmul.f32 0.5, %v5380_v9  ;;  %8181 = vtanh.f32 %v5129_v59  ;;  %v5379_v37 = vadd.f32 1.0, %v8172_v34 }
 0x45e   : > { %v5130_v38 = vmul.f32 0.7978846, %v5002_v53  ;;  %v5003_v33 = vadd.f32 %v4875_v52, %v13088_v27  ;;  %v4876_v41 = vmul.f32 0.044715, %v4748_v6  ;;  %v5942_v43 = vpop.f32.mrf.mxu1  ;;  %6064 = vmatmul.mubr.bf16.gmra.mxu1 %v5718_v48  ;;  %v5506_v25 = vmul.f32 0.5, %v5378_v42 }
 0x45f   : > { %v4749_v58 = vmul.f32 %v4621_v23, %v13108_v40  ;;  %v5381_v2 = vadd.f32 1.0, %v8174_v54  ;;  %v5507_v57 = vmul.f32 0.5, %v5379_v37  ;;  %v5636_v59 = vmul.f32 %v5508_v0, %v13017_v46 }
 0x460   : > { %v5004_v16 = vadd.f32 %v4876_v41, %v13097_v20  ;;  %v4447_v10 = vpop.f32.mrf.mxu0  ;;  %v13119_v36 = vpop.f32.mrf.mxu1  ;;  %8183 = vtanh.f32 %v5130_v38  ;;  %v5131_v7 = vmul.f32 0.7978846, %v5003_v33  ;;  %v5634_v42 = vmul.f32 %v5506_v25, %v13000_v61 }
 0x461   : > { %v4877_v62 = vmul.f32 0.044715, %v4749_v58  ;;  %v13122_v3 = vadd.f32 %v4447_v10, %v11802_v11  ;;  %v5509_v9 = vmul.f32 0.5, %v5381_v2  ;;  %v5635_v23 = vmul.f32 %v5507_v57, %v13009_v22 }
 0x462   : > { %v5132_v24 = vmul.f32 0.7978846, %v5004_v16  ;;  %v4449_v17 = vpop.f32.mrf.mxu0  ;;  %v5947_v49 = vpop.f32.mrf.mxu1  ;;  %v5720_v10 = vpack.c.bf16 %v5636_v59, %v5634_v42 }
 0x463   : > { %v5005_v26 = vadd.f32 %v4877_v62, %v13108_v40  ;;  %v4622_v55 = vmul.f32 %v13122_v3, %v13122_v3  ;;  %v13128_v4 = vadd.f32 %v4449_v17, %v11843_v47  ;;  %v5637_v38 = vmul.f32 %v5509_v9, %v13025_v39 }
 0x464   : > { %8185 = vtanh.f32 %v5132_v24  ;;  %v4451_v34 = vpop.f32.mrf.mxu0  ;;  %v13131_v53 = vpop.f32.mrf.mxu1 }
 0x465   : > { %v8176_v52 = vpop.eup %8175  ;;  %v5133_v6 = vmul.f32 0.7978846, %v5005_v26  ;;  %v4750_v28 = vmul.f32 %v4622_v55, %v13122_v3  ;;  %v4623_v54 = vmul.f32 %v13128_v4, %v13128_v4  ;;  %v13140_v33 = vadd.f32 %v4451_v34, %v11802_v11 }
 0x466   : > { %v4453_v46 = vpop.f32.mrf.mxu0  ;;  %v5950_v41 = vpop.f32.mrf.mxu1  ;;  %8187 = vtanh.f32 %v5131_v7  ;;  %v5721_v0 = vpack.c.bf16 %v5637_v38, %v5635_v23  ;;  %v5382_v39 = vadd.f32 1.0, %v8176_v52 }
 0x467   : > { %v4878_v48 = vmul.f32 0.044715, %v4750_v28  ;;  %v4751_v43 = vmul.f32 %v4623_v54, %v13128_v4  ;;  %v4624_v16 = vmul.f32 %v13140_v33, %v13140_v33  ;;  %v13146_v61 = vadd.f32 %v4453_v46, %v11843_v47 }
 0x468   : > { %v8178_v58 = vpop.eup %8177  ;;  %v4457_v22 = vpop.f32.mrf.mxu0  ;;  %8189 = vtanh.f32 %v5133_v6  ;;  %6071 = vmatprep.mubr.bf16.mxu1 %v5721_v0  ;;  %v5510_v28 = vmul.f32 0.5, %v5382_v39 }
 0x469   : > { %v5006_v37 = vadd.f32 %v4878_v48, %v13122_v3  ;;  %v4879_v25 = vmul.f32 0.044715, %v4751_v43  ;;  %v8180_v62 = vpop.eup %8179  ;;  %v5384_v2 = vadd.f32 1.0, %v8178_v58  ;;  %v4752_v7 = vmul.f32 %v4624_v16, %v13140_v33  ;;  %6072 = vmatmul.mubr.bf16.gmra.mxu1 %v5720_v10 }
 0x46a   : > { %v4625_v24 = vmul.f32 %v13146_v61, %v13146_v61  ;;  %v13153_v17 = vadd.f32 %v4457_v22, %v11802_v11  ;;  %v4459_v57 = vpop.f32.mrf.mxu0  ;;  %v8182_v6 = vpop.eup %8181  ;;  %v5383_v23 = vadd.f32 1.0, %v8180_v62  ;;  %v5638_v32 = vmul.f32 %v5510_v28, %v13048_v13 }
 0x46b   : > { %v5134_v49 = vmul.f32 0.7978846, %v5006_v37  ;;  %v13156_v26 = vadd.f32 %v4459_v57, %v11843_v47  ;;  %v13158_v55 = vpop.f32.mrf.mxu1  ;;  %v4880_v9 = vmul.f32 0.044715, %v4752_v7  ;;  %v5007_v54 = vadd.f32 %v4879_v25, %v13128_v4 }
 0x46c   : > { %v4753_v59 = vmul.f32 %v4625_v24, %v13146_v61  ;;  %v4626_v34 = vmul.f32 %v13153_v17, %v13153_v17  ;;  %v4461_v52 = vpop.f32.mrf.mxu0  ;;  %v5512_v46 = vmul.f32 0.5, %v5384_v2  ;;  %v5385_v2 = vadd.f32 1.0, %v8182_v6 }
 0x46d   : > { %v4627_v42 = vmul.f32 %v13156_v26, %v13156_v26  ;;  %v5955_v38 = vpop.f32.mrf.mxu1  ;;  %v5008_v41 = vadd.f32 %v4880_v9, %v13140_v33  ;;  %v8184_v0 = vpop.eup %8183  ;;  %8191 = vtanh.f32 %v5134_v49  ;;  %v13170_v10 = vadd.f32 %v4461_v52, %v11802_v11 }
 0x46e   : > { %v4881_v48 = vmul.f32 0.044715, %v4753_v59  ;;  %v4754_v43 = vmul.f32 %v4626_v34, %v13153_v17  ;;  %v4463_v58 = vpop.f32.mrf.mxu0  ;;  %v5135_v24 = vmul.f32 0.7978846, %v5007_v54  ;;  %v5386_v52 = vadd.f32 1.0, %v8184_v0 }
 0x46f   : > { %v4755_v16 = vmul.f32 %v4627_v42, %v13156_v26  ;;  %v13173_v22 = vadd.f32 %v4463_v58, %v11843_v47  ;;  %v13175_v39 = vpop.f32.mrf.mxu1  ;;  %v5136_v37 = vmul.f32 0.7978846, %v5008_v41  ;;  %v4628_v49 = vmul.f32 %v13170_v10, %v13170_v10 }
 0x470   : > { %v5009_v25 = vadd.f32 %v4881_v48, %v13146_v61  ;;  %v4882_v62 = vmul.f32 0.044715, %v4754_v43  ;;  %v5511_v38 = vmul.f32 0.5, %v5383_v23  ;;  %v5513_v5 = vmul.f32 0.5, %v5385_v2 }
 0x471   : > { %v8186_v7 = vpop.eup %8185  ;;  %v4883_v57 = vmul.f32 0.044715, %v4755_v16  ;;  %v4629_v9 = vmul.f32 %v13173_v22, %v13173_v22  ;;  %v4467_v59 = vpop.f32.mrf.mxu0  ;;  %8193 = vtanh.f32 %v5136_v37  ;;  %v4756_v6 = vmul.f32 %v4628_v49, %v13170_v10 }
 0x472   : > { %v5958_v34 = vpop.f32.mrf.mxu1  ;;  %v5388_v42 = vadd.f32 1.0, %v8186_v7  ;;  %v5137_v41 = vmul.f32 0.7978846, %v5009_v25  ;;  %v5010_v48 = vadd.f32 %v4882_v62, %v13153_v17  ;;  %8195 = vtanh.f32 %v5135_v24 }
 0x473   : > { %v4757_v54 = vmul.f32 %v4629_v9, %v13173_v22  ;;  %v4469_v43 = vpop.f32.mrf.mxu0  ;;  %v8188_v58 = vpop.eup %8187  ;;  %v5011_v16 = vadd.f32 %v4883_v57, %v13156_v26  ;;  %v5640_v34 = vmul.f32 %v5512_v46, %v13067_v63  ;;  %v4884_v0 = vmul.f32 0.044715, %v4756_v6 }
 0x474   : > { %v5516_v23 = vmul.f32 0.5, %v5388_v42  ;;  %v5639_v62 = vmul.f32 %v5511_v38, %v13057_v51  ;;  %v5641_v7 = vmul.f32 %v5513_v5, %v13074_v12  ;;  %v5514_v49 = vmul.f32 0.5, %v5386_v52 }
 0x475   : > { %v8190_v37 = vpop.eup %8189  ;;  %v4885_v25 = vmul.f32 0.044715, %v4757_v54  ;;  %8197 = vtanh.f32 %v5137_v41  ;;  %v5138_v9 = vmul.f32 0.7978846, %v5010_v48  ;;  %v5012_v50 = vadd.f32 %v4884_v0, %v13170_v10  ;;  %v4471_v57 = vpop.f32.mrf.mxu0 }
 0x476   : > { %v5139_v2 = vmul.f32 0.7978846, %v5011_v16  ;;  %v5723_v28 = vpack.c.bf16 %v5641_v7, %v5639_v62  ;;  %v13193_v63 = vadd.f32 %v4467_v59, %v11802_v11  ;;  %v5722_v24 = vpack.c.bf16 %v5640_v34, %v5638_v32 }
 0x477   : > { %v5013_v13 = vadd.f32 %v4885_v25, %v13173_v22  ;;  %v5140_v46 = vmul.f32 0.7978846, %v5012_v50  ;;  %v13196_v42 = vadd.f32 %v4469_v43, %v11843_v47  ;;  %v5387_v51 = vadd.f32 1.0, %v8188_v58  ;;  %v4473_v43 = vpop.f32.mrf.mxu0 }
 0x478   : > { %v5644_v5 = vmul.f32 %v5516_v23, %v13097_v20  ;;  %6079 = vmatprep.mubr.bf16.mxu1 %v5723_v28  ;;  %v4630_v12 = vmul.f32 %v13193_v63, %v13193_v63  ;;  %v5389_v52 = vadd.f32 1.0, %v8190_v37  ;;  %v13202_v38 = vadd.f32 %v4471_v57, %v11802_v11 }
 0x479   : > { %8199 = vtanh.f32 %v5140_v46  ;;  %v5141_v59 = vmul.f32 0.7978846, %v5013_v13  ;;  %6080 = vmatmul.mubr.bf16.gmra.mxu1 %v5722_v24  ;;  %v4631_v50 = vmul.f32 %v13196_v42, %v13196_v42  ;;  %v5515_v32 = vmul.f32 0.5, %v5387_v51 }
 0x47a   : > { %v13204_v41 = vpop.f32.mrf.mxu1  ;;  %v8192_v48 = vpop.eup %8191  ;;  %8201 = vtanh.f32 %v5138_v9  ;;  %v4758_v20 = vmul.f32 %v4630_v12, %v13193_v63  ;;  %v5517_v6 = vmul.f32 0.5, %v5389_v52  ;;  %v4632_v54 = vmul.f32 %v13202_v38, %v13202_v38 }
 0x47b   : > { %v5642_v16 = vmul.f32 %v5514_v49, %v13081_v56  ;;  %8203 = vtanh.f32 %v5139_v2  ;;  %v4759_v34 = vmul.f32 %v4631_v50, %v13196_v42  ;;  %v5643_v37 = vmul.f32 %v5515_v32, %v13088_v27 }
 0x47c   : > { %v5963_v58 = vpop.f32.mrf.mxu1  ;;  %v4886_v0 = vmul.f32 0.044715, %v4758_v20  ;;  %v5645_v23 = vmul.f32 %v5517_v6, %v13108_v40  ;;  %v4760_v25 = vmul.f32 %v4632_v54, %v13202_v38  ;;  %v5390_v57 = vadd.f32 1.0, %v8192_v48 }
 0x47d   : > { %8205 = vtanh.f32 %v5141_v59  ;;  %v4887_v13 = vmul.f32 0.044715, %v4759_v34  ;;  %v13219_v28 = vadd.f32 %v4473_v43, %v11843_v47  ;;  %v5724_v46 = vpack.c.bf16 %v5644_v5, %v5642_v16 }
 0x47e   : > { %v13216_v62 = vpop.f32.mrf.mxu1  ;;  %v4477_v7 = vpop.f32.mrf.mxu0  ;;  %v5014_v56 = vadd.f32 %v4886_v0, %v13193_v63  ;;  %v5725_v49 = vpack.c.bf16 %v5645_v23, %v5643_v37  ;;  %v4888_v2 = vmul.f32 0.044715, %v4760_v25  ;;  %v5518_v58 = vmul.f32 0.5, %v5390_v57 }
 0x47f   : > { %v8194_v9 = vpop.eup %8193  ;;  %v5015_v51 = vadd.f32 %v4887_v13, %v13196_v42  ;;  %v4633_v12 = vmul.f32 %v13219_v28, %v13219_v28  ;;  %v13226_v52 = vadd.f32 %v4477_v7, %v11802_v11 }
 0x480   : > { %v5966_v27 = vpop.f32.mrf.mxu1  ;;  %v4479_v24 = vpop.f32.mrf.mxu0  ;;  %v5392_v40 = vadd.f32 1.0, %v8194_v9  ;;  %v5142_v50 = vmul.f32 0.7978846, %v5014_v56  ;;  %6087 = vmatprep.mubr.bf16.mxu1 %v5725_v49  ;;  %v5016_v32 = vadd.f32 %v4888_v2, %v13202_v38 }
 0x481   : > { %v8196_v59 = vpop.eup %8195  ;;  %v13230_v48 = vadd.f32 %v4479_v24, %v11843_v47  ;;  %v5143_v20 = vmul.f32 0.7978846, %v5015_v51  ;;  %6088 = vmatmul.mubr.bf16.gmra.mxu1 %v5724_v46  ;;  %v4761_v6 = vmul.f32 %v4633_v12, %v13219_v28  ;;  %v4634_v54 = vmul.f32 %v13226_v52, %v13226_v52 }
 0x482   : > { %v4481_v5 = vpop.f32.mrf.mxu0  ;;  %v8198_v43 = vpop.eup %8197  ;;  %v5144_v16 = vmul.f32 0.7978846, %v5016_v32  ;;  %v5520_v37 = vmul.f32 0.5, %v5392_v40  ;;  %8207 = vtanh.f32 %v5142_v50  ;;  %v5391_v49 = vadd.f32 1.0, %v8196_v59 }
 0x483   : > { %v4635_v34 = vmul.f32 %v13230_v48, %v13230_v48  ;;  %v4889_v23 = vmul.f32 0.044715, %v4761_v6  ;;  %v4762_v25 = vmul.f32 %v4634_v54, %v13226_v52  ;;  %8209 = vtanh.f32 %v5143_v20 }
 0x484   : > { %v4483_v0 = vpop.f32.mrf.mxu0  ;;  %v13240_v9 = vadd.f32 %v4481_v5, %v11802_v11  ;;  %8211 = vtanh.f32 %v5144_v16  ;;  %v5393_v40 = vadd.f32 1.0, %v8198_v43  ;;  %v5519_v16 = vmul.f32 0.5, %v5391_v49 }
 0x485   : > { %v4763_v7 = vmul.f32 %v4635_v34, %v13230_v48  ;;  %v13243_v13 = vadd.f32 %v4483_v0, %v11843_v47  ;;  %v5017_v57 = vadd.f32 %v4889_v23, %v13219_v28  ;;  %v4890_v56 = vmul.f32 0.044715, %v4762_v25 }
 0x486   : > { %v8200_v2 = vpop.eup %8199  ;;  %v4636_v27 = vmul.f32 %v13240_v9, %v13240_v9  ;;  %v5648_v34 = vmul.f32 %v5520_v37, %v13140_v33  ;;  %v5521_v0 = vmul.f32 0.5, %v5393_v40  ;;  %v5646_v25 = vmul.f32 %v5518_v58, %v13122_v3 }
 0x487   : > { %v4891_v46 = vmul.f32 0.044715, %v4763_v7  ;;  %v4637_v24 = vmul.f32 %v13243_v13, %v13243_v13  ;;  %v8202_v51 = vpop.eup %8201  ;;  %v5396_v12 = vadd.f32 1.0, %v8200_v2  ;;  %v5145_v50 = vmul.f32 0.7978846, %v5017_v57 }
 0x488   : > { %v5018_v32 = vadd.f32 %v4890_v56, %v13226_v52  ;;  %v8204_v20 = vpop.eup %8203  ;;  %v4764_v59 = vmul.f32 %v4636_v27, %v13240_v9  ;;  %v5394_v2 = vadd.f32 1.0, %v8202_v51  ;;  %v5649_v27 = vmul.f32 %v5521_v0, %v13146_v61 }
 0x489   : > { %v4487_v5 = vpop.f32.mrf.mxu0  ;;  %v5019_v6 = vadd.f32 %v4891_v46, %v13230_v48  ;;  %v4765_v54 = vmul.f32 %v4637_v24, %v13243_v13  ;;  %8213 = vtanh.f32 %v5145_v50  ;;  %v5647_v46 = vmul.f32 %v5519_v16, %v13128_v4 }
 0x48a   : > { %v8206_v43 = vpop.eup %8205  ;;  %v4892_v7 = vmul.f32 0.044715, %v4764_v59  ;;  %v5146_v45 = vmul.f32 0.7978846, %v5018_v32  ;;  %v5524_v24 = vmul.f32 0.5, %v5396_v12  ;;  %v5726_v3 = vpack.c.bf16 %v5648_v34, %v5646_v25 }
 0x48b   : > { %v4489_v23 = vpop.f32.mrf.mxu0  ;;  %v4893_v57 = vmul.f32 0.044715, %v4765_v54  ;;  %v5147_v49 = vmul.f32 0.7978846, %v5019_v6  ;;  %v5727_v15 = vpack.c.bf16 %v5649_v27, %v5647_v46  ;;  %v13263_v58 = vadd.f32 %v4487_v5, %v11802_v11 }
 0x48c   : > { %v13256_v56 = vpop.f32.mrf.mxu1  ;;  %v5020_v33 = vadd.f32 %v4892_v7, %v13240_v9  ;;  %v13266_v51 = vadd.f32 %v4489_v23, %v11843_v47  ;;  %v5395_v61 = vadd.f32 1.0, %v8204_v20  ;;  %v5397_v12 = vadd.f32 1.0, %v8206_v43 }
 0x48d   : > { %v5021_v37 = vadd.f32 %v4893_v57, %v13243_v13  ;;  %v4491_v50 = vpop.f32.mrf.mxu0  ;;  %8215 = vtanh.f32 %v5146_v45  ;;  %6095 = vmatprep.mubr.bf16.mxu1 %v5727_v15  ;;  %v4638_v6 = vmul.f32 %v13263_v58, %v13263_v58  ;;  %v5522_v34 = vmul.f32 0.5, %v5394_v2 }
 0x48e   : > { %v5971_v40 = vpop.f32.mrf.mxu1  ;;  %v5148_v32 = vmul.f32 0.7978846, %v5020_v33  ;;  %v4639_v54 = vmul.f32 %v13266_v51, %v13266_v51  ;;  %v13275_v5 = vadd.f32 %v4491_v50, %v11802_v11  ;;  %6096 = vmatmul.mubr.bf16.gmra.mxu1 %v5726_v3  ;;  %v5523_v23 = vmul.f32 0.5, %v5395_v61 }
 0x48f   : > { %v5149_v4 = vmul.f32 0.7978846, %v5021_v37  ;;  %v8208_v16 = vpop.eup %8207  ;;  %v5525_v25 = vmul.f32 0.5, %v5397_v12  ;;  %v4766_v15 = vmul.f32 %v4638_v6, %v13263_v58  ;;  %v4493_v43 = vpop.f32.mrf.mxu0  ;;  %v5652_v57 = vmul.f32 %v5524_v24, %v13170_v10 }
 0x490   : > { %v13268_v59 = vpop.f32.mrf.mxu1  ;;  %8217 = vtanh.f32 %v5148_v32  ;;  %v8210_v20 = vpop.eup %8209  ;;  %v4767_v45 = vmul.f32 %v4639_v54, %v13266_v51  ;;  %v5651_v46 = vmul.f32 %v5523_v23, %v13156_v26  ;;  %v4640_v37 = vmul.f32 %v13275_v5, %v13275_v5 }
 0x491   : > { %8219 = vtanh.f32 %v5147_v49  ;;  %v8212_v7 = vpop.eup %8211  ;;  %v5653_v2 = vmul.f32 %v5525_v25, %v13173_v22  ;;  %v4894_v27 = vmul.f32 0.044715, %v4766_v15  ;;  %v5650_v49 = vmul.f32 %v5522_v34, %v13153_v17 }
 0x492   : > { %v5974_v0 = vpop.f32.mrf.mxu1  ;;  %8221 = vtanh.f32 %v5149_v4  ;;  %v4895_v33 = vmul.f32 0.044715, %v4767_v45  ;;  %v5398_v40 = vadd.f32 1.0, %v8208_v16  ;;  %v13286_v3 = vadd.f32 %v4493_v43, %v11843_v47 }
 0x493   : > { %v5729_v50 = vpack.c.bf16 %v5653_v2, %v5651_v46  ;;  %v5400_v32 = vadd.f32 1.0, %v8212_v7  ;;  %v5022_v10 = vadd.f32 %v4894_v27, %v13263_v58  ;;  %v4768_v26 = vmul.f32 %v4640_v37, %v13275_v5 }
 0x494   : > { %v5023_v24 = vadd.f32 %v4895_v33, %v13266_v51  ;;  %v5728_v61 = vpack.c.bf16 %v5652_v57, %v5650_v49  ;;  %v4641_v17 = vmul.f32 %v13286_v3, %v13286_v3  ;;  %v5399_v12 = vadd.f32 1.0, %v8210_v20 }
 0x495   : > { %6103 = vmatprep.mubr.bf16.mxu1 %v5729_v50  ;;  %v5150_v6 = vmul.f32 0.7978846, %v5022_v10  ;;  %v4896_v16 = vmul.f32 0.044715, %v4768_v26  ;;  %v5526_v45 = vmul.f32 0.5, %v5398_v40  ;;  %v5528_v43 = vmul.f32 0.5, %v5400_v32 }
 0x496   : > { %v8214_v22 = vpop.eup %8213  ;;  %v5151_v54 = vmul.f32 0.7978846, %v5023_v24  ;;  %6104 = vmatmul.mubr.bf16.gmra.mxu1 %v5728_v61  ;;  %v4769_v0 = vmul.f32 %v4641_v17, %v13286_v3  ;;  %v5527_v49 = vmul.f32 0.5, %v5399_v12 }
 0x497   : > { %v5401_v15 = vadd.f32 1.0, %v8214_v22  ;;  %v5024_v7 = vadd.f32 %v4896_v16, %v13275_v5  ;;  %8223 = vtanh.f32 %v5150_v6  ;;  %v5654_v17 = vmul.f32 %v5526_v45, %v13193_v63 }
 0x498   : > { %v13291_v4 = vpop.f32.mrf.mxu1  ;;  %v4897_v46 = vmul.f32 0.044715, %v4769_v0  ;;  %8225 = vtanh.f32 %v5151_v54  ;;  %v5656_v6 = vmul.f32 %v5528_v43, %v13202_v38 }
 0x499   : > { %v4497_v34 = vpop.f32.mrf.mxu0  ;;  %v5152_v33 = vmul.f32 0.7978846, %v5024_v7  ;;  %v5529_v50 = vmul.f32 0.5, %v5401_v15 }
 0x49a   : > { %v5979_v23 = vpop.f32.mrf.mxu1  ;;  %v13297_v25 = vadd.f32 %v4497_v34, %v11802_v11  ;;  %v8216_v40 = vpop.eup %8215  ;;  %v5025_v32 = vadd.f32 %v4897_v46, %v13286_v3  ;;  %v5655_v46 = vmul.f32 %v5527_v49, %v13196_v42 }
 0x49b   : > { %v4499_v57 = vpop.f32.mrf.mxu0  ;;  %8227 = vtanh.f32 %v5152_v33  ;;  %v5657_v63 = vmul.f32 %v5529_v50, %v13219_v28  ;;  %v5402_v38 = vadd.f32 1.0, %v8216_v40 }
 0x49c   : > { %v13300_v20 = vpop.f32.mrf.mxu1  ;;  %v4642_v2 = vmul.f32 %v13297_v25, %v13297_v25  ;;  %v13305_v27 = vadd.f32 %v4499_v57, %v11843_v47  ;;  %v5153_v34 = vmul.f32 0.7978846, %v5025_v32 }
 0x49d   : > { %v4501_v37 = vpop.f32.mrf.mxu0  ;;  %v8218_v61 = vpop.eup %8217  ;;  %v5530_v40 = vmul.f32 0.5, %v5402_v38 }
 0x49e   : > { %v4770_v10 = vmul.f32 %v4642_v2, %v13297_v25  ;;  %v5982_v24 = vpop.f32.mrf.mxu1  ;;  %v4643_v26 = vmul.f32 %v13305_v27, %v13305_v27  ;;  %v13312_v22 = vadd.f32 %v4501_v37, %v11802_v11  ;;  %v8220_v54 = vpop.eup %8219  ;;  %v5404_v16 = vadd.f32 1.0, %v8218_v61 }
 0x49f   : > { %v4503_v12 = vpop.f32.mrf.mxu0  ;;  %v8222_v15 = vpop.eup %8221  ;;  %8229 = vtanh.f32 %v5153_v34  ;;  %v5731_v37 = vpack.c.bf16 %v5657_v63, %v5655_v46  ;;  %v5403_v32 = vadd.f32 1.0, %v8220_v54  ;;  %v5658_v38 = vmul.f32 %v5530_v40, %v13226_v52 }
 0x4a0   : > { %v4898_v0 = vmul.f32 0.044715, %v4770_v10  ;;  %v4771_v23 = vmul.f32 %v4643_v26, %v13305_v27  ;;  %v4644_v7 = vmul.f32 %v13312_v22, %v13312_v22  ;;  %v13320_v57 = vadd.f32 %v4503_v12, %v11843_v47 }
 0x4a1   : > { %v5532_v10 = vmul.f32 0.5, %v5404_v16  ;;  %v5730_v26 = vpack.c.bf16 %v5656_v6, %v5654_v17  ;;  %v5405_v61 = vadd.f32 1.0, %v8222_v15  ;;  %6111 = vmatprep.mubr.bf16.mxu1 %v5731_v37  ;;  %v5531_v50 = vmul.f32 0.5, %v5403_v32 }
 0x4a2   : > { %v5026_v45 = vadd.f32 %v4898_v0, %v13297_v25  ;;  %v4899_v43 = vmul.f32 0.044715, %v4771_v23  ;;  %v4772_v2 = vmul.f32 %v4644_v7, %v13312_v22  ;;  %v4645_v33 = vmul.f32 %v13320_v57, %v13320_v57 }
 0x4a3   : > { %6112 = vmatmul.mubr.bf16.gmra.mxu1 %v5730_v26  ;;  %v5533_v34 = vmul.f32 0.5, %v5405_v61  ;;  %v5660_v54 = vmul.f32 %v5532_v10, %v13240_v9  ;;  %v5659_v16 = vmul.f32 %v5531_v50, %v13230_v48 }
 0x4a4   : > { %v5027_v24 = vadd.f32 %v4899_v43, %v13305_v27  ;;  %v5154_v42 = vmul.f32 0.7978846, %v5026_v45  ;;  %v4900_v49 = vmul.f32 0.044715, %v4772_v2  ;;  %v4773_v28 = vmul.f32 %v4645_v33, %v13320_v57  ;;  %v8224_v6 = vpop.eup %8223 }
 0x4a5   : > { %v5661_v17 = vmul.f32 %v5533_v34, %v13243_v13  ;;  %v8226_v63 = vpop.eup %8225  ;;  %v5732_v37 = vpack.c.bf16 %v5660_v54, %v5658_v38  ;;  %v5406_v32 = vadd.f32 1.0, %v8224_v6 }
 0x4a6   : > { %v5155_v12 = vmul.f32 0.7978846, %v5027_v24  ;;  %v5028_v0 = vadd.f32 %v4900_v49, %v13312_v22  ;;  %v4901_v23 = vmul.f32 0.044715, %v4773_v28  ;;  %8231 = vtanh.f32 %v5154_v42 }
 0x4a7   : > { %v5733_v43 = vpack.c.bf16 %v5661_v17, %v5659_v16  ;;  %v5407_v24 = vadd.f32 1.0, %v8226_v63 }
 0x4a8   : > { %v5156_v15 = vmul.f32 0.7978846, %v5028_v0  ;;  %v5029_v7 = vadd.f32 %v4901_v23, %v13320_v57  ;;  %8233 = vtanh.f32 %v5155_v12  ;;  %v8228_v48 = vpop.eup %8227  ;;  %v5534_v0 = vmul.f32 0.5, %v5406_v32 }
 0x4a9   : > { %v4507_v46 = vpop.f32.mrf.mxu0  ;;  %6119 = vmatprep.mubr.bf16.mxu1 %v5733_v43  ;;  %v5408_v10 = vadd.f32 1.0, %v8228_v48  ;;  %v5535_v16 = vmul.f32 0.5, %v5407_v24 }
 0x4aa   : > { %v13337_v45 = vadd.f32 %v4507_v46, %v11802_v11  ;;  %8235 = vtanh.f32 %v5156_v15  ;;  %v5157_v9 = vmul.f32 0.7978846, %v5029_v7  ;;  %v5662_v24 = vmul.f32 %v5534_v0, %v13263_v58 }
 0x4ab   : > { %v4509_v2 = vpop.f32.mrf.mxu0  ;;  %6120 = vmatmul.mubr.bf16.gmra.mxu1 %v5732_v37  ;;  %v5536_v23 = vmul.f32 0.5, %v5408_v10 }
 0x4ac   : > { %v4646_v13 = vmul.f32 %v13337_v45, %v13337_v45  ;;  %v13342_v33 = vadd.f32 %v4509_v2, %v11843_v47  ;;  %8237 = vtanh.f32 %v5157_v9  ;;  %v8230_v49 = vpop.eup %8229 }
 0x4ad   : > { %v4511_v52 = vpop.f32.mrf.mxu0  ;;  %v5409_v54 = vadd.f32 1.0, %v8230_v49 }
 0x4ae   : > { %v4774_v26 = vmul.f32 %v4646_v13, %v13337_v45  ;;  %v4647_v61 = vmul.f32 %v13342_v33, %v13342_v33  ;;  %v13348_v42 = vadd.f32 %v4511_v52, %v11802_v11  ;;  %v5664_v13 = vmul.f32 %v5536_v23, %v13275_v5 }
 0x4af   : > { %v4513_v28 = vpop.f32.mrf.mxu0  ;;  %v5537_v63 = vmul.f32 0.5, %v5409_v54 }
 0x4b0   : > { %v4902_v50 = vmul.f32 0.044715, %v4774_v26  ;;  %v4775_v40 = vmul.f32 %v4647_v61, %v13342_v33  ;;  %v4648_v12 = vmul.f32 %v13348_v42, %v13348_v42  ;;  %v13354_v34 = vadd.f32 %v4513_v28, %v11843_v47 }
 0x4b1   : > { %v13356_v17 = vpop.f32.mrf.mxu1  ;;  %v5665_v10 = vmul.f32 %v5537_v63, %v13286_v3 }
 0x4b2   : > { %v5030_v6 = vadd.f32 %v4902_v50, %v13337_v45  ;;  %v4903_v15 = vmul.f32 0.044715, %v4775_v40  ;;  %v4776_v7 = vmul.f32 %v4648_v12, %v13348_v42  ;;  %v4649_v46 = vmul.f32 %v13354_v34, %v13354_v34 }
 0x4b3   : > { %v5987_v38 = vpop.f32.mrf.mxu1  ;;  %v8232_v52 = vpop.eup %8231  ;;  %v5663_v50 = vmul.f32 %v5535_v16, %v13266_v51  ;;  %v5734_v16 = vpack.c.bf16 %v5664_v13, %v5662_v24 }
 0x4b4   : > { %v5158_v43 = vmul.f32 0.7978846, %v5030_v6  ;;  %v5031_v9 = vadd.f32 %v4903_v15, %v13342_v33  ;;  %v4904_v2 = vmul.f32 0.044715, %v4776_v7  ;;  %v4517_v48 = vpop.f32.mrf.mxu0  ;;  %v4777_v37 = vmul.f32 %v4649_v46, %v13354_v34 }
 0x4b5   : > { %v13366_v32 = vadd.f32 %v4517_v48, %v11802_v11  ;;  %v13370_v26 = vpop.f32.mrf.mxu1  ;;  %v8234_v40 = vpop.eup %8233  ;;  %v5735_v6 = vpack.c.bf16 %v5665_v10, %v5663_v50 }
 0x4b6   : > { %v5159_v61 = vmul.f32 0.7978846, %v5031_v9  ;;  %v5032_v49 = vadd.f32 %v4904_v2, %v13348_v42  ;;  %v4519_v28 = vpop.f32.mrf.mxu0  ;;  %8239 = vtanh.f32 %v5158_v43  ;;  %v4905_v5 = vmul.f32 0.044715, %v4777_v37 }
 0x4b7   : > { %v4650_v12 = vmul.f32 %v13366_v32, %v13366_v32  ;;  %v13377_v23 = vadd.f32 %v4519_v28, %v11843_v47  ;;  %v8236_v3 = vpop.eup %8235  ;;  %v5990_v54 = vpop.f32.mrf.mxu1  ;;  %6127 = vmatprep.mubr.bf16.mxu1 %v5735_v6  ;;  %v5410_v2 = vadd.f32 1.0, %v8232_v52  ;;  %v5411_v10 = vadd.f32 1.0, %v8234_v40 }
 0x4b8   : > { %8241 = vtanh.f32 %v5159_v61  ;;  %v5160_v58 = vmul.f32 0.7978846, %v5032_v49  ;;  %v4521_v0 = vpop.f32.mrf.mxu0  ;;  %v5412_v15 = vadd.f32 1.0, %v8236_v3  ;;  %v5033_v7 = vadd.f32 %v4905_v5, %v13354_v34  ;;  %6128 = vmatmul.mubr.bf16.gmra.mxu1 %v5734_v16 }
 0x4b9   : > { %v4778_v51 = vmul.f32 %v4650_v12, %v13366_v32  ;;  %v8238_v46 = vpop.eup %8237  ;;  %v4651_v38 = vmul.f32 %v13377_v23, %v13377_v23  ;;  %v13386_v43 = vadd.f32 %v4521_v0, %v11802_v11  ;;  %v15032_v11 = vld [vmem:[#allocation66_spill] sm:$0xff]  ;;  %v5539_v16 = vmul.f32 0.5, %v5411_v10 }
 0x4ba   : > { %8243 = vtanh.f32 %v5160_v58  ;;  %v13381_v63 = vpop.f32.mrf.mxu1  ;;  %v4523_v9 = vpop.f32.mrf.mxu0  ;;  %v5161_v48 = vmul.f32 0.7978846, %v5033_v7  ;;  %v5413_v50 = vadd.f32 1.0, %v8238_v46  ;;  %v6167_v5 = vadd.f32 %v13061_v35, %v15032_v11  ;;  %v15033_v0 = vld [vmem:[#allocation114_spill] sm:$0xff] }
 0x4bb   : > { %v4906_v37 = vmul.f32 0.044715, %v4778_v51  ;;  %v4779_v13 = vmul.f32 %v4651_v38, %v13377_v23  ;;  %v4652_v24 = vmul.f32 %v13386_v43, %v13386_v43  ;;  %v13392_v49 = vadd.f32 %v4523_v9, %v11843_v47 }
 0x4bc   : > { %v5995_v61 = vpop.f32.mrf.mxu1  ;;  %v5540_v12 = vmul.f32 0.5, %v5412_v15  ;;  %8245 = vtanh.f32 %v5161_v48  ;;  %v5538_v7 = vmul.f32 0.5, %v5410_v2  ;;  %v5541_v46 = vmul.f32 0.5, %v5413_v50  ;;  %v13408_v48 = vld [vmem:[%s14441_s7 + $0x1] ss:$0 sm:$0xff] }
 0x4bd   : > { %v5034_v52 = vadd.f32 %v4906_v37, %v13366_v32  ;;  %v4907_v40 = vmul.f32 0.044715, %v4779_v13  ;;  %v4780_v54 = vmul.f32 %v4652_v24, %v13386_v43  ;;  %v4653_v58 = vmul.f32 %v13392_v49, %v13392_v49  ;;  %v15034_v13 = vld [vmem:[#allocation115_spill] sm:$0xff] }
 0x4be   : > { %v13397_v3 = vpop.f32.mrf.mxu1  ;;  %v5668_v2 = vmul.f32 %v5540_v12, %v13312_v22  ;;  %v5667_v22 = vmul.f32 %v5539_v16, %v13305_v27 }
 0x4bf   : > { %v5905_v28 = vpop.f32.mrf.mxu0  ;;  %v5162_v51 = vmul.f32 0.7978846, %v5034_v52  ;;  %v5035_v15 = vadd.f32 %v4907_v40, %v13377_v23  ;;  %v4908_v38 = vmul.f32 0.044715, %v4780_v54  ;;  %v4781_v9 = vmul.f32 %v4653_v58, %v13392_v49 }
 0x4c0   : > { %v6160_v47 = vadd.f32 %v5905_v28, %v15033_v0  ;;  %v5998_v35 = vpop.f32.mrf.mxu1  ;;  %v5669_v52 = vmul.f32 %v5541_v46, %v13320_v57  ;;  %v13419_v40 = vadd.f32 %v13408_v48, %v6167_v5  ;;  %v5666_v58 = vmul.f32 %v5538_v7, %v13297_v25  ;;  %v15036_v5 = vld [vmem:[#allocation81_spill] sm:$0xff] }
 0x4c1   : > { %v5907_v6 = vpop.f32.mrf.mxu0  ;;  %v5163_v24 = vmul.f32 0.7978846, %v5035_v15  ;;  %v5036_v28 = vadd.f32 %v4908_v38, %v13386_v43  ;;  %v4909_v50 = vmul.f32 0.044715, %v4781_v9  ;;  %8247 = vtanh.f32 %v5162_v51  ;;  %v15035_v15 = vld [vmem:[#allocation59_spill] sm:$0xff] }
 0x4c2   : > { %v13411_v37 = vadd.f32 %v13408_v48, %v6160_v47  ;;  %v5737_v46 = vpack.c.bf16 %v5669_v52, %v5667_v22  ;;  %v6168_v51 = vadd.f32 %v13099_v29, %v15036_v5  ;;  %v5736_v25 = vpack.c.bf16 %v5668_v2, %v5666_v58  ;;  %v15037_v29 = vld [vmem:[#allocation60_spill] sm:$0xff] }
 0x4c3   : > { %v5908_v61 = vpop.f32.mrf.mxu0  ;;  %v8240_v12 = vpop.eup %8239  ;;  %8249 = vtanh.f32 %v5163_v24  ;;  %v5164_v0 = vmul.f32 0.7978846, %v5036_v28  ;;  %v5037_v47 = vadd.f32 %v4909_v50, %v13392_v49 }
 0x4c4   : > { %v6161_v10 = vadd.f32 %v5908_v61, %v15034_v13  ;;  %6293 = vadd.xlane.f32.xlu1 %v13411_v37  ;;  %6135 = vmatprep.mubr.bf16.mxu1 %v5737_v46  ;;  %v5414_v61 = vadd.f32 1.0, %v8240_v12  ;;  %v13440_v2 = vadd.f32 %v13408_v48, %v6168_v51  ;;  %v15040_v51 = vld [vmem:[#allocation82_spill] sm:$0xff] }
 0x4c5   : > { %v5910_v11 = vpop.f32.mrf.mxu0  ;;  %v8242_v35 = vpop.eup %8241  ;;  %8251 = vtanh.f32 %v5164_v0  ;;  %v5165_v38 = vmul.f32 0.7978846, %v5037_v47  ;;  %6136 = vmatmul.mubr.bf16.gmra.mxu1 %v5736_v25  ;;  %v15039_v0 = vld [vmem:[#allocation24_spill] sm:$0xff] }
 0x4c6   : > { %v13422_v54 = vadd.f32 %v13408_v48, %v6161_v10  ;;  %v5415_v9 = vadd.f32 1.0, %v8242_v35  ;;  %v15038_v11 = vld [vmem:[#allocation72_spill] sm:$0xff]  ;;  %v6170_v47 = vadd.f32 %v13119_v36, %v15039_v0 }
 0x4c7   : > { %v5913_v6 = vpop.f32.mrf.mxu0  ;;  %v8244_v7 = vpop.eup %8243  ;;  %8253 = vtanh.f32 %v5165_v38  ;;  %v6169_v52 = vadd.f32 %v13112_v60, %v15038_v11  ;;  %v6171_v38 = vadd.f32 %v13131_v53, %v15040_v51 }
 0x4c8   : > { %v6162_v57 = vadd.f32 %v5913_v6, %v15035_v15  ;;  %6295 = vadd.xlane.f32.xlu0 %v13422_v54  ;;  %6307 = vadd.xlane.f32.xlu1 %v13419_v40  ;;  %v5416_v13 = vadd.f32 1.0, %v8244_v7  ;;  %v5543_v15 = vmul.f32 0.5, %v5415_v9  ;;  %v13460_v25 = vadd.f32 %v13408_v48, %v6170_v47  ;;  %v15041_v7 = vld [vmem:[#allocation83_spill] sm:$0xff] }
 0x4c9   : > { %v5915_v27 = vpop.f32.mrf.mxu0  ;;  %v13435_v10 = vpop.f32.mrf.mxu1  ;;  %v13454_v60 = vadd.f32 %v13408_v48, %v6169_v52  ;;  %v6172_v9 = vadd.f32 %v13158_v55, %v15041_v7  ;;  %v15045_v7 = vld [vmem:[#allocation73_spill] sm:$0xff] }
 0x4ca   : > { %v13433_v16 = vadd.f32 %v13408_v48, %v6162_v57  ;;  %v8246_v50 = vpop.eup %8245  ;;  %v5544_v22 = vmul.f32 0.5, %v5416_v13  ;;  %v5542_v57 = vmul.f32 0.5, %v5414_v61  ;;  %v5671_v61 = vmul.f32 %v5543_v15, %v13342_v33 }
 0x4cb   : > { %v5916_v24 = vpop.f32.mrf.mxu0  ;;  %v6003_v58 = vpop.f32.mrf.mxu1  ;;  %v5417_v35 = vadd.f32 1.0, %v8246_v50 }
 0x4cc   : > { %v6163_v28 = vadd.f32 %v5916_v24, %v15037_v29  ;;  %6297 = vadd.xlane.f32.xlu0 %v13433_v16  ;;  %v5672_v36 = vmul.f32 %v5544_v22, %v13348_v42  ;;  %v5670_v29 = vmul.f32 %v5542_v57, %v13337_v45  ;;  %v13472_v42 = vadd.f32 %v13408_v48, %v6171_v38  ;;  %v15042_v22 = vld [vmem:[#allocation74_spill] sm:$0xff]  ;;  %v15043_v58 = vld [vmem:[#allocation97_spill] sm:$0xff]  ;;  %v15044_v57 = vld [vmem:[#allocation108_spill] sm:$0xff] }
 0x4cd   : > { %v5918_v12 = vpop.f32.mrf.mxu0  ;;  %v13449_v46 = vpop.f32.mrf.mxu1  ;;  %v5545_v5 = vmul.f32 0.5, %v5417_v35  ;;  %v6173_v45 = vadd.f32 %v13175_v39, %v15042_v22 }
 0x4ce   : > { %v13447_v6 = vadd.f32 %v13408_v48, %v6163_v28  ;;  %v8248_v24 = vpop.eup %8247  ;;  %v5738_v55 = vpack.c.bf16 %v5672_v36, %v5670_v29  ;;  %v6174_v12 = vadd.f32 %v13204_v41, %v15043_v58 }
 0x4cf   : > { %v6006_v27 = vpop.f32.mrf.mxu1  ;;  %v5673_v13 = vmul.f32 %v5545_v5, %v13354_v34  ;;  %v13475_v34 = vadd.f32 %v13408_v48, %v6172_v9  ;;  %v5418_v0 = vadd.f32 1.0, %v8248_v24  ;;  %v6175_v5 = vadd.f32 %v13216_v62, %v15044_v57  ;;  %v15050_v57 = vld [vmem:[#allocation112_spill] sm:$0xff] }
 0x4d0   : > { %6299 = vadd.xlane.f32.xlu1 %v13447_v6  ;;  %6309 = vadd.xlane.f32.xlu0 %v13440_v2  ;;  %v8250_v50 = vpop.eup %8249  ;;  %v13488_v41 = vadd.f32 %v13408_v48, %v6173_v45  ;;  %v13491_v27 = vadd.f32 %v13408_v48, %v6174_v12  ;;  %v6176_v9 = vadd.f32 %v13256_v56, %v15045_v7  ;;  %v15052_v7 = vld [vmem:[#allocation106_spill] sm:$0xff] }
 0x4d1   : > { %v13467_v28 = vpop.f32.mrf.mxu1  ;;  %v5739_v53 = vpack.c.bf16 %v5673_v13, %v5671_v61  ;;  %v5419_v52 = vadd.f32 1.0, %v8250_v50  ;;  %v5546_v61 = vmul.f32 0.5, %v5418_v0  ;;  %v13499_v62 = vadd.f32 %v13408_v48, %v6175_v5 }
 0x4d2   : > { %v8252_v33 = vpop.eup %8251  ;;  %v6181_v5 = vadd.f32 %v13370_v26, %v15050_v57  ;;  %v15059_v57 = vld [vmem:[#allocation30_spill] sm:$0xff] }
 0x4d3   : > { %v6011_v11 = vpop.f32.mrf.mxu1  ;;  %6143 = vmatprep.mubr.bf16.mxu1 %v5739_v53  ;;  %v5420_v47 = vadd.f32 1.0, %v8252_v33  ;;  %v5547_v36 = vmul.f32 0.5, %v5419_v52  ;;  %v13504_v53 = vadd.f32 %v13408_v48, %v6176_v9  ;;  %v5674_v52 = vmul.f32 %v5546_v61, %v13366_v32  ;;  %v15053_v61 = vld [vmem:[#allocation105_spill] sm:$0xff] }
 0x4d4   : > { %6311 = vadd.xlane.f32.xlu1 %v13454_v60  ;;  %6313 = vadd.xlane.f32.xlu0 %v13460_v25  ;;  %v8254_v15 = vpop.eup %8253  ;;  %v15046_v11 = vld [vmem:[#allocation17_spill] sm:$0xff]  ;;  %v6183_v9 = vadd.f32 %v13397_v3, %v15052_v7  ;;  %v6184_v26 = vadd.f32 %v13435_v10, %v15053_v61 }
 0x4d5   : > { %v13481_v35 = vpop.f32.mrf.mxu1  ;;  %6144 = vmatmul.mubr.bf16.gmra.mxu1 %v5738_v55  ;;  %v5548_v51 = vmul.f32 0.5, %v5420_v47  ;;  %v5421_v39 = vadd.f32 1.0, %v8254_v15  ;;  %v5675_v29 = vmul.f32 %v5547_v36, %v13377_v23  ;;  %v6177_v56 = vadd.f32 %v13268_v59, %v15046_v11  ;;  %v15047_v55 = vld [vmem:[#allocation21_spill] sm:$0xff] }
 0x4d6   : > { %v15048_v59 = vld [vmem:[#allocation25_spill] sm:$0xff] }
 0x4d7   : > { %v6014_v38 = vpop.f32.mrf.mxu1  ;;  %v5549_v13 = vmul.f32 0.5, %v5421_v39  ;;  %v5676_v24 = vmul.f32 %v5548_v51, %v13386_v43  ;;  %v6178_v43 = vadd.f32 %v13291_v4, %v15047_v55  ;;  %v6179_v58 = vadd.f32 %v13300_v20, %v15048_v59  ;;  %v15049_v4 = vld [vmem:[#allocation53_spill] sm:$0xff]  ;;  %v15051_v20 = vld [vmem:[#allocation96_spill] sm:$0xff] }
 0x4d8   : > { %6315 = vadd.xlane.f32.xlu1 %v13472_v42  ;;  %6317 = vadd.xlane.f32.xlu0 %v13475_v34  ;;  %v6180_v32 = vadd.f32 %v13356_v17, %v15049_v4  ;;  %v6182_v51 = vadd.f32 %v13381_v63, %v15051_v20  ;;  %v13538_v39 = vadd.f32 %v13408_v48, %v6181_v5 }
 0x4d9   : > { %v5677_v50 = vmul.f32 %v5549_v13, %v13392_v49  ;;  %v5740_v22 = vpack.c.bf16 %v5676_v24, %v5674_v52  ;;  %v13514_v49 = vadd.f32 %v13408_v48, %v6177_v56  ;;  %v13517_v45 = vadd.f32 %v13408_v48, %v6178_v43  ;;  %v15055_v56 = vld [vmem:[#allocation56_spill] sm:$0xff]  ;;  %v15056_v52 = vld [vmem:[#allocation27_spill] sm:$0xff] }
 0x4da   : > { %v13526_v47 = vadd.f32 %v13408_v48, %v6179_v58  ;;  %v13529_v15 = vadd.f32 %v13408_v48, %v6180_v32  ;;  %v13541_v36 = vadd.f32 %v13408_v48, %v6182_v51  ;;  %v13550_v24 = vadd.f32 %v13408_v48, %v6183_v9  ;;  %v15058_v32 = vld [vmem:[#allocation29_spill] sm:$0xff]  ;;  %v15061_v9 = vld [vmem:[#allocation35_spill] sm:$0xff] }
 0x4db   : > { %v5741_v33 = vpack.c.bf16 %v5677_v50, %v5675_v29  ;;  %v13553_v29 = vadd.f32 %v13408_v48, %v6184_v26  ;;  %v15054_v50 = vld [vmem:[#allocation26_spill] sm:$0xff]  ;;  %v6186_v3 = vadd.f32 %v13467_v28, %v15055_v56  ;;  %v15063_v56 = vld [vmem:[#allocation39_spill] sm:$0xff] }
 0x4dc   : > { %6319 = vadd.xlane.f32.xlu1 %v13488_v41  ;;  %6321 = vadd.xlane.f32.xlu0 %v13491_v27  ;;  %v6185_v11 = vadd.f32 %v13449_v46, %v15054_v50  ;;  %v15062_v50 = vld [vmem:[#allocation37_spill] sm:$0xff] }
 0x4dd   : > { %6151 = vmatprep.mubr.bf16.mxu1 %v5741_v33  ;;  %v13565_v43 = vadd.f32 %v13408_v48, %v6186_v3  ;;  %v6187_v33 = vadd.f32 %v13481_v35, %v15056_v52 }
 0x4de   : > { %v6017_v23 = vpop.f32.mrf.mxu1  ;;  %6152 = vmatmul.mubr.bf16.gmra.mxu1 %v5740_v22  ;;  %v13562_v10 = vadd.f32 %v13408_v48, %v6185_v11  ;;  %v15057_v22 = vld [vmem:[#allocation28_spill] sm:$0xff] }
 0x4df   : > { %v6188_v59 = vadd.f32 %v6017_v23, %v15057_v22  ;;  %v13573_v28 = vadd.f32 %v13408_v48, %v6187_v33  ;;  %v15064_v22 = vld [vmem:[#allocation40_spill] sm:$0xff] }
 0x4e0   : > { %6323 = vadd.xlane.f32.xlu1 %v13499_v62  ;;  %6325 = vadd.xlane.f32.xlu0 %v13504_v53  ;;  %v6019_v12 = vpop.f32.mrf.mxu1 }
 0x4e1   : > { %v13576_v4 = vadd.f32 %v13408_v48, %v6188_v59 }
 0x4e2   : > { %v6020_v0 = vpop.f32.mrf.mxu1 }
 0x4e3   : > { %v6189_v12 = vadd.f32 %v6020_v0, %v15058_v32  ;;  %v15065_v32 = vld [vmem:[#allocation49_spill] sm:$0xff] }
 0x4e4   : > { %6327 = vadd.xlane.f32.xlu1 %v13514_v49  ;;  %6329 = vadd.xlane.f32.xlu0 %v13517_v45  ;;  %v6022_v17 = vpop.f32.mrf.mxu1 }
 0x4e5   : > { %v13583_v23 = vadd.f32 %v13408_v48, %v6189_v12  ;;  %v15060_v17 = vld [vmem:[#allocation32_spill] sm:$0xff] }
 0x4e6   : > { %v6025_v38 = vpop.f32.mrf.mxu1 }
 0x4e7   : > { %v6190_v5 = vadd.f32 %v6025_v38, %v15059_v57 }
 0x4e8   : > { %6331 = vadd.xlane.f32.xlu1 %v13526_v47  ;;  %6333 = vadd.xlane.f32.xlu0 %v13529_v15  ;;  %v6027_v13 = vpop.f32.mrf.mxu1 }
 0x4e9   : > { %v13586_v51 = vadd.f32 %v13408_v48, %v6190_v5 }
 0x4ea   : > { %v6028_v63 = vpop.f32.mrf.mxu1 }
 0x4eb   : > { %v6191_v7 = vadd.f32 %v6028_v63, %v15060_v17 }
 0x4ec   : > { %6335 = vadd.xlane.f32.xlu1 %v13538_v39  ;;  %6337 = vadd.xlane.f32.xlu0 %v13541_v36  ;;  %v6030_v55 = vpop.f32.mrf.mxu1 }
 0x4ed   : > { %v13593_v38 = vadd.f32 %v13408_v48, %v6191_v7 }
 0x4ee   : > { %v6033_v46 = vpop.f32.mrf.mxu1 }
 0x4ef   : > { %v6192_v61 = vadd.f32 %v6033_v46, %v15061_v9 }
 0x4f0   : > { %6339 = vadd.xlane.f32.xlu1 %v13550_v24  ;;  %6341 = vadd.xlane.f32.xlu0 %v13553_v29  ;;  %v6035_v58 = vpop.f32.mrf.mxu1 }
 0x4f1   : > { %v13596_v13 = vadd.f32 %v13408_v48, %v6192_v61 }
 0x4f2   : > { %v6036_v20 = vpop.f32.mrf.mxu1 }
 0x4f3   : > { %v6193_v11 = vadd.f32 %v6036_v20, %v15062_v50 }
 0x4f4   : > { %6343 = vadd.xlane.f32.xlu1 %v13562_v10  ;;  %6345 = vadd.xlane.f32.xlu0 %v13565_v43  ;;  %v6038_v35 = vpop.f32.mrf.mxu1 }
 0x4f5   : > { %v13603_v52 = vadd.f32 %v13408_v48, %v6193_v11  ;;  %v15066_v35 = vld [vmem:[#allocation52_spill] sm:$0xff] }
 0x4f6   : > { %v6041_v26 = vpop.f32.mrf.mxu1 }
 0x4f7   : > { %v6194_v3 = vadd.f32 %v6041_v26, %v15063_v56  ;;  %v15067_v26 = vld [vmem:[#allocation55_spill] sm:$0xff] }
 0x4f8   : > { %6347 = vadd.xlane.f32.xlu1 %v13573_v28  ;;  %6349 = vadd.xlane.f32.xlu0 %v13576_v4  ;;  %v6043_v0 = vpop.f32.mrf.mxu1 }
 0x4f9   : > { %v13606_v33 = vadd.f32 %v13408_v48, %v6194_v3  ;;  %v15069_v3 = vld [vmem:[#allocation68_spill] sm:$0xff] }
 0x4fa   : > { %v6044_v55 = vpop.f32.mrf.mxu1 }
 0x4fb   : > { %v6195_v59 = vadd.f32 %v6044_v55, %v15064_v22 }
 0x4fc   : > { %6351 = vadd.xlane.f32.xlu1 %v13583_v23  ;;  %6353 = vadd.xlane.f32.xlu0 %v13586_v51  ;;  %v6046_v63 = vpop.f32.mrf.mxu1 }
 0x4fd   : > { %v13612_v46 = vadd.f32 %v13408_v48, %v6195_v59  ;;  %v6302_v59 = vpop.xlane.xlu0 %6301 }
 0x500   : > { %6355 = vadd.xlane.f32.xlu1 %v13593_v38  ;;  %6357 = vadd.xlane.f32.xlu0 %v13596_v13 }
 0x503   : > { %v6049_v58 = vpop.f32.mrf.mxu1 }
 0x504   : > { %6359 = vadd.xlane.f32.xlu1 %v13603_v52  ;;  %6361 = vadd.xlane.f32.xlu0 %v13606_v33  ;;  %v6196_v12 = vadd.f32 %v6049_v58, %v15065_v32  ;;  %v6426_v58 = vmul.f32 0.0078125, %v6302_v59  ;;  %v6304_v32 = vpop.xlane.xlu1 %6303 }
 0x505   : > { %v6051_v57 = vpop.f32.mrf.mxu1 }
 0x506   : > { %v13617_v5 = vadd.f32 %v13408_v48, %v6196_v12  ;;  %v15071_v57 = vld [vmem:[#allocation70_spill] sm:$0xff] }
 0x507   : > { %v6052_v20 = vpop.f32.mrf.mxu1 }
 0x508   : > { %6363 = vadd.xlane.f32.xlu1 %v13612_v46  ;;  %v6197_v17 = vadd.f32 %v6052_v20, %v15066_v35  ;;  %6365 = vadd.xlane.f32.xlu0 %v13617_v5 }
 0x509   : > { %v6054_v7 = vpop.f32.mrf.mxu1 }
 0x50a   : > { %v13622_v9 = vadd.f32 %v13408_v48, %v6197_v17  ;;  %v13637_v17 = vsub.f32 %v13036_v14, %v6426_v58  ;;  %v6427_v7 = vmul.f32 0.0078125, %v6304_v32 }
 0x50c   : > { %6367 = vadd.xlane.f32.xlu1 %v13622_v9  ;;  %15072 = vst [vmem:[#allocation79_spill] sm:$0xff] %v13637_v17  ;;  %v6554_v14 = vmul.f32 %v13637_v17, %v13637_v17 }
 0x50f   : > { %v6057_v61 = vpop.f32.mrf.mxu1 }
 0x510   : > { %v6198_v0 = vadd.f32 %v6057_v61, %v15067_v26 }
 0x511   : > { %v6059_v50 = vpop.f32.mrf.mxu1 }
 0x512   : > { %v13627_v11 = vadd.f32 %v13408_v48, %v6198_v0  ;;  %v15074_v0 = vld [vmem:[#allocation78_spill] sm:$0xff] }
 0x513   : > { %v6060_v56 = vpop.f32.mrf.mxu1 }
 0x514   : > { %15068 = vst [vmem:[#allocation89_spill] sm:$0xff] %v13627_v11  ;;  %v6199_v55 = vadd.f32 %v6060_v56, %v15069_v3  ;;  %6369 = vadd.xlane.f32.xlu0 %v13627_v11  ;;  %v13645_v3 = vsub.f32 %v13042_v8, %v6427_v7 }
 0x515   : > { %v6062_v63 = vpop.f32.mrf.mxu1 }
 0x516   : > { %v13632_v22 = vadd.f32 %v13408_v48, %v6199_v55  ;;  %15075 = vst [vmem:[#allocation12_spill] sm:$0xff] %v13645_v3  ;;  %v6555_v59 = vmul.f32 %v13645_v3, %v13645_v3 }
 0x518   : > { %15070 = vst [vmem:[#allocation107_spill] sm:$0xff] %v13632_v22  ;;  %6371 = vadd.xlane.f32.xlu1 %v13632_v22 }
 0x51e   : > { %v6065_v12 = vpop.f32.mrf.mxu1 }
 0x51f   : > { %v6200_v20 = vadd.f32 %v6065_v12, %v15071_v57 }
 0x520   : > { %v6067_v35 = vpop.f32.mrf.mxu1 }
 0x521   : > { %v13640_v61 = vadd.f32 %v13408_v48, %v6200_v20 }
 0x522   : > { %v6068_v26 = vpop.f32.mrf.mxu1 }
 0x523   : > { %15073 = vst [vmem:[#allocation87_spill] sm:$0xff] %v13640_v61  ;;  %v6201_v50 = vadd.f32 %v6068_v26, %v15074_v0  ;;  %6373 = vadd.xlane.f32.xlu0 %v13640_v61  ;;  %v15078_v61 = vld [vmem:[#allocation93_spill] sm:$0xff] }
 0x524   : > { %v6070_v56 = vpop.f32.mrf.mxu1 }
 0x525   : > { %v13648_v55 = vadd.f32 %v13408_v48, %v6201_v50  ;;  %v6306_v56 = vpop.xlane.xlu0 %6305 }
 0x527   : > { %15076 = vst [vmem:[#allocation85_spill] sm:$0xff] %v13648_v55  ;;  %6622 = vadd.xlane.f32.xlu0 %v6554_v14  ;;  %6375 = vadd.xlane.f32.xlu1 %v13648_v55 }
 0x529   : > { %v6073_v63 = vpop.f32.mrf.mxu1 }
 0x52b   : > { %v6075_v58 = vpop.f32.mrf.mxu1  ;;  %6624 = vadd.xlane.f32.xlu1 %v6555_v59  ;;  %v6428_v59 = vmul.f32 0.0078125, %v6306_v56 }
 0x52d   : > { %v6076_v32 = vpop.f32.mrf.mxu1 }
 0x52f   : > { %v6078_v12 = vpop.f32.mrf.mxu1 }
 0x530   : > { %v6202_v12 = vadd.f32 %v6073_v63, %v15078_v61 }
 0x532   : > { %v13675_v61 = vadd.f32 %v13408_v48, %v6202_v12 }
 0x539   : > { %v6081_v57 = vpop.f32.mrf.mxu1 }
 0x53b   : > { %v6083_v8 = vpop.f32.mrf.mxu1 }
 0x53d   : > { %v6084_v20 = vpop.f32.mrf.mxu1 }
 0x53f   : > { %v6086_v35 = vpop.f32.mrf.mxu1 }
 0x541   : > { %v6089_v7 = vpop.f32.mrf.mxu1 }
 0x543   : > { %v6091_v26 = vpop.f32.mrf.mxu1 }
 0x545   : > { %v13655_v0 = vpop.f32.mrf.mxu1 }
 0x547   : > { %v6094_v50 = vpop.f32.mrf.mxu1 }
 0x54d   : > { %v6294_v14 = vpop.xlane.xlu1 %6293 }
 0x54e   : > { %v6422_v55 = vmul.f32 0.0078125, %v6294_v14  ;;  %v13666_v26 = vpop.f32.mrf.mxu1  ;;  %v15080_v14 = vld [vmem:[#allocation102_spill] sm:$0xff] }
 0x54f   : > { %v6203_v11 = vadd.f32 %v6076_v32, %v15080_v14 }
 0x550   : > { %v13658_v17 = vsub.f32 %v13411_v37, %v6422_v55  ;;  %v13672_v55 = vsub.f32 %v13059_v1, %v6428_v59  ;;  %v6099_v63 = vpop.f32.mrf.mxu1 }
 0x551   : > { %v6296_v3 = vpop.xlane.xlu0 %6295  ;;  %v6308_v22 = vpop.xlane.xlu1 %6307  ;;  %v13681_v32 = vadd.f32 %v13408_v48, %v6203_v11  ;;  %v15083_v63 = vld [vmem:[#allocation100_spill] sm:$0xff] }
 0x552   : > { %15077 = vst [vmem:[#allocation13_spill] sm:$0xff] %v13658_v17  ;;  %v6423_v58 = vmul.f32 0.0078125, %v6296_v3  ;;  %v6550_v8 = vmul.f32 %v13658_v17, %v13658_v17  ;;  %v6429_v37 = vmul.f32 0.0078125, %v6308_v22  ;;  %15081 = vst [vmem:[#allocation88_spill] sm:$0xff] %v13672_v55 }
 0x553   : > { %15082 = vst [vmem:[#allocation94_spill] sm:$0xff] %v13681_v32 }
 0x554   : > { %v13664_v35 = vsub.f32 %v13422_v54, %v6423_v58  ;;  %6614 = vadd.xlane.f32.xlu0 %v6550_v8  ;;  %v13677_v54 = vpop.f32.mrf.mxu1  ;;  %v13684_v22 = vsub.f32 %v13419_v40, %v6429_v37 }
 0x555   : > { %v6298_v50 = vpop.xlane.xlu0 %6297 }
 0x556   : > { %15079 = vst [vmem:[#allocation92_spill] sm:$0xff] %v13664_v35  ;;  %v6551_v3 = vmul.f32 %v13664_v35, %v13664_v35  ;;  %v6424_v56 = vmul.f32 0.0078125, %v6298_v50  ;;  %v6102_v12 = vpop.f32.mrf.mxu1  ;;  %v6556_v50 = vmul.f32 %v13672_v55, %v13672_v55  ;;  %v6557_v37 = vmul.f32 %v13684_v22, %v13684_v22 }
 0x558   : > { %6616 = vadd.xlane.f32.xlu1 %v6551_v3  ;;  %6377 = vadd.xlane.f32.xlu0 %v13675_v61  ;;  %v13687_v59 = vsub.f32 %v13433_v16, %v6424_v56  ;;  %v13692_v14 = vpop.f32.mrf.mxu1  ;;  %v6204_v16 = vadd.f32 %v6081_v57, %v15083_v63 }
 0x559   : > { %v6300_v58 = vpop.xlane.xlu1 %6299  ;;  %v6310_v1 = vpop.xlane.xlu0 %6309 }
 0x55a   : > { %v6425_v8 = vmul.f32 0.0078125, %v6300_v58  ;;  %v6430_v56 = vmul.f32 0.0078125, %v6310_v1  ;;  %v6107_v58 = vpop.f32.mrf.mxu1  ;;  %v6552_v12 = vmul.f32 %v13687_v59, %v13687_v59 }
 0x55c   : > { %6379 = vadd.xlane.f32.xlu1 %v13681_v32  ;;  %6626 = vadd.xlane.f32.xlu0 %v6556_v50  ;;  %v13695_v11 = vsub.f32 %v13447_v6, %v6425_v8  ;;  %v6108_v55 = vpop.f32.mrf.mxu1  ;;  %v15084_v50 = vld [vmem:[#allocation50_spill] sm:$0xff]  ;;  %v13706_v8 = vadd.f32 %v13408_v48, %v6204_v16  ;;  %v13709_v57 = vsub.f32 %v13440_v2, %v6430_v56 }
 0x55d   : > { %v6312_v3 = vpop.xlane.xlu1 %6311  ;;  %v6314_v40 = vpop.xlane.xlu0 %6313  ;;  %v6205_v17 = vadd.f32 %v6084_v20, %v15084_v50 }
 0x55e   : > { %v6431_v32 = vmul.f32 0.0078125, %v6312_v3  ;;  %v6553_v6 = vmul.f32 %v13695_v11, %v13695_v11  ;;  %15085 = vst [vmem:[#allocation95_spill] sm:$0xff] %v13709_v57  ;;  %v6110_v1 = vpop.f32.mrf.mxu1  ;;  %v15087_v3 = vld [vmem:[#allocation104_spill] sm:$0xff]  ;;  %v6558_v16 = vmul.f32 %v13709_v57, %v13709_v57 }
 0x55f   : > { %v6206_v58 = vadd.f32 %v6089_v7, %v15087_v3 }
 0x560   : > { %6628 = vadd.xlane.f32.xlu1 %v6557_v37  ;;  %6618 = vadd.xlane.f32.xlu0 %v6552_v12  ;;  %v13713_v37 = vadd.f32 %v13408_v48, %v6205_v17  ;;  %v13716_v20 = vsub.f32 %v13454_v60, %v6431_v32  ;;  %v6432_v12 = vmul.f32 0.0078125, %v6314_v40 }
 0x561   : > { %v6316_v35 = vpop.xlane.xlu1 %6315  ;;  %v6318_v63 = vpop.xlane.xlu0 %6317  ;;  %v13727_v32 = vadd.f32 %v13408_v48, %v6206_v58 }
 0x562   : > { %15086 = vst [vmem:[#allocation98_spill] sm:$0xff] %v13716_v20  ;;  %v6433_v17 = vmul.f32 0.0078125, %v6316_v35  ;;  %v6559_v60 = vmul.f32 %v13716_v20, %v13716_v20  ;;  %v13730_v7 = vsub.f32 %v13460_v25, %v6432_v12  ;;  %v6208_v35 = vadd.f32 %v13666_v26, %v12349_v44 }
 0x563   : > { %v6113_v56 = vpop.f32.mrf.mxu1  ;;  %v6434_v58 = vmul.f32 0.0078125, %v6318_v63 }
 0x564   : > { %6620 = vadd.xlane.f32.xlu1 %v6553_v6  ;;  %6381 = vadd.xlane.f32.xlu0 %v13706_v8  ;;  %v15088_v6 = vld [vmem:[#allocation57_spill] sm:$0xff]  ;;  %v6560_v25 = vmul.f32 %v13730_v7, %v13730_v7 }
 0x565   : > { %v6320_v50 = vpop.xlane.xlu1 %6319  ;;  %v6322_v2 = vpop.xlane.xlu0 %6321  ;;  %v6207_v1 = vadd.f32 %v13655_v0, %v15088_v6  ;;  %v13737_v0 = vsub.f32 %v13472_v42, %v6433_v17  ;;  %v13749_v17 = vadd.f32 %v13408_v48, %v6208_v35  ;;  %v13752_v44 = vsub.f32 %v13475_v34, %v6434_v58 }
 0x566   : > { %v6115_v40 = vpop.f32.mrf.mxu1 }
 0x567   : > { %v6561_v42 = vmul.f32 %v13737_v0, %v13737_v0  ;;  %v6562_v34 = vmul.f32 %v13752_v44, %v13752_v44 }
 0x568   : > { %6383 = vadd.xlane.f32.xlu1 %v13713_v37  ;;  %6630 = vadd.xlane.f32.xlu0 %v6558_v16  ;;  %v6116_v57 = vpop.f32.mrf.mxu1  ;;  %v13734_v16 = vadd.f32 %v13408_v48, %v6207_v1  ;;  %v6209_v1 = vadd.f32 %v13677_v54, %v12358_v21  ;;  %v6210_v54 = vadd.f32 %v13692_v14, %v12382_v18 }
 0x569   : > { %v6324_v3 = vpop.xlane.xlu1 %6323  ;;  %v6326_v6 = vpop.xlane.xlu0 %6325 }
 0x56a   : > { %v6118_v20 = vpop.f32.mrf.mxu1 }
 0x56c   : > { %6632 = vadd.xlane.f32.xlu1 %v6559_v60  ;;  %6385 = vadd.xlane.f32.xlu0 %v13727_v32  ;;  %v6121_v12 = vpop.f32.mrf.mxu1  ;;  %v6435_v60 = vmul.f32 0.0078125, %v6320_v50  ;;  %v6436_v50 = vmul.f32 0.0078125, %v6322_v2 }
 0x56d   : > { %v6328_v26 = vpop.xlane.xlu1 %6327  ;;  %v6330_v20 = vpop.xlane.xlu0 %6329 }
 0x56e   : > { %v6123_v63 = vpop.f32.mrf.mxu1  ;;  %v13759_v21 = vsub.f32 %v13488_v41, %v6435_v60  ;;  %v13770_v41 = vadd.f32 %v13408_v48, %v6210_v54  ;;  %v13773_v18 = vsub.f32 %v13491_v27, %v6436_v50 }
 0x56f   : > { %v6437_v63 = vmul.f32 0.0078125, %v6324_v3  ;;  %v6438_v3 = vmul.f32 0.0078125, %v6326_v6 }
 0x570   : > { %6387 = vadd.xlane.f32.xlu1 %v13734_v16  ;;  %6634 = vadd.xlane.f32.xlu0 %v6560_v25  ;;  %v6124_v40 = vpop.f32.mrf.mxu1  ;;  %v13756_v25 = vadd.f32 %v13408_v48, %v6209_v1  ;;  %15089 = vst [vmem:[#allocation101_spill] sm:$0xff] %v13759_v21  ;;  %v6563_v1 = vmul.f32 %v13759_v21, %v13759_v21  ;;  %15090 = vst [vmem:[#allocation99_spill] sm:$0xff] %v13773_v18 }
 0x571   : > { %v6332_v58 = vpop.xlane.xlu1 %6331  ;;  %v6334_v14 = vpop.xlane.xlu0 %6333  ;;  %v13780_v60 = vsub.f32 %v13499_v62, %v6437_v63  ;;  %v6564_v54 = vmul.f32 %v13773_v18, %v13773_v18 }
 0x572   : > { %v6126_v35 = vpop.f32.mrf.mxu1 }
 0x573   : > { %15091 = vst [vmem:[#allocation103_spill] sm:$0xff] %v13780_v60  ;;  %v6565_v62 = vmul.f32 %v13780_v60, %v13780_v60 }
 0x574   : > { %6636 = vadd.xlane.f32.xlu1 %v6561_v42  ;;  %6389 = vadd.xlane.f32.xlu0 %v13749_v17  ;;  %v6211_v42 = vadd.f32 %v6108_v55, %v12404_v30  ;;  %v6212_v55 = vadd.f32 %v6113_v56, %v12431_v19  ;;  %v13793_v19 = vsub.f32 %v13504_v53, %v6438_v3  ;;  %v6441_v53 = vmul.f32 0.0078125, %v6332_v58  ;;  %v15096_v3 = vld [vmem:[#allocation14_spill] sm:$0xff] }
 0x575   : > { %v6336_v35 = vpop.xlane.xlu1 %6335  ;;  %v6338_v50 = vpop.xlane.xlu0 %6337 }
 0x576   : > { %v13777_v2 = vadd.f32 %v13408_v48, %v6211_v42  ;;  %v6439_v42 = vmul.f32 0.0078125, %v6328_v26  ;;  %v13790_v63 = vadd.f32 %v13408_v48, %v6212_v55  ;;  %15093 = vst [vmem:[#allocation22_spill] sm:$0xff] %v13793_v19  ;;  %v6440_v26 = vmul.f32 0.0078125, %v6330_v20 }
 0x577   : > { %v6566_v55 = vmul.f32 %v13793_v19, %v13793_v19  ;;  %v13819_v58 = vsub.f32 %v13526_v47, %v6441_v53  ;;  %v15098_v19 = vld [vmem:[#allocation64_spill] sm:$0xff] }
 0x578   : > { %6391 = vadd.xlane.f32.xlu1 %v13756_v25  ;;  %6638 = vadd.xlane.f32.xlu0 %v6562_v34  ;;  %v6129_v30 = vpop.f32.mrf.mxu1  ;;  %v15092_v34 = vld [vmem:[#allocation51_spill] sm:$0xff] }
 0x579   : > { %v6340_v6 = vpop.xlane.xlu1 %6339  ;;  %v6342_v60 = vpop.xlane.xlu0 %6341  ;;  %v6569_v47 = vmul.f32 %v13819_v58, %v13819_v58 }
 0x57a   : > { %v6131_v27 = vpop.f32.mrf.mxu1 }
 0x57b   : > { %v15095_v27 = vld [vmem:[#allocation54_spill] sm:$0xff] }
 0x57c   : > { %6640 = vadd.xlane.f32.xlu1 %v6563_v1  ;;  %6393 = vadd.xlane.f32.xlu0 %v13770_v41  ;;  %v6213_v1 = vadd.f32 %v6116_v57, %v15092_v34  ;;  %v6132_v21 = vpop.f32.mrf.mxu1  ;;  %v13800_v57 = vsub.f32 %v13514_v49, %v6439_v42  ;;  %v6214_v34 = vadd.f32 %v6121_v12, %v15095_v27 }
 0x57d   : > { %v6344_v12 = vpop.xlane.xlu1 %6343  ;;  %v13815_v42 = vpop.xlane.xlu0 %6345  ;;  %v6217_v18 = vadd.f32 %v6132_v21, %v15098_v19  ;;  %v6444_v21 = vmul.f32 0.0078125, %v6338_v50 }
 0x57e   : > { %v6134_v56 = vpop.f32.mrf.mxu1  ;;  %15094 = vst [vmem:[#allocation80_spill] sm:$0xff] %v13800_v57  ;;  %v13813_v49 = vadd.f32 %v13408_v48, %v6214_v34 }
 0x57f   : > { %v13810_v56 = vsub.f32 %v13517_v45, %v6440_v26  ;;  %v15097_v45 = vld [vmem:[#allocation58_spill] sm:$0xff]  ;;  %v13852_v50 = vsub.f32 %v13541_v36, %v6444_v21 }
 0x580   : > { %6395 = vadd.xlane.f32.xlu1 %v13777_v2  ;;  %6642 = vadd.xlane.f32.xlu0 %v6564_v54  ;;  %v13797_v54 = vadd.f32 %v13408_v48, %v6213_v1  ;;  %v6567_v1 = vmul.f32 %v13800_v57, %v13800_v57  ;;  %v6216_v26 = vadd.f32 %v6129_v30, %v15097_v45 }
 0x581   : > { %v6568_v34 = vmul.f32 %v13810_v56, %v13810_v56  ;;  %v6350_v30 = vpop.xlane.xlu0 %6349  ;;  %15102 = vst [vmem:[#allocation18_spill] sm:$0xff] %v13852_v50  ;;  %v6572_v21 = vmul.f32 %v13852_v50, %v13852_v50 }
 0x584   : > { %6644 = vadd.xlane.f32.xlu1 %v6565_v62  ;;  %6397 = vadd.xlane.f32.xlu0 %v13790_v63  ;;  %v6215_v62 = vadd.f32 %v6124_v40, %v15096_v3 }
 0x585   : > { %v6137_v20 = vpop.f32.mrf.mxu1 }
 0x586   : > { %v13822_v40 = vadd.f32 %v13408_v48, %v6215_v62 }
 0x587   : > { %v6139_v27 = vpop.f32.mrf.mxu1 }
 0x588   : > { %6399 = vadd.xlane.f32.xlu1 %v13797_v54  ;;  %6646 = vadd.xlane.f32.xlu0 %v6566_v55  ;;  %v6442_v55 = vmul.f32 0.0078125, %v6334_v14  ;;  %v6443_v27 = vmul.f32 0.0078125, %v6336_v35  ;;  %v13835_v14 = vadd.f32 %v13408_v48, %v6216_v26  ;;  %v13842_v35 = vadd.f32 %v13408_v48, %v6217_v18 }
 0x589   : > { %v6140_v3 = vpop.f32.mrf.mxu1 }
 0x58a   : > { %v13832_v53 = vsub.f32 %v13529_v15, %v6442_v55  ;;  %v13839_v62 = vsub.f32 %v13538_v39, %v6443_v27  ;;  %v6354_v55 = vpop.xlane.xlu0 %6353 }
 0x58b   : > { %v6142_v57 = vpop.f32.mrf.mxu1 }
 0x58c   : > { %6648 = vadd.xlane.f32.xlu1 %v6567_v1  ;;  %6401 = vadd.xlane.f32.xlu0 %v13813_v49  ;;  %v6348_v1 = vpop.xlane.xlu1 %6347  ;;  %15099 = vst [vmem:[#allocation15_spill] sm:$0xff] %v13832_v53  ;;  %15100 = vst [vmem:[#allocation16_spill] sm:$0xff] %v13839_v62  ;;  %v6218_v57 = vadd.f32 %v6137_v20, %v12627_v31  ;;  %v6570_v15 = vmul.f32 %v13832_v53, %v13832_v53 }
 0x58d   : > { %v6571_v18 = vmul.f32 %v13839_v62, %v13839_v62  ;;  %v6449_v50 = vmul.f32 0.0078125, %v6348_v1 }
 0x58e   : > { %v13855_v31 = vadd.f32 %v13408_v48, %v6218_v57  ;;  %v6447_v57 = vmul.f32 0.0078125, %v6344_v12 }
 0x590   : > { %6403 = vadd.xlane.f32.xlu1 %v13822_v40  ;;  %6650 = vadd.xlane.f32.xlu0 %v6568_v34  ;;  %v6352_v19 = vpop.xlane.xlu1 %6351  ;;  %v6445_v34 = vmul.f32 0.0078125, %v6340_v6  ;;  %v13879_v12 = vsub.f32 %v13562_v10, %v6447_v57  ;;  %v15108_v10 = vld [vmem:[#allocation77_spill] sm:$0xff] }
 0x591   : > { %v6451_v1 = vmul.f32 0.0078125, %v6352_v19 }
 0x594   : > { %6652 = vadd.xlane.f32.xlu1 %v6569_v47  ;;  %6405 = vadd.xlane.f32.xlu0 %v13835_v14  ;;  %v15101_v47 = vld [vmem:[#allocation71_spill] sm:$0xff]  ;;  %v6356_v27 = vpop.xlane.xlu1 %6355 }
 0x595   : > { %v6145_v45 = vpop.f32.mrf.mxu1  ;;  %v6219_v39 = vadd.f32 %v6140_v3, %v15101_v47  ;;  %v6446_v3 = vmul.f32 0.0078125, %v6342_v60  ;;  %v15104_v47 = vld [vmem:[#allocation67_spill] sm:$0xff] }
 0x596   : > { %v6220_v36 = vadd.f32 %v6145_v45, %v15104_v47 }
 0x597   : > { %v6147_v26 = vpop.f32.mrf.mxu1  ;;  %v13862_v6 = vadd.f32 %v13408_v48, %v6219_v39 }
 0x598   : > { %6407 = vadd.xlane.f32.xlu1 %v13842_v35  ;;  %6654 = vadd.xlane.f32.xlu0 %v6570_v15  ;;  %v13859_v15 = vsub.f32 %v13550_v24, %v6445_v34  ;;  %v6358_v26 = vpop.xlane.xlu0 %6357  ;;  %v13872_v34 = vsub.f32 %v13553_v29, %v6446_v3  ;;  %v6360_v60 = vpop.xlane.xlu1 %6359  ;;  %v13875_v39 = vadd.f32 %v13408_v48, %v6220_v36  ;;  %v15107_v29 = vld [vmem:[#allocation11_spill] sm:$0xff] }
 0x599   : > { %v6148_v20 = vpop.f32.mrf.mxu1 }
 0x59a   : > { %15103 = vst [vmem:[#allocation19_spill] sm:$0xff] %v13859_v15  ;;  %v6573_v24 = vmul.f32 %v13859_v15, %v13859_v15  ;;  %15106 = vst [vmem:[#allocation76_spill] sm:$0xff] %v13875_v39  ;;  %v6574_v36 = vmul.f32 %v13872_v34, %v13872_v34 }
 0x59b   : > { %v6150_v53 = vpop.f32.mrf.mxu1 }
 0x59c   : > { %6656 = vadd.xlane.f32.xlu1 %v6571_v18  ;;  %6409 = vadd.xlane.f32.xlu0 %v13855_v31  ;;  %v15105_v18 = vld [vmem:[#allocation69_spill] sm:$0xff]  ;;  %v6362_v47 = vpop.xlane.xlu0 %6361 }
 0x59d   : > { %v6221_v62 = vadd.f32 %v6148_v20, %v15105_v18  ;;  %v6448_v18 = vmul.f32 0.0078125, %v13815_v42  ;;  %v6450_v42 = vmul.f32 0.0078125, %v6350_v30 }
 0x59e   : > { %v6153_v53 = vpop.f32.mrf.mxu1 }
 0x59f   : > { %v13882_v20 = vadd.f32 %v13408_v48, %v6221_v62  ;;  %v6222_v3 = vadd.f32 %v6153_v53, %v15107_v29  ;;  %v6575_v62 = vmul.f32 %v13879_v12, %v13879_v12 }
 0x5a0   : > { %6411 = vadd.xlane.f32.xlu1 %v13862_v6  ;;  %6658 = vadd.xlane.f32.xlu0 %v6572_v21  ;;  %v6155_v45 = vpop.f32.mrf.mxu1 }
 0x5a1   : > { %v6366_v45 = vpop.xlane.xlu0 %6365  ;;  %v13896_v53 = vadd.f32 %v13408_v48, %v6222_v3 }
 0x5a2   : > { %v6156_v21 = vpop.f32.mrf.mxu1 }
 0x5a3   : > { %v6223_v57 = vadd.f32 %v6156_v21, %v15108_v10  ;;  %v13906_v10 = vsub.f32 %v13576_v4, %v6450_v42  ;;  %v6454_v4 = vmul.f32 0.0078125, %v6358_v26  ;;  %v6455_v42 = vmul.f32 0.0078125, %v6360_v60 }
 0x5a4   : > { %6660 = vadd.xlane.f32.xlu1 %v6573_v24  ;;  %6413 = vadd.xlane.f32.xlu0 %v13875_v39  ;;  %v6158_v15 = vpop.f32.mrf.mxu1  ;;  %v6364_v24 = vpop.xlane.xlu1 %6363  ;;  %v13893_v39 = vsub.f32 %v13565_v43, %v6448_v18  ;;  %v6452_v43 = vmul.f32 0.0078125, %v6354_v55  ;;  %v6453_v18 = vmul.f32 0.0078125, %v6356_v27 }
 0x5a5   : > { %v6370_v29 = vpop.xlane.xlu0 %6369  ;;  %v13903_v21 = vadd.f32 %v13408_v48, %v6223_v57  ;;  %v6578_v55 = vmul.f32 %v13906_v10, %v13906_v10  ;;  %v13934_v60 = vsub.f32 %v13603_v52, %v6455_v42 }
 0x5a6   : > { %v6576_v30 = vmul.f32 %v13893_v39, %v13893_v39  ;;  %v13917_v19 = vsub.f32 %v13586_v51, %v6452_v43  ;;  %v6456_v51 = vmul.f32 0.0078125, %v6362_v47  ;;  %v6458_v47 = vmul.f32 0.0078125, %v6366_v45 }
 0x5a7   : > { %v6583_v52 = vmul.f32 %v13934_v60, %v13934_v60 }
 0x5a8   : > { %6415 = vadd.xlane.f32.xlu1 %v13882_v20  ;;  %6662 = vadd.xlane.f32.xlu0 %v6574_v36  ;;  %v6368_v15 = vpop.xlane.xlu1 %6367  ;;  %v13900_v36 = vsub.f32 %v13573_v28, %v6449_v50  ;;  %v13912_v28 = vsub.f32 %v13583_v23, %v6451_v1  ;;  %v13922_v50 = vsub.f32 %v13593_v38, %v6453_v18  ;;  %v6457_v18 = vmul.f32 0.0078125, %v6364_v24 }
 0x5a9   : > { %v6580_v26 = vmul.f32 %v13917_v19, %v13917_v19  ;;  %v13947_v24 = vsub.f32 %v13617_v5, %v6458_v47 }
 0x5aa   : > { %v6577_v48 = vmul.f32 %v13900_v36, %v13900_v36  ;;  %v6579_v1 = vmul.f32 %v13912_v28, %v13912_v28  ;;  %v6581_v38 = vmul.f32 %v13922_v50, %v13922_v50 }
 0x5ab   : > { %v6586_v5 = vmul.f32 %v13947_v24, %v13947_v24 }
 0x5ac   : > { %6664 = vadd.xlane.f32.xlu1 %v6575_v62  ;;  %6417 = vadd.xlane.f32.xlu0 %v13896_v53  ;;  %v6372_v3 = vpop.xlane.xlu1 %6371  ;;  %v6374_v62 = vpop.xlane.xlu0 %6373 }
 0x5b0   : > { %6419 = vadd.xlane.f32.xlu1 %v13903_v21  ;;  %6666 = vadd.xlane.f32.xlu0 %v6576_v30  ;;  %v6623_v27 = vpop.xlane.xlu0 %6622  ;;  %v6376_v57 = vpop.xlane.xlu1 %6375  ;;  %v13927_v30 = vsub.f32 %v13596_v13, %v6454_v4  ;;  %v13937_v13 = vsub.f32 %v13606_v33, %v6456_v51  ;;  %v6460_v33 = vmul.f32 0.0078125, %v6370_v29  ;;  %v15109_v51 = vld [vmem:[#allocation89_spill] sm:$0xff]  ;;  %v15110_v29 = vld [vmem:[#allocation107_spill] sm:$0xff] }
 0x5b1   : > { %v6746_v23 = vmul.f32 0.0078125, %v6623_v27 }
 0x5b2   : > { %v6582_v4 = vmul.f32 %v13927_v30, %v13927_v30  ;;  %v6584_v45 = vmul.f32 %v13937_v13, %v13937_v13 }
 0x5b3   : > { %v6810_v43 = vadd.f32 1e-05, %v6746_v23  ;;  %v13942_v23 = vsub.f32 %v13612_v46, %v6457_v18  ;;  %v6461_v46 = vmul.f32 0.0078125, %v6372_v3  ;;  %v15111_v18 = vld [vmem:[#allocation87_spill] sm:$0xff] }
 0x5b4   : > { %6668 = vadd.xlane.f32.xlu1 %v6577_v48  ;;  %6670 = vadd.xlane.f32.xlu0 %v6578_v55  ;;  %v6625_v48 = vpop.xlane.xlu1 %6624 }
 0x5b5   : > { %8255 = vrsqrt.f32 %v6810_v43  ;;  %v6747_v55 = vmul.f32 0.0078125, %v6625_v48  ;;  %v6462_v43 = vmul.f32 0.0078125, %v6374_v62  ;;  %v13963_v48 = vsub.f32 %v15110_v29, %v6461_v46  ;;  %v13973_v62 = vld [vmem:[%s14442_s8] ss:$0 sm:$0xff] }
 0x5b7   : > { %v6811_v27 = vadd.f32 1e-05, %v6747_v55  ;;  %v13968_v55 = vsub.f32 %v15111_v18, %v6462_v43  ;;  %v15115_v43 = vld [vmem:[#allocation12_spill] sm:$0xff] }
 0x5b8   : > { %6672 = vadd.xlane.f32.xlu1 %v6579_v1  ;;  %6674 = vadd.xlane.f32.xlu0 %v6580_v26  ;;  %v6459_v1 = vmul.f32 0.0078125, %v6368_v15  ;;  %v6585_v15 = vmul.f32 %v13942_v23, %v13942_v23  ;;  %v13957_v26 = vsub.f32 %v15109_v51, %v6460_v33 }
 0x5b9   : > { %8257 = vrsqrt.f32 %v6811_v27 }
 0x5ba   : > { %v13952_v42 = vsub.f32 %v13622_v9, %v6459_v1  ;;  %v6463_v9 = vmul.f32 0.0078125, %v6376_v57  ;;  %v6588_v47 = vmul.f32 %v13957_v26, %v13957_v26  ;;  %v13983_v57 = vld [vmem:[%s14443_s9] ss:$0 sm:$0xff] }
 0x5bc   : > { %6676 = vadd.xlane.f32.xlu1 %v6581_v38  ;;  %6678 = vadd.xlane.f32.xlu0 %v6582_v4  ;;  %v6587_v3 = vmul.f32 %v13952_v42, %v13952_v42  ;;  %v15112_v4 = vld [vmem:[#allocation79_spill] sm:$0xff] }
 0x5c0   : > { %6680 = vadd.xlane.f32.xlu1 %v6583_v52  ;;  %6682 = vadd.xlane.f32.xlu0 %v6584_v45  ;;  %v15113_v52 = vld [vmem:[#allocation85_spill] sm:$0xff]  ;;  %v6589_v45 = vmul.f32 %v13963_v48, %v13963_v48 }
 0x5c1   : > { %v13987_v33 = vsub.f32 %v15113_v52, %v6463_v9 }
 0x5c2   : > { %v8256_v38 = vpop.eup %8255 }
 0x5c3   : > { %v6938_v27 = vmul.f32 %v8256_v38, %v15112_v4  ;;  %15114 = vst [vmem:[#allocation90_spill] sm:$0xff] %v13987_v33  ;;  %v6591_v9 = vmul.f32 %v13987_v33, %v13987_v33 }
 0x5c4   : > { %6684 = vadd.xlane.f32.xlu1 %v6585_v15  ;;  %6686 = vadd.xlane.f32.xlu0 %v6586_v5  ;;  %v6590_v15 = vmul.f32 %v13968_v55, %v13968_v55 }
 0x5c5   : > { %v7009_v1 = vmul.f32 %v13973_v62, %v6938_v27 }
 0x5c6   : > { %v8258_v46 = vpop.eup %8257 }
 0x5c7   : > { %v7080_v51 = vadd.f32 %v13983_v57, %v7009_v1  ;;  %v6939_v5 = vmul.f32 %v8258_v46, %v15115_v43 }
 0x5c8   : > { %6688 = vadd.xlane.f32.xlu1 %v6587_v3  ;;  %6690 = vadd.xlane.f32.xlu0 %v6588_v47 }
 0x5c9   : > { %7144 = vst [vmem:[%s13995_s24 + $0x20] sm:$0xff] %v7080_v51  ;;  %v7010_v29 = vmul.f32 %v13973_v62, %v6939_v5 }
 0x5cb   : > { %v7081_v3 = vadd.f32 %v13983_v57, %v7010_v29 }
 0x5cc   : > { %6692 = vadd.xlane.f32.xlu1 %v6589_v45  ;;  %6694 = vadd.xlane.f32.xlu0 %v6590_v15 }
 0x5cd   : > { %7145 = vst [vmem:[%s13995_s24 + $0x28] sm:$0xff] %v7081_v3 }
 0x5d0   : > { %6696 = vadd.xlane.f32.xlu1 %v6591_v9  ;;  %v15117_v9 = vld [vmem:[#allocation94_spill] sm:$0xff] }
 0x5dd   : > { %v6615_v38 = vpop.xlane.xlu0 %6614 }
 0x5de   : > { %v6742_v18 = vmul.f32 0.0078125, %v6615_v38 }
 0x5e0   : > { %v6806_v47 = vadd.f32 1e-05, %v6742_v18 }
 0x5e1   : > { %v6617_v4 = vpop.xlane.xlu1 %6616  ;;  %v6378_v1 = vpop.xlane.xlu0 %6377 }
 0x5e2   : > { %v6743_v27 = vmul.f32 0.0078125, %v6617_v4  ;;  %8259 = vrsqrt.f32 %v6806_v47  ;;  %v6464_v52 = vmul.f32 0.0078125, %v6378_v1 }
 0x5e4   : > { %v6807_v45 = vadd.f32 1e-05, %v6743_v27  ;;  %v14004_v46 = vsub.f32 %v13675_v61, %v6464_v52 }
 0x5e5   : > { %v6380_v15 = vpop.xlane.xlu1 %6379  ;;  %v6627_v51 = vpop.xlane.xlu0 %6626 }
 0x5e6   : > { %15116 = vst [vmem:[#allocation109_spill] sm:$0xff] %v14004_v46  ;;  %8261 = vrsqrt.f32 %v6807_v45  ;;  %v6465_v43 = vmul.f32 0.0078125, %v6380_v15  ;;  %v6748_v5 = vmul.f32 0.0078125, %v6627_v51  ;;  %v6592_v29 = vmul.f32 %v14004_v46, %v14004_v46 }
 0x5e8   : > { %v14009_v3 = vsub.f32 %v15117_v9, %v6465_v43  ;;  %v6812_v38 = vadd.f32 1e-05, %v6748_v5  ;;  %6698 = vadd.xlane.f32.xlu0 %v6592_v29  ;;  %v15118_v29 = vld [vmem:[#allocation13_spill] sm:$0xff] }
 0x5e9   : > { %v6629_v18 = vpop.xlane.xlu1 %6628  ;;  %v6619_v47 = vpop.xlane.xlu0 %6618 }
 0x5ea   : > { %v6749_v4 = vmul.f32 0.0078125, %v6629_v18  ;;  %v6593_v61 = vmul.f32 %v14009_v3, %v14009_v3  ;;  %8263 = vrsqrt.f32 %v6812_v38  ;;  %v6744_v27 = vmul.f32 0.0078125, %v6619_v47 }
 0x5ec   : > { %v6813_v1 = vadd.f32 1e-05, %v6749_v4  ;;  %6700 = vadd.xlane.f32.xlu1 %v6593_v61  ;;  %v6808_v52 = vadd.f32 1e-05, %v6744_v27 }
 0x5ed   : > { %v6621_v45 = vpop.xlane.xlu1 %6620  ;;  %v6382_v51 = vpop.xlane.xlu0 %6381 }
 0x5ee   : > { %8265 = vrsqrt.f32 %v6813_v1  ;;  %v6745_v15 = vmul.f32 0.0078125, %v6621_v45  ;;  %v6466_v43 = vmul.f32 0.0078125, %v6382_v51 }
 0x5ef   : > { %8267 = vrsqrt.f32 %v6808_v52  ;;  %v8260_v9 = vpop.eup %8259  ;;  %v15119_v52 = vld [vmem:[#allocation92_spill] sm:$0xff] }
 0x5f0   : > { %v6809_v5 = vadd.f32 1e-05, %v6745_v15  ;;  %v6934_v46 = vmul.f32 %v8260_v9, %v15118_v29  ;;  %v14015_v18 = vsub.f32 %v13706_v8, %v6466_v43 }
 0x5f1   : > { %v6384_v33 = vpop.xlane.xlu1 %6383  ;;  %v6631_v38 = vpop.xlane.xlu0 %6630 }
 0x5f2   : > { %8269 = vrsqrt.f32 %v6809_v5  ;;  %v6467_v47 = vmul.f32 0.0078125, %v6384_v33  ;;  %v7005_v61 = vmul.f32 %v13973_v62, %v6934_v46  ;;  %v6750_v27 = vmul.f32 0.0078125, %v6631_v38 }
 0x5f3   : > { %v8262_v4 = vpop.eup %8261  ;;  %v6594_v1 = vmul.f32 %v14015_v18, %v14015_v18 }
 0x5f4   : > { %v6935_v45 = vmul.f32 %v8262_v4, %v15119_v52  ;;  %v14022_v15 = vsub.f32 %v13713_v37, %v6467_v47  ;;  %v7076_v8 = vadd.f32 %v13983_v57, %v7005_v61  ;;  %v6814_v51 = vadd.f32 1e-05, %v6750_v27  ;;  %v15120_v4 = vld [vmem:[#allocation88_spill] sm:$0xff] }
 0x5f5   : > { %6702 = vadd.xlane.f32.xlu0 %v6594_v1  ;;  %v6633_v43 = vpop.xlane.xlu1 %6632  ;;  %v6386_v5 = vpop.xlane.xlu0 %6385 }
 0x5f6   : > { %v7006_v33 = vmul.f32 %v13973_v62, %v6935_v45  ;;  %v6751_v9 = vmul.f32 0.0078125, %v6633_v43  ;;  %v6595_v46 = vmul.f32 %v14022_v15, %v14022_v15  ;;  %7140 = vst [vmem:[%s13995_s24] sm:$0xff] %v7076_v8  ;;  %8271 = vrsqrt.f32 %v6814_v51 }
 0x5f7   : > { %v6468_v29 = vmul.f32 0.0078125, %v6386_v5  ;;  %v8264_v38 = vpop.eup %8263 }
 0x5f8   : > { %v7077_v37 = vadd.f32 %v13983_v57, %v7006_v33  ;;  %v6815_v47 = vadd.f32 1e-05, %v6751_v9  ;;  %6704 = vadd.xlane.f32.xlu1 %v6595_v46  ;;  %v6940_v61 = vmul.f32 %v8264_v38, %v15120_v4 }
 0x5f9   : > { %v14032_v27 = vsub.f32 %v13727_v32, %v6468_v29  ;;  %v6388_v1 = vpop.xlane.xlu1 %6387  ;;  %v6635_v52 = vpop.xlane.xlu0 %6634 }
 0x5fa   : > { %7141 = vst [vmem:[%s13995_s24 + $0x8] sm:$0xff] %v7077_v37  ;;  %8273 = vrsqrt.f32 %v6815_v47  ;;  %v6469_v45 = vmul.f32 0.0078125, %v6388_v1  ;;  %v7011_v8 = vmul.f32 %v13973_v62, %v6940_v61  ;;  %v6752_v51 = vmul.f32 0.0078125, %v6635_v52 }
 0x5fb   : > { %v8266_v43 = vpop.eup %8265  ;;  %v6596_v33 = vmul.f32 %v14032_v27, %v14032_v27 }
 0x5fc   : > { %v8268_v9 = vpop.eup %8267  ;;  %v6941_v5 = vmul.f32 %v8266_v43, %v13684_v22  ;;  %v14040_v46 = vsub.f32 %v13734_v16, %v6469_v45  ;;  %v7082_v32 = vadd.f32 %v13983_v57, %v7011_v8  ;;  %v6816_v38 = vadd.f32 1e-05, %v6752_v51 }
 0x5fd   : > { %v6936_v29 = vmul.f32 %v8268_v9, %v13687_v59  ;;  %6706 = vadd.xlane.f32.xlu0 %v6596_v33  ;;  %v6637_v37 = vpop.xlane.xlu1 %6636  ;;  %v6390_v61 = vpop.xlane.xlu0 %6389 }
 0x5fe   : > { %v7012_v47 = vmul.f32 %v13973_v62, %v6941_v5  ;;  %v6753_v4 = vmul.f32 0.0078125, %v6637_v37  ;;  %v6597_v1 = vmul.f32 %v14040_v46, %v14040_v46  ;;  %7146 = vst [vmem:[%s13995_s24 + $0x30] sm:$0xff] %v7082_v32  ;;  %8275 = vrsqrt.f32 %v6816_v38 }
 0x5ff   : > { %v8270_v52 = vpop.eup %8269  ;;  %v7007_v22 = vmul.f32 %v13973_v62, %v6936_v29  ;;  %v6470_v16 = vmul.f32 0.0078125, %v6390_v61 }
 0x600   : > { %v7083_v59 = vadd.f32 %v13983_v57, %v7012_v47  ;;  %v6937_v45 = vmul.f32 %v8270_v52, %v13695_v11  ;;  %v6817_v43 = vadd.f32 1e-05, %v6753_v4  ;;  %6708 = vadd.xlane.f32.xlu1 %v6597_v1 }
 0x601   : > { %v7078_v8 = vadd.f32 %v13983_v57, %v7007_v22  ;;  %v14053_v51 = vsub.f32 %v13749_v17, %v6470_v16  ;;  %v6392_v33 = vpop.xlane.xlu1 %6391  ;;  %v6639_v5 = vpop.xlane.xlu0 %6638  ;;  %v15121_v17 = vld [vmem:[#allocation95_spill] sm:$0xff] }
 0x602   : > { %7147 = vst [vmem:[%s13995_s24 + $0x38] sm:$0xff] %v7083_v59  ;;  %v7008_v9 = vmul.f32 %v13973_v62, %v6937_v45  ;;  %8277 = vrsqrt.f32 %v6817_v43  ;;  %v6471_v32 = vmul.f32 0.0078125, %v6392_v33  ;;  %v6754_v29 = vmul.f32 0.0078125, %v6639_v5 }
 0x603   : > { %7142 = vst [vmem:[%s13995_s24 + $0x10] sm:$0xff] %v7078_v8  ;;  %v6598_v11 = vmul.f32 %v14053_v51, %v14053_v51  ;;  %v8272_v38 = vpop.eup %8271  ;;  %v15122_v8 = vld [vmem:[#allocation98_spill] sm:$0xff] }
 0x604   : > { %v7079_v37 = vadd.f32 %v13983_v57, %v7008_v9  ;;  %v14062_v47 = vsub.f32 %v13756_v25, %v6471_v32  ;;  %v6942_v4 = vmul.f32 %v8272_v38, %v15121_v17  ;;  %v6818_v61 = vadd.f32 1e-05, %v6754_v29 }
 0x605   : > { %6710 = vadd.xlane.f32.xlu0 %v6598_v11  ;;  %v6641_v1 = vpop.xlane.xlu1 %6640  ;;  %v6394_v22 = vpop.xlane.xlu0 %6393 }
 0x606   : > { %7143 = vst [vmem:[%s13995_s24 + $0x18] sm:$0xff] %v7079_v37  ;;  %v6755_v52 = vmul.f32 0.0078125, %v6641_v1  ;;  %v6599_v16 = vmul.f32 %v14062_v47, %v14062_v47  ;;  %v7013_v45 = vmul.f32 %v13973_v62, %v6942_v4  ;;  %8279 = vrsqrt.f32 %v6818_v61 }
 0x607   : > { %v8274_v59 = vpop.eup %8273  ;;  %v6472_v43 = vmul.f32 0.0078125, %v6394_v22 }
 0x608   : > { %v6943_v25 = vmul.f32 %v8274_v59, %v15122_v8  ;;  %v6819_v33 = vadd.f32 1e-05, %v6755_v52  ;;  %6712 = vadd.xlane.f32.xlu1 %v6599_v16  ;;  %v7084_v9 = vadd.f32 %v13983_v57, %v7013_v45 }
 0x609   : > { %v14072_v5 = vsub.f32 %v13770_v41, %v6472_v43  ;;  %v6396_v32 = vpop.xlane.xlu1 %6395  ;;  %v6643_v11 = vpop.xlane.xlu0 %6642 }
 0x60a   : > { %v7014_v29 = vmul.f32 %v13973_v62, %v6943_v25  ;;  %8281 = vrsqrt.f32 %v6819_v33  ;;  %v6473_v38 = vmul.f32 0.0078125, %v6396_v32  ;;  %7148 = vst [vmem:[%s13995_s24 + $0x40] sm:$0xff] %v7084_v9  ;;  %v6756_v37 = vmul.f32 0.0078125, %v6643_v11 }
 0x60b   : > { %v6600_v17 = vmul.f32 %v14072_v5, %v14072_v5  ;;  %v8276_v4 = vpop.eup %8275 }
 0x60c   : > { %v7085_v61 = vadd.f32 %v13983_v57, %v7014_v29  ;;  %v14080_v1 = vsub.f32 %v13777_v2, %v6473_v38  ;;  %v6944_v41 = vmul.f32 %v8276_v4, %v13730_v7  ;;  %v6820_v52 = vadd.f32 1e-05, %v6756_v37 }
 0x60d   : > { %6714 = vadd.xlane.f32.xlu0 %v6600_v17  ;;  %v6645_v22 = vpop.xlane.xlu1 %6644  ;;  %v6398_v59 = vpop.xlane.xlu0 %6397 }
 0x60e   : > { %7149 = vst [vmem:[%s13995_s24 + $0x48] sm:$0xff] %v7085_v61  ;;  %v6757_v16 = vmul.f32 0.0078125, %v6645_v22  ;;  %v6601_v45 = vmul.f32 %v14080_v1, %v14080_v1  ;;  %v7015_v8 = vmul.f32 %v13973_v62, %v6944_v41  ;;  %8283 = vrsqrt.f32 %v6820_v52 }
 0x60f   : > { %v8278_v43 = vpop.eup %8277  ;;  %v6474_v25 = vmul.f32 0.0078125, %v6398_v59 }
 0x610   : > { %v6945_v2 = vmul.f32 %v8278_v43, %v13737_v0  ;;  %v6821_v33 = vadd.f32 1e-05, %v6757_v16  ;;  %6716 = vadd.xlane.f32.xlu1 %v6601_v45  ;;  %v7086_v7 = vadd.f32 %v13983_v57, %v7015_v8 }
 0x611   : > { %v14090_v9 = vsub.f32 %v13790_v63, %v6474_v25  ;;  %v6400_v32 = vpop.xlane.xlu1 %6399  ;;  %v6647_v11 = vpop.xlane.xlu0 %6646  ;;  %v15123_v25 = vld [vmem:[#allocation101_spill] sm:$0xff] }
 0x612   : > { %v7016_v29 = vmul.f32 %v13973_v62, %v6945_v2  ;;  %8285 = vrsqrt.f32 %v6821_v33  ;;  %v6475_v38 = vmul.f32 0.0078125, %v6400_v32  ;;  %7150 = vst [vmem:[%s13995_s24 + $0x50] sm:$0xff] %v7086_v7  ;;  %v6758_v37 = vmul.f32 0.0078125, %v6647_v11 }
 0x613   : > { %v6602_v17 = vmul.f32 %v14090_v9, %v14090_v9  ;;  %v8280_v0 = vpop.eup %8279 }
 0x614   : > { %v7087_v4 = vadd.f32 %v13983_v57, %v7016_v29  ;;  %v14098_v61 = vsub.f32 %v13797_v54, %v6475_v38  ;;  %v6946_v63 = vmul.f32 %v8280_v0, %v13752_v44  ;;  %v6822_v41 = vadd.f32 1e-05, %v6758_v37 }
 0x615   : > { %6718 = vadd.xlane.f32.xlu0 %v6602_v17  ;;  %v6649_v52 = vpop.xlane.xlu1 %6648  ;;  %v6402_v16 = vpop.xlane.xlu0 %6401 }
 0x616   : > { %7151 = vst [vmem:[%s13995_s24 + $0x58] sm:$0xff] %v7087_v4  ;;  %v6759_v22 = vmul.f32 0.0078125, %v6649_v52  ;;  %v6603_v59 = vmul.f32 %v14098_v61, %v14098_v61  ;;  %v7017_v43 = vmul.f32 %v13973_v62, %v6946_v63  ;;  %8287 = vrsqrt.f32 %v6822_v41 }
 0x617   : > { %v8282_v45 = vpop.eup %8281  ;;  %v6476_v8 = vmul.f32 0.0078125, %v6402_v16 }
 0x618   : > { %v6947_v54 = vmul.f32 %v8282_v45, %v15123_v25  ;;  %v6823_v2 = vadd.f32 1e-05, %v6759_v22  ;;  %6720 = vadd.xlane.f32.xlu1 %v6603_v59  ;;  %v7088_v44 = vadd.f32 %v13983_v57, %v7017_v43  ;;  %v15125_v25 = vld [vmem:[#allocation103_spill] sm:$0xff] }
 0x619   : > { %v14108_v33 = vsub.f32 %v13813_v49, %v6476_v8  ;;  %v6404_v7 = vpop.xlane.xlu1 %6403  ;;  %v6651_v29 = vpop.xlane.xlu0 %6650  ;;  %v15124_v49 = vld [vmem:[#allocation99_spill] sm:$0xff] }
 0x61a   : > { %v7018_v32 = vmul.f32 %v13973_v62, %v6947_v54  ;;  %8289 = vrsqrt.f32 %v6823_v2  ;;  %v6477_v11 = vmul.f32 0.0078125, %v6404_v7  ;;  %7152 = vst [vmem:[%s13995_s24 + $0x60] sm:$0xff] %v7088_v44  ;;  %v6760_v38 = vmul.f32 0.0078125, %v6651_v29 }
 0x61b   : > { %v6604_v37 = vmul.f32 %v14108_v33, %v14108_v33  ;;  %v8284_v17 = vpop.eup %8283 }
 0x61c   : > { %v7089_v0 = vadd.f32 %v13983_v57, %v7018_v32  ;;  %v14116_v4 = vsub.f32 %v13822_v40, %v6477_v11  ;;  %v6948_v63 = vmul.f32 %v8284_v17, %v15124_v49  ;;  %v6824_v41 = vadd.f32 1e-05, %v6760_v38 }
 0x61d   : > { %6722 = vadd.xlane.f32.xlu0 %v6604_v37  ;;  %v6653_v52 = vpop.xlane.xlu1 %6652  ;;  %v6406_v16 = vpop.xlane.xlu0 %6405 }
 0x61e   : > { %7153 = vst [vmem:[%s13995_s24 + $0x68] sm:$0xff] %v7089_v0  ;;  %v6761_v22 = vmul.f32 0.0078125, %v6653_v52  ;;  %v6605_v59 = vmul.f32 %v14116_v4, %v14116_v4  ;;  %v7019_v43 = vmul.f32 %v13973_v62, %v6948_v63  ;;  %8291 = vrsqrt.f32 %v6824_v41 }
 0x61f   : > { %v8286_v45 = vpop.eup %8285  ;;  %v6478_v8 = vmul.f32 0.0078125, %v6406_v16 }
 0x620   : > { %v6949_v40 = vmul.f32 %v8286_v45, %v15125_v25  ;;  %v6825_v54 = vadd.f32 1e-05, %v6761_v22  ;;  %6724 = vadd.xlane.f32.xlu1 %v6605_v59  ;;  %v7090_v2 = vadd.f32 %v13983_v57, %v7019_v43  ;;  %v15127_v25 = vld [vmem:[#allocation80_spill] sm:$0xff] }
 0x621   : > { %v14126_v44 = vsub.f32 %v13835_v14, %v6478_v8  ;;  %v6408_v7 = vpop.xlane.xlu1 %6407  ;;  %v6655_v29 = vpop.xlane.xlu0 %6654  ;;  %v15126_v14 = vld [vmem:[#allocation22_spill] sm:$0xff] }
 0x622   : > { %v7020_v32 = vmul.f32 %v13973_v62, %v6949_v40  ;;  %8293 = vrsqrt.f32 %v6825_v54  ;;  %v6479_v11 = vmul.f32 0.0078125, %v6408_v7  ;;  %7154 = vst [vmem:[%s13995_s24 + $0x70] sm:$0xff] %v7090_v2  ;;  %v6762_v38 = vmul.f32 0.0078125, %v6655_v29 }
 0x623   : > { %v6606_v37 = vmul.f32 %v14126_v44, %v14126_v44  ;;  %v8288_v17 = vpop.eup %8287 }
 0x624   : > { %v7091_v0 = vadd.f32 %v13983_v57, %v7020_v32  ;;  %v14134_v49 = vsub.f32 %v13842_v35, %v6479_v11  ;;  %v6950_v63 = vmul.f32 %v8288_v17, %v15126_v14  ;;  %v6826_v41 = vadd.f32 1e-05, %v6762_v38 }
 0x625   : > { %6726 = vadd.xlane.f32.xlu0 %v6606_v37  ;;  %v6657_v52 = vpop.xlane.xlu1 %6656  ;;  %v6410_v16 = vpop.xlane.xlu0 %6409 }
 0x626   : > { %7155 = vst [vmem:[%s13995_s24 + $0x78] sm:$0xff] %v7091_v0  ;;  %v6763_v22 = vmul.f32 0.0078125, %v6657_v52  ;;  %v6607_v59 = vmul.f32 %v14134_v49, %v14134_v49  ;;  %v7021_v43 = vmul.f32 %v13973_v62, %v6950_v63  ;;  %8295 = vrsqrt.f32 %v6826_v41 }
 0x627   : > { %v8290_v45 = vpop.eup %8289  ;;  %v6480_v8 = vmul.f32 0.0078125, %v6410_v16 }
 0x628   : > { %v6951_v35 = vmul.f32 %v8290_v45, %v15127_v25  ;;  %v6827_v40 = vadd.f32 1e-05, %v6763_v22  ;;  %6728 = vadd.xlane.f32.xlu1 %v6607_v59  ;;  %v7092_v54 = vadd.f32 %v13983_v57, %v7021_v43  ;;  %v15128_v25 = vld [vmem:[#allocation76_spill] sm:$0xff] }
 0x629   : > { %v14144_v2 = vsub.f32 %v13855_v31, %v6480_v8  ;;  %v6412_v7 = vpop.xlane.xlu1 %6411  ;;  %v6659_v29 = vpop.xlane.xlu0 %6658 }
 0x62a   : > { %v7022_v32 = vmul.f32 %v13973_v62, %v6951_v35  ;;  %8297 = vrsqrt.f32 %v6827_v40  ;;  %v6481_v11 = vmul.f32 0.0078125, %v6412_v7  ;;  %7156 = vst [vmem:[%s13995_s24 + $0x80] sm:$0xff] %v7092_v54  ;;  %v6764_v38 = vmul.f32 0.0078125, %v6659_v29 }
 0x62b   : > { %v6608_v37 = vmul.f32 %v14144_v2, %v14144_v2  ;;  %v8292_v17 = vpop.eup %8291 }
 0x62c   : > { %v7093_v0 = vadd.f32 %v13983_v57, %v7022_v32  ;;  %v14152_v14 = vsub.f32 %v13862_v6, %v6481_v11  ;;  %v6952_v31 = vmul.f32 %v8292_v17, %v13810_v56  ;;  %v6828_v63 = vadd.f32 1e-05, %v6764_v38  ;;  %v15129_v17 = vld [vmem:[#allocation15_spill] sm:$0xff] }
 0x62d   : > { %6730 = vadd.xlane.f32.xlu0 %v6608_v37  ;;  %v6661_v41 = vpop.xlane.xlu1 %6660  ;;  %v6414_v22 = vpop.xlane.xlu0 %6413 }
 0x62e   : > { %7157 = vst [vmem:[%s13995_s24 + $0x88] sm:$0xff] %v7093_v0  ;;  %v6765_v52 = vmul.f32 0.0078125, %v6661_v41  ;;  %v6609_v16 = vmul.f32 %v14152_v14, %v14152_v14  ;;  %v7023_v45 = vmul.f32 %v13973_v62, %v6952_v31  ;;  %8299 = vrsqrt.f32 %v6828_v63 }
 0x62f   : > { %v8294_v59 = vpop.eup %8293  ;;  %v6482_v43 = vmul.f32 0.0078125, %v6414_v22 }
 0x630   : > { %v6953_v6 = vmul.f32 %v8294_v59, %v13819_v58  ;;  %v6829_v8 = vadd.f32 1e-05, %v6765_v52  ;;  %6732 = vadd.xlane.f32.xlu1 %v6609_v16  ;;  %v7094_v56 = vadd.f32 %v13983_v57, %v7023_v45 }
 0x631   : > { %v14162_v35 = vsub.f32 %v15128_v25, %v6482_v43  ;;  %v6416_v40 = vpop.xlane.xlu1 %6415  ;;  %v6663_v7 = vpop.xlane.xlu0 %6662  ;;  %v15130_v43 = vld [vmem:[#allocation16_spill] sm:$0xff] }
 0x632   : > { %v7024_v54 = vmul.f32 %v13973_v62, %v6953_v6  ;;  %8301 = vrsqrt.f32 %v6829_v8  ;;  %v6483_v32 = vmul.f32 0.0078125, %v6416_v40  ;;  %7158 = vst [vmem:[%s13995_s24 + $0x90] sm:$0xff] %v7094_v56  ;;  %v6766_v29 = vmul.f32 0.0078125, %v6663_v7 }
 0x633   : > { %v6610_v11 = vmul.f32 %v14162_v35, %v14162_v35  ;;  %v8296_v58 = vpop.eup %8295 }
 0x634   : > { %v7095_v38 = vadd.f32 %v13983_v57, %v7024_v54  ;;  %v14170_v37 = vsub.f32 %v13882_v20, %v6483_v32  ;;  %v6954_v0 = vmul.f32 %v8296_v58, %v15129_v17  ;;  %v6830_v31 = vadd.f32 1e-05, %v6766_v29 }
 0x635   : > { %6734 = vadd.xlane.f32.xlu0 %v6610_v11  ;;  %v6665_v63 = vpop.xlane.xlu1 %6664  ;;  %v6418_v52 = vpop.xlane.xlu0 %6417 }
 0x636   : > { %7159 = vst [vmem:[%s13995_s24 + $0x98] sm:$0xff] %v7095_v38  ;;  %v6767_v41 = vmul.f32 0.0078125, %v6665_v63  ;;  %v6611_v22 = vmul.f32 %v14170_v37, %v14170_v37  ;;  %v7025_v59 = vmul.f32 %v13973_v62, %v6954_v0  ;;  %8303 = vrsqrt.f32 %v6830_v31 }
 0x637   : > { %v8298_v16 = vpop.eup %8297  ;;  %v6484_v45 = vmul.f32 0.0078125, %v6418_v52 }
 0x638   : > { %v6955_v20 = vmul.f32 %v8298_v16, %v15130_v43  ;;  %v6831_v6 = vadd.f32 1e-05, %v6767_v41  ;;  %6736 = vadd.xlane.f32.xlu1 %v6611_v22  ;;  %v7096_v8 = vadd.f32 %v13983_v57, %v7025_v59 }
 0x639   : > { %v14180_v56 = vsub.f32 %v13896_v53, %v6484_v45  ;;  %v6420_v25 = vpop.xlane.xlu1 %6419  ;;  %v6667_v54 = vpop.xlane.xlu0 %6666  ;;  %v15131_v53 = vld [vmem:[#allocation18_spill] sm:$0xff]  ;;  %v15132_v45 = vld [vmem:[#allocation19_spill] sm:$0xff] }
 0x63a   : > { %v7026_v40 = vmul.f32 %v13973_v62, %v6955_v20  ;;  %8305 = vrsqrt.f32 %v6831_v6  ;;  %v6485_v7 = vmul.f32 0.0078125, %v6420_v25  ;;  %7160 = vst [vmem:[%s13995_s24 + $0xa0] sm:$0xff] %v7096_v8  ;;  %v6768_v32 = vmul.f32 0.0078125, %v6667_v54 }
 0x63b   : > { %v6612_v29 = vmul.f32 %v14180_v56, %v14180_v56  ;;  %v8300_v11 = vpop.eup %8299 }
 0x63c   : > { %v7097_v58 = vadd.f32 %v13983_v57, %v7026_v40  ;;  %v14188_v38 = vsub.f32 %v13903_v21, %v6485_v7  ;;  %v6956_v17 = vmul.f32 %v8300_v11, %v15131_v53  ;;  %v6832_v0 = vadd.f32 1e-05, %v6768_v32 }
 0x63d   : > { %6738 = vadd.xlane.f32.xlu0 %v6612_v29  ;;  %v6669_v31 = vpop.xlane.xlu1 %6668  ;;  %v6671_v63 = vpop.xlane.xlu0 %6670 }
 0x63e   : > { %7161 = vst [vmem:[%s13995_s24 + $0xa8] sm:$0xff] %v7097_v58  ;;  %v6769_v41 = vmul.f32 0.0078125, %v6669_v31  ;;  %v6613_v52 = vmul.f32 %v14188_v38, %v14188_v38  ;;  %v7027_v16 = vmul.f32 %v13973_v62, %v6956_v17  ;;  %8307 = vrsqrt.f32 %v6832_v0 }
 0x63f   : > { %v8302_v22 = vpop.eup %8301  ;;  %v6770_v59 = vmul.f32 0.0078125, %v6671_v63 }
 0x640   : > { %v6957_v21 = vmul.f32 %v8302_v22, %v15132_v45  ;;  %v6833_v43 = vadd.f32 1e-05, %v6769_v41  ;;  %6740 = vadd.xlane.f32.xlu1 %v6613_v52  ;;  %v7098_v20 = vadd.f32 %v13983_v57, %v7027_v16 }
 0x641   : > { %v6834_v6 = vadd.f32 1e-05, %v6770_v59  ;;  %v6673_v8 = vpop.xlane.xlu1 %6672  ;;  %v6675_v40 = vpop.xlane.xlu0 %6674 }
 0x642   : > { %v7028_v25 = vmul.f32 %v13973_v62, %v6957_v21  ;;  %8309 = vrsqrt.f32 %v6833_v43  ;;  %v6771_v54 = vmul.f32 0.0078125, %v6673_v8  ;;  %7162 = vst [vmem:[%s13995_s24 + $0xb0] sm:$0xff] %v7098_v20  ;;  %v6772_v7 = vmul.f32 0.0078125, %v6675_v40 }
 0x643   : > { %8311 = vrsqrt.f32 %v6834_v6  ;;  %v8304_v32 = vpop.eup %8303 }
 0x644   : > { %v7099_v29 = vadd.f32 %v13983_v57, %v7028_v25  ;;  %v6835_v11 = vadd.f32 1e-05, %v6771_v54  ;;  %v6958_v58 = vmul.f32 %v8304_v32, %v13872_v34  ;;  %v6836_v53 = vadd.f32 1e-05, %v6772_v7 }
 0x645   : > { %v6677_v17 = vpop.xlane.xlu1 %6676  ;;  %v6679_v0 = vpop.xlane.xlu0 %6678 }
 0x646   : > { %7163 = vst [vmem:[%s13995_s24 + $0xb8] sm:$0xff] %v7099_v29  ;;  %8313 = vrsqrt.f32 %v6835_v11  ;;  %v6773_v31 = vmul.f32 0.0078125, %v6677_v17  ;;  %v7029_v41 = vmul.f32 %v13973_v62, %v6958_v58  ;;  %v6774_v52 = vmul.f32 0.0078125, %v6679_v0 }
 0x647   : > { %v8306_v63 = vpop.eup %8305  ;;  %8315 = vrsqrt.f32 %v6836_v53 }
 0x648   : > { %v6959_v22 = vmul.f32 %v8306_v63, %v13879_v12  ;;  %v6837_v16 = vadd.f32 1e-05, %v6773_v31  ;;  %v7100_v59 = vadd.f32 %v13983_v57, %v7029_v41  ;;  %v6838_v45 = vadd.f32 1e-05, %v6774_v52 }
 0x649   : > { %v6681_v34 = vpop.xlane.xlu1 %6680  ;;  %v6683_v43 = vpop.xlane.xlu0 %6682 }
 0x64a   : > { %v7030_v21 = vmul.f32 %v13973_v62, %v6959_v22  ;;  %8317 = vrsqrt.f32 %v6837_v16  ;;  %v6775_v20 = vmul.f32 0.0078125, %v6681_v34  ;;  %7164 = vst [vmem:[%s13995_s24 + $0xc0] sm:$0xff] %v7100_v59  ;;  %v6776_v6 = vmul.f32 0.0078125, %v6683_v43 }
 0x64b   : > { %8319 = vrsqrt.f32 %v6838_v45  ;;  %v8308_v8 = vpop.eup %8307 }
 0x64c   : > { %v7101_v25 = vadd.f32 %v13983_v57, %v7030_v21  ;;  %v6839_v40 = vadd.f32 1e-05, %v6775_v20  ;;  %v6960_v12 = vmul.f32 %v8308_v8, %v13893_v39  ;;  %v6840_v54 = vadd.f32 1e-05, %v6776_v6 }
 0x64d   : > { %v6685_v7 = vpop.xlane.xlu1 %6684  ;;  %v6687_v32 = vpop.xlane.xlu0 %6686 }
 0x64e   : > { %7165 = vst [vmem:[%s13995_s24 + $0xc8] sm:$0xff] %v7101_v25  ;;  %8321 = vrsqrt.f32 %v6839_v40  ;;  %v6777_v29 = vmul.f32 0.0078125, %v6685_v7  ;;  %v7031_v58 = vmul.f32 %v13973_v62, %v6960_v12  ;;  %v6778_v53 = vmul.f32 0.0078125, %v6687_v32 }
 0x64f   : > { %v8310_v11 = vpop.eup %8309  ;;  %8323 = vrsqrt.f32 %v6840_v54 }
 0x650   : > { %v8312_v17 = vpop.eup %8311  ;;  %v6961_v0 = vmul.f32 %v8310_v11, %v13900_v36  ;;  %v6841_v31 = vadd.f32 1e-05, %v6777_v29  ;;  %v7102_v63 = vadd.f32 %v13983_v57, %v7031_v58  ;;  %v6842_v41 = vadd.f32 1e-05, %v6778_v53 }
 0x651   : > { %v6962_v39 = vmul.f32 %v8312_v17, %v13906_v10  ;;  %v6689_v52 = vpop.xlane.xlu1 %6688  ;;  %v6691_v16 = vpop.xlane.xlu0 %6690 }
 0x652   : > { %v7032_v22 = vmul.f32 %v13973_v62, %v6961_v0  ;;  %8325 = vrsqrt.f32 %v6841_v31  ;;  %v6779_v59 = vmul.f32 0.0078125, %v6689_v52  ;;  %7166 = vst [vmem:[%s13995_s24 + $0xd0] sm:$0xff] %v7102_v63  ;;  %v6780_v36 = vmul.f32 0.0078125, %v6691_v16 }
 0x653   : > { %v8314_v45 = vpop.eup %8313  ;;  %v7033_v34 = vmul.f32 %v13973_v62, %v6962_v39  ;;  %8327 = vrsqrt.f32 %v6842_v41 }
 0x654   : > { %v8316_v21 = vpop.eup %8315  ;;  %v7103_v43 = vadd.f32 %v13983_v57, %v7032_v22  ;;  %v6963_v10 = vmul.f32 %v8314_v45, %v13912_v28  ;;  %v6843_v20 = vadd.f32 1e-05, %v6779_v59  ;;  %v6844_v25 = vadd.f32 1e-05, %v6780_v36 }
 0x655   : > { %v7104_v6 = vadd.f32 %v13983_v57, %v7033_v34  ;;  %v6964_v8 = vmul.f32 %v8316_v21, %v13917_v19  ;;  %v6693_v40 = vpop.xlane.xlu1 %6692  ;;  %v6695_v54 = vpop.xlane.xlu0 %6694 }
 0x656   : > { %7167 = vst [vmem:[%s13995_s24 + $0xd8] sm:$0xff] %v7103_v43  ;;  %v7034_v12 = vmul.f32 %v13973_v62, %v6963_v10  ;;  %8329 = vrsqrt.f32 %v6843_v20  ;;  %v6781_v7 = vmul.f32 0.0078125, %v6693_v40  ;;  %v6782_v28 = vmul.f32 0.0078125, %v6695_v54 }
 0x657   : > { %v8318_v32 = vpop.eup %8317  ;;  %7168 = vst [vmem:[%s13995_s24 + $0xe0] sm:$0xff] %v7104_v6  ;;  %v7035_v29 = vmul.f32 %v13973_v62, %v6964_v8  ;;  %8331 = vrsqrt.f32 %v6844_v25 }
 0x658   : > { %v8320_v11 = vpop.eup %8319  ;;  %v7105_v58 = vadd.f32 %v13983_v57, %v7034_v12  ;;  %v6965_v19 = vmul.f32 %v8318_v32, %v13922_v50  ;;  %v6845_v53 = vadd.f32 1e-05, %v6781_v7  ;;  %v6846_v31 = vadd.f32 1e-05, %v6782_v28 }
 0x659   : > { %v7106_v17 = vadd.f32 %v13983_v57, %v7035_v29  ;;  %v6966_v0 = vmul.f32 %v8320_v11, %v13927_v30  ;;  %v6697_v63 = vpop.xlane.xlu1 %6696 }
 0x65a   : > { %7169 = vst [vmem:[%s13995_s24 + $0xe8] sm:$0xff] %v7105_v58  ;;  %v7036_v39 = vmul.f32 %v13973_v62, %v6965_v19  ;;  %8333 = vrsqrt.f32 %v6845_v53  ;;  %v6783_v41 = vmul.f32 0.0078125, %v6697_v63  ;;  %v15133_v63 = vld [vmem:[#allocation90_spill] sm:$0xff] }
 0x65b   : > { %v8322_v52 = vpop.eup %8321  ;;  %7170 = vst [vmem:[%s13995_s24 + $0xf0] sm:$0xff] %v7106_v17  ;;  %v7037_v22 = vmul.f32 %v13973_v62, %v6966_v0  ;;  %8335 = vrsqrt.f32 %v6846_v31 }
 0x65c   : > { %v8324_v50 = vpop.eup %8323  ;;  %v7107_v16 = vadd.f32 %v13983_v57, %v7036_v39  ;;  %v6967_v30 = vmul.f32 %v8322_v52, %v13934_v60  ;;  %v6847_v59 = vadd.f32 1e-05, %v6783_v41 }
 0x65d   : > { %v7108_v45 = vadd.f32 %v13983_v57, %v7037_v22  ;;  %v6968_v34 = vmul.f32 %v8324_v50, %v13937_v13 }
 0x65e   : > { %7171 = vst [vmem:[%s13995_s24 + $0xf8] sm:$0xff] %v7107_v16  ;;  %v7038_v36 = vmul.f32 %v13973_v62, %v6967_v30  ;;  %8337 = vrsqrt.f32 %v6847_v59 }
 0x65f   : > { %v8326_v21 = vpop.eup %8325  ;;  %7172 = vst [vmem:[%s13995_s24 + $0x100] sm:$0xff] %v7108_v45  ;;  %v7039_v43 = vmul.f32 %v13973_v62, %v6968_v34 }
 0x660   : > { %v8328_v10 = vpop.eup %8327  ;;  %v7109_v20 = vadd.f32 %v13983_v57, %v7038_v36  ;;  %v6969_v60 = vmul.f32 %v8326_v21, %v13942_v23 }
 0x661   : > { %v7110_v6 = vadd.f32 %v13983_v57, %v7039_v43  ;;  %v6970_v8 = vmul.f32 %v8328_v10, %v13947_v24 }
 0x662   : > { %7173 = vst [vmem:[%s13995_s24 + $0x108] sm:$0xff] %v7109_v20  ;;  %v7040_v13 = vmul.f32 %v13973_v62, %v6969_v60  ;;  %v15134_v20 = vld [vmem:[#allocation109_spill] sm:$0xff] }
 0x663   : > { %v8330_v25 = vpop.eup %8329  ;;  %7174 = vst [vmem:[%s13995_s24 + $0x110] sm:$0xff] %v7110_v6  ;;  %v7041_v40 = vmul.f32 %v13973_v62, %v6970_v8 }
 0x664   : > { %v8332_v12 = vpop.eup %8331  ;;  %v7111_v54 = vadd.f32 %v13983_v57, %v7040_v13  ;;  %v6971_v7 = vmul.f32 %v8330_v25, %v13952_v42  ;;  %v14277_v13 = vld [vmem:[%s14442_s8] ss:$0 sm:$0xff] }
 0x665   : > { %v7112_v23 = vadd.f32 %v13983_v57, %v7041_v40  ;;  %v6972_v32 = vmul.f32 %v8332_v12, %v13957_v26 }
 0x666   : > { %7175 = vst [vmem:[%s13995_s24 + $0x118] sm:$0xff] %v7111_v54  ;;  %v7042_v24 = vmul.f32 %v13973_v62, %v6971_v7 }
 0x667   : > { %v8334_v29 = vpop.eup %8333  ;;  %7176 = vst [vmem:[%s13995_s24 + $0x120] sm:$0xff] %v7112_v23  ;;  %v7043_v28 = vmul.f32 %v13973_v62, %v6972_v32 }
 0x668   : > { %v8336_v11 = vpop.eup %8335  ;;  %v7113_v58 = vadd.f32 %v13983_v57, %v7042_v24  ;;  %v6973_v42 = vmul.f32 %v8334_v29, %v13963_v48  ;;  %v14287_v29 = vld [vmem:[%s14443_s9] ss:$0 sm:$0xff] }
 0x669   : > { %v7114_v19 = vadd.f32 %v13983_v57, %v7043_v28  ;;  %v6974_v53 = vmul.f32 %v8336_v11, %v13968_v55 }
 0x66a   : > { %7177 = vst [vmem:[%s13995_s24 + $0x128] sm:$0xff] %v7113_v58  ;;  %v7044_v26 = vmul.f32 %v13973_v62, %v6973_v42 }
 0x66b   : > { %v8338_v17 = vpop.eup %8337  ;;  %7178 = vst [vmem:[%s13995_s24 + $0x130] sm:$0xff] %v7114_v19  ;;  %v7045_v0 = vmul.f32 %v13973_v62, %v6974_v53 }
 0x66c   : > { %v7115_v31 = vadd.f32 %v13983_v57, %v7044_v26  ;;  %v6975_v39 = vmul.f32 %v8338_v17, %v15133_v63 }
 0x66d   : > { %v7116_v41 = vadd.f32 %v13983_v57, %v7045_v0 }
 0x66e   : > { %7179 = vst [vmem:[%s13995_s24 + $0x138] sm:$0xff] %v7115_v31  ;;  %v7046_v48 = vmul.f32 %v13973_v62, %v6975_v39 }
 0x66f   : > { %7180 = vst [vmem:[%s13995_s24 + $0x140] sm:$0xff] %v7116_v41 }
 0x670   : > { %v7117_v52 = vadd.f32 %v13983_v57, %v7046_v48 }
 0x671   : > { %v6699_v55 = vpop.xlane.xlu0 %6698 }
 0x672   : > { %7181 = vst [vmem:[%s13995_s24 + $0x148] sm:$0xff] %v7117_v52  ;;  %v6784_v22 = vmul.f32 0.0078125, %v6699_v55 }
 0x674   : > { %v6848_v50 = vadd.f32 1e-05, %v6784_v22 }
 0x675   : > { %v6701_v16 = vpop.xlane.xlu1 %6700 }
 0x676   : > { %v6785_v30 = vmul.f32 0.0078125, %v6701_v16  ;;  %8339 = vrsqrt.f32 %v6848_v50 }
 0x678   : > { %v6849_v59 = vadd.f32 1e-05, %v6785_v30 }
 0x67a   : > { %8341 = vrsqrt.f32 %v6849_v59 }
 0x67e   : > { %v6703_v45 = vpop.xlane.xlu0 %6702 }
 0x67f   : > { %v6786_v34 = vmul.f32 0.0078125, %v6703_v45 }
 0x681   : > { %v6850_v36 = vadd.f32 1e-05, %v6786_v34  ;;  %v6705_v21 = vpop.xlane.xlu1 %6704 }
 0x682   : > { %v6787_v43 = vmul.f32 0.0078125, %v6705_v21 }
 0x683   : > { %8343 = vrsqrt.f32 %v6850_v36  ;;  %v8340_v62 = vpop.eup %8339 }
 0x684   : > { %v6851_v10 = vadd.f32 1e-05, %v6787_v43  ;;  %v6976_v60 = vmul.f32 %v8340_v62, %v15134_v20 }
 0x686   : > { %8345 = vrsqrt.f32 %v6851_v10  ;;  %v6707_v6 = vpop.xlane.xlu0 %6706  ;;  %v7047_v25 = vmul.f32 %v14277_v13, %v6976_v60 }
 0x687   : > { %v8342_v8 = vpop.eup %8341  ;;  %v6788_v40 = vmul.f32 0.0078125, %v6707_v6 }
 0x688   : > { %v6977_v12 = vmul.f32 %v8342_v8, %v14009_v3  ;;  %v7118_v54 = vadd.f32 %v13983_v57, %v7047_v25 }
 0x689   : > { %v6852_v7 = vadd.f32 1e-05, %v6788_v40  ;;  %v6709_v23 = vpop.xlane.xlu1 %6708 }
 0x68a   : > { %v7048_v32 = vmul.f32 %v14277_v13, %v6977_v12  ;;  %v6789_v24 = vmul.f32 0.0078125, %v6709_v23  ;;  %7182 = vst [vmem:[%s13995_s24 + $0x150] sm:$0xff] %v7118_v54 }
 0x68b   : > { %8347 = vrsqrt.f32 %v6852_v7 }
 0x68c   : > { %v7119_v28 = vadd.f32 %v14287_v29, %v7048_v32  ;;  %v6853_v11 = vadd.f32 1e-05, %v6789_v24 }
 0x68e   : > { %7183 = vst [vmem:[%s13995_s24 + $0x158] sm:$0xff] %v7119_v28  ;;  %8349 = vrsqrt.f32 %v6853_v11  ;;  %v6711_v3 = vpop.xlane.xlu0 %6710 }
 0x68f   : > { %v6790_v57 = vmul.f32 0.0078125, %v6711_v3 }
 0x690   : > { %v8344_v58 = vpop.eup %8343 }
 0x691   : > { %v6978_v42 = vmul.f32 %v8344_v58, %v14015_v18  ;;  %v6854_v19 = vadd.f32 1e-05, %v6790_v57  ;;  %v6713_v53 = vpop.xlane.xlu1 %6712 }
 0x692   : > { %v6791_v26 = vmul.f32 0.0078125, %v6713_v53 }
 0x693   : > { %v8346_v17 = vpop.eup %8345  ;;  %v7049_v0 = vmul.f32 %v14277_v13, %v6978_v42  ;;  %8351 = vrsqrt.f32 %v6854_v19 }
 0x694   : > { %v6979_v31 = vmul.f32 %v8346_v17, %v14022_v15  ;;  %v6855_v63 = vadd.f32 1e-05, %v6791_v26 }
 0x695   : > { %v7120_v39 = vadd.f32 %v14287_v29, %v7049_v0 }
 0x696   : > { %v7050_v41 = vmul.f32 %v14277_v13, %v6979_v31  ;;  %8353 = vrsqrt.f32 %v6855_v63  ;;  %v6715_v48 = vpop.xlane.xlu0 %6714 }
 0x697   : > { %7184 = vst [vmem:[%s13995_s24 + $0x160] sm:$0xff] %v7120_v39  ;;  %v6792_v52 = vmul.f32 0.0078125, %v6715_v48 }
 0x698   : > { %v8348_v18 = vpop.eup %8347  ;;  %v7121_v55 = vadd.f32 %v14287_v29, %v7050_v41 }
 0x699   : > { %v6980_v22 = vmul.f32 %v8348_v18, %v14032_v27  ;;  %v6856_v50 = vadd.f32 1e-05, %v6792_v52  ;;  %v6717_v16 = vpop.xlane.xlu1 %6716 }
 0x69a   : > { %7185 = vst [vmem:[%s13995_s24 + $0x168] sm:$0xff] %v7121_v55  ;;  %v6793_v30 = vmul.f32 0.0078125, %v6717_v16 }
 0x69b   : > { %v8350_v15 = vpop.eup %8349  ;;  %v7051_v59 = vmul.f32 %v14277_v13, %v6980_v22  ;;  %8355 = vrsqrt.f32 %v6856_v50 }
 0x69c   : > { %v6981_v45 = vmul.f32 %v8350_v15, %v14040_v46  ;;  %v6857_v34 = vadd.f32 1e-05, %v6793_v30 }
 0x69d   : > { %v7122_v36 = vadd.f32 %v14287_v29, %v7051_v59 }
 0x69e   : > { %v7052_v21 = vmul.f32 %v14277_v13, %v6981_v45  ;;  %8357 = vrsqrt.f32 %v6857_v34  ;;  %v6719_v43 = vpop.xlane.xlu0 %6718 }
 0x69f   : > { %7186 = vst [vmem:[%s13995_s24 + $0x170] sm:$0xff] %v7122_v36  ;;  %v6794_v27 = vmul.f32 0.0078125, %v6719_v43 }
 0x6a0   : > { %v8352_v62 = vpop.eup %8351  ;;  %v7123_v10 = vadd.f32 %v14287_v29, %v7052_v21 }
 0x6a1   : > { %v6982_v20 = vmul.f32 %v8352_v62, %v14053_v51  ;;  %v6858_v60 = vadd.f32 1e-05, %v6794_v27  ;;  %v6721_v6 = vpop.xlane.xlu1 %6720 }
 0x6a2   : > { %7187 = vst [vmem:[%s13995_s24 + $0x178] sm:$0xff] %v7123_v10  ;;  %v6795_v8 = vmul.f32 0.0078125, %v6721_v6 }
 0x6a3   : > { %v8354_v46 = vpop.eup %8353  ;;  %v7053_v25 = vmul.f32 %v14277_v13, %v6982_v20  ;;  %8359 = vrsqrt.f32 %v6858_v60 }
 0x6a4   : > { %v6983_v40 = vmul.f32 %v8354_v46, %v14062_v47  ;;  %v6859_v12 = vadd.f32 1e-05, %v6795_v8 }
 0x6a5   : > { %v7124_v54 = vadd.f32 %v14287_v29, %v7053_v25 }
 0x6a6   : > { %v7054_v7 = vmul.f32 %v14277_v13, %v6983_v40  ;;  %8361 = vrsqrt.f32 %v6859_v12  ;;  %v6723_v23 = vpop.xlane.xlu0 %6722 }
 0x6a7   : > { %7188 = vst [vmem:[%s13995_s24 + $0x180] sm:$0xff] %v7124_v54  ;;  %v6796_v51 = vmul.f32 0.0078125, %v6723_v23 }
 0x6a8   : > { %v8356_v32 = vpop.eup %8355  ;;  %v7125_v24 = vadd.f32 %v14287_v29, %v7054_v7 }
 0x6a9   : > { %v6984_v28 = vmul.f32 %v8356_v32, %v14072_v5  ;;  %v6860_v11 = vadd.f32 1e-05, %v6796_v51  ;;  %v6725_v3 = vpop.xlane.xlu1 %6724 }
 0x6aa   : > { %7189 = vst [vmem:[%s13995_s24 + $0x188] sm:$0xff] %v7125_v24  ;;  %v6797_v57 = vmul.f32 0.0078125, %v6725_v3 }
 0x6ab   : > { %v8358_v47 = vpop.eup %8357  ;;  %v7055_v58 = vmul.f32 %v14277_v13, %v6984_v28  ;;  %8363 = vrsqrt.f32 %v6860_v11 }
 0x6ac   : > { %v6985_v42 = vmul.f32 %v8358_v47, %v14080_v1  ;;  %v6861_v19 = vadd.f32 1e-05, %v6797_v57 }
 0x6ad   : > { %v7126_v53 = vadd.f32 %v14287_v29, %v7055_v58 }
 0x6ae   : > { %v7056_v26 = vmul.f32 %v14277_v13, %v6985_v42  ;;  %8365 = vrsqrt.f32 %v6861_v19  ;;  %v6727_v17 = vpop.xlane.xlu0 %6726 }
 0x6af   : > { %7190 = vst [vmem:[%s13995_s24 + $0x190] sm:$0xff] %v7126_v53  ;;  %v6798_v5 = vmul.f32 0.0078125, %v6727_v17 }
 0x6b0   : > { %v8360_v0 = vpop.eup %8359  ;;  %v7127_v31 = vadd.f32 %v14287_v29, %v7056_v26 }
 0x6b1   : > { %v6986_v63 = vmul.f32 %v8360_v0, %v14090_v9  ;;  %v6862_v39 = vadd.f32 1e-05, %v6798_v5  ;;  %v6729_v41 = vpop.xlane.xlu1 %6728 }
 0x6b2   : > { %7191 = vst [vmem:[%s13995_s24 + $0x198] sm:$0xff] %v7127_v31  ;;  %v6799_v48 = vmul.f32 0.0078125, %v6729_v41 }
 0x6b3   : > { %v8362_v1 = vpop.eup %8361  ;;  %v7057_v52 = vmul.f32 %v14277_v13, %v6986_v63  ;;  %8367 = vrsqrt.f32 %v6862_v39 }
 0x6b4   : > { %v6987_v18 = vmul.f32 %v8362_v1, %v14098_v61  ;;  %v6863_v55 = vadd.f32 1e-05, %v6799_v48 }
 0x6b5   : > { %v7128_v22 = vadd.f32 %v14287_v29, %v7057_v52 }
 0x6b6   : > { %v7058_v50 = vmul.f32 %v14277_v13, %v6987_v18  ;;  %8369 = vrsqrt.f32 %v6863_v55  ;;  %v6731_v16 = vpop.xlane.xlu0 %6730 }
 0x6b7   : > { %7192 = vst [vmem:[%s13995_s24 + $0x1a0] sm:$0xff] %v7128_v22  ;;  %v6800_v9 = vmul.f32 0.0078125, %v6731_v16 }
 0x6b8   : > { %v8364_v30 = vpop.eup %8363  ;;  %v7129_v15 = vadd.f32 %v14287_v29, %v7058_v50 }
 0x6b9   : > { %v6988_v59 = vmul.f32 %v8364_v30, %v14108_v33  ;;  %v6864_v45 = vadd.f32 1e-05, %v6800_v9  ;;  %v6733_v34 = vpop.xlane.xlu1 %6732 }
 0x6ba   : > { %7193 = vst [vmem:[%s13995_s24 + $0x1a8] sm:$0xff] %v7129_v15  ;;  %v6801_v36 = vmul.f32 0.0078125, %v6733_v34 }
 0x6bb   : > { %v8366_v61 = vpop.eup %8365  ;;  %v7059_v21 = vmul.f32 %v14277_v13, %v6988_v59  ;;  %8371 = vrsqrt.f32 %v6864_v45 }
 0x6bc   : > { %v6989_v43 = vmul.f32 %v8366_v61, %v14116_v4  ;;  %v6865_v27 = vadd.f32 1e-05, %v6801_v36 }
 0x6bd   : > { %v7130_v62 = vadd.f32 %v14287_v29, %v7059_v21 }
 0x6be   : > { %v7060_v10 = vmul.f32 %v14277_v13, %v6989_v43  ;;  %8373 = vrsqrt.f32 %v6865_v27  ;;  %v6735_v20 = vpop.xlane.xlu0 %6734 }
 0x6bf   : > { %7194 = vst [vmem:[%s13995_s24 + $0x1b0] sm:$0xff] %v7130_v62  ;;  %v6802_v33 = vmul.f32 0.0078125, %v6735_v20 }
 0x6c0   : > { %v8368_v60 = vpop.eup %8367  ;;  %v7131_v6 = vadd.f32 %v14287_v29, %v7060_v10 }
 0x6c1   : > { %v6990_v8 = vmul.f32 %v8368_v60, %v14126_v44  ;;  %v6866_v46 = vadd.f32 1e-05, %v6802_v33  ;;  %v6737_v25 = vpop.xlane.xlu1 %6736 }
 0x6c2   : > { %7195 = vst [vmem:[%s13995_s24 + $0x1b8] sm:$0xff] %v7131_v6  ;;  %v6803_v40 = vmul.f32 0.0078125, %v6737_v25 }
 0x6c3   : > { %v8370_v4 = vpop.eup %8369  ;;  %v7061_v12 = vmul.f32 %v14277_v13, %v6990_v8  ;;  %8375 = vrsqrt.f32 %v6866_v46 }
 0x6c4   : > { %v6991_v54 = vmul.f32 %v8370_v4, %v14134_v49  ;;  %v6867_v7 = vadd.f32 1e-05, %v6803_v40 }
 0x6c5   : > { %v7132_v23 = vadd.f32 %v14287_v29, %v7061_v12 }
 0x6c6   : > { %v7062_v51 = vmul.f32 %v14277_v13, %v6991_v54  ;;  %8377 = vrsqrt.f32 %v6867_v7  ;;  %v6739_v32 = vpop.xlane.xlu0 %6738 }
 0x6c7   : > { %7196 = vst [vmem:[%s13995_s24 + $0x1c0] sm:$0xff] %v7132_v23  ;;  %v6804_v44 = vmul.f32 0.0078125, %v6739_v32 }
 0x6c8   : > { %v8372_v24 = vpop.eup %8371  ;;  %v7133_v28 = vadd.f32 %v14287_v29, %v7062_v51 }
 0x6c9   : > { %v6992_v11 = vmul.f32 %v8372_v24, %v14144_v2  ;;  %v6868_v3 = vadd.f32 1e-05, %v6804_v44  ;;  %v6741_v57 = vpop.xlane.xlu1 %6740 }
 0x6ca   : > { %7197 = vst [vmem:[%s13995_s24 + $0x1c8] sm:$0xff] %v7133_v28  ;;  %v6805_v49 = vmul.f32 0.0078125, %v6741_v57 }
 0x6cb   : > { %v8374_v47 = vpop.eup %8373  ;;  %v7063_v58 = vmul.f32 %v14277_v13, %v6992_v11  ;;  %8379 = vrsqrt.f32 %v6868_v3 }
 0x6cc   : > { %v6993_v42 = vmul.f32 %v8374_v47, %v14152_v14  ;;  %v6869_v19 = vadd.f32 1e-05, %v6805_v49 }
 0x6cd   : > { %v7134_v53 = vadd.f32 %v14287_v29, %v7063_v58 }
 0x6ce   : > { %v7064_v26 = vmul.f32 %v14277_v13, %v6993_v42  ;;  %8381 = vrsqrt.f32 %v6869_v19 }
 0x6cf   : > { %7198 = vst [vmem:[%s13995_s24 + $0x1d0] sm:$0xff] %v7134_v53 }
 0x6d0   : > { %v8376_v2 = vpop.eup %8375  ;;  %v7135_v17 = vadd.f32 %v14287_v29, %v7064_v26 }
 0x6d1   : > { %v6994_v5 = vmul.f32 %v8376_v2, %v14162_v35 }
 0x6d2   : > { %7199 = vst [vmem:[%s13995_s24 + $0x1d8] sm:$0xff] %v7135_v17 }
 0x6d3   : > { %v8378_v0 = vpop.eup %8377  ;;  %v7065_v14 = vmul.f32 %v14277_v13, %v6994_v5 }
 0x6d4   : > { %v6995_v31 = vmul.f32 %v8378_v0, %v14170_v37 }
 0x6d5   : > { %v7136_v63 = vadd.f32 %v14287_v29, %v7065_v14 }
 0x6d6   : > { %v7066_v39 = vmul.f32 %v14277_v13, %v6995_v31 }
 0x6d7   : > { %7200 = vst [vmem:[%s13995_s24 + $0x1e0] sm:$0xff] %v7136_v63 }
 0x6d8   : > { %v8380_v41 = vpop.eup %8379  ;;  %v7137_v48 = vadd.f32 %v14287_v29, %v7066_v39 }
 0x6d9   : > { %v6996_v35 = vmul.f32 %v8380_v41, %v14180_v56 }
 0x6da   : > { %7201 = vst [vmem:[%s13995_s24 + $0x1e8] sm:$0xff] %v7137_v48 }
 0x6db   : > { %v8382_v1 = vpop.eup %8381  ;;  %v7067_v37 = vmul.f32 %v14277_v13, %v6996_v35 }
 0x6dc   : > { %v6997_v52 = vmul.f32 %v8382_v1, %v14188_v38 }
 0x6dd   : > { %v7138_v18 = vadd.f32 %v14287_v29, %v7067_v37 }
 0x6de   : > { %v7068_v55 = vmul.f32 %v14277_v13, %v6997_v52 }
 0x6df   : > { %7202 = vst [vmem:[%s13995_s24 + $0x1f0] sm:$0xff] %v7138_v18 }
 0x6e0   : > { %v7139_v56 = vadd.f32 %v14287_v29, %v7068_v55 }
 0x6e2   : > { %7203 = vst [vmem:[%s13995_s24 + $0x1f8] sm:$0xff] %v7139_v56 }
 0x6e3   : > { %8448 = shalt.err (!%p8445_p7)
}
 0x6e4   : > { %s8449_s18 = scalar_lea.hbm %s14378_s25, 8192  ;;  %s8453_s12 = scalar_lea.hbm %s14444_s10, 32768 }
 0x6e5   : > { %p8450_p9 = scmp.ne.s32.totalorder %s14378_s25, %s8449_s18  ;;  %p8454_p12 = scmp.lt.s32.totalorder %s14378_s25, %s14444_s10 }
 0x6e6   : > { %p8455_p13 = scmp.lt.s32.totalorder %s8453_s12, %s8449_s18 }
 0x6e7   : > { %p8451_p10 = pnand %p8450_p9, %p8640_p3 }
 0x6e8   : > { %p8456_p0 = por %p8455_p13, %p8454_p12 }
 0x6e9   : > { %p8452_p11 = pneg %p8451_p10 }
 0x6eb   : > { %p8457_p1 = pnand %p8456_p0, %p8452_p11 }
 0x6ed   : > { %8460 = shalt.err (!%p8457_p1)
}
 0x6ee   : > { %s8532_s17 = smov 128   ;;  %s8533_s15 = smov 8  }
 0x6ef   : > { %7507 = dma.vmem_to_hbm [thread:$0]  (%p8640_p3), %s14372_s11, 8192, %s14378_s25, %s14383_s28, %s8532_s17, %s8532_s17, %s8533_s15  }
 0x6f0 PF: > { %p7513_p2 = scmp.ge.s32.totalorder %s8527_s20, 2  ;;  %s7238_s30 = sand.u32 1, %s8499_s13  }
 0x6f1   : > { %s7239_s21 = scalar_lea.sflag [#allocation3], %s7238_s30 }
 0x6f2   : > { %p7510_p4 = pnand %p7513_p2, %p8649_p8 }
 0x6f4   : > { %p7511_p5 = pneg %p7510_p4 }
 0x6f6   : > { %8494 = dma.done.wait (%p7511_p5), %s7239_s21, 8192  }
 0x6f7   : > { %8496 = vsyncadd (%p7511_p5), %s7239_s21, 4294959104  ;;  %s23_s20 = sadd.s32 1, %s8527_s20   ;;  %s15135_s29 = sld [smem:[#allocation5_spill]] }
 0x6f8   : > { %p20_p6 = scmp.ge.s32.totalorder %s23_s20, 6   ;;  %s15136_s15 = sld [smem:[#allocation10_spill]] }
 0x6f9   : > { %s15137_s16 = sld [smem:[#allocation6_spill]]  ;;  %s15141_s13 = smov %s8503_s14 }
 0x6fa   : > { %s15138_s17 = sld [smem:[#allocation7_spill]]  ;;  %22 = sbr.rel (!%p20_p6) target bundleno = 5 (0x5), region = 102 }
 0x6fb   : > { %s15139_s18 = sld [smem:[#allocation8_spill]] }
 0x6fc   : > { %s15140_s19 = sld [smem:[#allocation9_spill]] }
 0x6fd   : > { %s15142_s14 = smov %s15135_s29 }
 0x6ff   :  { %7244 = vsyncpa [#allocation3], 1 }
 0x700   :  { %7246 = vsyncpa [#allocation3 + $0x1], 1 }

</bundles_post_ra>
